<compile_context>
chip_gen: v7x
topology: tpu7x:2x2x1
jax: 0.10.0
libtpu: 0.0.40
codegen_flags: <defaults>
</compile_context>

<pallas_src>
import jax
import jax.numpy as jnp
from jax.experimental import pallas as pl
from jax.experimental.pallas import tpu as pltpu

_EPS = 1e-5  # LayerNorm default eps
_K = 3       # conv kernel width (1, 3)


def _phase_encoder_kernel(par_ref, x_ref, wc_ref, bc_ref, wm_ref, bm_ref, o_ref):
    # par_ref: SMEM [22]   = [w_pe (2*2*3), b_pe (2), w_me (2*3), b_me (2)]
    # x_ref:   VMEM [2, F, T]      one batch element, T on lanes
    # wc_ref/bc_ref: VMEM [2, F, 1]  LayerNorm(cplx) gamma / beta
    # wm_ref/bm_ref: VMEM [2, F, 1]  LayerNorm(mag)  gamma / beta
    # o_ref:   VMEM [4, F, T-2]    channels: [cplx0, cplx1, mag0, mag1]
    F = x_ref.shape[1]
    T = x_ref.shape[2]
    Tp = T - (_K - 1)

    # --- load input slab once; magnitude computed once on the full [F, T] ---
    xr = x_ref[0].astype(jnp.float32)          # real  [F, T]
    xi = x_ref[1].astype(jnp.float32)          # imag  [F, T]
    mg = jnp.sqrt(xr * xr + xi * xi)           # |X|   [F, T]  (EUP)

    # K=3 taps via static lane slices (no im2col, data already in VMEM/vregs).
    r = [xr[:, k:k + Tp] for k in range(_K)]
    im = [xi[:, k:k + Tp] for k in range(_K)]
    m = [mg[:, k:k + Tp] for k in range(_K)]

    # --- tiny conv parameters: scalars from SMEM ---
    def w_pe(o, c, k):  # Conv2d(2->2) weight, torch layout [O, C, 1, K] flattened
        return par_ref[o * 6 + c * 3 + k]

    def b_pe(o):
        return par_ref[12 + o]

    def w_me(o, k):     # Conv2d(1->2) weight
        return par_ref[14 + o * 3 + k]

    def b_me(o):
        return par_ref[20 + o]

    # --- conv branches: pure VPU scalar-FMA accumulation ---
    cplx = []
    for o in range(2):
        acc = r[0] * w_pe(o, 0, 0)
        for k in range(1, _K):
            acc = acc + r[k] * w_pe(o, 0, k)
        for k in range(_K):
            acc = acc + im[k] * w_pe(o, 1, k)
        cplx.append(acc + b_pe(o))             # [F, Tp]

    mag = []
    for o in range(2):
        acc = m[0] * w_me(o, 0)
        for k in range(1, _K):
            acc = acc + m[k] * w_me(o, k)
        mag.append(acc + b_me(o))              # [F, Tp]

    # --- LayerNorm([2, F]) per time frame t' (reduce over channel + freq) ---
    inv_n = 1.0 / (2.0 * F)

    def layer_norm(y0, y1, w_ref, b_ref, out_base):
        s = (jnp.sum(y0, axis=0, keepdims=True) +
             jnp.sum(y1, axis=0, keepdims=True))            # [1, Tp]
        mean = s * inv_n
        d0 = y0 - mean
        d1 = y1 - mean
        var = (jnp.sum(d0 * d0, axis=0, keepdims=True) +
               jnp.sum(d1 * d1, axis=0, keepdims=True)) * inv_n
        inv = jax.lax.rsqrt(var + _EPS)                      # [1, Tp]
        o_ref[out_base] = ((d0 * inv) * w_ref[0] + b_ref[0]).astype(o_ref.dtype)
        o_ref[out_base + 1] = ((d1 * inv) * w_ref[1] + b_ref[1]).astype(o_ref.dtype)

    layer_norm(cplx[0], cplx[1], wc_ref, bc_ref, 0)   # channels 0, 1
    layer_norm(mag[0], mag[1], wm_ref, bm_ref, 2)     # channels 2, 3


def phase_encoder_v9(x, w_pe, b_pe, w_me, b_me, ln_c_w, ln_c_b, ln_m_w, ln_m_b):
    """x: [B, 2, F, T] NCHW.  Returns [B, 4, F, T-2] (cplx ch 0-1, mag ch 2-3)."""
    B, C, F, T = x.shape
    assert C == 2
    Tp = T - (_K - 1)

    # Flatten the tiny conv params into one SMEM scalar table (22 floats).
    par = jnp.concatenate([
        w_pe.reshape(-1), b_pe.reshape(-1),
        w_me.reshape(-1), b_me.reshape(-1)]).astype(jnp.float32)

    # LayerNorm affine params, shaped [2, F, 1] so they broadcast over lanes (T').
    wc = ln_c_w.reshape(2, F, 1).astype(jnp.float32)
    bc = ln_c_b.reshape(2, F, 1).astype(jnp.float32)
    wm = ln_m_w.reshape(2, F, 1).astype(jnp.float32)
    bm = ln_m_b.reshape(2, F, 1).astype(jnp.float32)

    ln_spec = pl.BlockSpec((2, F, 1), lambda b: (0, 0, 0))
    smem_spec = pl.BlockSpec(memory_space=pltpu.MemorySpace.SMEM)

    itemsize = x.dtype.itemsize
    cost = pl.CostEstimate(
        flops=int(B * F * Tp * 60),                     # conv FMAs + magnitude + LN
        transcendentals=int(B * (F * T + 2 * Tp)),      # sqrt per input pos + rsqrt per frame
        bytes_accessed=int(x.size * itemsize + B * 4 * F * Tp * 4 + 4 * 2 * F * 4 + 22 * 4),
    )

    return pl.pallas_call(
        _phase_encoder_kernel,
        out_shape=jax.ShapeDtypeStruct((B, 4, F, Tp), jnp.float32),
        grid=(B,),
        in_specs=[
            smem_spec,                                            # conv params (SMEM)
            pl.BlockSpec((None, C, F, T), lambda b: (b, 0, 0, 0)),  # x[b]
            ln_spec, ln_spec, ln_spec, ln_spec,                   # LN affine params
        ],
        out_specs=pl.BlockSpec((None, 4, F, Tp), lambda b: (b, 0, 0, 0)),
        compiler_params=pltpu.CompilerParams(
            dimension_semantics=("parallel",),
            vmem_limit_bytes=32 * 1024 * 1024,
        ),
        cost_estimate=cost,
    )(par, x, wc, bc, wm, bm)


def _reference(x, w_pe, b_pe, w_me, b_me, ln_c_w, ln_c_b, ln_m_w, ln_m_b, eps=_EPS):
    """Pure-JAX reference matching the PyTorch PhaseEncoderV9 forward."""
    f32 = jnp.float32

    def conv(inp, w, b):
        y = jax.lax.conv_general_dilated(
            inp.astype(f32), w.astype(f32), window_strides=(1, 1), padding="VALID",
            dimension_numbers=("NCHW", "OIHW", "NCHW"))
        return y + b.reshape(1, -1, 1, 1)

    cplx = conv(x, w_pe, b_pe)                                            # [B,2,F,Tp]
    mag_in = jnp.sqrt(jnp.sum(x.astype(f32) ** 2, axis=1, keepdims=True))  # [B,1,F,T]
    mag = conv(mag_in, w_me, b_me)                                        # [B,2,F,Tp]

    def ln(y, g, b):
        yt = jnp.transpose(y, (0, 3, 1, 2))                               # [B,Tp,2,F]
        mu = jnp.mean(yt, axis=(2, 3), keepdims=True)
        var = jnp.mean((yt - mu) ** 2, axis=(2, 3), keepdims=True)
        out = (yt - mu) / jnp.sqrt(var + eps) * g + b
        return jnp.transpose(out, (0, 2, 3, 1))                           # [B,2,F,Tp]

    return jnp.concatenate([ln(cplx, ln_c_w, ln_c_b), ln(mag, ln_m_w, ln_m_b)], axis=1)


if __name__ == "__main__":
    key = jax.random.PRNGKey(0)
    B, C, F, T = 2, 2, 257, 16          # F=257 is fixed by LayerNorm([2, 257])
    Tp = T - (_K - 1)
    ks = jax.random.split(key, 8)

    x = jax.random.normal(ks[0], (B, C, F, T), dtype=jnp.float32)

    # PyTorch-style deterministic init: U(-bound, bound), bound = 1/sqrt(fan_in)
    bnd_pe = 1.0 / (C * 1 * _K) ** 0.5
    w_pe = jax.random.uniform(ks[1], (2, C, 1, _K), jnp.float32, -bnd_pe, bnd_pe)
    b_pe = jax.random.uniform(ks[2], (2,), jnp.float32, -bnd_pe, bnd_pe)
    bnd_me = 1.0 / (1 * 1 * _K) ** 0.5
    w_me = jax.random.uniform(ks[3], (2, 1, 1, _K), jnp.float32, -bnd_me, bnd_me)
    b_me = jax.random.uniform(ks[4], (2,), jnp.float32, -bnd_me, bnd_me)

    # LayerNorm affine params ([2, F]); randomized to exercise the affine path.
    ln_c_w = 1.0 + 0.1 * jax.random.normal(ks[5], (2, F), jnp.float32)
    ln_c_b = 0.1 * jax.random.normal(ks[6], (2, F), jnp.float32)
    ln_m_w = 1.0 + 0.1 * jax.random.normal(ks[7], (2, F), jnp.float32)
    ln_m_b = jnp.zeros((2, F), jnp.float32)

    out = jax.block_until_ready(
        phase_encoder_v9(x, w_pe, b_pe, w_me, b_me, ln_c_w, ln_c_b, ln_m_w, ln_m_b))
    ref = _reference(x, w_pe, b_pe, w_me, b_me, ln_c_w, ln_c_b, ln_m_w, ln_m_b)

    assert out.shape == (B, 4, F, Tp), out.shape
    assert jnp.allclose(out, ref, atol=2e-4, rtol=2e-4), \
        float(jnp.max(jnp.abs(out - ref)))
    print("KERNEL_OK")
</pallas_src>

<mosaic_0001>
module attributes {stable_mosaic.version = 11 : i64} {
  func.func @_phase_encoder_kernel(%arg0: i32, %arg1: memref<22xf32, #tpu.memory_space<smem>>, %arg2: memref<1x2x257x16xf32, #tpu.memory_space<vmem>>, %arg3: memref<2x257x1xf32, #tpu.memory_space<vmem>>, %arg4: memref<2x257x1xf32, #tpu.memory_space<vmem>>, %arg5: memref<2x257x1xf32, #tpu.memory_space<vmem>>, %arg6: memref<2x257x1xf32, #tpu.memory_space<vmem>>, %arg7: memref<1x4x257x14xf32, #tpu.memory_space<vmem>>) attributes {dimension_semantics = [#tpu.dimension_semantics<parallel>], iteration_bounds = array<i64: 2>, scalar_prefetch = 0 : i64, scratch_operands = 0 : i64, tpu.core_type = #tpu.core_type<tc>, window_params = [{transform_indices = @transform_0, window_bounds = array<i64: 22>}, {transform_indices = @transform_1, window_bounds = array<i64: 1, 2, 257, 16>}, {pipeline_mode = #tpu.pipeline_mode<synchronous>, transform_indices = @transform_2, window_bounds = array<i64: 2, 257, 1>}, {pipeline_mode = #tpu.pipeline_mode<synchronous>, transform_indices = @transform_3, window_bounds = array<i64: 2, 257, 1>}, {pipeline_mode = #tpu.pipeline_mode<synchronous>, transform_indices = @transform_4, window_bounds = array<i64: 2, 257, 1>}, {pipeline_mode = #tpu.pipeline_mode<synchronous>, transform_indices = @transform_5, window_bounds = array<i64: 2, 257, 1>}, {transform_indices = @transform_6, window_bounds = array<i64: 1, 4, 257, 14>}]} {
    %c0 = arith.constant 0 : index
    %c0_0 = arith.constant 0 : index
    %c0_1 = arith.constant 0 : index
    %c0_2 = arith.constant 0 : index
    %0 = vector.load %arg2[%c0, %c0_0, %c0_1, %c0_2] : memref<1x2x257x16xf32, #tpu.memory_space<vmem>>, vector<1x1x257x16xf32>
    %1 = vector.shape_cast %0 : vector<1x1x257x16xf32> to vector<257x16xf32>
    %c0_3 = arith.constant 0 : index
    %c1 = arith.constant 1 : index
    %c0_4 = arith.constant 0 : index
    %c0_5 = arith.constant 0 : index
    %2 = vector.load %arg2[%c0_3, %c1, %c0_4, %c0_5] : memref<1x2x257x16xf32, #tpu.memory_space<vmem>>, vector<1x1x257x16xf32>
    %3 = vector.shape_cast %2 : vector<1x1x257x16xf32> to vector<257x16xf32>
    %4 = arith.mulf %1, %1 : vector<257x16xf32>
    %5 = arith.mulf %3, %3 : vector<257x16xf32>
    %6 = arith.addf %4, %5 : vector<257x16xf32>
    %7 = math.sqrt %6 : vector<257x16xf32>
    %8 = vector.extract_strided_slice %1 {offsets = [0, 0], sizes = [257, 14], strides = [1, 1]} : vector<257x16xf32> to vector<257x14xf32>
    %9 = vector.extract_strided_slice %1 {offsets = [0, 1], sizes = [257, 14], strides = [1, 1]} : vector<257x16xf32> to vector<257x14xf32>
    %10 = vector.extract_strided_slice %1 {offsets = [0, 2], sizes = [257, 14], strides = [1, 1]} : vector<257x16xf32> to vector<257x14xf32>
    %11 = vector.extract_strided_slice %3 {offsets = [0, 0], sizes = [257, 14], strides = [1, 1]} : vector<257x16xf32> to vector<257x14xf32>
    %12 = vector.extract_strided_slice %3 {offsets = [0, 1], sizes = [257, 14], strides = [1, 1]} : vector<257x16xf32> to vector<257x14xf32>
    %13 = vector.extract_strided_slice %3 {offsets = [0, 2], sizes = [257, 14], strides = [1, 1]} : vector<257x16xf32> to vector<257x14xf32>
    %14 = vector.extract_strided_slice %7 {offsets = [0, 0], sizes = [257, 14], strides = [1, 1]} : vector<257x16xf32> to vector<257x14xf32>
    %15 = vector.extract_strided_slice %7 {offsets = [0, 1], sizes = [257, 14], strides = [1, 1]} : vector<257x16xf32> to vector<257x14xf32>
    %16 = vector.extract_strided_slice %7 {offsets = [0, 2], sizes = [257, 14], strides = [1, 1]} : vector<257x16xf32> to vector<257x14xf32>
    %c0_6 = arith.constant 0 : index
    %17 = memref.load %arg1[%c0_6] : memref<22xf32, #tpu.memory_space<smem>>
    %18 = vector.broadcast %17 : f32 to vector<257x14xf32>
    %19 = arith.mulf %8, %18 : vector<257x14xf32>
    %c1_7 = arith.constant 1 : index
    %20 = memref.load %arg1[%c1_7] : memref<22xf32, #tpu.memory_space<smem>>
    %21 = vector.broadcast %20 : f32 to vector<257x14xf32>
    %22 = arith.mulf %9, %21 : vector<257x14xf32>
    %23 = arith.addf %19, %22 : vector<257x14xf32>
    %c2 = arith.constant 2 : index
    %24 = memref.load %arg1[%c2] : memref<22xf32, #tpu.memory_space<smem>>
    %25 = vector.broadcast %24 : f32 to vector<257x14xf32>
    %26 = arith.mulf %10, %25 : vector<257x14xf32>
    %27 = arith.addf %23, %26 : vector<257x14xf32>
    %c3 = arith.constant 3 : index
    %28 = memref.load %arg1[%c3] : memref<22xf32, #tpu.memory_space<smem>>
    %29 = vector.broadcast %28 : f32 to vector<257x14xf32>
    %30 = arith.mulf %11, %29 : vector<257x14xf32>
    %31 = arith.addf %27, %30 : vector<257x14xf32>
    %c4 = arith.constant 4 : index
    %32 = memref.load %arg1[%c4] : memref<22xf32, #tpu.memory_space<smem>>
    %33 = vector.broadcast %32 : f32 to vector<257x14xf32>
    %34 = arith.mulf %12, %33 : vector<257x14xf32>
    %35 = arith.addf %31, %34 : vector<257x14xf32>
    %c5 = arith.constant 5 : index
    %36 = memref.load %arg1[%c5] : memref<22xf32, #tpu.memory_space<smem>>
    %37 = vector.broadcast %36 : f32 to vector<257x14xf32>
    %38 = arith.mulf %13, %37 : vector<257x14xf32>
    %39 = arith.addf %35, %38 : vector<257x14xf32>
    %c12 = arith.constant 12 : index
    %40 = memref.load %arg1[%c12] : memref<22xf32, #tpu.memory_space<smem>>
    %41 = vector.broadcast %40 : f32 to vector<257x14xf32>
    %42 = arith.addf %39, %41 : vector<257x14xf32>
    %c6 = arith.constant 6 : index
    %43 = memref.load %arg1[%c6] : memref<22xf32, #tpu.memory_space<smem>>
    %44 = vector.broadcast %43 : f32 to vector<257x14xf32>
    %45 = arith.mulf %8, %44 : vector<257x14xf32>
    %c7 = arith.constant 7 : index
    %46 = memref.load %arg1[%c7] : memref<22xf32, #tpu.memory_space<smem>>
    %47 = vector.broadcast %46 : f32 to vector<257x14xf32>
    %48 = arith.mulf %9, %47 : vector<257x14xf32>
    %49 = arith.addf %45, %48 : vector<257x14xf32>
    %c8 = arith.constant 8 : index
    %50 = memref.load %arg1[%c8] : memref<22xf32, #tpu.memory_space<smem>>
    %51 = vector.broadcast %50 : f32 to vector<257x14xf32>
    %52 = arith.mulf %10, %51 : vector<257x14xf32>
    %53 = arith.addf %49, %52 : vector<257x14xf32>
    %c9 = arith.constant 9 : index
    %54 = memref.load %arg1[%c9] : memref<22xf32, #tpu.memory_space<smem>>
    %55 = vector.broadcast %54 : f32 to vector<257x14xf32>
    %56 = arith.mulf %11, %55 : vector<257x14xf32>
    %57 = arith.addf %53, %56 : vector<257x14xf32>
    %c10 = arith.constant 10 : index
    %58 = memref.load %arg1[%c10] : memref<22xf32, #tpu.memory_space<smem>>
    %59 = vector.broadcast %58 : f32 to vector<257x14xf32>
    %60 = arith.mulf %12, %59 : vector<257x14xf32>
    %61 = arith.addf %57, %60 : vector<257x14xf32>
    %c11 = arith.constant 11 : index
    %62 = memref.load %arg1[%c11] : memref<22xf32, #tpu.memory_space<smem>>
    %63 = vector.broadcast %62 : f32 to vector<257x14xf32>
    %64 = arith.mulf %13, %63 : vector<257x14xf32>
    %65 = arith.addf %61, %64 : vector<257x14xf32>
    %c13 = arith.constant 13 : index
    %66 = memref.load %arg1[%c13] : memref<22xf32, #tpu.memory_space<smem>>
    %67 = vector.broadcast %66 : f32 to vector<257x14xf32>
    %68 = arith.addf %65, %67 : vector<257x14xf32>
    %c14 = arith.constant 14 : index
    %69 = memref.load %arg1[%c14] : memref<22xf32, #tpu.memory_space<smem>>
    %70 = vector.broadcast %69 : f32 to vector<257x14xf32>
    %71 = arith.mulf %14, %70 : vector<257x14xf32>
    %c15 = arith.constant 15 : index
    %72 = memref.load %arg1[%c15] : memref<22xf32, #tpu.memory_space<smem>>
    %73 = vector.broadcast %72 : f32 to vector<257x14xf32>
    %74 = arith.mulf %15, %73 : vector<257x14xf32>
    %75 = arith.addf %71, %74 : vector<257x14xf32>
    %c16 = arith.constant 16 : index
    %76 = memref.load %arg1[%c16] : memref<22xf32, #tpu.memory_space<smem>>
    %77 = vector.broadcast %76 : f32 to vector<257x14xf32>
    %78 = arith.mulf %16, %77 : vector<257x14xf32>
    %79 = arith.addf %75, %78 : vector<257x14xf32>
    %c20 = arith.constant 20 : index
    %80 = memref.load %arg1[%c20] : memref<22xf32, #tpu.memory_space<smem>>
    %81 = vector.broadcast %80 : f32 to vector<257x14xf32>
    %82 = arith.addf %79, %81 : vector<257x14xf32>
    %c17 = arith.constant 17 : index
    %83 = memref.load %arg1[%c17] : memref<22xf32, #tpu.memory_space<smem>>
    %84 = vector.broadcast %83 : f32 to vector<257x14xf32>
    %85 = arith.mulf %14, %84 : vector<257x14xf32>
    %c18 = arith.constant 18 : index
    %86 = memref.load %arg1[%c18] : memref<22xf32, #tpu.memory_space<smem>>
    %87 = vector.broadcast %86 : f32 to vector<257x14xf32>
    %88 = arith.mulf %15, %87 : vector<257x14xf32>
    %89 = arith.addf %85, %88 : vector<257x14xf32>
    %c19 = arith.constant 19 : index
    %90 = memref.load %arg1[%c19] : memref<22xf32, #tpu.memory_space<smem>>
    %91 = vector.broadcast %90 : f32 to vector<257x14xf32>
    %92 = arith.mulf %16, %91 : vector<257x14xf32>
    %93 = arith.addf %89, %92 : vector<257x14xf32>
    %c21 = arith.constant 21 : index
    %94 = memref.load %arg1[%c21] : memref<22xf32, #tpu.memory_space<smem>>
    %95 = vector.broadcast %94 : f32 to vector<257x14xf32>
    %96 = arith.addf %93, %95 : vector<257x14xf32>
    %cst = arith.constant dense<0.000000e+00> : vector<14xf32>
    %97 = vector.multi_reduction <add>, %42, %cst [0] : vector<257x14xf32> to vector<14xf32>
    %98 = vector.shape_cast %97 : vector<14xf32> to vector<1x14xf32>
    %cst_8 = arith.constant dense<0.000000e+00> : vector<14xf32>
    %99 = vector.multi_reduction <add>, %68, %cst_8 [0] : vector<257x14xf32> to vector<14xf32>
    %100 = vector.shape_cast %99 : vector<14xf32> to vector<1x14xf32>
    %101 = arith.addf %98, %100 : vector<1x14xf32>
    %cst_9 = arith.constant 0.00194552529 : f32
    %102 = vector.broadcast %cst_9 : f32 to vector<1x14xf32>
    %103 = arith.mulf %101, %102 : vector<1x14xf32>
    %104 = vector.broadcast %103 : vector<1x14xf32> to vector<257x14xf32>
    %105 = arith.subf %42, %104 : vector<257x14xf32>
    %106 = vector.broadcast %103 : vector<1x14xf32> to vector<257x14xf32>
    %107 = arith.subf %68, %106 : vector<257x14xf32>
    %108 = arith.mulf %105, %105 : vector<257x14xf32>
    %cst_10 = arith.constant dense<0.000000e+00> : vector<14xf32>
    %109 = vector.multi_reduction <add>, %108, %cst_10 [0] : vector<257x14xf32> to vector<14xf32>
    %110 = vector.shape_cast %109 : vector<14xf32> to vector<1x14xf32>
    %111 = arith.mulf %107, %107 : vector<257x14xf32>
    %cst_11 = arith.constant dense<0.000000e+00> : vector<14xf32>
    %112 = vector.multi_reduction <add>, %111, %cst_11 [0] : vector<257x14xf32> to vector<14xf32>
    %113 = vector.shape_cast %112 : vector<14xf32> to vector<1x14xf32>
    %114 = arith.addf %110, %113 : vector<1x14xf32>
    %cst_12 = arith.constant 0.00194552529 : f32
    %115 = vector.broadcast %cst_12 : f32 to vector<1x14xf32>
    %116 = arith.mulf %114, %115 : vector<1x14xf32>
    %cst_13 = arith.constant 9.99999974E-6 : f32
    %117 = vector.broadcast %cst_13 : f32 to vector<1x14xf32>
    %118 = arith.addf %116, %117 : vector<1x14xf32>
    %119 = math.rsqrt %118 : vector<1x14xf32>
    %120 = vector.broadcast %119 : vector<1x14xf32> to vector<257x14xf32>
    %121 = arith.mulf %105, %120 : vector<257x14xf32>
    %c0_14 = arith.constant 0 : index
    %c0_15 = arith.constant 0 : index
    %c0_16 = arith.constant 0 : index
    %122 = vector.load %arg3[%c0_14, %c0_15, %c0_16] : memref<2x257x1xf32, #tpu.memory_space<vmem>>, vector<1x257x1xf32>
    %123 = vector.shape_cast %122 : vector<1x257x1xf32> to vector<257x1xf32>
    %124 = vector.broadcast %123 : vector<257x1xf32> to vector<257x14xf32>
    %125 = arith.mulf %121, %124 : vector<257x14xf32>
    %c0_17 = arith.constant 0 : index
    %c0_18 = arith.constant 0 : index
    %c0_19 = arith.constant 0 : index
    %126 = vector.load %arg4[%c0_17, %c0_18, %c0_19] : memref<2x257x1xf32, #tpu.memory_space<vmem>>, vector<1x257x1xf32>
    %127 = vector.shape_cast %126 : vector<1x257x1xf32> to vector<257x1xf32>
    %128 = vector.broadcast %127 : vector<257x1xf32> to vector<257x14xf32>
    %129 = arith.addf %125, %128 : vector<257x14xf32>
    %c0_20 = arith.constant 0 : index
    %c0_21 = arith.constant 0 : index
    %c0_22 = arith.constant 0 : index
    %c0_23 = arith.constant 0 : index
    %130 = vector.load %arg7[%c0_20, %c0_21, %c0_22, %c0_23] : memref<1x4x257x14xf32, #tpu.memory_space<vmem>>, vector<1x1x257x14xf32>
    %131 = vector.shape_cast %130 : vector<1x1x257x14xf32> to vector<257x14xf32>
    %132 = vector.shape_cast %129 : vector<257x14xf32> to vector<1x1x257x14xf32>
    tpu.vector_store %arg7[%c0_20, %c0_21, %c0_22, %c0_23], %132 {strides = array<i32>} : memref<1x4x257x14xf32, #tpu.memory_space<vmem>>, vector<1x1x257x14xf32>,
    %133 = vector.broadcast %119 : vector<1x14xf32> to vector<257x14xf32>
    %134 = arith.mulf %107, %133 : vector<257x14xf32>
    %c1_24 = arith.constant 1 : index
    %c0_25 = arith.constant 0 : index
    %c0_26 = arith.constant 0 : index
    %135 = vector.load %arg3[%c1_24, %c0_25, %c0_26] : memref<2x257x1xf32, #tpu.memory_space<vmem>>, vector<1x257x1xf32>
    %136 = vector.shape_cast %135 : vector<1x257x1xf32> to vector<257x1xf32>
    %137 = vector.broadcast %136 : vector<257x1xf32> to vector<257x14xf32>
    %138 = arith.mulf %134, %137 : vector<257x14xf32>
    %c1_27 = arith.constant 1 : index
    %c0_28 = arith.constant 0 : index
    %c0_29 = arith.constant 0 : index
    %139 = vector.load %arg4[%c1_27, %c0_28, %c0_29] : memref<2x257x1xf32, #tpu.memory_space<vmem>>, vector<1x257x1xf32>
    %140 = vector.shape_cast %139 : vector<1x257x1xf32> to vector<257x1xf32>
    %141 = vector.broadcast %140 : vector<257x1xf32> to vector<257x14xf32>
    %142 = arith.addf %138, %141 : vector<257x14xf32>
    %c0_30 = arith.constant 0 : index
    %c1_31 = arith.constant 1 : index
    %c0_32 = arith.constant 0 : index
    %c0_33 = arith.constant 0 : index
    %143 = vector.load %arg7[%c0_30, %c1_31, %c0_32, %c0_33] : memref<1x4x257x14xf32, #tpu.memory_space<vmem>>, vector<1x1x257x14xf32>
    %144 = vector.shape_cast %143 : vector<1x1x257x14xf32> to vector<257x14xf32>
    %145 = vector.shape_cast %142 : vector<257x14xf32> to vector<1x1x257x14xf32>
    tpu.vector_store %arg7[%c0_30, %c1_31, %c0_32, %c0_33], %145 {strides = array<i32>} : memref<1x4x257x14xf32, #tpu.memory_space<vmem>>, vector<1x1x257x14xf32>,
    %cst_34 = arith.constant dense<0.000000e+00> : vector<14xf32>
    %146 = vector.multi_reduction <add>, %82, %cst_34 [0] : vector<257x14xf32> to vector<14xf32>
    %147 = vector.shape_cast %146 : vector<14xf32> to vector<1x14xf32>
    %cst_35 = arith.constant dense<0.000000e+00> : vector<14xf32>
    %148 = vector.multi_reduction <add>, %96, %cst_35 [0] : vector<257x14xf32> to vector<14xf32>
    %149 = vector.shape_cast %148 : vector<14xf32> to vector<1x14xf32>
    %150 = arith.addf %147, %149 : vector<1x14xf32>
    %cst_36 = arith.constant 0.00194552529 : f32
    %151 = vector.broadcast %cst_36 : f32 to vector<1x14xf32>
    %152 = arith.mulf %150, %151 : vector<1x14xf32>
    %153 = vector.broadcast %152 : vector<1x14xf32> to vector<257x14xf32>
    %154 = arith.subf %82, %153 : vector<257x14xf32>
    %155 = vector.broadcast %152 : vector<1x14xf32> to vector<257x14xf32>
    %156 = arith.subf %96, %155 : vector<257x14xf32>
    %157 = arith.mulf %154, %154 : vector<257x14xf32>
    %cst_37 = arith.constant dense<0.000000e+00> : vector<14xf32>
    %158 = vector.multi_reduction <add>, %157, %cst_37 [0] : vector<257x14xf32> to vector<14xf32>
    %159 = vector.shape_cast %158 : vector<14xf32> to vector<1x14xf32>
    %160 = arith.mulf %156, %156 : vector<257x14xf32>
    %cst_38 = arith.constant dense<0.000000e+00> : vector<14xf32>
    %161 = vector.multi_reduction <add>, %160, %cst_38 [0] : vector<257x14xf32> to vector<14xf32>
    %162 = vector.shape_cast %161 : vector<14xf32> to vector<1x14xf32>
    %163 = arith.addf %159, %162 : vector<1x14xf32>
    %cst_39 = arith.constant 0.00194552529 : f32
    %164 = vector.broadcast %cst_39 : f32 to vector<1x14xf32>
    %165 = arith.mulf %163, %164 : vector<1x14xf32>
    %cst_40 = arith.constant 9.99999974E-6 : f32
    %166 = vector.broadcast %cst_40 : f32 to vector<1x14xf32>
    %167 = arith.addf %165, %166 : vector<1x14xf32>
    %168 = math.rsqrt %167 : vector<1x14xf32>
    %169 = vector.broadcast %168 : vector<1x14xf32> to vector<257x14xf32>
    %170 = arith.mulf %154, %169 : vector<257x14xf32>
    %c0_41 = arith.constant 0 : index
    %c0_42 = arith.constant 0 : index
    %c0_43 = arith.constant 0 : index
    %171 = vector.load %arg5[%c0_41, %c0_42, %c0_43] : memref<2x257x1xf32, #tpu.memory_space<vmem>>, vector<1x257x1xf32>
    %172 = vector.shape_cast %171 : vector<1x257x1xf32> to vector<257x1xf32>
    %173 = vector.broadcast %172 : vector<257x1xf32> to vector<257x14xf32>
    %174 = arith.mulf %170, %173 : vector<257x14xf32>
    %c0_44 = arith.constant 0 : index
    %c0_45 = arith.constant 0 : index
    %c0_46 = arith.constant 0 : index
    %175 = vector.load %arg6[%c0_44, %c0_45, %c0_46] : memref<2x257x1xf32, #tpu.memory_space<vmem>>, vector<1x257x1xf32>
    %176 = vector.shape_cast %175 : vector<1x257x1xf32> to vector<257x1xf32>
    %177 = vector.broadcast %176 : vector<257x1xf32> to vector<257x14xf32>
    %178 = arith.addf %174, %177 : vector<257x14xf32>
    %c0_47 = arith.constant 0 : index
    %c2_48 = arith.constant 2 : index
    %c0_49 = arith.constant 0 : index
    %c0_50 = arith.constant 0 : index
    %179 = vector.load %arg7[%c0_47, %c2_48, %c0_49, %c0_50] : memref<1x4x257x14xf32, #tpu.memory_space<vmem>>, vector<1x1x257x14xf32>
    %180 = vector.shape_cast %179 : vector<1x1x257x14xf32> to vector<257x14xf32>
    %181 = vector.shape_cast %178 : vector<257x14xf32> to vector<1x1x257x14xf32>
    tpu.vector_store %arg7[%c0_47, %c2_48, %c0_49, %c0_50], %181 {strides = array<i32>} : memref<1x4x257x14xf32, #tpu.memory_space<vmem>>, vector<1x1x257x14xf32>,
    %182 = vector.broadcast %168 : vector<1x14xf32> to vector<257x14xf32>
    %183 = arith.mulf %156, %182 : vector<257x14xf32>
    %c1_51 = arith.constant 1 : index
    %c0_52 = arith.constant 0 : index
    %c0_53 = arith.constant 0 : index
    %184 = vector.load %arg5[%c1_51, %c0_52, %c0_53] : memref<2x257x1xf32, #tpu.memory_space<vmem>>, vector<1x257x1xf32>
    %185 = vector.shape_cast %184 : vector<1x257x1xf32> to vector<257x1xf32>
    %186 = vector.broadcast %185 : vector<257x1xf32> to vector<257x14xf32>
    %187 = arith.mulf %183, %186 : vector<257x14xf32>
    %c1_54 = arith.constant 1 : index
    %c0_55 = arith.constant 0 : index
    %c0_56 = arith.constant 0 : index
    %188 = vector.load %arg6[%c1_54, %c0_55, %c0_56] : memref<2x257x1xf32, #tpu.memory_space<vmem>>, vector<1x257x1xf32>
    %189 = vector.shape_cast %188 : vector<1x257x1xf32> to vector<257x1xf32>
    %190 = vector.broadcast %189 : vector<257x1xf32> to vector<257x14xf32>
    %191 = arith.addf %187, %190 : vector<257x14xf32>
    %c0_57 = arith.constant 0 : index
    %c3_58 = arith.constant 3 : index
    %c0_59 = arith.constant 0 : index
    %c0_60 = arith.constant 0 : index
    %192 = vector.load %arg7[%c0_57, %c3_58, %c0_59, %c0_60] : memref<1x4x257x14xf32, #tpu.memory_space<vmem>>, vector<1x1x257x14xf32>
    %193 = vector.shape_cast %192 : vector<1x1x257x14xf32> to vector<257x14xf32>
    %194 = vector.shape_cast %191 : vector<257x14xf32> to vector<1x1x257x14xf32>
    tpu.vector_store %arg7[%c0_57, %c3_58, %c0_59, %c0_60], %194 {strides = array<i32>} : memref<1x4x257x14xf32, #tpu.memory_space<vmem>>, vector<1x1x257x14xf32>,
    return
  }
  func.func @transform_0(%arg0: i32) -> i32 {
    %c0_i32 = arith.constant 0 : i32
    %c0_i32_0 = arith.constant 0 : i32
    return %c0_i32 : i32
  }
  func.func @transform_1(%arg0: i32) -> (i32, i32, i32, i32) {
    %c0_i32 = arith.constant 0 : i32
    %c0_i32_0 = arith.constant 0 : i32
    %c0_i32_1 = arith.constant 0 : i32
    %c0_i32_2 = arith.constant 0 : i32
    return %arg0, %c0_i32, %c0_i32_0, %c0_i32_1 : i32, i32, i32, i32
  }
  func.func @transform_2(%arg0: i32) -> (i32, i32, i32) {
    %c0_i32 = arith.constant 0 : i32
    %c0_i32_0 = arith.constant 0 : i32
    %c0_i32_1 = arith.constant 0 : i32
    %c0_i32_2 = arith.constant 0 : i32
    return %c0_i32, %c0_i32_0, %c0_i32_1 : i32, i32, i32
  }
  func.func @transform_3(%arg0: i32) -> (i32, i32, i32) {
    %c0_i32 = arith.constant 0 : i32
    %c0_i32_0 = arith.constant 0 : i32
    %c0_i32_1 = arith.constant 0 : i32
    %c0_i32_2 = arith.constant 0 : i32
    return %c0_i32, %c0_i32_0, %c0_i32_1 : i32, i32, i32
  }
  func.func @transform_4(%arg0: i32) -> (i32, i32, i32) {
    %c0_i32 = arith.constant 0 : i32
    %c0_i32_0 = arith.constant 0 : i32
    %c0_i32_1 = arith.constant 0 : i32
    %c0_i32_2 = arith.constant 0 : i32
    return %c0_i32, %c0_i32_0, %c0_i32_1 : i32, i32, i32
  }
  func.func @transform_5(%arg0: i32) -> (i32, i32, i32) {
    %c0_i32 = arith.constant 0 : i32
    %c0_i32_0 = arith.constant 0 : i32
    %c0_i32_1 = arith.constant 0 : i32
    %c0_i32_2 = arith.constant 0 : i32
    return %c0_i32, %c0_i32_0, %c0_i32_1 : i32, i32, i32
  }
  func.func @transform_6(%arg0: i32) -> (i32, i32, i32, i32) {
    %c0_i32 = arith.constant 0 : i32
    %c0_i32_0 = arith.constant 0 : i32
    %c0_i32_1 = arith.constant 0 : i32
    %c0_i32_2 = arith.constant 0 : i32
    return %arg0, %c0_i32, %c0_i32_0, %c0_i32_1 : i32, i32, i32, i32
  }
}

</mosaic_0001>

<bundles_post_ra>
// kernel: tpu_custom_call.1
= control target key start
LH: loop header
LB: loop body
LE: loop exit
PB: predicated region body
PF: predicated region fallthrough
CT: control target
= control target key end

     0   :  { %11 = vsyncpa [#allocation3], 0  ;;  %s7111_s21 = smov 0   ;;  %s14884_s0 = inlined_call_operand.vmem [shape: f32[22], index: 0, kind: input, shape index: {}]   ;;  %s14885_s1 = inlined_call_operand.vmem [shape: f32[2,2,257,16], index: 1, kind: input, shape index: {}]   ;;  %s14886_s2 = inlined_call_operand.vmem [shape: f32[2,257,1], index: 2, kind: input, shape index: {}]   ;;  %s14887_s3 = inlined_call_operand.vmem [shape: f32[2,257,1], index: 3, kind: input, shape index: {}]   ;;  %s14888_s4 = inlined_call_operand.vmem [shape: f32[2,257,1], index: 4, kind: input, shape index: {}]   ;;  %s14889_s5 = inlined_call_operand.vmem [shape: f32[2,257,1], index: 5, kind: input, shape index: {}]   ;;  %s14890_s6 = inlined_call_operand.vmem [shape: f32[2,4,257,14], index: 6, kind: output, shape index: {}]  }
   0x1 LB: > { %s6511_s22 = sadd.s32 4294967295, %s7070_s21   ;;  %p6513_p0 = scmp.ge.s32.totalorder %s7070_s21, 1  ;;  %s7070_s21 = sphi %s7111_s21, %s17_s21  }
   0x2   : > { %p179_p1 = scmp.lt.s32.totalorder %s7070_s21, 3  ;;  %s192_s25 = sshll.u32 %s14884_s0, 4  ;;  %s193_s25 = int_to_ptr.vmem [resolvable:$true] %s192_s25 }
   0x3   : > { %p6817_p3 = scmp.eq.s32.totalorder %s6511_s22, 0  ;;  %s7045_s27 = scalar_lea.vmem %s193_s25, 16 }
   0x4   : > { %p7122_p2 = pnand %p6513_p0, %p179_p1  ;;  %p7046_p6 = scmp.ne.s32.totalorder %s193_s25, %s7045_s27 }
   0x5   : > { %p7053_p10 = scmp.lt.s32.totalorder %s193_s25, %s193_s25  ;;  %p7054_p11 = scmp.lt.s32.totalorder %s7045_s27, %s7045_s27 }
   0x6   : > { %p6813_p4 = pneg %p7122_p2 }
   0x7   : > { %p7055_p12 = por %p7054_p11, %p7053_p10 }
   0x8   : > { %p6814_p5 = pnand %p6817_p3, %p6813_p4 }
   0xa   : > { %p7047_p7 = pneg %p6814_p5 }
   0xc   : > { %p7048_p8 = pnand %p7047_p7, %p7046_p6 }
   0xe   : > { %p7049_p9 = pneg %p7048_p8 }
  0x10   : > { %p7056_p13 = pnand %p7055_p12, %p7049_p9 }
  0x12   : > { %7059 = shalt.err (!%p7056_p13)
}
  0x13   : > { %s7072_s28 = smov [#allocation2]   ;;  %225 = sbr.rel (%p7122_p2) target bundleno = 1509 (0x5e5), region = 44 }
  0x14   : > { %6816 = dma.vmem_to_smem (!%p6814_p5), %s193_s25, 16, %s7072_s28, [#allocation3]  }
  0x1a   : > { %7065 = dma.done.wait (%p6817_p3), [#allocation3], 16  }
  0x1b   : > { %7067 = vsyncadd (%p6817_p3), [#allocation3], 4294967280 }
  0x1c   : > { %231 = sfence }
  0x1d   : > { %p256_p0 = scmp.lt.s32.totalorder %s6511_s22, 1  ;;  %s6553_s29 = sld [smem:[#allocation2 + $0x1]] }
  0x1e   : > { %s7073_s10 = smov 127   ;;  %s6554_s11 = sld [smem:[#allocation2 + $0x2]] }
  0x1f   : > { %s16819_s22 = smov (!%p256_p0, %s6511_s22), 1  ;;  %s7074_s12 = smov 126  }
  0x20   : > { %s6807_s30 = smul.u32 528, %s16819_s22  ;;  %s6556_s13 = sld [smem:[#allocation2 + $0x4]] }
  0x21   : > { %s6557_s14 = sld [smem:[#allocation2 + $0x5]]  ;;  %s6560_s15 = sld [smem:[#allocation2 + $0x7]] }
  0x22   : > { %s7139_s9 = scalar_lea.vmem %s14885_s1, %s6807_s30  ;;  %s6561_s16 = sld [smem:[#allocation2 + $0x8]] }
  0x23   : > { %v7141_v0 = vstv %s6553_s29  ;;  %v7144_v1 = vld [vmem:[%s7139_s9 + $0x10] sm:$0xff]  ;;  %v7147_v2 = vld [vmem:[%s7139_s9] sm:$0xff]  ;;  %v7150_v3 = vld [vmem:[%s7139_s9 + $0x18] sm:$0xff]  ;;  %s6563_s17 = sld [smem:[#allocation2 + $0xa]]  ;;  %s6564_s18 = sld [smem:[#allocation2 + $0xb]] }
  0x24   : > { %v702_v4 = vmul.f32 %v7141_v0, %v7144_v1  ;;  %v700_v5 = vmul.f32 %v7141_v0, %v7147_v2  ;;  %v7157_v6 = vld [vmem:[%s7139_s9 + $0x8] sm:$0xff]  ;;  %v703_v7 = vmul.f32 %v7141_v0, %v7150_v3  ;;  %v7169_v10 = vld [vmem:[%s7139_s9 + $0x20] sm:$0xff]  ;;  %v7178_v13 = vld [vmem:[%s7139_s9 + $0x38] sm:$0xff]  ;;  %s663_s19 = sld [smem:[#allocation2]]  ;;  %s8606_s20 = sld [smem:[#allocation2 + $0x3]] }
  0x25   : > { %v701_v8 = vmul.f32 %v7141_v0, %v7157_v6  ;;  %v7166_v9 = vld [vmem:[%s7139_s9 + $0x28] sm:$0xff]  ;;  %v704_v12 = vmul.f32 %v7141_v0, %v7169_v10  ;;  %v7181_v14 = vld [vmem:[%s7139_s9 + $0x30] sm:$0xff]  ;;  %v707_v15 = vmul.f32 %v7141_v0, %v7178_v13  ;;  %v7193_v18 = vld [vmem:[%s7139_s9 + $0x40] sm:$0xff]  ;;  %s8934_s23 = sld [smem:[#allocation2 + $0xf]]  ;;  %s9743_s24 = sld [smem:[#allocation2 + $0x10]] }
  0x26   : > { %770 = vrot.lane.b32.xlu1 %v702_v4, %s7073_s10  ;;  %766 = vrot.lane.b32.xlu0 %v700_v5, %s7073_s10  ;;  %v705_v11 = vmul.f32 %v7141_v0, %v7166_v9  ;;  %v706_v16 = vmul.f32 %v7141_v0, %v7181_v14  ;;  %v7190_v17 = vld [vmem:[%s7139_s9 + $0x48] sm:$0xff]  ;;  %v708_v20 = vmul.f32 %v7141_v0, %v7193_v18  ;;  %v7202_v21 = vld [vmem:[%s7139_s9 + $0x58] sm:$0xff]  ;;  %s10021_s25 = sld [smem:[#allocation2 + $0x6]]  ;;  %s10064_s26 = sld [smem:[#allocation2 + $0xc]] }
  0x27   : > { %v709_v19 = vmul.f32 %v7141_v0, %v7190_v17  ;;  %v7205_v22 = vld [vmem:[%s7139_s9 + $0x50] sm:$0xff]  ;;  %v711_v23 = vmul.f32 %v7141_v0, %v7202_v21  ;;  %v7214_v25 = vld [vmem:[%s7139_s9 + $0x68] sm:$0xff]  ;;  %v7217_v26 = vld [vmem:[%s7139_s9 + $0x60] sm:$0xff]  ;;  %v7333_v5 = vstv %s6554_s11  ;;  %s10115_s27 = sld [smem:[#allocation2 + $0x9]]  ;;  %s10269_s28 = sld [smem:[#allocation2 + $0xd]] }
  0x28   : > { %v710_v24 = vmul.f32 %v7141_v0, %v7205_v22  ;;  %v713_v27 = vmul.f32 %v7141_v0, %v7214_v25  ;;  %v712_v28 = vmul.f32 %v7141_v0, %v7217_v26  ;;  %v7226_v29 = vld [vmem:[%s7139_s9 + $0x78] sm:$0xff]  ;;  %v7229_v30 = vld [vmem:[%s7139_s9 + $0x70] sm:$0xff]  ;;  %v7238_v33 = vld [vmem:[%s7139_s9 + $0x88] sm:$0xff]  ;;  %s10451_s29 = sld [smem:[#allocation2 + $0x12]]  ;;  %s10979_s30 = sld [smem:[#allocation2 + $0x13]] }
  0x29   : > { %v715_v31 = vmul.f32 %v7141_v0, %v7226_v29  ;;  %v714_v32 = vmul.f32 %v7141_v0, %v7229_v30  ;;  %v7241_v34 = vld [vmem:[%s7139_s9 + $0x80] sm:$0xff]  ;;  %v717_v35 = vmul.f32 %v7141_v0, %v7238_v33  ;;  %v7250_v37 = vld [vmem:[%s7139_s9 + $0x98] sm:$0xff]  ;;  %v7253_v38 = vld [vmem:[%s7139_s9 + $0x90] sm:$0xff] }
  0x2a   : > { %772 = vrot.lane.b32.xlu1 %v703_v7, %s7073_s10  ;;  %768 = vrot.lane.b32.xlu0 %v701_v8, %s7073_s10  ;;  %v716_v36 = vmul.f32 %v7141_v0, %v7241_v34  ;;  %v719_v39 = vmul.f32 %v7141_v0, %v7250_v37  ;;  %v718_v40 = vmul.f32 %v7141_v0, %v7253_v38  ;;  %v7262_v41 = vld [vmem:[%s7139_s9 + $0xa8] sm:$0xff]  ;;  %v7265_v42 = vld [vmem:[%s7139_s9 + $0xa0] sm:$0xff] }
  0x2b   : > { %15243 = vst [vmem:[#allocation5_spill] sm:$0xff] %v7265_v42  ;;  %v721_v43 = vmul.f32 %v7141_v0, %v7262_v41  ;;  %v720_v44 = vmul.f32 %v7141_v0, %v7265_v42  ;;  %v7274_v45 = vld [vmem:[%s7139_s9 + $0xb8] sm:$0xff]  ;;  %v7277_v46 = vld [vmem:[%s7139_s9 + $0xb0] sm:$0xff]  ;;  %v7286_v49 = vld [vmem:[%s7139_s9 + $0xc8] sm:$0xff]  ;;  %v900_v8 = vmul.f32 %v7333_v5, %v7147_v2 }
  0x2c   : > { %15244 = vst [vmem:[#allocation6_spill] sm:$0xff] %v7274_v45  ;;  %15245 = vst [vmem:[#allocation7_spill] sm:$0xff] %v7277_v46  ;;  %v723_v47 = vmul.f32 %v7141_v0, %v7274_v45  ;;  %v722_v48 = vmul.f32 %v7141_v0, %v7277_v46  ;;  %v7289_v50 = vld [vmem:[%s7139_s9 + $0xc0] sm:$0xff]  ;;  %v725_v51 = vmul.f32 %v7141_v0, %v7286_v49  ;;  %v7298_v53 = vld [vmem:[%s7139_s9 + $0xd8] sm:$0xff] }
  0x2d   : > { %15246 = vst [vmem:[#allocation8_spill] sm:$0xff] %v7286_v49  ;;  %15247 = vst [vmem:[#allocation9_spill] sm:$0xff] %v7289_v50  ;;  %v724_v52 = vmul.f32 %v7141_v0, %v7289_v50  ;;  %v7301_v54 = vld [vmem:[%s7139_s9 + $0xd0] sm:$0xff]  ;;  %v727_v55 = vmul.f32 %v7141_v0, %v7298_v53  ;;  %v7310_v57 = vld [vmem:[%s7139_s9 + $0xe8] sm:$0xff] }
  0x2e   : > { %776 = vrot.lane.b32.xlu1 %v705_v11, %s7073_s10  ;;  %774 = vrot.lane.b32.xlu0 %v704_v12, %s7073_s10  ;;  %15248 = vst [vmem:[#allocation10_spill] sm:$0xff] %v7298_v53  ;;  %15249 = vst [vmem:[#allocation11_spill] sm:$0xff] %v7301_v54  ;;  %v726_v56 = vmul.f32 %v7141_v0, %v7301_v54  ;;  %v7313_v58 = vld [vmem:[%s7139_s9 + $0xe0] sm:$0xff]  ;;  %v729_v59 = vmul.f32 %v7141_v0, %v7310_v57  ;;  %v7322_v61 = vld [vmem:[%s7139_s9 + $0xf8] sm:$0xff] }
  0x2f   : > { %15250 = vst [vmem:[#allocation12_spill] sm:$0xff] %v7310_v57  ;;  %15251 = vst [vmem:[#allocation13_spill] sm:$0xff] %v7313_v58  ;;  %v728_v60 = vmul.f32 %v7141_v0, %v7313_v58  ;;  %v7325_v62 = vld [vmem:[%s7139_s9 + $0xf0] sm:$0xff]  ;;  %v731_v63 = vmul.f32 %v7141_v0, %v7322_v61  ;;  %v7336_v7 = vld [vmem:[%s7139_s9 + $0x100] sm:$0x1]  ;;  %v902_v12 = vmul.f32 %v7333_v5, %v7144_v1 }
  0x30   : > { %15252 = vst [vmem:[#allocation14_spill] sm:$0xff] %v7322_v61  ;;  %15253 = vst [vmem:[#allocation15_spill] sm:$0xff] %v7325_v62  ;;  %v730_v4 = vmul.f32 %v7141_v0, %v7325_v62  ;;  %v732_v11 = vmul.f32 %v7141_v0, %v7336_v7  ;;  %v903_v0 = vmul.f32 %v7333_v5, %v7150_v3 }
  0x31   : > { %15254 = vst [vmem:[#allocation16_spill] sm:$0xff] %v7336_v7 }
  0x32   : > { %780 = vrot.lane.b32.xlu1 %v707_v15, %s7073_s10  ;;  %778 = vrot.lane.b32.xlu0 %v706_v16, %s7073_s10  ;;  %v901_v15 = vmul.f32 %v7333_v5, %v7157_v6  ;;  %v904_v16 = vmul.f32 %v7333_v5, %v7169_v10 }
  0x36   : > { %784 = vrot.lane.b32.xlu1 %v709_v19, %s7073_s10  ;;  %782 = vrot.lane.b32.xlu0 %v708_v20, %s7073_s10  ;;  %v906_v19 = vmul.f32 %v7333_v5, %v7181_v14  ;;  %v905_v20 = vmul.f32 %v7333_v5, %v7166_v9 }
  0x3a   : > { %788 = vrot.lane.b32.xlu1 %v711_v23, %s7073_s10  ;;  %786 = vrot.lane.b32.xlu0 %v710_v24, %s7073_s10  ;;  %v908_v23 = vmul.f32 %v7333_v5, %v7193_v18  ;;  %v907_v24 = vmul.f32 %v7333_v5, %v7178_v13 }
  0x3e   : > { %792 = vrot.lane.b32.xlu1 %v713_v27, %s7073_s10  ;;  %790 = vrot.lane.b32.xlu0 %v712_v28, %s7073_s10  ;;  %v910_v27 = vmul.f32 %v7333_v5, %v7205_v22  ;;  %v909_v28 = vmul.f32 %v7333_v5, %v7190_v17 }
  0x42   : > { %796 = vrot.lane.b32.xlu1 %v715_v31, %s7073_s10  ;;  %794 = vrot.lane.b32.xlu0 %v714_v32, %s7073_s10  ;;  %v912_v31 = vmul.f32 %v7333_v5, %v7217_v26  ;;  %v911_v32 = vmul.f32 %v7333_v5, %v7202_v21 }
  0x46   : > { %800 = vrot.lane.b32.xlu1 %v717_v35, %s7073_s10  ;;  %798 = vrot.lane.b32.xlu0 %v716_v36, %s7073_s10  ;;  %v914_v35 = vmul.f32 %v7333_v5, %v7229_v30  ;;  %v913_v36 = vmul.f32 %v7333_v5, %v7214_v25 }
  0x4a   : > { %804 = vrot.lane.b32.xlu1 %v719_v39, %s7073_s10  ;;  %802 = vrot.lane.b32.xlu0 %v718_v40, %s7073_s10  ;;  %v916_v39 = vmul.f32 %v7333_v5, %v7241_v34  ;;  %v915_v40 = vmul.f32 %v7333_v5, %v7226_v29 }
  0x4e   : > { %808 = vrot.lane.b32.xlu1 %v721_v43, %s7073_s10  ;;  %806 = vrot.lane.b32.xlu0 %v720_v44, %s7073_s10  ;;  %v918_v43 = vmul.f32 %v7333_v5, %v7253_v38  ;;  %v917_v44 = vmul.f32 %v7333_v5, %v7238_v33 }
  0x52   : > { %812 = vrot.lane.b32.xlu1 %v723_v47, %s7073_s10  ;;  %810 = vrot.lane.b32.xlu0 %v722_v48, %s7073_s10  ;;  %v920_v47 = vmul.f32 %v7333_v5, %v7265_v42  ;;  %v919_v48 = vmul.f32 %v7333_v5, %v7250_v37 }
  0x56   : > { %816 = vrot.lane.b32.xlu1 %v725_v51, %s7073_s10  ;;  %814 = vrot.lane.b32.xlu0 %v724_v52, %s7073_s10  ;;  %v922_v51 = vmul.f32 %v7333_v5, %v7277_v46  ;;  %v921_v52 = vmul.f32 %v7333_v5, %v7262_v41 }
  0x5a   : > { %820 = vrot.lane.b32.xlu1 %v727_v55, %s7073_s10  ;;  %818 = vrot.lane.b32.xlu0 %v726_v56, %s7073_s10  ;;  %v924_v55 = vmul.f32 %v7333_v5, %v7289_v50  ;;  %v923_v56 = vmul.f32 %v7333_v5, %v7274_v45  ;;  %v7698_v50 = vld [vmem:[%s7139_s9 + $0x1f8] sm:$0xff] }
  0x5e   : > { %824 = vrot.lane.b32.xlu1 %v729_v59, %s7073_s10  ;;  %822 = vrot.lane.b32.xlu0 %v728_v60, %s7073_s10  ;;  %v926_v59 = vmul.f32 %v7333_v5, %v7301_v54  ;;  %v925_v60 = vmul.f32 %v7333_v5, %v7286_v49  ;;  %v7682_v54 = vld [vmem:[%s7139_s9 + $0x1e8] sm:$0xff] }
  0x62   : > { %828 = vrot.lane.b32.xlu1 %v731_v63, %s7073_s10  ;;  %826 = vrot.lane.b32.xlu0 %v730_v4, %s7073_s10 }
  0x66   : > { %966 = vrot.lane.b32.xlu1 %v900_v8, %s7074_s12  ;;  %830 = vrot.lane.b32.xlu0 %v732_v11, %s7073_s10  ;;  %v928_v8 = vmul.f32 %v7333_v5, %v7313_v58  ;;  %v927_v11 = vmul.f32 %v7333_v5, %v7298_v53  ;;  %v7666_v58 = vld [vmem:[%s7139_s9 + $0x1d8] sm:$0xff] }
  0x6a   : > { %970 = vrot.lane.b32.xlu1 %v902_v12, %s7074_s12  ;;  %968 = vrot.lane.b32.xlu0 %v901_v15, %s7074_s12 }
  0x6e   : > { %974 = vrot.lane.b32.xlu1 %v904_v16, %s7074_s12  ;;  %972 = vrot.lane.b32.xlu0 %v903_v0, %s7074_s12  ;;  %v930_v16 = vmul.f32 %v7333_v5, %v7325_v62  ;;  %v929_v0 = vmul.f32 %v7333_v5, %v7310_v57  ;;  %v7650_v62 = vld [vmem:[%s7139_s9 + $0x1c8] sm:$0xff] }
  0x72   : > { %978 = vrot.lane.b32.xlu1 %v906_v19, %s7074_s12  ;;  %976 = vrot.lane.b32.xlu0 %v905_v20, %s7074_s12 }
  0x76   : > { %982 = vrot.lane.b32.xlu1 %v908_v23, %s7074_s12  ;;  %980 = vrot.lane.b32.xlu0 %v907_v24, %s7074_s12  ;;  %v932_v23 = vmul.f32 %v7333_v5, %v7336_v7  ;;  %v931_v24 = vmul.f32 %v7333_v5, %v7322_v61 }
  0x7a   : > { %986 = vrot.lane.b32.xlu1 %v910_v27, %s7074_s12  ;;  %984 = vrot.lane.b32.xlu0 %v909_v28, %s7074_s12  ;;  %v7453_v27 = vld [vmem:[%s7139_s9 + $0x110] sm:$0xff]  ;;  %v7455_v28 = vstv %s6556_s13 }
  0x7e   : > { %990 = vrot.lane.b32.xlu1 %v912_v31, %s7074_s12  ;;  %988 = vrot.lane.b32.xlu0 %v911_v32, %s7074_s12  ;;  %v7458_v31 = vld [vmem:[%s7139_s9 + $0x108] sm:$0xff] }
  0x7f   : > { %v1168_v5 = vmul.f32 %v7458_v31, %v7455_v28 }
  0x82   : > { %994 = vrot.lane.b32.xlu1 %v914_v35, %s7074_s12  ;;  %992 = vrot.lane.b32.xlu0 %v913_v36, %s7074_s12  ;;  %v1169_v36 = vmul.f32 %v7453_v27, %v7455_v28 }
  0x86   : > { %998 = vrot.lane.b32.xlu1 %v916_v39, %s7074_s12  ;;  %996 = vrot.lane.b32.xlu0 %v915_v40, %s7074_s12  ;;  %v7471_v39 = vld [vmem:[%s7139_s9 + $0x120] sm:$0xff]  ;;  %v7474_v40 = vld [vmem:[%s7139_s9 + $0x118] sm:$0xff] }
  0x8a   : > { %1002 = vrot.lane.b32.xlu1 %v918_v43, %s7074_s12  ;;  %1000 = vrot.lane.b32.xlu0 %v917_v44, %s7074_s12 }
  0x8e   : > { %1006 = vrot.lane.b32.xlu1 %v920_v47, %s7074_s12  ;;  %1004 = vrot.lane.b32.xlu0 %v919_v48, %s7074_s12  ;;  %v1171_v47 = vmul.f32 %v7471_v39, %v7455_v28  ;;  %v1170_v48 = vmul.f32 %v7474_v40, %v7455_v28 }
  0x92   : > { %1010 = vrot.lane.b32.xlu1 %v922_v51, %s7074_s12  ;;  %1008 = vrot.lane.b32.xlu0 %v921_v52, %s7074_s12  ;;  %v7487_v51 = vld [vmem:[%s7139_s9 + $0x130] sm:$0xff]  ;;  %v7490_v52 = vld [vmem:[%s7139_s9 + $0x128] sm:$0xff] }
  0x96   : > { %1014 = vrot.lane.b32.xlu1 %v924_v55, %s7074_s12  ;;  %1012 = vrot.lane.b32.xlu0 %v923_v56, %s7074_s12 }
  0x98   : > { %v7422_v63 = vpop.permute.xlu1 %770  ;;  %v7424_v4 = vpop.permute.xlu0 %766 }
  0x99   : > { %15255 = vst [vmem:[#allocation17_spill] sm:$0xff] %v7422_v63  ;;  %15256 = vst [vmem:[#allocation18_spill] sm:$0xff] %v7424_v4  ;;  %v7634_v63 = vld [vmem:[%s7139_s9 + $0x1b8] sm:$0xff] }
  0x9a   : > { %1018 = vrot.lane.b32.xlu1 %v926_v59, %s7074_s12  ;;  %1016 = vrot.lane.b32.xlu0 %v925_v60, %s7074_s12  ;;  %v1173_v59 = vmul.f32 %v7487_v51, %v7455_v28  ;;  %v1172_v60 = vmul.f32 %v7490_v52, %v7455_v28 }
  0x9c   : > { %v7432_v12 = vpop.permute.xlu1 %772  ;;  %v7434_v15 = vpop.permute.xlu0 %768 }
  0x9d   : > { %15257 = vst [vmem:[#allocation19_spill] sm:$0xff] %v7432_v12  ;;  %15258 = vst [vmem:[#allocation20_spill] sm:$0xff] %v7434_v15  ;;  %v7618_v12 = vld [vmem:[%s7139_s9 + $0x1a8] sm:$0xff] }
  0x9e   : > { %1022 = vrot.lane.b32.xlu1 %v928_v8, %s7074_s12  ;;  %1020 = vrot.lane.b32.xlu0 %v927_v11, %s7074_s12  ;;  %v7503_v8 = vld [vmem:[%s7139_s9 + $0x140] sm:$0xff]  ;;  %v7506_v11 = vld [vmem:[%s7139_s9 + $0x138] sm:$0xff] }
  0xa0   : > { %v7442_v19 = vpop.permute.xlu1 %776  ;;  %v7444_v20 = vpop.permute.xlu0 %774 }
  0xa1   : > { %15259 = vst [vmem:[#allocation21_spill] sm:$0xff] %v7442_v19  ;;  %15260 = vst [vmem:[#allocation22_spill] sm:$0xff] %v7444_v20  ;;  %v7602_v19 = vld [vmem:[%s7139_s9 + $0x198] sm:$0xff] }
  0xa2   : > { %1026 = vrot.lane.b32.xlu1 %v930_v16, %s7074_s12  ;;  %1024 = vrot.lane.b32.xlu0 %v929_v0, %s7074_s12 }
  0xa4   : > { %v7460_v32 = vpop.permute.xlu1 %780  ;;  %v7462_v35 = vpop.permute.xlu0 %778 }
  0xa5   : > { %15261 = vst [vmem:[#allocation23_spill] sm:$0xff] %v7460_v32  ;;  %15262 = vst [vmem:[#allocation24_spill] sm:$0xff] %v7462_v35  ;;  %v7586_v32 = vld [vmem:[%s7139_s9 + $0x188] sm:$0xff] }
  0xa6   : > { %1030 = vrot.lane.b32.xlu1 %v932_v23, %s7074_s12  ;;  %1028 = vrot.lane.b32.xlu0 %v931_v24, %s7074_s12  ;;  %v1175_v23 = vmul.f32 %v7503_v8, %v7455_v28  ;;  %v1174_v24 = vmul.f32 %v7506_v11, %v7455_v28 }
  0xa8   : > { %v7476_v43 = vpop.permute.xlu1 %784  ;;  %v7478_v44 = vpop.permute.xlu0 %782 }
  0xa9   : > { %15263 = vst [vmem:[#allocation25_spill] sm:$0xff] %v7476_v43  ;;  %15264 = vst [vmem:[#allocation26_spill] sm:$0xff] %v7478_v44  ;;  %v7570_v43 = vld [vmem:[%s7139_s9 + $0x178] sm:$0xff] }
  0xaa   : > { %1236 = vrot.lane.b32.xlu1 %v1169_v36, %s7073_s10  ;;  %1234 = vrot.lane.b32.xlu0 %v1168_v5, %s7073_s10  ;;  %v7519_v36 = vld [vmem:[%s7139_s9 + $0x150] sm:$0xff]  ;;  %v7522_v5 = vld [vmem:[%s7139_s9 + $0x148] sm:$0xff] }
  0xac   : > { %v7492_v55 = vpop.permute.xlu1 %788  ;;  %v7494_v56 = vpop.permute.xlu0 %786 }
  0xad   : > { %15265 = vst [vmem:[#allocation27_spill] sm:$0xff] %v7492_v55  ;;  %15266 = vst [vmem:[#allocation28_spill] sm:$0xff] %v7494_v56  ;;  %v7554_v55 = vld [vmem:[%s7139_s9 + $0x168] sm:$0xff] }
  0xae   : > { %1240 = vrot.lane.b32.xlu1 %v1171_v47, %s7073_s10  ;;  %1238 = vrot.lane.b32.xlu0 %v1170_v48, %s7073_s10 }
  0xb0   : > { %v7508_v16 = vpop.permute.xlu1 %792  ;;  %v7510_v0 = vpop.permute.xlu0 %790 }
  0xb1   : > { %15267 = vst [vmem:[#allocation29_spill] sm:$0xff] %v7508_v16  ;;  %15268 = vst [vmem:[#allocation30_spill] sm:$0xff] %v7510_v0  ;;  %v7535_v0 = vld [vmem:[%s7139_s9 + $0x160] sm:$0xff]  ;;  %v7538_v16 = vld [vmem:[%s7139_s9 + $0x158] sm:$0xff] }
  0xb2   : > { %1244 = vrot.lane.b32.xlu1 %v1173_v59, %s7073_s10  ;;  %1242 = vrot.lane.b32.xlu0 %v1172_v60, %s7073_s10  ;;  %v1177_v59 = vmul.f32 %v7519_v36, %v7455_v28  ;;  %v1176_v60 = vmul.f32 %v7522_v5, %v7455_v28 }
  0xb4   : > { %v7524_v47 = vpop.permute.xlu1 %796  ;;  %v7526_v48 = vpop.permute.xlu0 %794 }
  0xb5   : > { %15269 = vst [vmem:[#allocation31_spill] sm:$0xff] %v7524_v47  ;;  %15270 = vst [vmem:[#allocation32_spill] sm:$0xff] %v7526_v48  ;;  %v7551_v48 = vld [vmem:[%s7139_s9 + $0x170] sm:$0xff] }
  0xb6   : > { %1248 = vrot.lane.b32.xlu1 %v1175_v23, %s7073_s10  ;;  %1246 = vrot.lane.b32.xlu0 %v1174_v24, %s7073_s10  ;;  %v1179_v23 = vmul.f32 %v7535_v0, %v7455_v28  ;;  %v1178_v24 = vmul.f32 %v7538_v16, %v7455_v28 }
  0xb8   : > { %v7540_v56 = vpop.permute.xlu1 %800  ;;  %v7542_v47 = vpop.permute.xlu0 %798 }
  0xb9   : > { %15271 = vst [vmem:[#allocation33_spill] sm:$0xff] %v7540_v56  ;;  %15272 = vst [vmem:[#allocation34_spill] sm:$0xff] %v7542_v47  ;;  %v7567_v47 = vld [vmem:[%s7139_s9 + $0x180] sm:$0xff] }
  0xba   : > { %1252 = vrot.lane.b32.xlu1 %v1177_v59, %s7073_s10  ;;  %1250 = vrot.lane.b32.xlu0 %v1176_v60, %s7073_s10  ;;  %v1181_v59 = vmul.f32 %v7551_v48, %v7455_v28  ;;  %v1180_v60 = vmul.f32 %v7554_v55, %v7455_v28 }
  0xbc   : > { %v7556_v44 = vpop.permute.xlu1 %804  ;;  %v7558_v56 = vpop.permute.xlu0 %802 }
  0xbd   : > { %15273 = vst [vmem:[#allocation35_spill] sm:$0xff] %v7556_v44  ;;  %15274 = vst [vmem:[#allocation36_spill] sm:$0xff] %v7558_v56  ;;  %v7583_v56 = vld [vmem:[%s7139_s9 + $0x190] sm:$0xff] }
  0xbe   : > { %1256 = vrot.lane.b32.xlu1 %v1179_v23, %s7073_s10  ;;  %1254 = vrot.lane.b32.xlu0 %v1178_v24, %s7073_s10  ;;  %v1183_v23 = vmul.f32 %v7567_v47, %v7455_v28  ;;  %v1182_v24 = vmul.f32 %v7570_v43, %v7455_v28 }
  0xc0   : > { %v7572_v35 = vpop.permute.xlu1 %808  ;;  %v7574_v44 = vpop.permute.xlu0 %806 }
  0xc1   : > { %15275 = vst [vmem:[#allocation37_spill] sm:$0xff] %v7572_v35  ;;  %15276 = vst [vmem:[#allocation38_spill] sm:$0xff] %v7574_v44  ;;  %v7599_v44 = vld [vmem:[%s7139_s9 + $0x1a0] sm:$0xff] }
  0xc2   : > { %1260 = vrot.lane.b32.xlu1 %v1181_v59, %s7073_s10  ;;  %1258 = vrot.lane.b32.xlu0 %v1180_v60, %s7073_s10  ;;  %v1185_v59 = vmul.f32 %v7583_v56, %v7455_v28  ;;  %v1184_v60 = vmul.f32 %v7586_v32, %v7455_v28 }
  0xc4   : > { %v7588_v20 = vpop.permute.xlu1 %812  ;;  %v7590_v35 = vpop.permute.xlu0 %810 }
  0xc5   : > { %15277 = vst [vmem:[#allocation39_spill] sm:$0xff] %v7588_v20  ;;  %15278 = vst [vmem:[#allocation40_spill] sm:$0xff] %v7590_v35  ;;  %v7615_v35 = vld [vmem:[%s7139_s9 + $0x1b0] sm:$0xff] }
  0xc6   : > { %1264 = vrot.lane.b32.xlu1 %v1183_v23, %s7073_s10  ;;  %1262 = vrot.lane.b32.xlu0 %v1182_v24, %s7073_s10  ;;  %v1187_v23 = vmul.f32 %v7599_v44, %v7455_v28  ;;  %v1186_v24 = vmul.f32 %v7602_v19, %v7455_v28 }
  0xc8   : > { %v7604_v15 = vpop.permute.xlu1 %816  ;;  %v7606_v20 = vpop.permute.xlu0 %814 }
  0xc9   : > { %15279 = vst [vmem:[#allocation41_spill] sm:$0xff] %v7604_v15  ;;  %15280 = vst [vmem:[#allocation42_spill] sm:$0xff] %v7606_v20  ;;  %v7631_v20 = vld [vmem:[%s7139_s9 + $0x1c0] sm:$0xff] }
  0xca   : > { %1268 = vrot.lane.b32.xlu1 %v1185_v59, %s7073_s10  ;;  %1266 = vrot.lane.b32.xlu0 %v1184_v60, %s7073_s10  ;;  %v1189_v59 = vmul.f32 %v7615_v35, %v7455_v28  ;;  %v1188_v60 = vmul.f32 %v7618_v12, %v7455_v28 }
  0xcc   : > { %v7620_v4 = vpop.permute.xlu1 %820  ;;  %v7622_v15 = vpop.permute.xlu0 %818 }
  0xcd   : > { %15281 = vst [vmem:[#allocation43_spill] sm:$0xff] %v7620_v4  ;;  %15282 = vst [vmem:[#allocation44_spill] sm:$0xff] %v7622_v15  ;;  %v7647_v15 = vld [vmem:[%s7139_s9 + $0x1d0] sm:$0xff] }
  0xce   : > { %1272 = vrot.lane.b32.xlu1 %v1187_v23, %s7073_s10  ;;  %1270 = vrot.lane.b32.xlu0 %v1186_v24, %s7073_s10  ;;  %v1191_v23 = vmul.f32 %v7631_v20, %v7455_v28  ;;  %v1190_v24 = vmul.f32 %v7634_v63, %v7455_v28 }
  0xd0   : > { %v7636_v7 = vpop.permute.xlu1 %824  ;;  %v7638_v4 = vpop.permute.xlu0 %822 }
  0xd1   : > { %15283 = vst [vmem:[#allocation45_spill] sm:$0xff] %v7636_v7  ;;  %15284 = vst [vmem:[#allocation46_spill] sm:$0xff] %v7638_v4  ;;  %v7663_v4 = vld [vmem:[%s7139_s9 + $0x1e0] sm:$0xff] }
  0xd2   : > { %1276 = vrot.lane.b32.xlu1 %v1189_v59, %s7073_s10  ;;  %1274 = vrot.lane.b32.xlu0 %v1188_v60, %s7073_s10  ;;  %v1193_v59 = vmul.f32 %v7647_v15, %v7455_v28  ;;  %v1192_v60 = vmul.f32 %v7650_v62, %v7455_v28 }
  0xd4   : > { %v7652_v61 = vpop.permute.xlu1 %828  ;;  %v7654_v7 = vpop.permute.xlu0 %826 }
  0xd5   : > { %15285 = vst [vmem:[#allocation47_spill] sm:$0xff] %v7652_v61  ;;  %15286 = vst [vmem:[#allocation48_spill] sm:$0xff] %v7654_v7  ;;  %v7679_v7 = vld [vmem:[%s7139_s9 + $0x1f0] sm:$0xff] }
  0xd6   : > { %1280 = vrot.lane.b32.xlu1 %v1191_v23, %s7073_s10  ;;  %1278 = vrot.lane.b32.xlu0 %v1190_v24, %s7073_s10  ;;  %v1195_v23 = vmul.f32 %v7663_v4, %v7455_v28  ;;  %v1194_v24 = vmul.f32 %v7666_v58, %v7455_v28 }
  0xd8   : > { %v7668_v57 = vpop.permute.xlu1 %966  ;;  %v7670_v61 = vpop.permute.xlu0 %830 }
  0xd9   : > { %15287 = vst [vmem:[#allocation49_spill] sm:$0xff] %v7668_v57  ;;  %15288 = vst [vmem:[#allocation50_spill] sm:$0xff] %v7670_v61  ;;  %v7695_v61 = vld [vmem:[%s7139_s9 + $0x200] sm:$0xff] }
  0xda   : > { %1284 = vrot.lane.b32.xlu1 %v1193_v59, %s7073_s10  ;;  %1282 = vrot.lane.b32.xlu0 %v1192_v60, %s7073_s10  ;;  %v1197_v59 = vmul.f32 %v7679_v7, %v7455_v28  ;;  %v1196_v60 = vmul.f32 %v7682_v54, %v7455_v28 }
  0xdc   : > { %v7684_v57 = vpop.permute.xlu1 %970  ;;  %v7686_v53 = vpop.permute.xlu0 %968 }
  0xdd   : > { %15289 = vst [vmem:[#allocation51_spill] sm:$0xff] %v7684_v57  ;;  %15290 = vst [vmem:[#allocation52_spill] sm:$0xff] %v7686_v53  ;;  %v7710_v53 = vstv %s6557_s14  ;;  %v7713_v57 = vld [vmem:[%s7139_s9 + $0x208] sm:$0x1]  ;;  %s12106_s14 = sld [smem:[#allocation2 + $0x15]] }
  0xde   : > { %1288 = vrot.lane.b32.xlu1 %v1195_v23, %s7073_s10  ;;  %1286 = vrot.lane.b32.xlu0 %v1194_v24, %s7073_s10  ;;  %v1199_v23 = vmul.f32 %v7695_v61, %v7455_v28  ;;  %v1198_v24 = vmul.f32 %v7698_v50, %v7455_v28 }
  0xe0   : > { %v7700_v49 = vpop.permute.xlu1 %974  ;;  %v7702_v46 = vpop.permute.xlu0 %972 }
  0xe1   : > { %15291 = vst [vmem:[#allocation53_spill] sm:$0xff] %v7700_v49  ;;  %15292 = vst [vmem:[#allocation54_spill] sm:$0xff] %v7702_v46 }
  0xe2   : > { %1292 = vrot.lane.b32.xlu1 %v1197_v59, %s7073_s10  ;;  %1290 = vrot.lane.b32.xlu0 %v1196_v60, %s7073_s10  ;;  %v1368_v59 = vmul.f32 %v7458_v31, %v7710_v53  ;;  %v1200_v60 = vmul.f32 %v7713_v57, %v7455_v28  ;;  %v1372_v28 = vmul.f32 %v7490_v52, %v7710_v53 }
  0xe4   : > { %v7715_v45 = vpop.permute.xlu1 %978  ;;  %v7717_v42 = vpop.permute.xlu0 %976 }
  0xe5   : > { %15293 = vst [vmem:[#allocation55_spill] sm:$0xff] %v7715_v45  ;;  %15294 = vst [vmem:[#allocation56_spill] sm:$0xff] %v7717_v42  ;;  %v1370_v45 = vmul.f32 %v7474_v40, %v7710_v53 }
  0xe6   : > { %1296 = vrot.lane.b32.xlu1 %v1199_v23, %s7073_s10  ;;  %1294 = vrot.lane.b32.xlu0 %v1198_v24, %s7073_s10  ;;  %v1369_v23 = vmul.f32 %v7453_v27, %v7710_v53 }
  0xe8   : > { %v7725_v49 = vpop.permute.xlu1 %982  ;;  %v7727_v46 = vpop.permute.xlu0 %980 }
  0xe9   : > { %15295 = vst [vmem:[#allocation57_spill] sm:$0xff] %v7725_v49  ;;  %15296 = vst [vmem:[#allocation58_spill] sm:$0xff] %v7727_v46 }
  0xea   : > { %1434 = vrot.lane.b32.xlu1 %v1368_v59, %s7074_s12  ;;  %1298 = vrot.lane.b32.xlu0 %v1200_v60, %s7073_s10  ;;  %v1371_v59 = vmul.f32 %v7471_v39, %v7710_v53 }
  0xec   : > { %v7735_v24 = vpop.permute.xlu1 %986  ;;  %v7737_v42 = vpop.permute.xlu0 %984 }
  0xed   : > { %15297 = vst [vmem:[#allocation59_spill] sm:$0xff] %v7735_v24  ;;  %15298 = vst [vmem:[#allocation60_spill] sm:$0xff] %v7737_v42  ;;  %v1374_v42 = vmul.f32 %v7506_v11, %v7710_v53 }
  0xee   : > { %1438 = vrot.lane.b32.xlu1 %v1370_v45, %s7074_s12  ;;  %1436 = vrot.lane.b32.xlu0 %v1369_v23, %s7074_s12  ;;  %v1373_v45 = vmul.f32 %v7487_v51, %v7710_v53 }
  0xf0   : > { %v7745_v60 = vpop.permute.xlu1 %990  ;;  %v7747_v46 = vpop.permute.xlu0 %988 }
  0xf1   : > { %15299 = vst [vmem:[#allocation61_spill] sm:$0xff] %v7745_v60  ;;  %15300 = vst [vmem:[#allocation62_spill] sm:$0xff] %v7747_v46  ;;  %v1376_v46 = vmul.f32 %v7522_v5, %v7710_v53 }
  0xf2   : > { %1442 = vrot.lane.b32.xlu1 %v1372_v28, %s7074_s12  ;;  %1440 = vrot.lane.b32.xlu0 %v1371_v59, %s7074_s12  ;;  %v1375_v28 = vmul.f32 %v7503_v8, %v7710_v53 }
  0xf4   : > { %v7755_v23 = vpop.permute.xlu1 %994  ;;  %v7757_v24 = vpop.permute.xlu0 %992 }
  0xf5   : > { %15301 = vst [vmem:[#allocation63_spill] sm:$0xff] %v7755_v23  ;;  %15302 = vst [vmem:[#allocation64_spill] sm:$0xff] %v7757_v24  ;;  %v1378_v24 = vmul.f32 %v7538_v16, %v7710_v53 }
  0xf6   : > { %1446 = vrot.lane.b32.xlu1 %v1374_v42, %s7074_s12  ;;  %1444 = vrot.lane.b32.xlu0 %v1373_v45, %s7074_s12  ;;  %v1377_v42 = vmul.f32 %v7519_v36, %v7710_v53 }
  0xf8   : > { %v7765_v59 = vpop.permute.xlu1 %998  ;;  %v7767_v60 = vpop.permute.xlu0 %996 }
  0xf9   : > { %15303 = vst [vmem:[#allocation65_spill] sm:$0xff] %v7765_v59  ;;  %15304 = vst [vmem:[#allocation66_spill] sm:$0xff] %v7767_v60  ;;  %v1380_v59 = vmul.f32 %v7554_v55, %v7710_v53 }
  0xfa   : > { %1450 = vrot.lane.b32.xlu1 %v1376_v46, %s7074_s12  ;;  %1448 = vrot.lane.b32.xlu0 %v1375_v28, %s7074_s12  ;;  %v1379_v46 = vmul.f32 %v7535_v0, %v7710_v53 }
  0xfc   : > { %v7775_v45 = vpop.permute.xlu1 %1002  ;;  %v7777_v23 = vpop.permute.xlu0 %1000 }
  0xfd   : > { %15305 = vst [vmem:[#allocation67_spill] sm:$0xff] %v7775_v45  ;;  %15306 = vst [vmem:[#allocation68_spill] sm:$0xff] %v7777_v23  ;;  %v1382_v45 = vmul.f32 %v7570_v43, %v7710_v53 }
  0xfe   : > { %1454 = vrot.lane.b32.xlu1 %v1378_v24, %s7074_s12  ;;  %1452 = vrot.lane.b32.xlu0 %v1377_v42, %s7074_s12  ;;  %v1381_v24 = vmul.f32 %v7551_v48, %v7710_v53 }
 0x100   : > { %v7785_v28 = vpop.permute.xlu1 %1006  ;;  %v7787_v60 = vpop.permute.xlu0 %1004 }
 0x101   : > { %15307 = vst [vmem:[#allocation69_spill] sm:$0xff] %v7785_v28  ;;  %15308 = vst [vmem:[#allocation70_spill] sm:$0xff] %v7787_v60  ;;  %v1384_v60 = vmul.f32 %v7586_v32, %v7710_v53 }
 0x102   : > { %1458 = vrot.lane.b32.xlu1 %v1380_v59, %s7074_s12  ;;  %1456 = vrot.lane.b32.xlu0 %v1379_v46, %s7074_s12  ;;  %v1383_v59 = vmul.f32 %v7567_v47, %v7710_v53 }
 0x104   : > { %v7795_v42 = vpop.permute.xlu1 %1010  ;;  %v7797_v23 = vpop.permute.xlu0 %1008 }
 0x105   : > { %15309 = vst [vmem:[#allocation71_spill] sm:$0xff] %v7795_v42  ;;  %15310 = vst [vmem:[#allocation72_spill] sm:$0xff] %v7797_v23  ;;  %v1386_v42 = vmul.f32 %v7602_v19, %v7710_v53 }
 0x106   : > { %1462 = vrot.lane.b32.xlu1 %v1382_v45, %s7074_s12  ;;  %1460 = vrot.lane.b32.xlu0 %v1381_v24, %s7074_s12  ;;  %v1385_v45 = vmul.f32 %v7583_v56, %v7710_v53 }
 0x108   : > { %v7805_v46 = vpop.permute.xlu1 %1014  ;;  %v7807_v28 = vpop.permute.xlu0 %1012 }
 0x109   : > { %15311 = vst [vmem:[#allocation73_spill] sm:$0xff] %v7805_v46  ;;  %15312 = vst [vmem:[#allocation74_spill] sm:$0xff] %v7807_v28  ;;  %v1388_v28 = vmul.f32 %v7618_v12, %v7710_v53 }
 0x10a   : > { %1466 = vrot.lane.b32.xlu1 %v1384_v60, %s7074_s12  ;;  %1464 = vrot.lane.b32.xlu0 %v1383_v59, %s7074_s12  ;;  %v1387_v60 = vmul.f32 %v7599_v44, %v7710_v53 }
 0x10c   : > { %v7815_v24 = vpop.permute.xlu1 %1018  ;;  %v7817_v23 = vpop.permute.xlu0 %1016 }
 0x10d   : > { %15313 = vst [vmem:[#allocation75_spill] sm:$0xff] %v7815_v24  ;;  %15314 = vst [vmem:[#allocation76_spill] sm:$0xff] %v7817_v23  ;;  %v1390_v24 = vmul.f32 %v7634_v63, %v7710_v53 }
 0x10e   : > { %1470 = vrot.lane.b32.xlu1 %v1386_v42, %s7074_s12  ;;  %1468 = vrot.lane.b32.xlu0 %v1385_v45, %s7074_s12  ;;  %v1389_v42 = vmul.f32 %v7615_v35, %v7710_v53 }
 0x110   : > { %v7825_v59 = vpop.permute.xlu1 %1022  ;;  %v7827_v46 = vpop.permute.xlu0 %1020 }
 0x111   : > { %15315 = vst [vmem:[#allocation77_spill] sm:$0xff] %v7825_v59  ;;  %15316 = vst [vmem:[#allocation78_spill] sm:$0xff] %v7827_v46  ;;  %v1392_v46 = vmul.f32 %v7650_v62, %v7710_v53 }
 0x112   : > { %1474 = vrot.lane.b32.xlu1 %v1388_v28, %s7074_s12  ;;  %1472 = vrot.lane.b32.xlu0 %v1387_v60, %s7074_s12  ;;  %v1391_v28 = vmul.f32 %v7631_v20, %v7710_v53 }
 0x114   : > { %v7835_v45 = vpop.permute.xlu1 %1026  ;;  %v7837_v23 = vpop.permute.xlu0 %1024 }
 0x115   : > { %15317 = vst [vmem:[#allocation79_spill] sm:$0xff] %v7835_v45  ;;  %15318 = vst [vmem:[#allocation80_spill] sm:$0xff] %v7837_v23  ;;  %v1394_v45 = vmul.f32 %v7666_v58, %v7710_v53 }
 0x116   : > { %1478 = vrot.lane.b32.xlu1 %v1390_v24, %s7074_s12  ;;  %1476 = vrot.lane.b32.xlu0 %v1389_v42, %s7074_s12  ;;  %v1393_v24 = vmul.f32 %v7647_v15, %v7710_v53 }
 0x118   : > { %v7845_v60 = vpop.permute.xlu1 %1030  ;;  %v7847_v59 = vpop.permute.xlu0 %1028 }
 0x119   : > { %15319 = vst [vmem:[#allocation81_spill] sm:$0xff] %v7845_v60  ;;  %15320 = vst [vmem:[#allocation82_spill] sm:$0xff] %v7847_v59  ;;  %v1396_v60 = vmul.f32 %v7682_v54, %v7710_v53 }
 0x11a   : > { %1482 = vrot.lane.b32.xlu1 %v1392_v46, %s7074_s12  ;;  %1480 = vrot.lane.b32.xlu0 %v1391_v28, %s7074_s12  ;;  %v1395_v46 = vmul.f32 %v7663_v4, %v7710_v53 }
 0x11c   : > { %v7855_v42 = vpop.permute.xlu1 %1236  ;;  %v7857_v23 = vpop.permute.xlu0 %1234 }
 0x11d   : > { %15321 = vst [vmem:[#allocation83_spill] sm:$0xff] %v7855_v42  ;;  %15322 = vst [vmem:[#allocation84_spill] sm:$0xff] %v7857_v23 }
 0x11e   : > { %1486 = vrot.lane.b32.xlu1 %v1394_v45, %s7074_s12  ;;  %1484 = vrot.lane.b32.xlu0 %v1393_v24, %s7074_s12  ;;  %v1398_v45 = vmul.f32 %v7698_v50, %v7710_v53  ;;  %v1397_v24 = vmul.f32 %v7679_v7, %v7710_v53 }
 0x120   : > { %v7865_v28 = vpop.permute.xlu1 %1240  ;;  %v7867_v59 = vpop.permute.xlu0 %1238 }
 0x121   : > { %15323 = vst [vmem:[#allocation85_spill] sm:$0xff] %v7865_v28  ;;  %15324 = vst [vmem:[#allocation86_spill] sm:$0xff] %v7867_v59  ;;  %v1400_v59 = vmul.f32 %v7713_v57, %v7710_v53 }
 0x122   : > { %1490 = vrot.lane.b32.xlu1 %v1396_v60, %s7074_s12  ;;  %1488 = vrot.lane.b32.xlu0 %v1395_v46, %s7074_s12  ;;  %v1399_v60 = vmul.f32 %v7695_v61, %v7710_v53  ;;  %v7885_v46 = vstv %s6560_s15 }
 0x123   : > { %v1641_v53 = vmul.f32 %v7885_v46, %v7150_v3 }
 0x124   : > { %v7875_v23 = vpop.permute.xlu1 %1244  ;;  %v7877_v42 = vpop.permute.xlu0 %1242 }
 0x125   : > { %15325 = vst [vmem:[#allocation87_spill] sm:$0xff] %v7875_v23  ;;  %15326 = vst [vmem:[#allocation88_spill] sm:$0xff] %v7877_v42 }
 0x126   : > { %1494 = vrot.lane.b32.xlu1 %v1398_v45, %s7074_s12  ;;  %1492 = vrot.lane.b32.xlu0 %v1397_v24, %s7074_s12  ;;  %v1639_v45 = vmul.f32 %v7885_v46, %v7157_v6  ;;  %v1638_v24 = vmul.f32 %v7885_v46, %v7147_v2 }
 0x128   : > { %v7887_v28 = vpop.permute.xlu1 %1248  ;;  %v7889_v49 = vpop.permute.xlu0 %1246 }
 0x129   : > { %15327 = vst [vmem:[#allocation89_spill] sm:$0xff] %v7887_v28  ;;  %15328 = vst [vmem:[#allocation90_spill] sm:$0xff] %v7889_v49 }
 0x12a   : > { %1498 = vrot.lane.b32.xlu1 %v1400_v59, %s7074_s12  ;;  %1496 = vrot.lane.b32.xlu0 %v1399_v60, %s7074_s12  ;;  %v1640_v59 = vmul.f32 %v7885_v46, %v7144_v1  ;;  %v1645_v1 = vmul.f32 %v7885_v46, %v7178_v13 }
 0x12c   : > { %v7897_v42 = vpop.permute.xlu1 %1252  ;;  %v7899_v23 = vpop.permute.xlu0 %1250 }
 0x12d   : > { %15329 = vst [vmem:[#allocation91_spill] sm:$0xff] %v7897_v42  ;;  %15330 = vst [vmem:[#allocation92_spill] sm:$0xff] %v7899_v23  ;;  %v1643_v23 = vmul.f32 %v7885_v46, %v7166_v9 }
 0x12e   : > { %1706 = vrot.lane.b32.xlu1 %v1639_v45, %s7073_s10  ;;  %1704 = vrot.lane.b32.xlu0 %v1638_v24, %s7073_s10  ;;  %v1642_v45 = vmul.f32 %v7885_v46, %v7169_v10  ;;  %v1647_v10 = vmul.f32 %v7885_v46, %v7190_v17 }
 0x130   : > { %v7907_v60 = vpop.permute.xlu1 %1256  ;;  %v7909_v6 = vpop.permute.xlu0 %1254 }
 0x131   : > { %15331 = vst [vmem:[#allocation93_spill] sm:$0xff] %v7907_v60  ;;  %15332 = vst [vmem:[#allocation94_spill] sm:$0xff] %v7909_v6 }
 0x132   : > { %1710 = vrot.lane.b32.xlu1 %v1641_v53, %s7073_s10  ;;  %1708 = vrot.lane.b32.xlu0 %v1640_v59, %s7073_s10  ;;  %v1644_v53 = vmul.f32 %v7885_v46, %v7181_v14  ;;  %v1649_v14 = vmul.f32 %v7885_v46, %v7202_v21 }
 0x134   : > { %v7917_v24 = vpop.permute.xlu1 %1260  ;;  %v7919_v3 = vpop.permute.xlu0 %1258 }
 0x135   : > { %15333 = vst [vmem:[#allocation95_spill] sm:$0xff] %v7917_v24  ;;  %15334 = vst [vmem:[#allocation96_spill] sm:$0xff] %v7919_v3 }
 0x136   : > { %1714 = vrot.lane.b32.xlu1 %v1643_v23, %s7073_s10  ;;  %1712 = vrot.lane.b32.xlu0 %v1642_v45, %s7073_s10  ;;  %v1646_v23 = vmul.f32 %v7885_v46, %v7193_v18  ;;  %v1651_v18 = vmul.f32 %v7885_v46, %v7214_v25 }
 0x138   : > { %v7927_v59 = vpop.permute.xlu1 %1264  ;;  %v7929_v9 = vpop.permute.xlu0 %1262 }
 0x139   : > { %15335 = vst [vmem:[#allocation97_spill] sm:$0xff] %v7927_v59  ;;  %15336 = vst [vmem:[#allocation98_spill] sm:$0xff] %v7929_v9 }
 0x13a   : > { %1718 = vrot.lane.b32.xlu1 %v1645_v1, %s7073_s10  ;;  %1716 = vrot.lane.b32.xlu0 %v1644_v53, %s7073_s10  ;;  %v1648_v1 = vmul.f32 %v7885_v46, %v7205_v22  ;;  %v1653_v22 = vmul.f32 %v7885_v46, %v7226_v29 }
 0x13c   : > { %v7937_v45 = vpop.permute.xlu1 %1268  ;;  %v7939_v13 = vpop.permute.xlu0 %1266 }
 0x13d   : > { %15337 = vst [vmem:[#allocation99_spill] sm:$0xff] %v7937_v45  ;;  %15338 = vst [vmem:[#allocation100_spill] sm:$0xff] %v7939_v13 }
 0x13e   : > { %1722 = vrot.lane.b32.xlu1 %v1647_v10, %s7073_s10  ;;  %1720 = vrot.lane.b32.xlu0 %v1646_v23, %s7073_s10  ;;  %v1650_v10 = vmul.f32 %v7885_v46, %v7217_v26  ;;  %v1655_v26 = vmul.f32 %v7885_v46, %v7238_v33 }
 0x140   : > { %v7947_v53 = vpop.permute.xlu1 %1272  ;;  %v7949_v17 = vpop.permute.xlu0 %1270 }
 0x141   : > { %15339 = vst [vmem:[#allocation101_spill] sm:$0xff] %v7947_v53  ;;  %15340 = vst [vmem:[#allocation102_spill] sm:$0xff] %v7949_v17  ;;  %v8087_v17 = vld [vmem:[%s7139_s9 + $0x18] sm:$0xff] }
 0x142   : > { %1726 = vrot.lane.b32.xlu1 %v1649_v14, %s7073_s10  ;;  %1724 = vrot.lane.b32.xlu0 %v1648_v1, %s7073_s10  ;;  %v1652_v14 = vmul.f32 %v7885_v46, %v7229_v30  ;;  %v1657_v30 = vmul.f32 %v7885_v46, %v7250_v37 }
 0x144   : > { %v7957_v23 = vpop.permute.xlu1 %1276  ;;  %v7959_v21 = vpop.permute.xlu0 %1274 }
 0x145   : > { %15341 = vst [vmem:[#allocation103_spill] sm:$0xff] %v7957_v23  ;;  %15342 = vst [vmem:[#allocation104_spill] sm:$0xff] %v7959_v21  ;;  %v8066_v23 = vld [vmem:[%s7139_s9 + $0x10] sm:$0xff] }
 0x146   : > { %1730 = vrot.lane.b32.xlu1 %v1651_v18, %s7073_s10  ;;  %1728 = vrot.lane.b32.xlu0 %v1650_v10, %s7073_s10  ;;  %v1654_v18 = vmul.f32 %v7885_v46, %v7241_v34  ;;  %v1659_v34 = vmul.f32 %v7885_v46, %v7262_v41 }
 0x148   : > { %v7967_v1 = vpop.permute.xlu1 %1280  ;;  %v7969_v25 = vpop.permute.xlu0 %1278 }
 0x149   : > { %15343 = vst [vmem:[#allocation105_spill] sm:$0xff] %v7967_v1  ;;  %15344 = vst [vmem:[#allocation106_spill] sm:$0xff] %v7969_v25 }
 0x14a   : > { %1734 = vrot.lane.b32.xlu1 %v1653_v22, %s7073_s10  ;;  %1732 = vrot.lane.b32.xlu0 %v1652_v14, %s7073_s10  ;;  %v1656_v22 = vmul.f32 %v7885_v46, %v7253_v38  ;;  %v15352_v38 = vld [vmem:[#allocation6_spill] sm:$0xff] }
 0x14c   : > { %v7977_v10 = vpop.permute.xlu1 %1284  ;;  %v7979_v29 = vpop.permute.xlu0 %1282 }
 0x14d   : > { %15345 = vst [vmem:[#allocation107_spill] sm:$0xff] %v7977_v10  ;;  %15346 = vst [vmem:[#allocation108_spill] sm:$0xff] %v7979_v29 }
 0x14e   : > { %1738 = vrot.lane.b32.xlu1 %v1655_v26, %s7073_s10  ;;  %1736 = vrot.lane.b32.xlu0 %v1654_v18, %s7073_s10  ;;  %v15349_v26 = vld [vmem:[#allocation5_spill] sm:$0xff] }
 0x14f   : > { %v1658_v18 = vmul.f32 %v7885_v46, %v15349_v26  ;;  %v15356_v26 = vld [vmem:[#allocation8_spill] sm:$0xff] }
 0x150   : > { %v7987_v14 = vpop.permute.xlu1 %1288  ;;  %v7989_v33 = vpop.permute.xlu0 %1286 }
 0x151   : > { %15347 = vst [vmem:[#allocation109_spill] sm:$0xff] %v7987_v14  ;;  %15348 = vst [vmem:[#allocation110_spill] sm:$0xff] %v7989_v33  ;;  %v1661_v33 = vmul.f32 %v7885_v46, %v15352_v38 }
 0x152   : > { %1742 = vrot.lane.b32.xlu1 %v1657_v30, %s7073_s10  ;;  %1740 = vrot.lane.b32.xlu0 %v1656_v22, %s7073_s10  ;;  %v15353_v30 = vld [vmem:[#allocation7_spill] sm:$0xff] }
 0x153   : > { %v1660_v22 = vmul.f32 %v7885_v46, %v15353_v30  ;;  %v15360_v30 = vld [vmem:[#allocation10_spill] sm:$0xff] }
 0x154   : > { %v7997_v29 = vpop.permute.xlu1 %1292  ;;  %v7999_v37 = vpop.permute.xlu0 %1290 }
 0x155   : > { %15350 = vst [vmem:[#allocation5_spill] sm:$0xff] %v7997_v29  ;;  %15351 = vst [vmem:[#allocation111_spill] sm:$0xff] %v7999_v37  ;;  %v1663_v37 = vmul.f32 %v7885_v46, %v15356_v26 }
 0x156   : > { %1746 = vrot.lane.b32.xlu1 %v1659_v34, %s7073_s10  ;;  %1744 = vrot.lane.b32.xlu0 %v1658_v18, %s7073_s10  ;;  %v15357_v34 = vld [vmem:[#allocation9_spill] sm:$0xff] }
 0x157   : > { %v1662_v18 = vmul.f32 %v7885_v46, %v15357_v34  ;;  %v15364_v34 = vld [vmem:[#allocation12_spill] sm:$0xff] }
 0x158   : > { %v8007_v14 = vpop.permute.xlu1 %1296  ;;  %v8009_v41 = vpop.permute.xlu0 %1294 }
 0x159   : > { %15354 = vst [vmem:[#allocation6_spill] sm:$0xff] %v8007_v14  ;;  %15355 = vst [vmem:[#allocation7_spill] sm:$0xff] %v8009_v41  ;;  %v1665_v14 = vmul.f32 %v7885_v46, %v15360_v30 }
 0x15a   : > { %1750 = vrot.lane.b32.xlu1 %v1661_v33, %s7073_s10  ;;  %1748 = vrot.lane.b32.xlu0 %v1660_v22, %s7073_s10  ;;  %v15361_v33 = vld [vmem:[#allocation11_spill] sm:$0xff] }
 0x15b   : > { %v1664_v22 = vmul.f32 %v7885_v46, %v15361_v33  ;;  %v15368_v33 = vld [vmem:[#allocation14_spill] sm:$0xff] }
 0x15c   : > { %v8017_v29 = vpop.permute.xlu1 %1434  ;;  %v8019_v38 = vpop.permute.xlu0 %1298 }
 0x15d   : > { %15358 = vst [vmem:[#allocation8_spill] sm:$0xff] %v8017_v29  ;;  %15359 = vst [vmem:[#allocation9_spill] sm:$0xff] %v8019_v38  ;;  %v15365_v38 = vld [vmem:[#allocation13_spill] sm:$0xff] }
 0x15e   : > { %1754 = vrot.lane.b32.xlu1 %v1663_v37, %s7073_s10  ;;  %1752 = vrot.lane.b32.xlu0 %v1662_v18, %s7073_s10  ;;  %v1667_v37 = vmul.f32 %v7885_v46, %v15364_v34  ;;  %v1666_v18 = vmul.f32 %v7885_v46, %v15365_v38  ;;  %v8047_v34 = vstv %s6561_s16 }
 0x15f   : > { %v1841_v53 = vmul.f32 %v8087_v17, %v8047_v34 }
 0x160   : > { %v8027_v41 = vpop.permute.xlu1 %1438  ;;  %v8029_v26 = vpop.permute.xlu0 %1436 }
 0x161   : > { %15362 = vst [vmem:[#allocation10_spill] sm:$0xff] %v8027_v41  ;;  %15363 = vst [vmem:[#allocation11_spill] sm:$0xff] %v8029_v26 }
 0x162   : > { %1758 = vrot.lane.b32.xlu1 %v1665_v14, %s7073_s10  ;;  %1756 = vrot.lane.b32.xlu0 %v1664_v22, %s7073_s10  ;;  %v1669_v14 = vmul.f32 %v7885_v46, %v15368_v33  ;;  %v15369_v22 = vld [vmem:[#allocation15_spill] sm:$0xff] }
 0x163   : > { %v1668_v25 = vmul.f32 %v7885_v46, %v15369_v22 }
 0x164   : > { %v8037_v10 = vpop.permute.xlu1 %1442  ;;  %v8039_v30 = vpop.permute.xlu0 %1440 }
 0x165   : > { %15366 = vst [vmem:[#allocation12_spill] sm:$0xff] %v8037_v10  ;;  %15367 = vst [vmem:[#allocation13_spill] sm:$0xff] %v8039_v30 }
 0x166   : > { %1762 = vrot.lane.b32.xlu1 %v1667_v37, %s7073_s10  ;;  %1760 = vrot.lane.b32.xlu0 %v1666_v18, %s7073_s10  ;;  %v1838_v37 = vmul.f32 %v8047_v34, %v7147_v2  ;;  %v15372_v18 = vld [vmem:[#allocation16_spill] sm:$0xff] }
 0x167   : > { %v1670_v33 = vmul.f32 %v7885_v46, %v15372_v18 }
 0x168   : > { %v8049_v1 = vpop.permute.xlu1 %1446  ;;  %v8051_v38 = vpop.permute.xlu0 %1444 }
 0x169   : > { %15370 = vst [vmem:[#allocation14_spill] sm:$0xff] %v8049_v1  ;;  %15371 = vst [vmem:[#allocation15_spill] sm:$0xff] %v8051_v38 }
 0x16a   : > { %1766 = vrot.lane.b32.xlu1 %v1669_v14, %s7073_s10  ;;  %1764 = vrot.lane.b32.xlu0 %v1668_v25, %s7073_s10  ;;  %v1840_v25 = vmul.f32 %v8066_v23, %v8047_v34  ;;  %v8071_v14 = vld [vmem:[%s7139_s9 + $0x8] sm:$0xff] }
 0x16b   : > { %v1839_v2 = vmul.f32 %v8071_v14, %v8047_v34 }
 0x16c   : > { %v8059_v21 = vpop.permute.xlu1 %1450  ;;  %v8061_v22 = vpop.permute.xlu0 %1448 }
 0x16d   : > { %15373 = vst [vmem:[#allocation16_spill] sm:$0xff] %v8059_v21  ;;  %15374 = vst [vmem:[#allocation112_spill] sm:$0xff] %v8061_v22 }
 0x16e   : > { %1904 = vrot.lane.b32.xlu1 %v1838_v37, %s7074_s12  ;;  %1768 = vrot.lane.b32.xlu0 %v1670_v33, %s7073_s10  ;;  %v8082_v37 = vld [vmem:[%s7139_s9 + $0x20] sm:$0xff] }
 0x16f   : > { %v1842_v33 = vmul.f32 %v8082_v37, %v8047_v34 }
 0x170   : > { %v8075_v46 = vpop.permute.xlu1 %1454  ;;  %v8077_v18 = vpop.permute.xlu0 %1452 }
 0x171   : > { %15375 = vst [vmem:[#allocation113_spill] sm:$0xff] %v8075_v46  ;;  %15376 = vst [vmem:[#allocation114_spill] sm:$0xff] %v8077_v18  ;;  %v8103_v18 = vld [vmem:[%s7139_s9 + $0x28] sm:$0xff] }
 0x172   : > { %1908 = vrot.lane.b32.xlu1 %v1840_v25, %s7074_s12  ;;  %1906 = vrot.lane.b32.xlu0 %v1839_v2, %s7074_s12  ;;  %v8098_v25 = vld [vmem:[%s7139_s9 + $0x30] sm:$0xff]  ;;  %v1843_v22 = vmul.f32 %v8103_v18, %v8047_v34 }
 0x173   : > { %v1844_v2 = vmul.f32 %v8098_v25, %v8047_v34 }
 0x174   : > { %v8091_v21 = vpop.permute.xlu1 %1458  ;;  %v8093_v46 = vpop.permute.xlu0 %1456 }
 0x175   : > { %15377 = vst [vmem:[#allocation115_spill] sm:$0xff] %v8091_v21  ;;  %15378 = vst [vmem:[#allocation116_spill] sm:$0xff] %v8093_v46  ;;  %v8119_v46 = vld [vmem:[%s7139_s9 + $0x38] sm:$0xff] }
 0x176   : > { %1912 = vrot.lane.b32.xlu1 %v1842_v33, %s7074_s12  ;;  %1910 = vrot.lane.b32.xlu0 %v1841_v53, %s7074_s12  ;;  %v8114_v53 = vld [vmem:[%s7139_s9 + $0x40] sm:$0xff]  ;;  %v1845_v1 = vmul.f32 %v8119_v46, %v8047_v34 }
 0x177   : > { %v1846_v33 = vmul.f32 %v8114_v53, %v8047_v34 }
 0x178   : > { %v8107_v13 = vpop.permute.xlu1 %1462  ;;  %v8109_v21 = vpop.permute.xlu0 %1460 }
 0x179   : > { %15379 = vst [vmem:[#allocation117_spill] sm:$0xff] %v8107_v13  ;;  %15380 = vst [vmem:[#allocation118_spill] sm:$0xff] %v8109_v21  ;;  %v8135_v21 = vld [vmem:[%s7139_s9 + $0x48] sm:$0xff] }
 0x17a   : > { %1916 = vrot.lane.b32.xlu1 %v1844_v2, %s7074_s12  ;;  %1914 = vrot.lane.b32.xlu0 %v1843_v22, %s7074_s12  ;;  %v8130_v22 = vld [vmem:[%s7139_s9 + $0x50] sm:$0xff]  ;;  %v1847_v38 = vmul.f32 %v8135_v21, %v8047_v34 }
 0x17b   : > { %v1848_v2 = vmul.f32 %v8130_v22, %v8047_v34 }
 0x17c   : > { %v8123_v45 = vpop.permute.xlu1 %1466  ;;  %v8125_v13 = vpop.permute.xlu0 %1464 }
 0x17d   : > { %15381 = vst [vmem:[#allocation119_spill] sm:$0xff] %v8123_v45  ;;  %15382 = vst [vmem:[#allocation120_spill] sm:$0xff] %v8125_v13  ;;  %v8151_v13 = vld [vmem:[%s7139_s9 + $0x58] sm:$0xff] }
 0x17e   : > { %1920 = vrot.lane.b32.xlu1 %v1846_v33, %s7074_s12  ;;  %1918 = vrot.lane.b32.xlu0 %v1845_v1, %s7074_s12  ;;  %v8146_v1 = vld [vmem:[%s7139_s9 + $0x60] sm:$0xff]  ;;  %v1849_v9 = vmul.f32 %v8151_v13, %v8047_v34 }
 0x17f   : > { %v1850_v33 = vmul.f32 %v8146_v1, %v8047_v34 }
 0x180   : > { %v8139_v10 = vpop.permute.xlu1 %1470  ;;  %v8141_v45 = vpop.permute.xlu0 %1468 }
 0x181   : > { %15383 = vst [vmem:[#allocation121_spill] sm:$0xff] %v8139_v10  ;;  %15384 = vst [vmem:[#allocation122_spill] sm:$0xff] %v8141_v45  ;;  %v8167_v45 = vld [vmem:[%s7139_s9 + $0x68] sm:$0xff] }
 0x182   : > { %1924 = vrot.lane.b32.xlu1 %v1848_v2, %s7074_s12  ;;  %1922 = vrot.lane.b32.xlu0 %v1847_v38, %s7074_s12  ;;  %v8162_v38 = vld [vmem:[%s7139_s9 + $0x70] sm:$0xff]  ;;  %v1851_v30 = vmul.f32 %v8167_v45, %v8047_v34 }
 0x183   : > { %v1852_v2 = vmul.f32 %v8162_v38, %v8047_v34 }
 0x184   : > { %v8155_v59 = vpop.permute.xlu1 %1474  ;;  %v8157_v10 = vpop.permute.xlu0 %1472 }
 0x185   : > { %15385 = vst [vmem:[#allocation123_spill] sm:$0xff] %v8155_v59  ;;  %15386 = vst [vmem:[#allocation124_spill] sm:$0xff] %v8157_v10  ;;  %v8183_v10 = vld [vmem:[%s7139_s9 + $0x78] sm:$0xff] }
 0x186   : > { %1928 = vrot.lane.b32.xlu1 %v1850_v33, %s7074_s12  ;;  %1926 = vrot.lane.b32.xlu0 %v1849_v9, %s7074_s12  ;;  %v8178_v9 = vld [vmem:[%s7139_s9 + $0x80] sm:$0xff]  ;;  %v1853_v24 = vmul.f32 %v8183_v10, %v8047_v34 }
 0x187   : > { %v1854_v33 = vmul.f32 %v8178_v9, %v8047_v34 }
 0x188   : > { %v8171_v3 = vpop.permute.xlu1 %1478  ;;  %v8173_v59 = vpop.permute.xlu0 %1476 }
 0x189   : > { %15387 = vst [vmem:[#allocation125_spill] sm:$0xff] %v8171_v3  ;;  %15388 = vst [vmem:[#allocation126_spill] sm:$0xff] %v8173_v59  ;;  %v8199_v59 = vld [vmem:[%s7139_s9 + $0x88] sm:$0xff] }
 0x18a   : > { %1932 = vrot.lane.b32.xlu1 %v1852_v2, %s7074_s12  ;;  %1930 = vrot.lane.b32.xlu0 %v1851_v30, %s7074_s12  ;;  %v8194_v30 = vld [vmem:[%s7139_s9 + $0x90] sm:$0xff]  ;;  %v1855_v6 = vmul.f32 %v8199_v59, %v8047_v34 }
 0x18b   : > { %v1856_v2 = vmul.f32 %v8194_v30, %v8047_v34 }
 0x18c   : > { %v8187_v41 = vpop.permute.xlu1 %1482  ;;  %v8189_v3 = vpop.permute.xlu0 %1480 }
 0x18d   : > { %15389 = vst [vmem:[#allocation127_spill] sm:$0xff] %v8187_v41  ;;  %15390 = vst [vmem:[#allocation128_spill] sm:$0xff] %v8189_v3  ;;  %v8215_v3 = vld [vmem:[%s7139_s9 + $0x98] sm:$0xff] }
 0x18e   : > { %1936 = vrot.lane.b32.xlu1 %v1854_v33, %s7074_s12  ;;  %1934 = vrot.lane.b32.xlu0 %v1853_v24, %s7074_s12  ;;  %v8210_v24 = vld [vmem:[%s7139_s9 + $0xa0] sm:$0xff]  ;;  %v1857_v29 = vmul.f32 %v8215_v3, %v8047_v34 }
 0x18f   : > { %15393 = vst [vmem:[#allocation131_spill] sm:$0xff] %v8210_v24  ;;  %v1858_v33 = vmul.f32 %v8210_v24, %v8047_v34 }
 0x190   : > { %v8203_v60 = vpop.permute.xlu1 %1486  ;;  %v8205_v41 = vpop.permute.xlu0 %1484 }
 0x191   : > { %15391 = vst [vmem:[#allocation129_spill] sm:$0xff] %v8203_v60  ;;  %15392 = vst [vmem:[#allocation130_spill] sm:$0xff] %v8205_v41  ;;  %v8231_v41 = vld [vmem:[%s7139_s9 + $0xa8] sm:$0xff] }
 0x192   : > { %1940 = vrot.lane.b32.xlu1 %v1856_v2, %s7074_s12  ;;  %1938 = vrot.lane.b32.xlu0 %v1855_v6, %s7074_s12  ;;  %v8226_v6 = vld [vmem:[%s7139_s9 + $0xb0] sm:$0xff]  ;;  %v1859_v26 = vmul.f32 %v8231_v41, %v8047_v34 }
 0x193   : > { %15396 = vst [vmem:[#allocation134_spill] sm:$0xff] %v8226_v6  ;;  %v1860_v2 = vmul.f32 %v8226_v6, %v8047_v34 }
 0x194   : > { %v8219_v42 = vpop.permute.xlu1 %1490  ;;  %v8221_v60 = vpop.permute.xlu0 %1488 }
 0x195   : > { %15394 = vst [vmem:[#allocation132_spill] sm:$0xff] %v8219_v42  ;;  %15395 = vst [vmem:[#allocation133_spill] sm:$0xff] %v8221_v60  ;;  %v8247_v60 = vld [vmem:[%s7139_s9 + $0xb8] sm:$0xff] }
 0x196   : > { %1944 = vrot.lane.b32.xlu1 %v1858_v33, %s7074_s12  ;;  %1942 = vrot.lane.b32.xlu0 %v1857_v29, %s7074_s12  ;;  %v8242_v29 = vld [vmem:[%s7139_s9 + $0xc0] sm:$0xff]  ;;  %15400 = vst [vmem:[#allocation138_spill] sm:$0xff] %v8247_v60  ;;  %v1861_v28 = vmul.f32 %v8247_v60, %v8047_v34 }
 0x197   : > { %15399 = vst [vmem:[#allocation137_spill] sm:$0xff] %v8242_v29  ;;  %v1862_v33 = vmul.f32 %v8242_v29, %v8047_v34 }
 0x198   : > { %v8235_v49 = vpop.permute.xlu1 %1494  ;;  %v8237_v42 = vpop.permute.xlu0 %1492 }
 0x199   : > { %15397 = vst [vmem:[#allocation135_spill] sm:$0xff] %v8235_v49  ;;  %15398 = vst [vmem:[#allocation136_spill] sm:$0xff] %v8237_v42  ;;  %v8263_v42 = vld [vmem:[%s7139_s9 + $0xc8] sm:$0xff] }
 0x19a   : > { %1948 = vrot.lane.b32.xlu1 %v1860_v2, %s7074_s12  ;;  %1946 = vrot.lane.b32.xlu0 %v1859_v26, %s7074_s12  ;;  %v8258_v26 = vld [vmem:[%s7139_s9 + $0xd0] sm:$0xff]  ;;  %15404 = vst [vmem:[#allocation142_spill] sm:$0xff] %v8263_v42  ;;  %v1863_v29 = vmul.f32 %v8263_v42, %v8047_v34 }
 0x19b   : > { %15403 = vst [vmem:[#allocation141_spill] sm:$0xff] %v8258_v26  ;;  %v1864_v2 = vmul.f32 %v8258_v26, %v8047_v34 }
 0x19c   : > { %v8251_v6 = vpop.permute.xlu1 %1498  ;;  %v8253_v49 = vpop.permute.xlu0 %1496 }
 0x19d   : > { %15401 = vst [vmem:[#allocation139_spill] sm:$0xff] %v8251_v6  ;;  %15402 = vst [vmem:[#allocation140_spill] sm:$0xff] %v8253_v49  ;;  %v8279_v49 = vld [vmem:[%s7139_s9 + $0xd8] sm:$0xff] }
 0x19e   : > { %1952 = vrot.lane.b32.xlu1 %v1862_v33, %s7074_s12  ;;  %1950 = vrot.lane.b32.xlu0 %v1861_v28, %s7074_s12  ;;  %v8274_v28 = vld [vmem:[%s7139_s9 + $0xe0] sm:$0xff]  ;;  %15408 = vst [vmem:[#allocation146_spill] sm:$0xff] %v8279_v49  ;;  %v1865_v26 = vmul.f32 %v8279_v49, %v8047_v34 }
 0x19f   : > { %15407 = vst [vmem:[#allocation145_spill] sm:$0xff] %v8274_v28  ;;  %v1866_v33 = vmul.f32 %v8274_v28, %v8047_v34  ;;  %v8295_v28 = vld [vmem:[%s7139_s9 + $0xe8] sm:$0xff] }
 0x1a0   : > { %v8267_v60 = vpop.permute.xlu1 %1706  ;;  %v8269_v6 = vpop.permute.xlu0 %1704  ;;  %15412 = vst [vmem:[#allocation150_spill] sm:$0xff] %v8295_v28  ;;  %v1867_v49 = vmul.f32 %v8295_v28, %v8047_v34 }
 0x1a1   : > { %15405 = vst [vmem:[#allocation143_spill] sm:$0xff] %v8267_v60  ;;  %15406 = vst [vmem:[#allocation144_spill] sm:$0xff] %v8269_v6 }
 0x1a2   : > { %1956 = vrot.lane.b32.xlu1 %v1864_v2, %s7074_s12  ;;  %1954 = vrot.lane.b32.xlu0 %v1863_v29, %s7074_s12  ;;  %v8290_v29 = vld [vmem:[%s7139_s9 + $0xf0] sm:$0xff] }
 0x1a3   : > { %15411 = vst [vmem:[#allocation149_spill] sm:$0xff] %v8290_v29  ;;  %v1868_v2 = vmul.f32 %v8290_v29, %v8047_v34  ;;  %v8315_v29 = vstv %s6563_s17 }
 0x1a4   : > { %v8283_v60 = vpop.permute.xlu1 %1710  ;;  %v8285_v6 = vpop.permute.xlu0 %1708 }
 0x1a5   : > { %15409 = vst [vmem:[#allocation147_spill] sm:$0xff] %v8283_v60  ;;  %15410 = vst [vmem:[#allocation148_spill] sm:$0xff] %v8285_v6  ;;  %v8311_v60 = vld [vmem:[%s7139_s9 + $0xf8] sm:$0xff] }
 0x1a6   : > { %1960 = vrot.lane.b32.xlu1 %v1866_v33, %s7074_s12  ;;  %1958 = vrot.lane.b32.xlu0 %v1865_v26, %s7074_s12  ;;  %v8306_v33 = vld [vmem:[%s7139_s9 + $0x100] sm:$0x1]  ;;  %v1869_v6 = vmul.f32 %v8311_v60, %v8047_v34 }
 0x1a7   : > { %15415 = vst [vmem:[#allocation153_spill] sm:$0xff] %v8306_v33  ;;  %v1870_v26 = vmul.f32 %v8306_v33, %v8047_v34  ;;  %v2109_v34 = vmul.f32 %v7471_v39, %v8315_v29 }
 0x1a8   : > { %v8299_v42 = vpop.permute.xlu1 %1714  ;;  %v8301_v24 = vpop.permute.xlu0 %1712 }
 0x1a9   : > { %15413 = vst [vmem:[#allocation151_spill] sm:$0xff] %v8299_v42  ;;  %15414 = vst [vmem:[#allocation152_spill] sm:$0xff] %v8301_v24 }
 0x1aa   : > { %1964 = vrot.lane.b32.xlu1 %v1868_v2, %s7074_s12  ;;  %1962 = vrot.lane.b32.xlu0 %v1867_v49, %s7074_s12  ;;  %v2107_v49 = vmul.f32 %v7453_v27, %v8315_v29  ;;  %v2106_v2 = vmul.f32 %v7458_v31, %v8315_v29  ;;  %v2111_v31 = vmul.f32 %v7487_v51, %v8315_v29 }
 0x1ac   : > { %v8317_v28 = vpop.permute.xlu1 %1718  ;;  %v8319_v42 = vpop.permute.xlu0 %1716 }
 0x1ad   : > { %15416 = vst [vmem:[#allocation154_spill] sm:$0xff] %v8317_v28  ;;  %15417 = vst [vmem:[#allocation155_spill] sm:$0xff] %v8319_v42 }
 0x1ae   : > { %1968 = vrot.lane.b32.xlu1 %v1870_v26, %s7074_s12  ;;  %1966 = vrot.lane.b32.xlu0 %v1869_v6, %s7074_s12  ;;  %v2108_v6 = vmul.f32 %v7474_v40, %v8315_v29  ;;  %v2113_v40 = vmul.f32 %v7503_v8, %v8315_v29 }
 0x1b0   : > { %v8327_v24 = vpop.permute.xlu1 %1722  ;;  %v8329_v33 = vpop.permute.xlu0 %1720 }
 0x1b1   : > { %15418 = vst [vmem:[#allocation156_spill] sm:$0xff] %v8327_v24  ;;  %15419 = vst [vmem:[#allocation157_spill] sm:$0xff] %v8329_v33 }
 0x1b2   : > { %2174 = vrot.lane.b32.xlu1 %v2107_v49, %s7073_s10  ;;  %2172 = vrot.lane.b32.xlu0 %v2106_v2, %s7073_s10  ;;  %v2110_v49 = vmul.f32 %v7490_v52, %v8315_v29  ;;  %v2115_v52 = vmul.f32 %v7519_v36, %v8315_v29 }
 0x1b4   : > { %v8337_v26 = vpop.permute.xlu1 %1726  ;;  %v8339_v27 = vpop.permute.xlu0 %1724 }
 0x1b5   : > { %15420 = vst [vmem:[#allocation158_spill] sm:$0xff] %v8337_v26  ;;  %15421 = vst [vmem:[#allocation159_spill] sm:$0xff] %v8339_v27 }
 0x1b6   : > { %2178 = vrot.lane.b32.xlu1 %v2109_v34, %s7073_s10  ;;  %2176 = vrot.lane.b32.xlu0 %v2108_v6, %s7073_s10  ;;  %v2112_v34 = vmul.f32 %v7506_v11, %v8315_v29  ;;  %v2117_v11 = vmul.f32 %v7535_v0, %v8315_v29 }
 0x1b8   : > { %v8347_v2 = vpop.permute.xlu1 %1730  ;;  %v8349_v39 = vpop.permute.xlu0 %1728 }
 0x1b9   : > { %15422 = vst [vmem:[#allocation160_spill] sm:$0xff] %v8347_v2  ;;  %15423 = vst [vmem:[#allocation161_spill] sm:$0xff] %v8349_v39 }
 0x1ba   : > { %2182 = vrot.lane.b32.xlu1 %v2111_v31, %s7073_s10  ;;  %2180 = vrot.lane.b32.xlu0 %v2110_v49, %s7073_s10  ;;  %v2114_v31 = vmul.f32 %v7522_v5, %v8315_v29  ;;  %v2119_v5 = vmul.f32 %v7551_v48, %v8315_v29 }
 0x1bc   : > { %v8357_v6 = vpop.permute.xlu1 %1734  ;;  %v8359_v51 = vpop.permute.xlu0 %1732 }
 0x1bd   : > { %15424 = vst [vmem:[#allocation162_spill] sm:$0xff] %v8357_v6  ;;  %15425 = vst [vmem:[#allocation163_spill] sm:$0xff] %v8359_v51 }
 0x1be   : > { %2186 = vrot.lane.b32.xlu1 %v2113_v40, %s7073_s10  ;;  %2184 = vrot.lane.b32.xlu0 %v2112_v34, %s7073_s10  ;;  %v2116_v40 = vmul.f32 %v7538_v16, %v8315_v29  ;;  %v2121_v16 = vmul.f32 %v7567_v47, %v8315_v29 }
 0x1c0   : > { %v8367_v49 = vpop.permute.xlu1 %1738  ;;  %v8369_v8 = vpop.permute.xlu0 %1736 }
 0x1c1   : > { %15426 = vst [vmem:[#allocation164_spill] sm:$0xff] %v8367_v49  ;;  %15427 = vst [vmem:[#allocation165_spill] sm:$0xff] %v8369_v8 }
 0x1c2   : > { %2190 = vrot.lane.b32.xlu1 %v2115_v52, %s7073_s10  ;;  %2188 = vrot.lane.b32.xlu0 %v2114_v31, %s7073_s10  ;;  %v2118_v52 = vmul.f32 %v7554_v55, %v8315_v29  ;;  %v2123_v55 = vmul.f32 %v7583_v56, %v8315_v29 }
 0x1c4   : > { %v8377_v34 = vpop.permute.xlu1 %1742  ;;  %v8379_v36 = vpop.permute.xlu0 %1740 }
 0x1c5   : > { %15428 = vst [vmem:[#allocation166_spill] sm:$0xff] %v8377_v34  ;;  %15429 = vst [vmem:[#allocation167_spill] sm:$0xff] %v8379_v36 }
 0x1c6   : > { %2194 = vrot.lane.b32.xlu1 %v2117_v11, %s7073_s10  ;;  %2192 = vrot.lane.b32.xlu0 %v2116_v40, %s7073_s10  ;;  %v2120_v11 = vmul.f32 %v7570_v43, %v8315_v29  ;;  %v2125_v43 = vmul.f32 %v7599_v44, %v8315_v29 }
 0x1c8   : > { %v8387_v31 = vpop.permute.xlu1 %1746  ;;  %v8389_v0 = vpop.permute.xlu0 %1744 }
 0x1c9   : > { %15430 = vst [vmem:[#allocation168_spill] sm:$0xff] %v8387_v31  ;;  %15431 = vst [vmem:[#allocation169_spill] sm:$0xff] %v8389_v0  ;;  %v8550_v0 = vld [vmem:[%s7139_s9 + $0x130] sm:$0xff] }
 0x1ca   : > { %2198 = vrot.lane.b32.xlu1 %v2119_v5, %s7073_s10  ;;  %2196 = vrot.lane.b32.xlu0 %v2118_v52, %s7073_s10  ;;  %v2122_v5 = vmul.f32 %v7586_v32, %v8315_v29  ;;  %v2127_v32 = vmul.f32 %v7615_v35, %v8315_v29 }
 0x1cc   : > { %v8397_v40 = vpop.permute.xlu1 %1750  ;;  %v8399_v48 = vpop.permute.xlu0 %1748 }
 0x1cd   : > { %15432 = vst [vmem:[#allocation170_spill] sm:$0xff] %v8397_v40  ;;  %15433 = vst [vmem:[#allocation171_spill] sm:$0xff] %v8399_v48  ;;  %v8545_v48 = vld [vmem:[%s7139_s9 + $0x138] sm:$0xff] }
 0x1ce   : > { %2202 = vrot.lane.b32.xlu1 %v2121_v16, %s7073_s10  ;;  %2200 = vrot.lane.b32.xlu0 %v2120_v11, %s7073_s10  ;;  %v2124_v16 = vmul.f32 %v7602_v19, %v8315_v29  ;;  %v2129_v19 = vmul.f32 %v7631_v20, %v8315_v29 }
 0x1d0   : > { %v8407_v52 = vpop.permute.xlu1 %1754  ;;  %v8409_v47 = vpop.permute.xlu0 %1752 }
 0x1d1   : > { %15434 = vst [vmem:[#allocation172_spill] sm:$0xff] %v8407_v52  ;;  %15435 = vst [vmem:[#allocation173_spill] sm:$0xff] %v8409_v47  ;;  %v6940_v47 = vld [vmem:[%s7139_s9] sm:$0xff] }
 0x1d2   : > { %2206 = vrot.lane.b32.xlu1 %v2123_v55, %s7073_s10  ;;  %2204 = vrot.lane.b32.xlu0 %v2122_v5, %s7073_s10  ;;  %v2126_v55 = vmul.f32 %v7618_v12, %v8315_v29  ;;  %v2131_v12 = vmul.f32 %v7647_v15, %v8315_v29 }
 0x1d4   : > { %v8417_v11 = vpop.permute.xlu1 %1758  ;;  %v8419_v56 = vpop.permute.xlu0 %1756 }
 0x1d5   : > { %15436 = vst [vmem:[#allocation174_spill] sm:$0xff] %v8417_v11  ;;  %15437 = vst [vmem:[#allocation175_spill] sm:$0xff] %v8419_v56 }
 0x1d6   : > { %2210 = vrot.lane.b32.xlu1 %v2125_v43, %s7073_s10  ;;  %2208 = vrot.lane.b32.xlu0 %v2124_v16, %s7073_s10  ;;  %v2128_v43 = vmul.f32 %v7634_v63, %v8315_v29  ;;  %v2133_v63 = vmul.f32 %v7663_v4, %v8315_v29 }
 0x1d8   : > { %v8427_v5 = vpop.permute.xlu1 %1762  ;;  %v8429_v44 = vpop.permute.xlu0 %1760 }
 0x1d9   : > { %15438 = vst [vmem:[#allocation176_spill] sm:$0xff] %v8427_v5  ;;  %15439 = vst [vmem:[#allocation177_spill] sm:$0xff] %v8429_v44  ;;  %v8512_v5 = vstv %s663_s19  ;;  %v8522_v44 = vld [vmem:[%s7139_s9 + $0x120] sm:$0xff]  ;;  %s6566_s19 = sld [smem:[#allocation2 + $0xe]] }
 0x1da   : > { %2214 = vrot.lane.b32.xlu1 %v2127_v32, %s7073_s10  ;;  %2212 = vrot.lane.b32.xlu0 %v2126_v55, %s7073_s10  ;;  %v2130_v32 = vmul.f32 %v7650_v62, %v8315_v29  ;;  %v2135_v62 = vmul.f32 %v7679_v7, %v8315_v29  ;;  %v8477_v7 = vstv %s6564_s18  ;;  %v8540_v40 = vmul.f32 %v8087_v17, %v8512_v5 }
 0x1db   : > { %v2309_v11 = vmul.f32 %v8522_v44, %v8477_v7  ;;  %v2312_v31 = vmul.f32 %v8545_v48, %v8477_v7  ;;  %v2311_v34 = vmul.f32 %v8550_v0, %v8477_v7  ;;  %v8556_v36 = vmul.f32 %v8071_v14, %v8512_v5 }
 0x1dc   : > { %v8437_v16 = vpop.permute.xlu1 %1766  ;;  %v8439_v35 = vpop.permute.xlu0 %1764  ;;  %15458 = vst [vmem:[#allocation196_spill] sm:$0xff] %v8540_v40  ;;  %v8560_v49 = vmul.f32 %v8103_v18, %v8512_v5  ;;  %v8572_v8 = vmul.f32 %v8098_v25, %v8512_v5  ;;  %v8576_v6 = vmul.f32 %v8135_v21, %v8512_v5  ;;  %v8580_v51 = vmul.f32 %v8114_v53, %v8512_v5 }
 0x1dd   : > { %15440 = vst [vmem:[#allocation178_spill] sm:$0xff] %v8437_v16  ;;  %15441 = vst [vmem:[#allocation179_spill] sm:$0xff] %v8439_v35  ;;  %v8504_v16 = vld [vmem:[%s7139_s9 + $0x110] sm:$0xff]  ;;  %v8600_v26 = vmul.f32 %v8146_v1, %v8512_v5  ;;  %v8604_v27 = vmul.f32 %v8183_v10, %v8512_v5  ;;  %v8626_v33 = vmul.f32 %v8199_v59, %v8512_v5 }
 0x1de   : > { %2218 = vrot.lane.b32.xlu1 %v2129_v19, %s7073_s10  ;;  %2216 = vrot.lane.b32.xlu0 %v2128_v43, %s7073_s10  ;;  %v2132_v19 = vmul.f32 %v7666_v58, %v8315_v29  ;;  %v2137_v58 = vmul.f32 %v7695_v61, %v8315_v29  ;;  %15459 = vst [vmem:[#allocation197_spill] sm:$0xff] %v8556_v36  ;;  %15460 = vst [vmem:[#allocation198_spill] sm:$0xff] %v8560_v49 }
 0x1df   : > { %15463 = vst [vmem:[#allocation201_spill] sm:$0xff] %v8572_v8  ;;  %15464 = vst [vmem:[#allocation202_spill] sm:$0xff] %v8576_v6  ;;  %v8642_v28 = vmul.f32 %v8194_v30, %v8512_v5  ;;  %v8941_v6 = vld [vmem:[%s7139_s9 + $0x1d8] sm:$0xff] }
 0x1e0   : > { %v8447_v55 = vpop.permute.xlu1 %1904  ;;  %v8449_v20 = vpop.permute.xlu0 %1768  ;;  %15465 = vst [vmem:[#allocation203_spill] sm:$0xff] %v8580_v51  ;;  %15471 = vst [vmem:[#allocation209_spill] sm:$0xff] %v8600_v26  ;;  %v15497_v26 = vld [vmem:[#allocation150_spill] sm:$0xff]  ;;  %v8945_v8 = vmul.f32 %v8941_v6, %v8477_v7 }
 0x1e1   : > { %15442 = vst [vmem:[#allocation180_spill] sm:$0xff] %v8447_v55  ;;  %15443 = vst [vmem:[#allocation181_spill] sm:$0xff] %v8449_v20 }
 0x1e2   : > { %2222 = vrot.lane.b32.xlu1 %v2131_v12, %s7073_s10  ;;  %2220 = vrot.lane.b32.xlu0 %v2130_v32, %s7073_s10  ;;  %v2134_v12 = vmul.f32 %v7682_v54, %v8315_v29  ;;  %15472 = vst [vmem:[#allocation210_spill] sm:$0xff] %v8604_v27  ;;  %15474 = vst [vmem:[#allocation212_spill] sm:$0xff] %v8626_v33 }
 0x1e3   : > { %15477 = vst [vmem:[#allocation215_spill] sm:$0xff] %v8642_v28  ;;  %15534 = vst [vmem:[#allocation250_spill] sm:$0xff] %v8941_v6 }
 0x1e4   : > { %v8457_v43 = vpop.permute.xlu1 %1908  ;;  %v8459_v15 = vpop.permute.xlu0 %1906 }
 0x1e5   : > { %15444 = vst [vmem:[#allocation182_spill] sm:$0xff] %v8457_v43  ;;  %15445 = vst [vmem:[#allocation183_spill] sm:$0xff] %v8459_v15  ;;  %v15481_v43 = vld [vmem:[#allocation131_spill] sm:$0xff]  ;;  %v15483_v15 = vld [vmem:[#allocation138_spill] sm:$0xff] }
 0x1e6   : > { %2226 = vrot.lane.b32.xlu1 %v2133_v63, %s7073_s10  ;;  %2224 = vrot.lane.b32.xlu0 %v2132_v19, %s7073_s10  ;;  %v2136_v63 = vmul.f32 %v7698_v50, %v8315_v29  ;;  %v2138_v50 = vmul.f32 %v7713_v57, %v8315_v29  ;;  %v2307_v57 = vmul.f32 %v8504_v16, %v8477_v7 }
 0x1e7   : > { %v8656_v55 = vmul.f32 %v15481_v43, %v8512_v5 }
 0x1e8   : > { %v8467_v4 = vpop.permute.xlu1 %1912  ;;  %v8469_v32 = vpop.permute.xlu0 %1910 }
 0x1e9   : > { %15446 = vst [vmem:[#allocation184_spill] sm:$0xff] %v8467_v4  ;;  %15447 = vst [vmem:[#allocation185_spill] sm:$0xff] %v8469_v32  ;;  %v333_v4 = vmul.f32 %v6940_v47, %v6940_v47  ;;  %v8652_v32 = vmul.f32 %v8231_v41, %v8512_v5 }
 0x1ea   : > { %2230 = vrot.lane.b32.xlu1 %v2135_v62, %s7073_s10  ;;  %2228 = vrot.lane.b32.xlu0 %v2134_v12, %s7073_s10  ;;  %v8486_v62 = vld [vmem:[%s7139_s9 + $0x108] sm:$0xff]  ;;  %15482 = vst [vmem:[#allocation131_spill] sm:$0xff] %v8656_v55 }
 0x1eb   : > { %v2306_v61 = vmul.f32 %v8486_v62, %v8477_v7  ;;  %15480 = vst [vmem:[#allocation218_spill] sm:$0xff] %v8652_v32  ;;  %v8673_v32 = vld [vmem:[%s7139_s9 + $0x158] sm:$0xff] }
 0x1ec   : > { %v8479_v19 = vpop.permute.xlu1 %1916  ;;  %v8481_v54 = vpop.permute.xlu0 %1914  ;;  %v2316_v55 = vmul.f32 %v8673_v32, %v8477_v7 }
 0x1ed   : > { %15448 = vst [vmem:[#allocation186_spill] sm:$0xff] %v8479_v19  ;;  %15449 = vst [vmem:[#allocation187_spill] sm:$0xff] %v8481_v54  ;;  %v8638_v19 = vmul.f32 %v8215_v3, %v8512_v5 }
 0x1ee   : > { %2234 = vrot.lane.b32.xlu1 %v2137_v58, %s7073_s10  ;;  %2232 = vrot.lane.b32.xlu0 %v2136_v63, %s7073_s10  ;;  %v8499_v58 = vld [vmem:[%s7139_s9 + $0x118] sm:$0xff] }
 0x1ef   : > { %v2308_v63 = vmul.f32 %v8499_v58, %v8477_v7  ;;  %15476 = vst [vmem:[#allocation214_spill] sm:$0xff] %v8638_v19  ;;  %v8660_v19 = vmul.f32 %v15483_v15, %v8512_v5 }
 0x1f0   : > { %v8492_v12 = vpop.permute.xlu1 %1920  ;;  %v8494_v20 = vpop.permute.xlu0 %1918 }
 0x1f1   : > { %15450 = vst [vmem:[#allocation188_spill] sm:$0xff] %v8492_v12  ;;  %15451 = vst [vmem:[#allocation189_spill] sm:$0xff] %v8494_v20  ;;  %v8620_v12 = vld [vmem:[%s7139_s9 + $0x140] sm:$0xff]  ;;  %v8630_v20 = vmul.f32 %v8178_v9, %v8512_v5 }
 0x1f2   : > { %2372 = vrot.lane.b32.xlu1 %v2306_v61, %s7074_s12  ;;  %2236 = vrot.lane.b32.xlu0 %v2138_v50, %s7073_s10  ;;  %v8517_v61 = vld [vmem:[%s7139_s9 + $0x128] sm:$0xff]  ;;  %v2313_v24 = vmul.f32 %v8620_v12, %v8477_v7  ;;  %15484 = vst [vmem:[#allocation138_spill] sm:$0xff] %v8660_v19 }
 0x1f3   : > { %v2310_v50 = vmul.f32 %v8517_v61, %v8477_v7  ;;  %15475 = vst [vmem:[#allocation213_spill] sm:$0xff] %v8630_v20  ;;  %v8678_v20 = vld [vmem:[%s7139_s9 + $0x150] sm:$0xff] }
 0x1f4   : > { %v8508_v29 = vpop.permute.xlu1 %1924  ;;  %v8510_v35 = vpop.permute.xlu0 %1922 }
 0x1f5   : > { %15452 = vst [vmem:[#allocation190_spill] sm:$0xff] %v8508_v29  ;;  %15453 = vst [vmem:[#allocation191_spill] sm:$0xff] %v8510_v35  ;;  %v8596_v29 = vmul.f32 %v8167_v45, %v8512_v5 }
 0x1f6   : > { %2376 = vrot.lane.b32.xlu1 %v2308_v63, %s7074_s12  ;;  %2374 = vrot.lane.b32.xlu0 %v2307_v57, %s7074_s12  ;;  %v8532_v63 = vmul.f32 %v8066_v23, %v8512_v5  ;;  %v8536_v57 = vmul.f32 %v6940_v47, %v8512_v5  ;;  %v15487_v47 = vld [vmem:[#allocation142_spill] sm:$0xff] }
 0x1f7   : > { %15470 = vst [vmem:[#allocation208_spill] sm:$0xff] %v8596_v29  ;;  %v8921_v29 = vld [vmem:[%s7139_s9 + $0x1c8] sm:$0xff] }
 0x1f8   : > { %v8526_v56 = vpop.permute.xlu1 %1928  ;;  %v8528_v52 = vpop.permute.xlu0 %1926  ;;  %15456 = vst [vmem:[#allocation194_spill] sm:$0xff] %v8532_v63  ;;  %15457 = vst [vmem:[#allocation195_spill] sm:$0xff] %v8536_v57 }
 0x1f9   : > { %15454 = vst [vmem:[#allocation192_spill] sm:$0xff] %v8526_v56  ;;  %15455 = vst [vmem:[#allocation193_spill] sm:$0xff] %v8528_v52  ;;  %v8584_v56 = vmul.f32 %v8151_v13, %v8512_v5  ;;  %v8592_v52 = vmul.f32 %v8130_v22, %v8512_v5 }
 0x1fa   : > { %2380 = vrot.lane.b32.xlu1 %v2310_v50, %s7074_s12  ;;  %2378 = vrot.lane.b32.xlu0 %v2309_v11, %s7074_s12  ;;  %v8564_v11 = vmul.f32 %v8082_v37, %v8512_v5  ;;  %v8568_v50 = vmul.f32 %v8119_v46, %v8512_v5  ;;  %15531 = vst [vmem:[#allocation247_spill] sm:$0xff] %v8921_v29 }
 0x1fb   : > { %15466 = vst [vmem:[#allocation204_spill] sm:$0xff] %v8584_v56  ;;  %15469 = vst [vmem:[#allocation207_spill] sm:$0xff] %v8592_v52  ;;  %v8925_v52 = vmul.f32 %v8921_v29, %v8477_v7  ;;  %v9017_v29 = vld [vmem:[%s7139_s9 + $0x1f0] sm:$0xff] }
 0x1fc   : > { %15461 = vst [vmem:[#allocation199_spill] sm:$0xff] %v8564_v11  ;;  %15462 = vst [vmem:[#allocation200_spill] sm:$0xff] %v8568_v50  ;;  %v8586_v2 = vpop.permute.xlu1 %1932  ;;  %v8588_v39 = vpop.permute.xlu0 %1930  ;;  %v8948_v50 = vld [vmem:[%s7139_s9 + $0x1d0] sm:$0xff] }
 0x1fd   : > { %15467 = vst [vmem:[#allocation205_spill] sm:$0xff] %v8586_v2  ;;  %15468 = vst [vmem:[#allocation206_spill] sm:$0xff] %v8588_v39  ;;  %v8610_v2 = vmul.f32 %v8162_v38, %v8512_v5  ;;  %v8615_v39 = vld [vmem:[%s7139_s9 + $0x148] sm:$0xff]  ;;  %v8952_v11 = vmul.f32 %v8948_v50, %v8477_v7 }
 0x1fe   : > { %2384 = vrot.lane.b32.xlu1 %v2312_v31, %s7074_s12  ;;  %2382 = vrot.lane.b32.xlu0 %v2311_v34, %s7074_s12  ;;  %v2314_v35 = vmul.f32 %v8615_v39, %v8477_v7  ;;  %v334_v34 = vmul.f32 %v8071_v14, %v8071_v14  ;;  %v367_v31 = vmul.f32 %v8504_v16, %v8504_v16 }
 0x1ff   : > { %15473 = vst [vmem:[#allocation211_spill] sm:$0xff] %v8610_v2  ;;  %v366_v14 = vmul.f32 %v8486_v62, %v8486_v62  ;;  %15535 = vst [vmem:[#allocation251_spill] sm:$0xff] %v8948_v50 }
 0x200   : > { %v8644_v42 = vpop.permute.xlu1 %1936  ;;  %v8646_v54 = vpop.permute.xlu0 %1934  ;;  %15541 = vst [vmem:[#allocation257_spill] sm:$0xff] %v9017_v29 }
 0x201   : > { %15478 = vst [vmem:[#allocation216_spill] sm:$0xff] %v8644_v42  ;;  %15479 = vst [vmem:[#allocation217_spill] sm:$0xff] %v8646_v54  ;;  %v15485_v42 = vld [vmem:[#allocation134_spill] sm:$0xff]  ;;  %v8668_v54 = vmul.f32 %v15487_v47, %v8512_v5  ;;  %v8686_v47 = vadd.f32 %v367_v31, %v334_v34  ;;  %v335_v34 = vmul.f32 %v8066_v23, %v8066_v23  ;;  %v15495_v31 = vld [vmem:[#allocation141_spill] sm:$0xff] }
 0x202   : > { %v8664_v28 = vmul.f32 %v15485_v42, %v8512_v5  ;;  %2388 = vrot.lane.b32.xlu1 %v2314_v35, %s7074_s12  ;;  %2386 = vrot.lane.b32.xlu0 %v2313_v24, %s7074_s12  ;;  %v2315_v42 = vmul.f32 %v8678_v20, %v8477_v7  ;;  %v336_v24 = vmul.f32 %v8087_v17, %v8087_v17 }
 0x203   : > { %15488 = vst [vmem:[#allocation142_spill] sm:$0xff] %v8668_v54  ;;  %v369_v35 = vmul.f32 %v8522_v44, %v8522_v44  ;;  %v15491_v54 = vld [vmem:[#allocation146_spill] sm:$0xff]  ;;  %v368_v17 = vmul.f32 %v8499_v58, %v8499_v58  ;;  %v8723_v23 = vmul.f32 %v8311_v60, %v8512_v5  ;;  %v15505_v60 = vld [vmem:[#allocation153_spill] sm:$0xff]  ;;  %6833 = vrsqrt.f32 %v8686_v47 }
 0x204   : > { %15486 = vst [vmem:[#allocation134_spill] sm:$0xff] %v8664_v28  ;;  %v15489_v28 = vld [vmem:[#allocation137_spill] sm:$0xff]  ;;  %v8694_v33 = vmul.f32 %v15491_v54, %v8512_v5  ;;  %v8696_v2 = vpop.permute.xlu1 %1940  ;;  %v8698_v27 = vpop.permute.xlu0 %1938  ;;  %v8712_v54 = vmul.f32 %v15497_v26, %v8512_v5  ;;  %vm441_vm0 = vcmp.eq.f32.partialorder %v8686_v47, inf  ;;  %vm443_vm2 = vcmp.eq.f32.partialorder %v8686_v47, 0.0 }
 0x205   : > { %v8684_v19 = vmul.f32 %v15489_v28, %v8512_v5  ;;  %15493 = vst [vmem:[#allocation219_spill] sm:$0xff] %v8696_v2  ;;  %15494 = vst [vmem:[#allocation220_spill] sm:$0xff] %v8698_v27  ;;  %v8700_v28 = vadd.f32 %v366_v14, %v333_v4  ;;  %v15499_v2 = vld [vmem:[#allocation145_spill] sm:$0xff]  ;;  %v8719_v4 = vstv %s8606_s20  ;;  %v8728_v14 = vld [vmem:[%s7139_s9 + $0x168] sm:$0xff] }
 0x206   : > { %15492 = vst [vmem:[#allocation146_spill] sm:$0xff] %v8694_v33  ;;  %15498 = vst [vmem:[#allocation150_spill] sm:$0xff] %v8712_v54  ;;  %v8716_v33 = vmul.f32 %v15499_v2, %v8512_v5  ;;  %2392 = vrot.lane.b32.xlu1 %v2316_v55, %s7074_s12  ;;  %2390 = vrot.lane.b32.xlu0 %v2315_v42, %s7074_s12  ;;  %v2318_v26 = vmul.f32 %v8728_v14, %v8477_v7  ;;  %v15503_v27 = vld [vmem:[#allocation149_spill] sm:$0xff] }
 0x207   : > { %15490 = vst [vmem:[#allocation137_spill] sm:$0xff] %v8684_v19  ;;  %v8708_v19 = vmul.f32 %v15495_v31, %v8512_v5  ;;  %15501 = vst [vmem:[#allocation221_spill] sm:$0xff] %v8719_v4  ;;  %v8733_v31 = vld [vmem:[%s7139_s9 + $0x160] sm:$0xff]  ;;  %v8743_v55 = vmul.f32 %v15505_v60, %v8512_v5  ;;  %v8746_v42 = vadd.f32 %v369_v35, %v336_v24  ;;  %6835 = vrsqrt.f32 %v8700_v28  ;;  %v8776_v35 = vld [vmem:[%s7139_s9 + $0x178] sm:$0xff] }
 0x208   : > { %15500 = vst [vmem:[#allocation145_spill] sm:$0xff] %v8716_v33  ;;  %15502 = vst [vmem:[#allocation222_spill] sm:$0xff] %v8723_v23  ;;  %v2317_v2 = vmul.f32 %v8733_v31, %v8477_v7  ;;  %v8739_v33 = vmul.f32 %v15503_v27, %v8512_v5  ;;  %v8750_v23 = vmul.f32 %v8504_v16, %v8719_v4  ;;  %v8758_v27 = vpop.permute.xlu0 %1942  ;;  %vm434_vm1 = vcmp.eq.f32.partialorder %v8700_v28, inf }
 0x209   : > { %15496 = vst [vmem:[#allocation141_spill] sm:$0xff] %v8708_v19  ;;  %15506 = vst [vmem:[#allocation153_spill] sm:$0xff] %v8743_v55  ;;  %v8754_v54 = vmul.f32 %v8486_v62, %v8719_v4  ;;  %v8756_v19 = vpop.permute.xlu1 %1944  ;;  %v8761_v5 = vadd.f32 %v368_v17, %v335_v34  ;;  %v8765_v24 = vmul.f32 %v8522_v44, %v8719_v4  ;;  %v8783_v44 = vld [vmem:[%s7139_s9 + $0x170] sm:$0xff]  ;;  %6837 = vrsqrt.f32 %v8746_v42 }
 0x20a   : > { %15504 = vst [vmem:[#allocation149_spill] sm:$0xff] %v8739_v33  ;;  %15507 = vst [vmem:[#allocation223_spill] sm:$0xff] %v8750_v23  ;;  %v8769_v16 = vmul.f32 %v8499_v58, %v8719_v4  ;;  %v8773_v62 = vmul.f32 %v8517_v61, %v8719_v4  ;;  %v2320_v60 = vmul.f32 %v8776_v35, %v8477_v7  ;;  %2396 = vrot.lane.b32.xlu1 %v2318_v26, %s7074_s12  ;;  %v8899_v23 = vld [vmem:[%s7139_s9 + $0x1a0] sm:$0xff] }
 0x20b   : > { %15508 = vst [vmem:[#allocation224_spill] sm:$0xff] %v8754_v54  ;;  %15509 = vst [vmem:[#allocation225_spill] sm:$0xff] %v8756_v19  ;;  %2394 = vrot.lane.b32.xlu0 %v2317_v2, %s7074_s12  ;;  %v2319_v58 = vmul.f32 %v8783_v44, %v8477_v7  ;;  %v338_v34 = vmul.f32 %v8103_v18, %v8103_v18  ;;  %v371_v17 = vmul.f32 %v8550_v0, %v8550_v0  ;;  %v8894_v54 = vld [vmem:[%s7139_s9 + $0x1a8] sm:$0xff] }
 0x20c   : > { %15510 = vst [vmem:[#allocation226_spill] sm:$0xff] %v8758_v27  ;;  %15511 = vst [vmem:[#allocation227_spill] sm:$0xff] %v8765_v24  ;;  %v8793_v19 = vmul.f32 %v8550_v0, %v8719_v4  ;;  %v8797_v26 = vmul.f32 %v8620_v12, %v8719_v4  ;;  %v8801_v2 = vmul.f32 %v8545_v48, %v8719_v4  ;;  %6839 = vrsqrt.f32 %v8761_v5 }
 0x20d   : > { %15512 = vst [vmem:[#allocation228_spill] sm:$0xff] %v8769_v16  ;;  %15513 = vst [vmem:[#allocation229_spill] sm:$0xff] %v8773_v62  ;;  %v8806_v18 = vmul.f32 %v8678_v20, %v8719_v4  ;;  %v8810_v27 = vmul.f32 %v8615_v39, %v8719_v4  ;;  %v8814_v0 = vmul.f32 %v8673_v32, %v8719_v4  ;;  %vm436_vm3 = vcmp.eq.f32.partialorder %v8700_v28, 0.0 }
 0x20e   : > { %15514 = vst [vmem:[#allocation230_spill] sm:$0xff] %v8793_v19  ;;  %15515 = vst [vmem:[#allocation231_spill] sm:$0xff] %v8797_v26  ;;  %v8816_v19 = vpop.permute.xlu1 %1948  ;;  %v8818_v26 = vpop.permute.xlu0 %1946  ;;  %v337_v24 = vmul.f32 %v8082_v37, %v8082_v37  ;;  %2400 = vrot.lane.b32.xlu1 %v2320_v60, %s7074_s12  ;;  %v373_v16 = vmul.f32 %v8620_v12, %v8620_v12  ;;  %v8845_v37 = vmul.f32 %v8733_v31, %v8719_v4 }
 0x20f   : > { %15516 = vst [vmem:[#allocation232_spill] sm:$0xff] %v8801_v2  ;;  %15517 = vst [vmem:[#allocation233_spill] sm:$0xff] %v8806_v18  ;;  %v8822_v2 = vld [vmem:[%s7139_s9 + $0x188] sm:$0xff]  ;;  %v8827_v18 = vld [vmem:[%s7139_s9 + $0x180] sm:$0xff]  ;;  %2398 = vrot.lane.b32.xlu0 %v2319_v58, %s7074_s12  ;;  %v8853_v60 = vmul.f32 %v8728_v14, %v8719_v4  ;;  %v8857_v58 = vmul.f32 %v8776_v35, %v8719_v4  ;;  %v2325_v55 = vmul.f32 %v8899_v23, %v8477_v7 }
 0x210   : > { %15518 = vst [vmem:[#allocation234_spill] sm:$0xff] %v8810_v27  ;;  %15519 = vst [vmem:[#allocation235_spill] sm:$0xff] %v8814_v0  ;;  %v2322_v62 = vmul.f32 %v8822_v2, %v8477_v7  ;;  %v2321_v27 = vmul.f32 %v8827_v18, %v8477_v7  ;;  %v340_v0 = vmul.f32 %v8119_v46, %v8119_v46  ;;  %v437_v6 = vand.u32 2147483648, %v8700_v28 }
 0x211   : > { %15520 = vst [vmem:[#allocation236_spill] sm:$0xff] %v8816_v19  ;;  %15521 = vst [vmem:[#allocation237_spill] sm:$0xff] %v8818_v26  ;;  %v370_v19 = vmul.f32 %v8517_v61, %v8517_v61  ;;  %v8837_v26 = vadd.f32 %v371_v17, %v338_v34  ;;  %v8849_v61 = vmul.f32 %v8783_v44, %v8719_v4  ;;  %vm455_vm4 = vcmp.eq.f32.partialorder %v8746_v42, inf }
 0x212   : > { %15522 = vst [vmem:[#allocation238_spill] sm:$0xff] %v8845_v37  ;;  %15524 = vst [vmem:[#allocation240_spill] sm:$0xff] %v8853_v60  ;;  %v8861_v46 = vmul.f32 %v8827_v18, %v8719_v4  ;;  %v8865_v12 = vmul.f32 %v8822_v2, %v8719_v4  ;;  %v8867_v34 = vpop.permute.xlu1 %1952  ;;  %v8869_v17 = vpop.permute.xlu0 %1950  ;;  %v8876_v37 = vld [vmem:[%s7139_s9 + $0x190] sm:$0xff]  ;;  %2404 = vrot.lane.b32.xlu1 %v2322_v62, %s7074_s12  ;;  %vm448_vm5 = vcmp.eq.f32.partialorder %v8761_v5, inf  ;;  %vm457_vm6 = vcmp.eq.f32.partialorder %v8746_v42, 0.0 }
 0x213   : > { %15523 = vst [vmem:[#allocation239_spill] sm:$0xff] %v8849_v61  ;;  %15525 = vst [vmem:[#allocation241_spill] sm:$0xff] %v8857_v58  ;;  %v339_v61 = vmul.f32 %v8098_v25, %v8098_v25  ;;  %v372_v58 = vmul.f32 %v8545_v48, %v8545_v48  ;;  %v6834_v60 = vpop.eup %6833  ;;  %v2323_v25 = vmul.f32 %v8876_v37, %v8477_v7  ;;  %2402 = vrot.lane.b32.xlu0 %v2321_v27, %s7074_s12  ;;  %v8914_v62 = vld [vmem:[%s7139_s9 + $0x1b0] sm:$0xff] }
 0x214   : > { %15526 = vst [vmem:[#allocation242_spill] sm:$0xff] %v8861_v46  ;;  %15527 = vst [vmem:[#allocation243_spill] sm:$0xff] %v8865_v12  ;;  %v8880_v46 = vmul.f32 %v8876_v37, %v8719_v4  ;;  %v8883_v12 = vld [vmem:[%s7139_s9 + $0x198] sm:$0xff]  ;;  %v6836_v48 = vpop.eup %6835  ;;  %6841 = vrsqrt.f32 %v8837_v26  ;;  %v8918_v33 = vmul.f32 %v8914_v62, %v8477_v7  ;;  %v440_v49 = vmul.f32 %v6834_v60, %v8686_v47 }
 0x215   : > { %15528 = vst [vmem:[#allocation244_spill] sm:$0xff] %v8867_v34  ;;  %15529 = vst [vmem:[#allocation245_spill] sm:$0xff] %v8869_v17  ;;  %v2324_v34 = vmul.f32 %v8883_v12, %v8477_v7  ;;  %v8889_v17 = vadd.f32 %v370_v19, %v337_v24  ;;  %v8904_v19 = vadd.f32 %v373_v16, %v340_v0  ;;  %v8907_v24 = vld [vmem:[%s7139_s9 + $0x1b8] sm:$0xff]  ;;  %v8928_v16 = vld [vmem:[%s7139_s9 + $0x1c0] sm:$0xff]  ;;  %vm450_vm7 = vcmp.eq.f32.partialorder %v8761_v5, 0.0 }
 0x216   : > { %15530 = vst [vmem:[#allocation246_spill] sm:$0xff] %v8880_v46  ;;  %v2326_v46 = vmul.f32 %v8894_v54, %v8477_v7  ;;  %v8911_v27 = vmul.f32 %v8907_v24, %v8477_v7  ;;  %v8932_v0 = vmul.f32 %v8928_v16, %v8477_v7  ;;  %v8936_v56 = vpop.permute.xlu1 %1956  ;;  %v8938_v51 = vpop.permute.xlu0 %1954  ;;  %v8955_v36 = vadd.f32 %v372_v58, %v339_v61  ;;  %v8976_v58 = vld [vmem:[%s7139_s9 + $0x1e0] sm:$0xff]  ;;  %v8983_v4 = vld [vmem:[%s7139_s9 + $0x1f8] sm:$0xff] }
 0x217   : > { %15532 = vst [vmem:[#allocation248_spill] sm:$0xff] %v8936_v56  ;;  %15533 = vst [vmem:[#allocation249_spill] sm:$0xff] %v8938_v51  ;;  %v6838_v56 = vpop.eup %6837  ;;  %v8958_v51 = vld [vmem:[%s7139_s9 + $0x1e8] sm:$0xff]  ;;  %v433_v57 = vmul.f32 %v6836_v48, %v8700_v28  ;;  %6843 = vrsqrt.f32 %v8889_v17  ;;  %2408 = vrot.lane.b32.xlu1 %v2324_v34, %s7074_s12  ;;  %2406 = vrot.lane.b32.xlu0 %v2323_v25, %s7074_s12  ;;  %v342_v61 = vmul.f32 %v8135_v21, %v8135_v21 }
 0x218   : > { %15536 = vst [vmem:[#allocation252_spill] sm:$0xff] %v8958_v51  ;;  %v8962_v40 = vmul.f32 %v8958_v51, %v8477_v7  ;;  %v6840_v63 = vpop.eup %6839  ;;  %6845 = vrsqrt.f32 %v8904_v19  ;;  %v375_v60 = vmul.f32 %v8678_v20, %v8678_v20  ;;  %15537 = vst [vmem:[#allocation253_spill] sm:$0xff] %v8976_v58  ;;  %v8980_v48 = vmul.f32 %v8976_v58, %v8477_v7 }
 0x219   : > { %15538 = vst [vmem:[#allocation254_spill] sm:$0xff] %v8983_v4  ;;  %v8987_v34 = vmul.f32 %v8983_v4, %v8477_v7  ;;  %v444_v25 = vand.u32 2147483648, %v8686_v47  ;;  %v442_v51 = vsel %vm441_vm0, %v8686_v47, %v440_v49  ;;  %6847 = vrsqrt.f32 %v8955_v36 }
 0x21a   : > { %v8991_v21 = vpop.permute.xlu1 %1960  ;;  %v8993_v20 = vpop.permute.xlu0 %1958  ;;  %v435_v4 = vsel %vm434_vm1, %v8700_v28, %v433_v57  ;;  %v9010_v49 = vadd.f32 %v375_v60, %v342_v61  ;;  %v341_v58 = vmul.f32 %v8114_v53, %v8114_v53  ;;  %v374_v57 = vmul.f32 %v8615_v39, %v8615_v39 }
 0x21b   : > { %15539 = vst [vmem:[#allocation255_spill] sm:$0xff] %v8991_v21  ;;  %15540 = vst [vmem:[#allocation256_spill] sm:$0xff] %v8993_v20  ;;  %v454_v21 = vmul.f32 %v6838_v56, %v8746_v42  ;;  %v447_v20 = vmul.f32 %v6840_v63, %v8761_v5  ;;  %2412 = vrot.lane.b32.xlu1 %v2326_v46, %s7074_s12  ;;  %2410 = vrot.lane.b32.xlu0 %v2325_v55, %s7074_s12  ;;  %v9024_v63 = vld [vmem:[%s7139_s9 + $0x208] sm:$0x1]  ;;  %v9031_v46 = vld [vmem:[%s7139_s9 + $0x200] sm:$0xff]  ;;  %vm469_vm8 = vcmp.eq.f32.partialorder %v8837_v26, inf }
 0x21c   : > { %v9021_v56 = vmul.f32 %v9017_v29, %v8477_v7  ;;  %15542 = vst [vmem:[#allocation258_spill] sm:$0xff] %v9024_v63  ;;  %v9028_v55 = vmul.f32 %v9024_v63, %v8477_v7  ;;  %15543 = vst [vmem:[#allocation259_spill] sm:$0xff] %v9031_v46  ;;  %v9035_v53 = vmul.f32 %v9031_v46, %v8477_v7  ;;  %v9038_v61 = vstv %s8934_s23 }
 0x21d   : > { %v9046_v29 = vsel %vm443_vm2, %v444_v25, %v442_v51  ;;  %v9050_v63 = vsel %vm436_vm3, %v437_v6, %v435_v4  ;;  %v458_v7 = vand.u32 2147483648, %v8746_v42  ;;  %v456_v46 = vsel %vm455_vm4, %v8746_v42, %v454_v21 }
 0x21e   : > { %v6842_v39 = vpop.eup %6841  ;;  %v9040_v60 = vpop.permute.xlu1 %1964  ;;  %15546 = vst [vmem:[#allocation262_spill] sm:$0xff] %v9046_v29  ;;  %15547 = vst [vmem:[#allocation263_spill] sm:$0xff] %v9050_v63  ;;  %v451_v51 = vand.u32 2147483648, %v8761_v5  ;;  %6849 = vrsqrt.f32 %v9010_v49  ;;  %v9067_v6 = vadd.f32 %v374_v57, %v341_v58  ;;  %v344_v47 = vmul.f32 %v8151_v13, %v8151_v13 }
 0x21f   : > { %15544 = vst [vmem:[#allocation260_spill] sm:$0xff] %v9040_v60  ;;  %v9042_v50 = vpop.permute.xlu0 %1962  ;;  %v449_v60 = vsel %vm448_vm5, %v8761_v5, %v447_v20  ;;  %2416 = vrot.lane.b32.xlu1 %v8911_v27, %s7074_s12  ;;  %2414 = vrot.lane.b32.xlu0 %v8918_v33, %s7074_s12  ;;  %v377_v28 = vmul.f32 %v8733_v31, %v8733_v31  ;;  %vm471_vm9 = vcmp.eq.f32.partialorder %v8837_v26, 0.0  ;;  %vm462_vm10 = vcmp.eq.f32.partialorder %v8889_v17, inf }
 0x220   : > { %15545 = vst [vmem:[#allocation261_spill] sm:$0xff] %v9042_v50  ;;  %v9075_v25 = vmul.f32 %v9038_v61, %v9046_v29  ;;  %v468_v27 = vmul.f32 %v6842_v39, %v8837_v26  ;;  %v343_v33 = vmul.f32 %v8130_v22, %v8130_v22  ;;  %v376_v58 = vmul.f32 %v8673_v32, %v8673_v32 }
 0x221   : > { %v6844_v4 = vpop.eup %6843  ;;  %v9088_v31 = vmul.f32 %v9038_v61, %v9050_v63  ;;  %v346_v57 = vmul.f32 %v8167_v45, %v8167_v45  ;;  %v379_v22 = vmul.f32 %v8783_v44, %v8783_v44  ;;  %v9097_v32 = vsel %vm457_vm6, %v458_v7, %v456_v46 }
 0x222   : > { %v6846_v21 = vpop.eup %6845  ;;  %v9082_v20 = vpop.permute.xlu1 %1968  ;;  %15550 = vst [vmem:[#allocation266_spill] sm:$0xff] %v9097_v32  ;;  %v9101_v39 = vsel %vm450_vm7, %v451_v51, %v449_v60  ;;  %v472_v45 = vand.u32 2147483648, %v8837_v26  ;;  %6851 = vrsqrt.f32 %v9067_v6  ;;  %v9114_v42 = vadd.f32 %v377_v28, %v344_v47 }
 0x223   : > { %15548 = vst [vmem:[#allocation264_spill] sm:$0xff] %v9082_v20  ;;  %v9084_v13 = vpop.permute.xlu0 %1966  ;;  %15551 = vst [vmem:[#allocation267_spill] sm:$0xff] %v9101_v39  ;;  %v345_v20 = vmul.f32 %v8146_v1, %v8146_v1  ;;  %v6848_v50 = vpop.eup %6847  ;;  %2420 = vrot.lane.b32.xlu1 %v8925_v52, %s7074_s12  ;;  %2418 = vrot.lane.b32.xlu0 %v8932_v0, %s7074_s12  ;;  %v470_v1 = vsel %vm469_vm8, %v8837_v26, %v468_v27  ;;  %vm464_vm11 = vcmp.eq.f32.partialorder %v8889_v17, 0.0 }
 0x224   : > { %15549 = vst [vmem:[#allocation265_spill] sm:$0xff] %v9084_v13  ;;  %v378_v13 = vmul.f32 %v8728_v14, %v8728_v14  ;;  %v461_v5 = vmul.f32 %v6844_v4, %v8889_v17  ;;  %v482_v14 = vmul.f32 %v6846_v21, %v8904_v19  ;;  %v9119_v44 = vadd.f32 %v376_v58, %v343_v33 }
 0x225   : > { %vm483_vm12 = vcmp.eq.f32.partialorder %v8904_v19, inf  ;;  %v9128_v0 = vadd.f32 %v379_v22, %v346_v57  ;;  %v475_v60 = vmul.f32 %v6848_v50, %v8955_v36  ;;  %v348_v51 = vmul.f32 %v8183_v10, %v8183_v10 }
 0x226   : > { %v9121_v52 = vpop.permute.xlu1 %2174  ;;  %v9131_v7 = vadd.f32 %v378_v13, %v345_v20  ;;  %v381_v47 = vmul.f32 %v8827_v18, %v8827_v18  ;;  %v465_v28 = vand.u32 2147483648, %v8889_v17  ;;  %v486_v4 = vand.u32 2147483648, %v8904_v19 }
 0x227   : > { %15552 = vst [vmem:[#allocation268_spill] sm:$0xff] %v9121_v52  ;;  %v9123_v46 = vpop.permute.xlu0 %2172  ;;  %2424 = vrot.lane.b32.xlu1 %v8945_v8, %s7074_s12  ;;  %2422 = vrot.lane.b32.xlu0 %v8952_v11, %s7074_s12  ;;  %vm476_vm13 = vcmp.eq.f32.partialorder %v8955_v36, inf  ;;  %6853 = vrsqrt.f32 %v9114_v42  ;;  %v463_v50 = vsel %vm462_vm10, %v8889_v17, %v461_v5  ;;  %v484_v10 = vsel %vm483_vm12, %v8904_v19, %v482_v14 }
 0x228   : > { %15553 = vst [vmem:[#allocation269_spill] sm:$0xff] %v9123_v46  ;;  %vm485_vm14 = vcmp.eq.f32.partialorder %v8904_v19, 0.0  ;;  %6855 = vrsqrt.f32 %v9119_v44  ;;  %v6850_v8 = vpop.eup %6849  ;;  %v479_v27 = vand.u32 2147483648, %v8955_v36  ;;  %v347_v33 = vmul.f32 %v8162_v38, %v8162_v38 }
 0x229   : > { %6857 = vrsqrt.f32 %v9128_v0  ;;  %v380_v58 = vmul.f32 %v8776_v35, %v8776_v35  ;;  %v477_v21 = vsel %vm476_vm13, %v8955_v36, %v475_v60  ;;  %vm478_vm15 = vcmp.eq.f32.partialorder %v8955_v36, 0.0 }
 0x22a   : > { %v9149_v18 = vpop.permute.xlu1 %2178  ;;  %6859 = vrsqrt.f32 %v9131_v7  ;;  %v9162_v20 = vadd.f32 %v381_v47, %v348_v51  ;;  %v9170_v38 = vsel %vm471_vm9, %v472_v45, %v470_v1  ;;  %v9174_v35 = vsel %vm464_vm11, %v465_v28, %v463_v50 }
 0x22b   : > { %15554 = vst [vmem:[#allocation270_spill] sm:$0xff] %v9149_v18  ;;  %v9151_v11 = vpop.permute.xlu0 %2176  ;;  %2428 = vrot.lane.b32.xlu1 %v8962_v40, %s7074_s12  ;;  %2426 = vrot.lane.b32.xlu0 %v8980_v48, %s7074_s12  ;;  %15556 = vst [vmem:[#allocation272_spill] sm:$0xff] %v9174_v35  ;;  %v9178_v36 = vsel %vm485_vm14, %v486_v4, %v484_v10  ;;  %v9182_v13 = vmul.f32 %v9038_v61, %v9097_v32  ;;  %vm497_vm0 = vcmp.eq.f32.partialorder %v9010_v49, inf }
 0x22c   : > { %15555 = vst [vmem:[#allocation271_spill] sm:$0xff] %v9151_v11  ;;  %15557 = vst [vmem:[#allocation273_spill] sm:$0xff] %v9178_v36  ;;  %v9186_v40 = vmul.f32 %v9038_v61, %v9101_v39  ;;  %v496_v26 = vmul.f32 %v6850_v8, %v9010_v49  ;;  %v6852_v48 = vpop.eup %6851  ;;  %v9194_v19 = vsel %vm478_vm15, %v479_v27, %v477_v21  ;;  %6861 = vrsqrt.f32 %v9162_v20  ;;  %v15589_v11 = vld [vmem:[#allocation252_spill] sm:$0xff] }
 0x22d   : > { %15560 = vst [vmem:[#allocation276_spill] sm:$0xff] %v9194_v19  ;;  %v9196_v22 = vadd.f32 %v380_v58, %v347_v33  ;;  %v350_v45 = vmul.f32 %v8199_v59, %v8199_v59  ;;  %v383_v1 = vmul.f32 %v8876_v37, %v8876_v37  ;;  %v9204_v5 = vmul.f32 %v9038_v61, %v9170_v38 }
 0x22e   : > { %v9190_v17 = vpop.permute.xlu1 %2182  ;;  %v9208_v14 = vmul.f32 %v9038_v61, %v9174_v35  ;;  %v9212_v60 = vmul.f32 %v9038_v61, %v9178_v36  ;;  %vm499_vm1 = vcmp.eq.f32.partialorder %v9010_v49, 0.0  ;;  %v500_v59 = vand.u32 2147483648, %v9010_v49 }
 0x22f   : > { %15558 = vst [vmem:[#allocation274_spill] sm:$0xff] %v9190_v17  ;;  %v9192_v57 = vpop.permute.xlu0 %2180  ;;  %2432 = vrot.lane.b32.xlu1 %v8987_v34, %s7074_s12  ;;  %2430 = vrot.lane.b32.xlu0 %v9021_v56, %s7074_s12  ;;  %vm490_vm2 = vcmp.eq.f32.partialorder %v9067_v6, inf  ;;  %vm492_vm3 = vcmp.eq.f32.partialorder %v9067_v6, 0.0  ;;  %v9225_v37 = vmul.f32 %v9038_v61, %v9194_v19  ;;  %v498_v51 = vsel %vm497_vm0, %v9010_v49, %v496_v26  ;;  %v15584_v17 = vld [vmem:[#allocation250_spill] sm:$0xff] }
 0x230   : > { %15559 = vst [vmem:[#allocation275_spill] sm:$0xff] %v9192_v57  ;;  %v489_v34 = vmul.f32 %v6852_v48, %v9067_v6  ;;  %v493_v56 = vand.u32 2147483648, %v9067_v6  ;;  %6863 = vrsqrt.f32 %v9196_v22  ;;  %v9237_v50 = vadd.f32 %v383_v1, %v350_v45 }
 0x231   : > { %v6854_v47 = vpop.eup %6853  ;;  %v349_v10 = vmul.f32 %v8178_v9, %v8178_v9  ;;  %v382_v8 = vmul.f32 %v8822_v2, %v8822_v2  ;;  %vm511_vm4 = vcmp.eq.f32.partialorder %v9114_v42, inf  ;;  %vm513_vm5 = vcmp.eq.f32.partialorder %v9114_v42, 0.0 }
 0x232   : > { %v9232_v28 = vpop.permute.xlu1 %2186  ;;  %v6856_v27 = vpop.eup %6855  ;;  %v514_v33 = vand.u32 2147483648, %v9114_v42  ;;  %vm504_vm6 = vcmp.eq.f32.partialorder %v9119_v44, inf  ;;  %vm506_vm7 = vcmp.eq.f32.partialorder %v9119_v44, 0.0  ;;  %v507_v9 = vand.u32 2147483648, %v9119_v44 }
 0x233   : > { %15561 = vst [vmem:[#allocation277_spill] sm:$0xff] %v9232_v28  ;;  %v9234_v4 = vpop.permute.xlu0 %2184  ;;  %v6858_v58 = vpop.eup %6857  ;;  %2436 = vrot.lane.b32.xlu1 %v9028_v55, %s7074_s12  ;;  %2434 = vrot.lane.b32.xlu0 %v9035_v53, %s7074_s12  ;;  %vm525_vm8 = vcmp.eq.f32.partialorder %v9128_v0, inf  ;;  %vm527_vm9 = vcmp.eq.f32.partialorder %v9128_v0, 0.0  ;;  %v528_v2 = vand.u32 2147483648, %v9128_v0  ;;  %v9258_v26 = vsel %vm499_vm1, %v500_v59, %v498_v51 }
 0x234   : > { %15562 = vst [vmem:[#allocation278_spill] sm:$0xff] %v9234_v4  ;;  %v6860_v21 = vpop.eup %6859  ;;  %15563 = vst [vmem:[#allocation279_spill] sm:$0xff] %v9258_v26  ;;  %v491_v55 = vsel %vm490_vm2, %v9067_v6, %v489_v34  ;;  %v352_v53 = vmul.f32 %v8215_v3, %v8215_v3  ;;  %v385_v48 = vmul.f32 %v8899_v23, %v8899_v23  ;;  %6865 = vrsqrt.f32 %v9237_v50 }
 0x235   : > { %v9272_v28 = vadd.f32 %v382_v8, %v349_v10  ;;  %v351_v49 = vmul.f32 %v8194_v30, %v8194_v30  ;;  %v384_v59 = vmul.f32 %v8883_v12, %v8883_v12  ;;  %v510_v51 = vmul.f32 %v6854_v47, %v9114_v42 }
 0x236   : > { %v9267_v45 = vpop.permute.xlu1 %2190  ;;  %v503_v3 = vmul.f32 %v6856_v27, %v9119_v44  ;;  %vm518_vm10 = vcmp.eq.f32.partialorder %v9131_v7, inf  ;;  %vm520_vm11 = vcmp.eq.f32.partialorder %v9131_v7, 0.0  ;;  %v9288_v30 = vsel %vm492_vm3, %v493_v56, %v491_v55  ;;  %v6862_v8 = vpop.eup %6861 }
 0x237   : > { %15564 = vst [vmem:[#allocation280_spill] sm:$0xff] %v9267_v45  ;;  %v9269_v1 = vpop.permute.xlu0 %2188  ;;  %2644 = vrot.lane.b32.xlu1 %v9075_v25, %s7073_s10  ;;  %2642 = vrot.lane.b32.xlu0 %v9088_v31, %s7073_s10  ;;  %15566 = vst [vmem:[#allocation282_spill] sm:$0xff] %v9288_v30  ;;  %v524_v34 = vmul.f32 %v6858_v58, %v9128_v0  ;;  %v517_v47 = vmul.f32 %v6860_v21, %v9131_v7  ;;  %v521_v10 = vand.u32 2147483648, %v9131_v7 }
 0x238   : > { %15565 = vst [vmem:[#allocation281_spill] sm:$0xff] %v9269_v1  ;;  %v9295_v27 = vmul.f32 %v9038_v61, %v9258_v26  ;;  %vm539_vm12 = vcmp.eq.f32.partialorder %v9162_v20, inf  ;;  %vm541_vm13 = vcmp.eq.f32.partialorder %v9162_v20, 0.0  ;;  %v9299_v25 = vadd.f32 %v385_v48, %v352_v53  ;;  %v6973_v1 = vld [vmem:[%s7139_s9 + $0xd0] sm:$0xff] }
 0x239   : > { %6867 = vrsqrt.f32 %v9272_v28  ;;  %v9306_v56 = vadd.f32 %v384_v59, %v351_v49  ;;  %v354_v58 = vmul.f32 %v8231_v41, %v8231_v41  ;;  %v387_v21 = vmul.f32 %v8914_v62, %v8914_v62 }
 0x23a   : > { %v9301_v6 = vpop.permute.xlu1 %2194  ;;  %v9314_v55 = vmul.f32 %v9038_v61, %v9288_v30  ;;  %v512_v53 = vsel %vm511_vm4, %v9114_v42, %v510_v51  ;;  %v505_v48 = vsel %vm504_vm6, %v9119_v44, %v503_v3  ;;  %v542_v49 = vand.u32 2147483648, %v9162_v20  ;;  %v6864_v59 = vpop.eup %6863 }
 0x23b   : > { %15567 = vst [vmem:[#allocation283_spill] sm:$0xff] %v9301_v6  ;;  %v9303_v31 = vpop.permute.xlu0 %2192  ;;  %2648 = vrot.lane.b32.xlu1 %v9182_v13, %s7073_s10  ;;  %2646 = vrot.lane.b32.xlu0 %v9186_v40, %s7073_s10  ;;  %v526_v41 = vsel %vm525_vm8, %v9128_v0, %v524_v34  ;;  %v519_v51 = vsel %vm518_vm10, %v9131_v7, %v517_v47  ;;  %vm532_vm14 = vcmp.eq.f32.partialorder %v9196_v22, inf  ;;  %vm534_vm15 = vcmp.eq.f32.partialorder %v9196_v22, 0.0 }
 0x23c   : > { %15568 = vst [vmem:[#allocation284_spill] sm:$0xff] %v9303_v31  ;;  %v538_v6 = vmul.f32 %v6862_v8, %v9162_v20  ;;  %6869 = vrsqrt.f32 %v9299_v25  ;;  %v353_v13 = vmul.f32 %v15481_v43, %v15481_v43  ;;  %v386_v40 = vmul.f32 %v8894_v54, %v8894_v54 }
 0x23d   : > { %v9347_v47 = vsel %vm513_vm5, %v514_v33, %v512_v53  ;;  %v535_v8 = vand.u32 2147483648, %v9196_v22  ;;  %6871 = vrsqrt.f32 %v9306_v56  ;;  %v9351_v31 = vadd.f32 %v387_v21, %v354_v58 }
 0x23e   : > { %v9341_v3 = vpop.permute.xlu1 %2198  ;;  %15571 = vst [vmem:[#allocation287_spill] sm:$0xff] %v9347_v47  ;;  %v9355_v43 = vsel %vm506_vm7, %v507_v9, %v505_v48  ;;  %v9363_v42 = vsel %vm520_vm11, %v521_v10, %v519_v51  ;;  %v531_v33 = vmul.f32 %v6864_v59, %v9196_v22  ;;  %v6866_v53 = vpop.eup %6865  ;;  %v540_v44 = vsel %vm539_vm12, %v9162_v20, %v538_v6  ;;  %v6970_v20 = vld [vmem:[%s7139_s9 + $0xc8] sm:$0xff] }
 0x23f   : > { %15569 = vst [vmem:[#allocation285_spill] sm:$0xff] %v9341_v3  ;;  %v9343_v34 = vpop.permute.xlu0 %2196  ;;  %15572 = vst [vmem:[#allocation288_spill] sm:$0xff] %v9355_v43  ;;  %v9359_v3 = vsel %vm527_vm9, %v528_v2, %v526_v41  ;;  %2652 = vrot.lane.b32.xlu1 %v9204_v5, %s7073_s10  ;;  %2650 = vrot.lane.b32.xlu0 %v9208_v14, %s7073_s10  ;;  %vm553_vm0 = vcmp.eq.f32.partialorder %v9237_v50, inf  ;;  %v356_v0 = vmul.f32 %v15483_v15, %v15483_v15  ;;  %v6969_v5 = vld [vmem:[%s7139_s9 + $0xb0] sm:$0xff] }
 0x240   : > { %15570 = vst [vmem:[#allocation286_spill] sm:$0xff] %v9343_v34  ;;  %15573 = vst [vmem:[#allocation289_spill] sm:$0xff] %v9359_v3  ;;  %v389_v7 = vmul.f32 %v8928_v16, %v8928_v16  ;;  %vm555_vm1 = vcmp.eq.f32.partialorder %v9237_v50, 0.0  ;;  %v9379_v9 = vadd.f32 %v386_v40, %v353_v13  ;;  %v355_v2 = vmul.f32 %v6969_v5, %v6969_v5  ;;  %v15579_v34 = vld [vmem:[#allocation247_spill] sm:$0xff] }
 0x241   : > { %15574 = vst [vmem:[#allocation290_spill] sm:$0xff] %v9363_v42  ;;  %v388_v14 = vmul.f32 %v8907_v24, %v8907_v24  ;;  %v2587_v15 = vmul.f32 %v9038_v61, %v9347_v47  ;;  %v2586_v58 = vmul.f32 %v9038_v61, %v9355_v43  ;;  %v9394_v21 = vmul.f32 %v9038_v61, %v9359_v3 }
 0x242   : > { %v9384_v10 = vpop.permute.xlu1 %2202  ;;  %6873 = vrsqrt.f32 %v9351_v31  ;;  %v9399_v48 = vmul.f32 %v9038_v61, %v9363_v42  ;;  %v9403_v59 = vsel %vm541_vm13, %v542_v49, %v540_v44  ;;  %v533_v41 = vsel %vm532_vm14, %v9196_v22, %v531_v33  ;;  %v15578_v44 = vld [vmem:[#allocation251_spill] sm:$0xff] }
 0x243   : > { %15575 = vst [vmem:[#allocation291_spill] sm:$0xff] %v9384_v10  ;;  %v9386_v6 = vpop.permute.xlu0 %2200  ;;  %15577 = vst [vmem:[#allocation293_spill] sm:$0xff] %v9403_v59  ;;  %v552_v51 = vmul.f32 %v6866_v53, %v9237_v50  ;;  %v6868_v13 = vpop.eup %6867  ;;  %2656 = vrot.lane.b32.xlu1 %v9212_v60, %s7073_s10  ;;  %2654 = vrot.lane.b32.xlu0 %v9225_v37, %s7073_s10  ;;  %v556_v40 = vand.u32 2147483648, %v9237_v50  ;;  %v9414_v5 = vadd.f32 %v389_v7, %v356_v0  ;;  %v6971_v53 = vld [vmem:[%s7139_s9 + $0xc0] sm:$0xff] }
 0x244   : > { %15576 = vst [vmem:[#allocation292_spill] sm:$0xff] %v9386_v6  ;;  %v358_v49 = vmul.f32 %v6970_v20, %v6970_v20  ;;  %v391_v10 = vmul.f32 %v15578_v44, %v15578_v44  ;;  %6875 = vrsqrt.f32 %v9379_v9  ;;  %v9420_v33 = vadd.f32 %v388_v14, %v355_v2 }
 0x245   : > { %v357_v6 = vmul.f32 %v6971_v53, %v6971_v53  ;;  %v390_v60 = vmul.f32 %v15579_v34, %v15579_v34  ;;  %v9431_v0 = vmul.f32 %v9038_v61, %v9403_v59  ;;  %vm546_vm2 = vcmp.eq.f32.partialorder %v9272_v28, inf }
 0x246   : > { %v9425_v45 = vpop.permute.xlu1 %2206  ;;  %vm548_vm3 = vcmp.eq.f32.partialorder %v9272_v28, 0.0  ;;  %v549_v7 = vand.u32 2147483648, %v9272_v28  ;;  %v6870_v2 = vpop.eup %6869  ;;  %v9438_v14 = vsel %vm534_vm15, %v535_v8, %v533_v41  ;;  %v554_v20 = vsel %vm553_vm0, %v9237_v50, %v552_v51  ;;  %v6972_v8 = vld [vmem:[%s7139_s9 + $0xd8] sm:$0xff] }
 0x247   : > { %15580 = vst [vmem:[#allocation251_spill] sm:$0xff] %v9425_v45  ;;  %v9427_v37 = vpop.permute.xlu0 %2204  ;;  %15582 = vst [vmem:[#allocation294_spill] sm:$0xff] %v9438_v14  ;;  %v545_v53 = vmul.f32 %v6868_v13, %v9272_v28  ;;  %vm567_vm4 = vcmp.eq.f32.partialorder %v9299_v25, inf  ;;  %v6872_v45 = vpop.eup %6871  ;;  %2660 = vrot.lane.b32.xlu1 %v9295_v27, %s7073_s10  ;;  %2658 = vrot.lane.b32.xlu0 %v9314_v55, %s7073_s10  ;;  %6877 = vrsqrt.f32 %v9414_v5  ;;  %vm569_vm5 = vcmp.eq.f32.partialorder %v9299_v25, 0.0 }
 0x248   : > { %15581 = vst [vmem:[#allocation247_spill] sm:$0xff] %v9427_v37  ;;  %v9450_v22 = vadd.f32 %v391_v10, %v358_v49  ;;  %v360_v41 = vmul.f32 %v6972_v8, %v6972_v8  ;;  %v15583_v37 = vld [vmem:[#allocation253_spill] sm:$0xff]  ;;  %6879 = vrsqrt.f32 %v9420_v33  ;;  %v9456_v13 = vadd.f32 %v390_v60, %v357_v6 }
 0x249   : > { %v393_v51 = vmul.f32 %v15583_v37, %v15583_v37  ;;  %v359_v4 = vmul.f32 %v6973_v1, %v6973_v1  ;;  %v392_v27 = vmul.f32 %v15584_v17, %v15584_v17  ;;  %v2590_v10 = vmul.f32 %v9038_v61, %v9438_v14 }
 0x24a   : > { %v9461_v55 = vpop.permute.xlu1 %2210  ;;  %v9469_v49 = vsel %vm555_vm1, %v556_v40, %v554_v20  ;;  %v570_v1 = vand.u32 2147483648, %v9299_v25  ;;  %v547_v6 = vsel %vm546_vm2, %v9272_v28, %v545_v53  ;;  %v566_v60 = vmul.f32 %v6870_v2, %v9299_v25  ;;  %v6974_v40 = vld [vmem:[%s7139_s9 + $0xe8] sm:$0xff] }
 0x24b   : > { %15585 = vst [vmem:[#allocation253_spill] sm:$0xff] %v9461_v55  ;;  %v9463_v57 = vpop.permute.xlu0 %2208  ;;  %15587 = vst [vmem:[#allocation295_spill] sm:$0xff] %v9469_v49  ;;  %v559_v8 = vmul.f32 %v6872_v45, %v9306_v56  ;;  %vm560_vm6 = vcmp.eq.f32.partialorder %v9306_v56, inf  ;;  %2664 = vrot.lane.b32.xlu1 %v2587_v15, %s7073_s10  ;;  %2662 = vrot.lane.b32.xlu0 %v2586_v58, %s7073_s10  ;;  %6881 = vrsqrt.f32 %v9450_v22  ;;  %v6975_v45 = vld [vmem:[%s7139_s9 + $0xe0] sm:$0xff]  ;;  %vm562_vm7 = vcmp.eq.f32.partialorder %v9306_v56, 0.0 }
 0x24c   : > { %15586 = vst [vmem:[#allocation250_spill] sm:$0xff] %v9463_v57  ;;  %v6874_v55 = vpop.eup %6873  ;;  %v9482_v50 = vadd.f32 %v393_v51, %v360_v41  ;;  %v362_v20 = vmul.f32 %v6974_v40, %v6974_v40  ;;  %v15588_v57 = vld [vmem:[#allocation257_spill] sm:$0xff]  ;;  %6883 = vrsqrt.f32 %v9456_v13  ;;  %v9488_v2 = vadd.f32 %v392_v27, %v359_v4 }
 0x24d   : > { %v395_v53 = vmul.f32 %v15588_v57, %v15588_v57  ;;  %v361_v18 = vmul.f32 %v6975_v45, %v6975_v45  ;;  %v394_v15 = vmul.f32 %v15589_v11, %v15589_v11  ;;  %v2593_v41 = vmul.f32 %v9038_v61, %v9469_v49  ;;  %v15594_v49 = vld [vmem:[#allocation254_spill] sm:$0xff] }
 0x24e   : > { %v9493_v58 = vpop.permute.xlu1 %2214  ;;  %v563_v51 = vand.u32 2147483648, %v9306_v56  ;;  %vm581_vm8 = vcmp.eq.f32.partialorder %v9351_v31, inf  ;;  %v6876_v4 = vpop.eup %6875  ;;  %v9504_v27 = vsel %vm548_vm3, %v549_v7, %v547_v6  ;;  %v568_v40 = vsel %vm567_vm4, %v9299_v25, %v566_v60  ;;  %v6976_v7 = vld [vmem:[%s7139_s9 + $0xf8] sm:$0xff] }
 0x24f   : > { %15590 = vst [vmem:[#allocation257_spill] sm:$0xff] %v9493_v58  ;;  %v9495_v46 = vpop.permute.xlu0 %2212  ;;  %15592 = vst [vmem:[#allocation296_spill] sm:$0xff] %v9504_v27  ;;  %v561_v45 = vsel %vm560_vm6, %v9306_v56, %v559_v8  ;;  %v580_v58 = vmul.f32 %v6874_v55, %v9351_v31  ;;  %2668 = vrot.lane.b32.xlu1 %v9394_v21, %s7073_s10  ;;  %2666 = vrot.lane.b32.xlu0 %v9399_v48, %s7073_s10  ;;  %6885 = vrsqrt.f32 %v9482_v50  ;;  %v6977_v55 = vld [vmem:[%s7139_s9 + $0xf0] sm:$0xff] }
 0x250   : > { %15591 = vst [vmem:[#allocation252_spill] sm:$0xff] %v9495_v46  ;;  %v9518_v28 = vadd.f32 %v395_v53, %v362_v20  ;;  %v364_v6 = vmul.f32 %v6976_v7, %v6976_v7  ;;  %v15593_v46 = vld [vmem:[#allocation259_spill] sm:$0xff]  ;;  %6887 = vrsqrt.f32 %v9488_v2  ;;  %v9524_v8 = vadd.f32 %v394_v15, %v361_v18 }
 0x251   : > { %v397_v60 = vmul.f32 %v15593_v46, %v15593_v46  ;;  %v363_v52 = vmul.f32 %v6977_v55, %v6977_v55  ;;  %v396_v21 = vmul.f32 %v15594_v49, %v15594_v49  ;;  %v6878_v59 = vpop.eup %6877  ;;  %v2592_v20 = vmul.f32 %v9038_v61, %v9504_v27  ;;  %v15689_v27 = vld [vmem:[#allocation41_spill] sm:$0xff] }
 0x252   : > { %v9529_v48 = vpop.permute.xlu1 %2218  ;;  %vm583_vm9 = vcmp.eq.f32.partialorder %v9351_v31, 0.0  ;;  %v584_v53 = vand.u32 2147483648, %v9351_v31  ;;  %v573_v18 = vmul.f32 %v6876_v4, %v9379_v9  ;;  %v6880_v15 = vpop.eup %6879  ;;  %v9540_v7 = vsel %vm569_vm5, %v570_v1, %v568_v40  ;;  %v6978_v40 = vld [vmem:[%s7139_s9 + $0x100] sm:$0x1] }
 0x253   : > { %15595 = vst [vmem:[#allocation259_spill] sm:$0xff] %v9529_v48  ;;  %v9531_v3 = vpop.permute.xlu0 %2216  ;;  %15597 = vst [vmem:[#allocation297_spill] sm:$0xff] %v9540_v7  ;;  %vm574_vm10 = vcmp.eq.f32.partialorder %v9379_v9, inf  ;;  %vm576_vm11 = vcmp.eq.f32.partialorder %v9379_v9, 0.0  ;;  %v577_v55 = vand.u32 2147483648, %v9379_v9  ;;  %2672 = vrot.lane.b32.xlu1 %v9431_v0, %s7073_s10  ;;  %2670 = vrot.lane.b32.xlu0 %v2590_v10, %s7073_s10  ;;  %v9550_v48 = vsel %vm562_vm7, %v563_v51, %v561_v45 }
 0x254   : > { %15596 = vst [vmem:[#allocation254_spill] sm:$0xff] %v9531_v3  ;;  %15598 = vst [vmem:[#allocation298_spill] sm:$0xff] %v9550_v48  ;;  %v582_v25 = vsel %vm581_vm8, %v9351_v31, %v580_v58  ;;  %6889 = vrsqrt.f32 %v9518_v28  ;;  %v9556_v1 = vadd.f32 %v397_v60, %v364_v6  ;;  %v9559_v4 = vadd.f32 %v396_v21, %v363_v52  ;;  %v15599_v3 = vld [vmem:[#allocation258_spill] sm:$0xff] }
 0x255   : > { %6891 = vrsqrt.f32 %v9524_v8  ;;  %v365_v0 = vmul.f32 %v6978_v40, %v6978_v40  ;;  %v398_v10 = vmul.f32 %v15599_v3, %v15599_v3  ;;  %v6882_v56 = vpop.eup %6881  ;;  %v575_v58 = vsel %vm574_vm10, %v9379_v9, %v573_v18 }
 0x256   : > { %v9564_v51 = vpop.permute.xlu1 %2222  ;;  %v594_v6 = vmul.f32 %v6878_v59, %v9414_v5  ;;  %vm595_vm12 = vcmp.eq.f32.partialorder %v9414_v5, inf  ;;  %v587_v52 = vmul.f32 %v6880_v15, %v9420_v33  ;;  %v6884_v60 = vpop.eup %6883  ;;  %v2595_v21 = vmul.f32 %v9038_v61, %v9540_v7  ;;  %v15606_v7 = vld [vmem:[#allocation221_spill] sm:$0xff] }
 0x257   : > { %15600 = vst [vmem:[#allocation258_spill] sm:$0xff] %v9564_v51  ;;  %v9566_v45 = vpop.permute.xlu0 %2220  ;;  %vm597_vm13 = vcmp.eq.f32.partialorder %v9414_v5, 0.0  ;;  %v598_v40 = vand.u32 2147483648, %v9414_v5  ;;  %vm588_vm14 = vcmp.eq.f32.partialorder %v9420_v33, inf  ;;  %2676 = vrot.lane.b32.xlu1 %v2593_v41, %s7073_s10  ;;  %2674 = vrot.lane.b32.xlu0 %v2592_v20, %s7073_s10  ;;  %v2594_v59 = vmul.f32 %v9038_v61, %v9550_v48 }
 0x258   : > { %15601 = vst [vmem:[#allocation299_spill] sm:$0xff] %v9566_v45  ;;  %v9585_v18 = vsel %vm583_vm9, %v584_v53, %v582_v25  ;;  %vm590_vm15 = vcmp.eq.f32.partialorder %v9420_v33, 0.0  ;;  %6893 = vrsqrt.f32 %v9556_v1  ;;  %v9591_v15 = vsel %vm576_vm11, %v577_v55, %v575_v58 }
 0x259   : > { %15602 = vst [vmem:[#allocation300_spill] sm:$0xff] %v9585_v18  ;;  %15603 = vst [vmem:[#allocation301_spill] sm:$0xff] %v9591_v15  ;;  %v591_v51 = vand.u32 2147483648, %v9420_v33  ;;  %6895 = vrsqrt.f32 %v9559_v4  ;;  %v9595_v41 = vadd.f32 %v398_v10, %v365_v0  ;;  %v6886_v20 = vpop.eup %6885  ;;  %v596_v53 = vsel %vm595_vm12, %v9414_v5, %v594_v6 }
 0x25a   : > { %v9597_v45 = vpop.permute.xlu1 %2226  ;;  %v589_v25 = vsel %vm588_vm14, %v9420_v33, %v587_v52  ;;  %v608_v9 = vmul.f32 %v6882_v56, %v9450_v22  ;;  %v601_v55 = vmul.f32 %v6884_v60, %v9456_v13  ;;  %v6888_v58 = vpop.eup %6887  ;;  %v9609_v0 = vmul.f32 %v8883_v12, %v15606_v7 }
 0x25b   : > { %15604 = vst [vmem:[#allocation302_spill] sm:$0xff] %v9597_v45  ;;  %v9599_v31 = vpop.permute.xlu0 %2224  ;;  %v2597_v10 = vmul.f32 %v9038_v61, %v9585_v18  ;;  %vm609_vm0 = vcmp.eq.f32.partialorder %v9450_v22, inf  ;;  %vm602_vm1 = vcmp.eq.f32.partialorder %v9456_v13, inf  ;;  %2680 = vrot.lane.b32.xlu1 %v2595_v21, %s7073_s10  ;;  %2678 = vrot.lane.b32.xlu0 %v2594_v59, %s7073_s10  ;;  %v2596_v56 = vmul.f32 %v9038_v61, %v9591_v15 }
 0x25c   : > { %15605 = vst [vmem:[#allocation303_spill] sm:$0xff] %v9599_v31  ;;  %vm611_vm2 = vcmp.eq.f32.partialorder %v9450_v22, 0.0  ;;  %v612_v6 = vand.u32 2147483648, %v9450_v22  ;;  %vm604_vm3 = vcmp.eq.f32.partialorder %v9456_v13, 0.0  ;;  %v9624_v12 = vsel %vm597_vm13, %v598_v40, %v596_v53 }
 0x25d   : > { %15607 = vst [vmem:[#allocation221_spill] sm:$0xff] %v9624_v12  ;;  %v9628_v52 = vsel %vm590_vm15, %v591_v51, %v589_v25  ;;  %v605_v60 = vand.u32 2147483648, %v9456_v13  ;;  %6897 = vrsqrt.f32 %v9595_v41  ;;  %v610_v31 = vsel %vm609_vm0, %v9450_v22, %v608_v9 }
 0x25e   : > { %15608 = vst [vmem:[#allocation304_spill] sm:$0xff] %v9628_v52  ;;  %v6890_v21 = vpop.eup %6889  ;;  %v9632_v59 = vpop.permute.xlu1 %2230  ;;  %v603_v18 = vsel %vm602_vm1, %v9456_v13, %v601_v55  ;;  %v622_v5 = vmul.f32 %v6886_v20, %v9482_v50  ;;  %v615_v40 = vmul.f32 %v6888_v58, %v9488_v2  ;;  %v9642_v51 = vmul.f32 %v8899_v23, %v15606_v7 }
 0x25f   : > { %15609 = vst [vmem:[#allocation305_spill] sm:$0xff] %v9632_v59  ;;  %v9634_v45 = vpop.permute.xlu0 %2228  ;;  %v6892_v33 = vpop.eup %6891  ;;  %v9646_v53 = vmul.f32 %v8894_v54, %v15606_v7  ;;  %vm623_vm4 = vcmp.eq.f32.partialorder %v9482_v50, inf  ;;  %vm616_vm5 = vcmp.eq.f32.partialorder %v9488_v2, inf  ;;  %2684 = vrot.lane.b32.xlu1 %v2597_v10, %s7073_s10  ;;  %2682 = vrot.lane.b32.xlu0 %v2596_v56, %s7073_s10  ;;  %v2599_v20 = vmul.f32 %v9038_v61, %v9624_v12 }
 0x260   : > { %15610 = vst [vmem:[#allocation306_spill] sm:$0xff] %v9634_v45  ;;  %v2598_v25 = vmul.f32 %v9038_v61, %v9628_v52  ;;  %vm625_vm6 = vcmp.eq.f32.partialorder %v9482_v50, 0.0  ;;  %v626_v23 = vand.u32 2147483648, %v9482_v50  ;;  %v9660_v54 = vsel %vm611_vm2, %v612_v6, %v610_v31 }
 0x261   : > { %15611 = vst [vmem:[#allocation307_spill] sm:$0xff] %v9660_v54  ;;  %v9664_v9 = vsel %vm604_vm3, %v605_v60, %v603_v18  ;;  %vm618_vm7 = vcmp.eq.f32.partialorder %v9488_v2, 0.0  ;;  %v619_v55 = vand.u32 2147483648, %v9488_v2  ;;  %v624_v59 = vsel %vm623_vm4, %v9482_v50, %v622_v5 }
 0x262   : > { %15612 = vst [vmem:[#allocation308_spill] sm:$0xff] %v9664_v9  ;;  %v6894_v58 = vpop.eup %6893  ;;  %v9668_v10 = vpop.permute.xlu1 %2234  ;;  %v617_v45 = vsel %vm616_vm5, %v9488_v2, %v615_v40  ;;  %v636_v22 = vmul.f32 %v6890_v21, %v9518_v28  ;;  %v629_v31 = vmul.f32 %v6892_v33, %v9524_v8  ;;  %v9678_v18 = vmul.f32 %v8914_v62, %v15606_v7 }
 0x263   : > { %15613 = vst [vmem:[#allocation309_spill] sm:$0xff] %v9668_v10  ;;  %v9670_v56 = vpop.permute.xlu0 %2232  ;;  %v6896_v13 = vpop.eup %6895  ;;  %v9682_v6 = vmul.f32 %v8907_v24, %v15606_v7  ;;  %vm637_vm8 = vcmp.eq.f32.partialorder %v9518_v28, inf  ;;  %vm630_vm9 = vcmp.eq.f32.partialorder %v9524_v8, inf  ;;  %2688 = vrot.lane.b32.xlu1 %v2599_v20, %s7073_s10  ;;  %2686 = vrot.lane.b32.xlu0 %v2598_v25, %s7073_s10  ;;  %v2601_v60 = vmul.f32 %v9038_v61, %v9660_v54  ;;  %v15655_v54 = vld [vmem:[#allocation26_spill] sm:$0xff] }
 0x264   : > { %15614 = vst [vmem:[#allocation310_spill] sm:$0xff] %v9670_v56  ;;  %v2600_v21 = vmul.f32 %v9038_v61, %v9664_v9  ;;  %vm639_vm10 = vcmp.eq.f32.partialorder %v9518_v28, 0.0  ;;  %v640_v62 = vand.u32 2147483648, %v9518_v28  ;;  %v9696_v24 = vsel %vm625_vm6, %v626_v23, %v624_v59  ;;  %v15663_v9 = vld [vmem:[#allocation29_spill] sm:$0xff] }
 0x265   : > { %15615 = vst [vmem:[#allocation311_spill] sm:$0xff] %v9696_v24  ;;  %v9700_v5 = vsel %vm618_vm7, %v619_v55, %v617_v45  ;;  %vm632_vm11 = vcmp.eq.f32.partialorder %v9524_v8, 0.0  ;;  %v633_v40 = vand.u32 2147483648, %v9524_v8  ;;  %v638_v25 = vsel %vm637_vm8, %v9518_v28, %v636_v22 }
 0x266   : > { %15616 = vst [vmem:[#allocation312_spill] sm:$0xff] %v9700_v5  ;;  %v9704_v33 = vpop.permute.xlu1 %2372  ;;  %v631_v10 = vsel %vm630_vm9, %v9524_v8, %v629_v31  ;;  %v650_v50 = vmul.f32 %v6894_v58, %v9556_v1  ;;  %v643_v59 = vmul.f32 %v6896_v13, %v9559_v4  ;;  %v9714_v2 = vmul.f32 %v8928_v16, %v15606_v7 }
 0x267   : > { %15617 = vst [vmem:[#allocation313_spill] sm:$0xff] %v9704_v33  ;;  %v9706_v20 = vpop.permute.xlu0 %2236  ;;  %v6898_v23 = vpop.eup %6897  ;;  %v9718_v45 = vmul.f32 %v15579_v34, %v15606_v7  ;;  %vm651_vm12 = vcmp.eq.f32.partialorder %v9556_v1, inf  ;;  %vm644_vm13 = vcmp.eq.f32.partialorder %v9559_v4, inf  ;;  %v9724_v55 = vmul.f32 %v15578_v44, %v15606_v7  ;;  %2692 = vrot.lane.b32.xlu1 %v2601_v60, %s7073_s10  ;;  %2690 = vrot.lane.b32.xlu0 %v2600_v21, %s7073_s10 }
 0x268   : > { %15618 = vst [vmem:[#allocation314_spill] sm:$0xff] %v9706_v20  ;;  %v2603_v16 = vmul.f32 %v9038_v61, %v9696_v24  ;;  %v2602_v58 = vmul.f32 %v9038_v61, %v9700_v5  ;;  %vm653_vm14 = vcmp.eq.f32.partialorder %v9556_v1, 0.0  ;;  %v9735_v34 = vsel %vm639_vm10, %v640_v62, %v638_v25  ;;  %v15634_v20 = vld [vmem:[#allocation18_spill] sm:$0xff] }
 0x269   : > { %15619 = vst [vmem:[#allocation315_spill] sm:$0xff] %v9718_v45  ;;  %15620 = vst [vmem:[#allocation316_spill] sm:$0xff] %v9735_v34  ;;  %v9739_v44 = vsel %vm632_vm11, %v633_v40, %v631_v10  ;;  %v654_v22 = vand.u32 2147483648, %v9556_v1  ;;  %v647_v31 = vand.u32 2147483648, %v9559_v4  ;;  %v652_v21 = vsel %vm651_vm12, %v9556_v1, %v650_v50  ;;  %v15637_v1 = vld [vmem:[#allocation196_spill] sm:$0xff] }
 0x26a   : > { %15621 = vst [vmem:[#allocation317_spill] sm:$0xff] %v9739_v44  ;;  %v9745_v13 = vpop.permute.xlu1 %2376  ;;  %v645_v28 = vsel %vm644_vm13, %v9559_v4, %v643_v59  ;;  %vm646_vm15 = vcmp.eq.f32.partialorder %v9559_v4, 0.0  ;;  %v657_v8 = vmul.f32 %v6898_v23, %v9595_v41  ;;  %v9755_v10 = vmul.f32 %v15583_v37, %v15606_v7  ;;  %v15631_v59 = vld [vmem:[#allocation194_spill] sm:$0xff]  ;;  %v15632_v23 = vld [vmem:[#allocation17_spill] sm:$0xff]  ;;  %v15716_v45 = vld [vmem:[#allocation224_spill] sm:$0xff] }
 0x26b   : > { %15622 = vst [vmem:[#allocation318_spill] sm:$0xff] %v9745_v13  ;;  %v9747_v60 = vpop.permute.xlu0 %2374  ;;  %v9759_v62 = vmul.f32 %v15584_v17, %v15606_v7  ;;  %v9763_v40 = vmul.f32 %v15589_v11, %v15606_v7  ;;  %vm658_vm0 = vcmp.eq.f32.partialorder %v9595_v41, inf  ;;  %v9768_v25 = vmul.f32 %v15588_v57, %v15606_v7  ;;  %2696 = vrot.lane.b32.xlu1 %v2603_v16, %s7073_s10 }
 0x26c   : > { %15623 = vst [vmem:[#allocation319_spill] sm:$0xff] %v9747_v60  ;;  %15624 = vst [vmem:[#allocation320_spill] sm:$0xff] %v9755_v10  ;;  %2694 = vrot.lane.b32.xlu0 %v2602_v58, %s7073_s10  ;;  %v2605_v37 = vmul.f32 %v9038_v61, %v9735_v34  ;;  %v2604_v17 = vmul.f32 %v9038_v61, %v9739_v44  ;;  %v9778_v11 = vmul.f32 %v15594_v49, %v15606_v7  ;;  %v15633_v58 = vld [vmem:[#allocation195_spill] sm:$0xff]  ;;  %vm3479_vm2 = vcmask 113664  }
 0x26d   : > { %15625 = vst [vmem:[#allocation321_spill] sm:$0xff] %v9759_v62  ;;  %15626 = vst [vmem:[#allocation322_spill] sm:$0xff] %v9763_v40  ;;  %v9782_v4 = vsel %vm653_vm14, %v654_v22, %v652_v21  ;;  %v9784_v57 = vsel %vm646_vm15, %v647_v31, %v645_v28  ;;  %v661_v50 = vand.u32 2147483648, %v9595_v41  ;;  %v867_v16 = vadd.f32 %v15632_v23, %v15631_v59  ;;  %v15638_v22 = vld [vmem:[#allocation19_spill] sm:$0xff]  ;;  %v15639_v21 = vld [vmem:[#allocation197_spill] sm:$0xff] }
 0x26e   : > { %15627 = vst [vmem:[#allocation323_spill] sm:$0xff] %v9768_v25  ;;  %15628 = vst [vmem:[#allocation324_spill] sm:$0xff] %v9778_v11  ;;  %v865_v56 = vadd.f32 %v15634_v20, %v15633_v58  ;;  %v9791_v34 = vpop.permute.xlu1 %2380  ;;  %v659_v49 = vsel %vm658_vm0, %v9595_v41, %v657_v8  ;;  %vm660_vm1 = vcmp.eq.f32.partialorder %v9595_v41, 0.0  ;;  %v868_v31 = vadd.f32 %v15638_v22, %v15637_v1  ;;  %v15640_v28 = vld [vmem:[#allocation20_spill] sm:$0xff]  ;;  %v15643_v23 = vld [vmem:[#allocation198_spill] sm:$0xff] }
 0x26f   : > { %15629 = vst [vmem:[#allocation325_spill] sm:$0xff] %v9782_v4  ;;  %15630 = vst [vmem:[#allocation326_spill] sm:$0xff] %v9784_v57  ;;  %v9793_v24 = vpop.permute.xlu0 %2378  ;;  %v866_v11 = vadd.f32 %v15640_v28, %v15639_v21  ;;  %v9803_v59 = vmul.f32 %v15593_v46, %v15606_v7  ;;  %v9807_v20 = vmul.f32 %v15599_v3, %v15606_v7  ;;  %v15644_v58 = vld [vmem:[#allocation21_spill] sm:$0xff]  ;;  %2700 = vrot.lane.b32.xlu1 %v2605_v37, %s7073_s10  ;;  %v15645_v1 = vld [vmem:[#allocation199_spill] sm:$0xff]  ;;  %vm3543_vm3 = vcmask 106496  }
 0x270   : > { %15635 = vst [vmem:[#allocation194_spill] sm:$0xff] %v9791_v34  ;;  %15636 = vst [vmem:[#allocation17_spill] sm:$0xff] %v9793_v24  ;;  %v870_v44 = vadd.f32 %v15644_v58, %v15643_v23  ;;  %2698 = vrot.lane.b32.xlu0 %v2604_v17, %s7073_s10  ;;  %v2607_v41 = vmul.f32 %v9038_v61, %v9782_v4  ;;  %v2606_v8 = vmul.f32 %v9038_v61, %v9784_v57  ;;  %v15646_v46 = vld [vmem:[#allocation22_spill] sm:$0xff]  ;;  %v15647_v21 = vld [vmem:[#allocation200_spill] sm:$0xff] }
 0x271   : > { %15641 = vst [vmem:[#allocation195_spill] sm:$0xff] %v9803_v59  ;;  %15642 = vst [vmem:[#allocation18_spill] sm:$0xff] %v9807_v20  ;;  %v869_v22 = vadd.f32 %v15646_v46, %v15645_v1  ;;  %v15648_v28 = vld [vmem:[#allocation23_spill] sm:$0xff]  ;;  %v9822_v7 = vstv %s9743_s24  ;;  %v9824_v20 = vsel %vm660_vm1, %v661_v50, %v659_v49  ;;  %v15650_v23 = vld [vmem:[#allocation201_spill] sm:$0xff] }
 0x272   : > { %v872_v3 = vadd.f32 %v15648_v28, %v15647_v21  ;;  %15649 = vst [vmem:[#allocation196_spill] sm:$0xff] %v9824_v20  ;;  %v15651_v37 = vld [vmem:[#allocation24_spill] sm:$0xff]  ;;  %v15652_v17 = vld [vmem:[#allocation202_spill] sm:$0xff]  ;;  %v15653_v59 = vld [vmem:[#allocation25_spill] sm:$0xff]  ;;  %v9834_v1 = vpop.permute.xlu1 %2384 }
 0x273   : > { %v871_v58 = vadd.f32 %v15651_v37, %v15650_v23  ;;  %v874_v34 = vadd.f32 %v15653_v59, %v15652_v17  ;;  %v15654_v4 = vld [vmem:[#allocation203_spill] sm:$0xff]  ;;  %v15656_v57 = vld [vmem:[#allocation204_spill] sm:$0xff]  ;;  %15658 = vst [vmem:[#allocation19_spill] sm:$0xff] %v9834_v1  ;;  %v9836_v46 = vpop.permute.xlu0 %2382  ;;  %v15664_v23 = vld [vmem:[#allocation209_spill] sm:$0xff]  ;;  %2704 = vrot.lane.b32.xlu1 %v2607_v41, %s7073_s10 }
 0x274   : > { %v873_v5 = vadd.f32 %v15655_v54, %v15654_v4  ;;  %v15657_v24 = vld [vmem:[#allocation27_spill] sm:$0xff]  ;;  %15659 = vst [vmem:[#allocation197_spill] sm:$0xff] %v9836_v46  ;;  %v15661_v28 = vld [vmem:[#allocation28_spill] sm:$0xff]  ;;  %v15665_v37 = vld [vmem:[#allocation30_spill] sm:$0xff]  ;;  %2702 = vrot.lane.b32.xlu0 %v2606_v8, %s7073_s10 }
 0x275   : > { %v876_v12 = vadd.f32 %v15657_v24, %v15656_v57  ;;  %v15660_v21 = vld [vmem:[#allocation207_spill] sm:$0xff]  ;;  %v15662_v49 = vld [vmem:[#allocation208_spill] sm:$0xff]  ;;  %v877_v52 = vadd.f32 %v15665_v37, %v15664_v23  ;;  %v15666_v59 = vld [vmem:[#allocation210_spill] sm:$0xff]  ;;  %v2776_v24 = vmul.f32 %v9822_v7, %v9050_v63  ;;  %v2608_v57 = vmul.f32 %v9038_v61, %v9824_v20 }
 0x276   : > { %v875_v50 = vadd.f32 %v15661_v28, %v15660_v21  ;;  %v878_v13 = vadd.f32 %v15663_v9, %v15662_v49  ;;  %v15667_v17 = vld [vmem:[#allocation31_spill] sm:$0xff]  ;;  %v15669_v4 = vld [vmem:[#allocation32_spill] sm:$0xff]  ;;  %v15671_v21 = vld [vmem:[#allocation33_spill] sm:$0xff] }
 0x277   : > { %v880_v33 = vadd.f32 %v15667_v17, %v15666_v59  ;;  %v15668_v54 = vld [vmem:[#allocation211_spill] sm:$0xff]  ;;  %v15670_v9 = vld [vmem:[#allocation212_spill] sm:$0xff]  ;;  %v15672_v49 = vld [vmem:[#allocation213_spill] sm:$0xff]  ;;  %2842 = vrot.lane.b32.xlu1 %v2776_v24, %s7074_s12 }
 0x278   : > { %v879_v60 = vadd.f32 %v15669_v4, %v15668_v54  ;;  %v9856_v28 = vadd.f32 %v15671_v21, %v15670_v9  ;;  %v15673_v23 = vld [vmem:[#allocation34_spill] sm:$0xff]  ;;  %v15675_v17 = vld [vmem:[#allocation35_spill] sm:$0xff]  ;;  %v15677_v4 = vld [vmem:[#allocation36_spill] sm:$0xff]  ;;  %2706 = vrot.lane.b32.xlu0 %v2608_v57, %s7073_s10 }
 0x279   : > { %v881_v37 = vadd.f32 %v15673_v23, %v15672_v49  ;;  %v15674_v59 = vld [vmem:[#allocation214_spill] sm:$0xff]  ;;  %v15676_v41 = vld [vmem:[#allocation215_spill] sm:$0xff]  ;;  %v15679_v63 = vld [vmem:[#allocation37_spill] sm:$0xff] }
 0x27a   : > { %v9862_v54 = vadd.f32 %v15675_v17, %v15674_v59  ;;  %v9866_v8 = vadd.f32 %v15677_v4, %v15676_v41  ;;  %v15678_v1 = vld [vmem:[#allocation218_spill] sm:$0xff]  ;;  %v15680_v61 = vld [vmem:[#allocation131_spill] sm:$0xff]  ;;  %v15685_v23 = vld [vmem:[#allocation40_spill] sm:$0xff]  ;;  %v9884_v17 = vpop.permute.xlu1 %2388  ;;  %v9886_v41 = vpop.permute.xlu0 %2386 }
 0x27b   : > { %v9870_v46 = vadd.f32 %v15679_v63, %v15678_v1  ;;  %v15681_v20 = vld [vmem:[#allocation38_spill] sm:$0xff]  ;;  %v15683_v21 = vld [vmem:[#allocation39_spill] sm:$0xff]  ;;  %15686 = vst [vmem:[#allocation20_spill] sm:$0xff] %v9884_v17  ;;  %15687 = vst [vmem:[#allocation198_spill] sm:$0xff] %v9886_v41 }
 0x27c   : > { %v9874_v15 = vadd.f32 %v15681_v20, %v15680_v61  ;;  %v15682_v9 = vld [vmem:[#allocation138_spill] sm:$0xff]  ;;  %v15690_v1 = vld [vmem:[#allocation49_spill] sm:$0xff]  ;;  %v15691_v20 = vld [vmem:[#allocation51_spill] sm:$0xff] }
 0x27d   : > { %v9878_v48 = vadd.f32 %v15683_v21, %v15682_v9  ;;  %v15684_v49 = vld [vmem:[#allocation134_spill] sm:$0xff]  ;;  %v1065_v14 = vadd.f32 %v15690_v1, %v865_v56  ;;  %v1067_v61 = vadd.f32 %v15691_v20, %v867_v16  ;;  %v15692_v25 = vld [vmem:[#allocation52_spill] sm:$0xff]  ;;  %v15693_v9 = vld [vmem:[#allocation137_spill] sm:$0xff] }
 0x27e   : > { %v9882_v59 = vadd.f32 %v15685_v23, %v15684_v49  ;;  %v15688_v4 = vld [vmem:[#allocation142_spill] sm:$0xff]  ;;  %v1066_v47 = vadd.f32 %v15692_v25, %v866_v11  ;;  %v2778_v49 = vmul.f32 %v9822_v7, %v9101_v39  ;;  %v15696_v56 = vld [vmem:[#allocation43_spill] sm:$0xff]  ;;  %v15697_v16 = vld [vmem:[#allocation141_spill] sm:$0xff] }
 0x27f   : > { %v9890_v63 = vadd.f32 %v15689_v27, %v15688_v4  ;;  %v15694_v21 = vld [vmem:[#allocation42_spill] sm:$0xff]  ;;  %v2777_v27 = vmul.f32 %v9822_v7, %v9046_v29  ;;  %v15698_v25 = vld [vmem:[#allocation44_spill] sm:$0xff]  ;;  %v15700_v20 = vld [vmem:[#allocation45_spill] sm:$0xff] }
 0x280   : > { %v9897_v42 = vadd.f32 %v15694_v21, %v15693_v9  ;;  %v15695_v23 = vld [vmem:[#allocation146_spill] sm:$0xff]  ;;  %v9911_v11 = vadd.f32 %v15698_v25, %v15697_v16  ;;  %v15702_v21 = vld [vmem:[#allocation145_spill] sm:$0xff]  ;;  %v15705_v29 = vld [vmem:[#allocation47_spill] sm:$0xff]  ;;  %2846 = vrot.lane.b32.xlu1 %v2778_v49, %s7074_s12 }
 0x281   : > { %v9907_v4 = vadd.f32 %v15696_v56, %v15695_v23  ;;  %v15699_v1 = vld [vmem:[#allocation150_spill] sm:$0xff]  ;;  %v15707_v23 = vld [vmem:[#allocation149_spill] sm:$0xff]  ;;  %v15708_v56 = vld [vmem:[#allocation48_spill] sm:$0xff]  ;;  %2844 = vrot.lane.b32.xlu0 %v2777_v27, %s7074_s12 }
 0x282   : > { %v9915_v9 = vadd.f32 %v15700_v20, %v15699_v1  ;;  %v15701_v24 = vld [vmem:[#allocation54_spill] sm:$0xff]  ;;  %v9928_v62 = vadd.f32 %v15708_v56, %v15707_v23  ;;  %v15709_v16 = vld [vmem:[#allocation153_spill] sm:$0xff]  ;;  %v9934_v1 = vpop.permute.xlu1 %2392  ;;  %v9936_v20 = vpop.permute.xlu0 %2390  ;;  %v15719_v23 = vld [vmem:[#allocation56_spill] sm:$0xff] }
 0x283   : > { %v1068_v57 = vadd.f32 %v15701_v24, %v868_v31  ;;  %v15703_v17 = vld [vmem:[#allocation46_spill] sm:$0xff]  ;;  %15712 = vst [vmem:[#allocation22_spill] sm:$0xff] %v9934_v1  ;;  %15713 = vst [vmem:[#allocation200_spill] sm:$0xff] %v9936_v20  ;;  %v15714_v31 = vld [vmem:[#allocation53_spill] sm:$0xff]  ;;  %v1070_v56 = vadd.f32 %v15719_v23, %v870_v44 }
 0x284   : > { %v9920_v39 = vadd.f32 %v15703_v17, %v15702_v21  ;;  %v15704_v41 = vld [vmem:[#allocation222_spill] sm:$0xff]  ;;  %v1069_v24 = vadd.f32 %v15714_v31, %v869_v22  ;;  %v15715_v17 = vld [vmem:[#allocation223_spill] sm:$0xff]  ;;  %v2779_v22 = vmul.f32 %v9822_v7, %v9097_v32  ;;  %v15721_v31 = vld [vmem:[#allocation57_spill] sm:$0xff] }
 0x285   : > { %v9924_v40 = vadd.f32 %v15705_v29, %v15704_v41  ;;  %v15710_v25 = vld [vmem:[#allocation50_spill] sm:$0xff]  ;;  %v9940_v21 = vadd.f32 %v15715_v17, %v1066_v47  ;;  %v9943_v29 = vadd.f32 %v15716_v45, %v1065_v14  ;;  %v15717_v41 = vld [vmem:[#allocation228_spill] sm:$0xff]  ;;  %v15720_v47 = vld [vmem:[#allocation55_spill] sm:$0xff]  ;;  %v1073_v14 = vadd.f32 %v15721_v31, %v873_v5 }
 0x286   : > { %v9932_v10 = vadd.f32 %v15710_v25, %v15709_v16  ;;  %v2780_v16 = vmul.f32 %v9822_v7, %v9174_v35  ;;  %v1071_v25 = vadd.f32 %v15720_v47, %v871_v58  ;;  %v15722_v45 = vld [vmem:[#allocation58_spill] sm:$0xff]  ;;  %v15724_v44 = vld [vmem:[#allocation59_spill] sm:$0xff]  ;;  %v15725_v49 = vld [vmem:[#allocation60_spill] sm:$0xff]  ;;  %v9967_v32 = vpop.permute.xlu0 %2394  ;;  %2848 = vrot.lane.b32.xlu0 %v2779_v22, %s7074_s12 }
 0x287   : > { %15706 = vst [vmem:[#allocation21_spill] sm:$0xff] %v9924_v40  ;;  %v9946_v40 = vadd.f32 %v15717_v41, %v1067_v61  ;;  %v1072_v17 = vadd.f32 %v15722_v45, %v872_v3  ;;  %v15723_v61 = vld [vmem:[#allocation227_spill] sm:$0xff]  ;;  %v1075_v23 = vadd.f32 %v15724_v44, %v875_v50  ;;  %v15726_v27 = vld [vmem:[#allocation61_spill] sm:$0xff]  ;;  %v15727_v20 = vld [vmem:[#allocation62_spill] sm:$0xff] }
 0x288   : > { %15711 = vst [vmem:[#allocation199_spill] sm:$0xff] %v9932_v10  ;;  %v9959_v41 = vadd.f32 %v15723_v61, %v1068_v57  ;;  %v1074_v10 = vadd.f32 %v15725_v49, %v874_v34  ;;  %v1077_v1 = vadd.f32 %v15726_v27, %v877_v52  ;;  %v1076_v35 = vadd.f32 %v15727_v20, %v876_v12  ;;  %v15728_v58 = vld [vmem:[#allocation63_spill] sm:$0xff]  ;;  %v15729_v5 = vld [vmem:[#allocation64_spill] sm:$0xff]  ;;  %v15730_v3 = vld [vmem:[#allocation66_spill] sm:$0xff] }
 0x289   : > { %15718 = vst [vmem:[#allocation23_spill] sm:$0xff] %v9946_v40  ;;  %v9965_v40 = vpop.permute.xlu1 %2396  ;;  %v1079_v47 = vadd.f32 %v15728_v58, %v879_v60  ;;  %v1078_v31 = vadd.f32 %v15729_v5, %v878_v13  ;;  %v1080_v45 = vadd.f32 %v15730_v3, %v880_v33  ;;  %v15731_v57 = vld [vmem:[#allocation229_spill] sm:$0xff]  ;;  %v15732_v50 = vld [vmem:[#allocation230_spill] sm:$0xff]  ;;  %2850 = vrot.lane.b32.xlu1 %v2780_v16, %s7074_s12  ;;  %v15734_v60 = vld [vmem:[#allocation231_spill] sm:$0xff] }
 0x28a   : > { %v9973_v61 = vadd.f32 %v15731_v57, %v1069_v24  ;;  %v9976_v44 = vadd.f32 %v15732_v50, %v1070_v56  ;;  %v2782_v12 = vmul.f32 %v9822_v7, %v9194_v19  ;;  %v2781_v52 = vmul.f32 %v9822_v7, %v9170_v38  ;;  %v15733_v34 = vld [vmem:[#allocation65_spill] sm:$0xff]  ;;  %v15735_v20 = vld [vmem:[#allocation232_spill] sm:$0xff]  ;;  %v15736_v56 = vld [vmem:[#allocation234_spill] sm:$0xff]  ;;  %v10008_v50 = vpop.permute.xlu0 %2398 }
 0x28b   : > { %v1081_v13 = vadd.f32 %v15733_v34, %v881_v37  ;;  %v9986_v33 = vadd.f32 %v15734_v60, %v1072_v17  ;;  %v9989_v24 = vadd.f32 %v15735_v20, %v1071_v25  ;;  %v9992_v49 = vadd.f32 %v15736_v56, %v1073_v14  ;;  %v15737_v16 = vld [vmem:[#allocation233_spill] sm:$0xff]  ;;  %v15738_v22 = vld [vmem:[#allocation238_spill] sm:$0xff]  ;;  %v15739_v5 = vld [vmem:[#allocation235_spill] sm:$0xff] }
 0x28c   : > { %v9995_v27 = vadd.f32 %v15737_v16, %v1074_v10  ;;  %v9998_v58 = vadd.f32 %v15738_v22, %v1076_v35  ;;  %v10001_v3 = vadd.f32 %v15739_v5, %v1075_v23  ;;  %v15740_v57 = vld [vmem:[#allocation240_spill] sm:$0xff]  ;;  %v15743_v34 = vld [vmem:[#allocation239_spill] sm:$0xff]  ;;  %v15744_v10 = vld [vmem:[#allocation242_spill] sm:$0xff]  ;;  %2852 = vrot.lane.b32.xlu0 %v2781_v52, %s7074_s12 }
 0x28d   : > { %v10004_v37 = vadd.f32 %v15740_v57, %v1077_v1  ;;  %v10006_v17 = vpop.permute.xlu1 %2400  ;;  %v15742_v25 = vld [vmem:[#allocation68_spill] sm:$0xff]  ;;  %v10013_v60 = vadd.f32 %v15743_v34, %v1078_v31  ;;  %v10016_v20 = vadd.f32 %v15744_v10, %v1080_v45  ;;  %v15745_v35 = vld [vmem:[#allocation241_spill] sm:$0xff]  ;;  %v15746_v1 = vld [vmem:[#allocation67_spill] sm:$0xff]  ;;  %2854 = vrot.lane.b32.xlu1 %v2782_v12, %s7074_s12  ;;  %v2783_v31 = vmul.f32 %v9822_v7, %v9178_v36 }
 0x28e   : > { %15741 = vst [vmem:[#allocation201_spill] sm:$0xff] %v10006_v17  ;;  %v1082_v14 = vadd.f32 %v15742_v25, %v9856_v28  ;;  %v10019_v56 = vadd.f32 %v15745_v35, %v1079_v47  ;;  %v1083_v23 = vadd.f32 %v15746_v1, %v9866_v8  ;;  %v2784_v28 = vmul.f32 %v9822_v7, %v9288_v30  ;;  %v15747_v45 = vld [vmem:[#allocation69_spill] sm:$0xff]  ;;  %v15748_v47 = vld [vmem:[#allocation70_spill] sm:$0xff]  ;;  %v15749_v5 = vld [vmem:[#allocation72_spill] sm:$0xff] }
 0x28f   : > { %v1085_v16 = vadd.f32 %v15747_v45, %v9874_v15  ;;  %v1084_v22 = vadd.f32 %v15748_v47, %v9862_v54  ;;  %v1086_v57 = vadd.f32 %v15749_v5, %v9870_v46  ;;  %v15750_v8 = vld [vmem:[#allocation243_spill] sm:$0xff]  ;;  %v15752_v34 = vld [vmem:[#allocation73_spill] sm:$0xff]  ;;  %v15753_v35 = vld [vmem:[#allocation74_spill] sm:$0xff]  ;;  %v10050_v54 = vpop.permute.xlu0 %2402 }
 0x290   : > { %v10038_v25 = vadd.f32 %v15750_v8, %v1081_v13  ;;  %v15751_v12 = vld [vmem:[#allocation71_spill] sm:$0xff]  ;;  %v1089_v10 = vadd.f32 %v15752_v34, %v9897_v42  ;;  %v1088_v1 = vadd.f32 %v15753_v35, %v9878_v48  ;;  %v15754_v15 = vld [vmem:[#allocation76_spill] sm:$0xff]  ;;  %15756 = vst [vmem:[#allocation202_spill] sm:$0xff] %v10050_v54  ;;  %v15758_v47 = vld [vmem:[#allocation77_spill] sm:$0xff]  ;;  %v10062_v48 = vadd.f32 %v9609_v0, %v1083_v23 }
 0x291   : > { %v1087_v52 = vadd.f32 %v15751_v12, %v9882_v59  ;;  %v1090_v45 = vadd.f32 %v15754_v15, %v9890_v63  ;;  %v10048_v17 = vpop.permute.xlu1 %2404  ;;  %v15757_v46 = vld [vmem:[#allocation75_spill] sm:$0xff]  ;;  %v1093_v5 = vadd.f32 %v15758_v47, %v9920_v39  ;;  %v15759_v59 = vld [vmem:[#allocation78_spill] sm:$0xff]  ;;  %2858 = vrot.lane.b32.xlu1 %v2784_v28, %s7074_s12  ;;  %2856 = vrot.lane.b32.xlu0 %v2783_v31, %s7074_s12  ;;  %v6990_v54 = vld [vmem:[%s7139_s9 + $0x58] sm:$0xff] }
 0x292   : > { %15755 = vst [vmem:[#allocation24_spill] sm:$0xff] %v10048_v17  ;;  %v1091_v13 = vadd.f32 %v15757_v46, %v9911_v11  ;;  %v1092_v8 = vadd.f32 %v15759_v59, %v9907_v4  ;;  %v15760_v42 = vld [vmem:[#allocation246_spill] sm:$0xff]  ;;  %v2786_v63 = vmul.f32 %v9822_v7, %v9355_v43  ;;  %v2785_v39 = vmul.f32 %v9822_v7, %v9258_v26  ;;  %v15761_v4 = vld [vmem:[#allocation80_spill] sm:$0xff]  ;;  %v15767_v35 = vld [vmem:[#allocation315_spill] sm:$0xff] }
 0x293   : > { %v10059_v12 = vadd.f32 %v15760_v42, %v1082_v14  ;;  %v1094_v11 = vadd.f32 %v15761_v4, %v9915_v9  ;;  %v10075_v14 = vadd.f32 %v9642_v51, %v1084_v22  ;;  %v10078_v0 = vadd.f32 %v9678_v18, %v1086_v57  ;;  %v10097_v22 = vpop.permute.xlu0 %2406  ;;  %v15771_v18 = vld [vmem:[#allocation320_spill] sm:$0xff]  ;;  %v15782_v47 = vld [vmem:[#allocation82_spill] sm:$0xff]  ;;  %v15788_v4 = vld [vmem:[#allocation85_spill] sm:$0xff] }
 0x294   : > { %v10081_v23 = vadd.f32 %v9646_v53, %v1085_v16  ;;  %v10084_v28 = vadd.f32 %v9714_v2, %v1088_v1  ;;  %v10087_v31 = vadd.f32 %v9682_v6, %v1087_v52  ;;  %v10090_v34 = vadd.f32 %v9724_v55, %v1090_v45  ;;  %15770 = vst [vmem:[#allocation208_spill] sm:$0xff] %v10097_v22  ;;  %v15773_v53 = vld [vmem:[#allocation321_spill] sm:$0xff]  ;;  %v15775_v16 = vld [vmem:[#allocation322_spill] sm:$0xff]  ;;  %v15777_v52 = vld [vmem:[#allocation79_spill] sm:$0xff] }
 0x295   : > { %15762 = vst [vmem:[#allocation25_spill] sm:$0xff] %v10078_v0  ;;  %v10093_v9 = vadd.f32 %v15767_v35, %v1089_v10  ;;  %v10095_v51 = vpop.permute.xlu1 %2408  ;;  %v10100_v57 = vadd.f32 %v15771_v18, %v1092_v8  ;;  %v10103_v2 = vadd.f32 %v15773_v53, %v1091_v13  ;;  %v10106_v6 = vadd.f32 %v15775_v16, %v1093_v5  ;;  %v15779_v1 = vld [vmem:[#allocation290_spill] sm:$0xff]  ;;  %v15780_v45 = vld [vmem:[#allocation287_spill] sm:$0xff]  ;;  %v15781_v13 = vld [vmem:[#allocation21_spill] sm:$0xff] }
 0x296   : > { %15763 = vst [vmem:[#allocation203_spill] sm:$0xff] %v10081_v23  ;;  %15764 = vst [vmem:[#allocation26_spill] sm:$0xff] %v10084_v28  ;;  %v10109_v55 = vstv %s10021_s25  ;;  %v10113_v10 = vadd.f32 %v15777_v52, %v9928_v62  ;;  %2862 = vrot.lane.b32.xlu1 %v2786_v63, %s7074_s12  ;;  %2860 = vrot.lane.b32.xlu0 %v2785_v39, %s7074_s12  ;;  %v2788_v15 = vmul.f32 %v9822_v7, %v15779_v1  ;;  %v15784_v62 = vld [vmem:[#allocation83_spill] sm:$0xff]  ;;  %v15785_v8 = vld [vmem:[#allocation84_spill] sm:$0xff]  ;;  %s11946_s25 = sld [smem:[#allocation2 + $0x11]] }
 0x297   : > { %15765 = vst [vmem:[#allocation204_spill] sm:$0xff] %v10087_v31  ;;  %15766 = vst [vmem:[#allocation27_spill] sm:$0xff] %v10090_v34  ;;  %v2787_v46 = vmul.f32 %v9822_v7, %v15780_v45  ;;  %v10125_v5 = vadd.f32 %v15782_v47, %v15781_v13  ;;  %v1334_v59 = vadd.f32 %v15784_v62, %v9940_v21  ;;  %v15786_v63 = vld [vmem:[#allocation323_spill] sm:$0xff]  ;;  %v15790_v53 = vld [vmem:[#allocation86_spill] sm:$0xff] }
 0x298   : > { %15768 = vst [vmem:[#allocation207_spill] sm:$0xff] %v10093_v9  ;;  %15769 = vst [vmem:[#allocation28_spill] sm:$0xff] %v10095_v51  ;;  %v1333_v42 = vadd.f32 %v15785_v8, %v9943_v29  ;;  %v10132_v39 = vadd.f32 %v15786_v63, %v1094_v11  ;;  %v10136_v35 = vadd.f32 %v15788_v4, %v9959_v41  ;;  %v15789_v18 = vld [vmem:[#allocation23_spill] sm:$0xff]  ;;  %v6979_v52 = vld [vmem:[%s7139_s9 + $0x8] sm:$0xff]  ;;  %v10146_v29 = vpop.permute.xlu0 %2410 }
 0x299   : > { %15772 = vst [vmem:[#allocation29_spill] sm:$0xff] %v10100_v57  ;;  %15774 = vst [vmem:[#allocation209_spill] sm:$0xff] %v10103_v2  ;;  %v1335_v16 = vadd.f32 %v15790_v53, %v15789_v18  ;;  %v1604_v13 = vmul.f32 %v6979_v52, %v10109_v55  ;;  %v6980_v21 = vld [vmem:[%s7139_s9] sm:$0xff]  ;;  %v10144_v62 = vpop.permute.xlu1 %2412  ;;  %v15793_v11 = vld [vmem:[#allocation87_spill] sm:$0xff] }
 0x29a   : > { %15776 = vst [vmem:[#allocation30_spill] sm:$0xff] %v10106_v6  ;;  %15778 = vst [vmem:[#allocation210_spill] sm:$0xff] %v10113_v10  ;;  %v1603_v47 = vmul.f32 %v6980_v21, %v10109_v55  ;;  %v10150_v8 = vadd.f32 %v15793_v11, %v9976_v44  ;;  %v15794_v41 = vld [vmem:[#allocation88_spill] sm:$0xff]  ;;  %v6982_v53 = vld [vmem:[%s7139_s9 + $0x10] sm:$0xff]  ;;  %v10163_v21 = vstv %s10064_s26  ;;  %2866 = vrot.lane.b32.xlu1 %v2788_v15, %s7074_s12  ;;  %2864 = vrot.lane.b32.xlu0 %v2787_v46, %s7074_s12 }
 0x29b   : > { %15783 = vst [vmem:[#allocation31_spill] sm:$0xff] %v10125_v5  ;;  %15787 = vst [vmem:[#allocation211_spill] sm:$0xff] %v10132_v39  ;;  %v10154_v63 = vadd.f32 %v15794_v41, %v9973_v61  ;;  %v6981_v4 = vld [vmem:[%s7139_s9 + $0x18] sm:$0xff]  ;;  %v1605_v52 = vmul.f32 %v6982_v53, %v10109_v55  ;;  %v6983_v5 = vld [vmem:[%s7139_s9 + $0x28] sm:$0xff] }
 0x29c   : > { %15791 = vst [vmem:[#allocation32_spill] sm:$0xff] %v10144_v62  ;;  %15792 = vst [vmem:[#allocation212_spill] sm:$0xff] %v10146_v29  ;;  %v10158_v18 = vmul.f32 %v6981_v4, %v10109_v55  ;;  %v10167_v44 = vmul.f32 %v6983_v5, %v10109_v55  ;;  %v15795_v61 = vld [vmem:[#allocation294_spill] sm:$0xff]  ;;  %v15796_v41 = vld [vmem:[#allocation289_spill] sm:$0xff] }
 0x29d   : > { %v2790_v11 = vmul.f32 %v9822_v7, %v15795_v61  ;;  %v2789_v4 = vmul.f32 %v9822_v7, %v15796_v41  ;;  %v15797_v10 = vld [vmem:[#allocation89_spill] sm:$0xff]  ;;  %v15798_v6 = vld [vmem:[#allocation90_spill] sm:$0xff]  ;;  %v15799_v5 = vld [vmem:[#allocation11_spill] sm:$0xff] }
 0x29e   : > { %v10177_v53 = vadd.f32 %v15797_v10, %v9986_v33  ;;  %v10181_v39 = vadd.f32 %v15798_v6, %v9989_v24  ;;  %v1534_v15 = vadd.f32 %v15799_v5, %v1334_v59  ;;  %v6984_v2 = vld [vmem:[%s7139_s9 + $0x20] sm:$0xff]  ;;  %v15800_v57 = vld [vmem:[#allocation91_spill] sm:$0xff]  ;;  %v15801_v9 = vld [vmem:[#allocation8_spill] sm:$0xff]  ;;  %v10201_v59 = vpop.permute.xlu1 %2416  ;;  %v10203_v5 = vpop.permute.xlu0 %2414 }
 0x29f   : > { %v10186_v46 = vmul.f32 %v6984_v2, %v10109_v55  ;;  %v10190_v62 = vadd.f32 %v15800_v57, %v9995_v27  ;;  %v1533_v34 = vadd.f32 %v15801_v9, %v1333_v42  ;;  %v6985_v33 = vld [vmem:[%s7139_s9 + $0x38] sm:$0xff]  ;;  %v6986_v24 = vld [vmem:[%s7139_s9 + $0x30] sm:$0xff]  ;;  %15802 = vst [vmem:[#allocation33_spill] sm:$0xff] %v10201_v59  ;;  %15803 = vst [vmem:[#allocation213_spill] sm:$0xff] %v10203_v5  ;;  %v10223_v5 = vstv %s10115_s27 }
 0x2a0   : > { %v10195_v10 = vmul.f32 %v6985_v33, %v10109_v55  ;;  %v10199_v6 = vmul.f32 %v6986_v24, %v10109_v55  ;;  %v15804_v2 = vld [vmem:[#allocation92_spill] sm:$0xff]  ;;  %v15805_v27 = vld [vmem:[#allocation143_spill] sm:$0xff]  ;;  %v6987_v9 = vld [vmem:[%s7139_s9 + $0x48] sm:$0xff]  ;;  %2870 = vrot.lane.b32.xlu1 %v2790_v11, %s7074_s12  ;;  %2868 = vrot.lane.b32.xlu0 %v2789_v4, %s7074_s12 }
 0x2a1   : > { %v10207_v29 = vadd.f32 %v15804_v2, %v9992_v49  ;;  %v1804_v57 = vadd.f32 %v15805_v27, %v1604_v13  ;;  %v10212_v42 = vmul.f32 %v6987_v9, %v10109_v55  ;;  %v6988_v33 = vld [vmem:[%s7139_s9 + $0x40] sm:$0xff]  ;;  %v15807_v49 = vld [vmem:[#allocation296_spill] sm:$0xff]  ;;  %v10232_v9 = vadd.f32 %v10163_v21, %v1534_v15  ;;  %v6989_v22 = vld [vmem:[%s7139_s9 + $0x110] sm:$0xff] }
 0x2a2   : > { %v10216_v24 = vmul.f32 %v6988_v33, %v10109_v55  ;;  %v15806_v59 = vld [vmem:[#allocation93_spill] sm:$0xff]  ;;  %v2792_v13 = vmul.f32 %v9822_v7, %v15807_v49  ;;  %v15810_v33 = vld [vmem:[#allocation144_spill] sm:$0xff]  ;;  %v2039_v11 = vmul.f32 %v6989_v22, %v10223_v5  ;;  %v15812_v4 = vld [vmem:[#allocation94_spill] sm:$0xff]  ;;  %v10243_v49 = vadd.f32 %v10163_v21, %v1533_v34 }
 0x2a3   : > { %v10220_v51 = vadd.f32 %v15806_v59, %v9998_v58  ;;  %v15808_v2 = vld [vmem:[#allocation293_spill] sm:$0xff]  ;;  %15809 = vst [vmem:[#allocation34_spill] sm:$0xff] %v10232_v9  ;;  %v1803_v58 = vadd.f32 %v15810_v33, %v1603_v47  ;;  %v15811_v59 = vld [vmem:[#allocation183_spill] sm:$0xff]  ;;  %v10240_v17 = vadd.f32 %v15812_v4, %v10001_v3  ;;  %v15814_v28 = vld [vmem:[#allocation10_spill] sm:$0xff]  ;;  %v10248_v15 = vmul.f32 %v6990_v54, %v10109_v55  ;;  %v10252_v47 = vpop.permute.xlu0 %2418 }
 0x2a4   : > { %v2791_v27 = vmul.f32 %v9822_v7, %v15808_v2  ;;  %v2004_v31 = vadd.f32 %v15811_v59, %v1804_v57  ;;  %15813 = vst [vmem:[#allocation214_spill] sm:$0xff] %v10243_v49  ;;  %v1535_v61 = vadd.f32 %v15814_v28, %v1335_v16  ;;  %v10250_v2 = vpop.permute.xlu1 %2420  ;;  %15816 = vst [vmem:[#allocation215_spill] sm:$0xff] %v10252_v47  ;;  %v15817_v22 = vld [vmem:[#allocation95_spill] sm:$0xff]  ;;  %v15818_v34 = vld [vmem:[#allocation180_spill] sm:$0xff]  ;;  %2874 = vrot.lane.b32.xlu1 %v2792_v13, %s7074_s12 }
 0x2a5   : > { %15815 = vst [vmem:[#allocation35_spill] sm:$0xff] %v10250_v2  ;;  %v10256_v57 = vadd.f32 %v15817_v22, %v10013_v60  ;;  %v6991_v3 = vld [vmem:[%s7139_s9 + $0x50] sm:$0xff]  ;;  %v2003_v59 = vadd.f32 %v15818_v34, %v1803_v58  ;;  %v6992_v28 = vld [vmem:[%s7139_s9 + $0x108] sm:$0xff]  ;;  %v15819_v16 = vld [vmem:[#allocation96_spill] sm:$0xff]  ;;  %v3481_v34 = vsel %vm3479_vm2, %v10232_v9, 0.0  ;;  %v3480_v13 = vsel %vm3479_vm2, %v10243_v49, 0.0 }
 0x2a6   : > { %v10260_v33 = vmul.f32 %v6991_v3, %v10109_v55  ;;  %v2038_v54 = vmul.f32 %v6992_v28, %v10223_v5  ;;  %v10267_v4 = vadd.f32 %v15819_v16, %v10004_v37  ;;  %2872 = vrot.lane.b32.xlu0 %v2791_v27, %s7074_s12  ;;  %v15820_v60 = vld [vmem:[#allocation298_spill] sm:$0xff]  ;;  %v15821_v3 = vld [vmem:[#allocation295_spill] sm:$0xff]  ;;  %v15822_v28 = vld [vmem:[#allocation148_spill] sm:$0xff]  ;;  %v2072_v16 = vadd.f32 %v2039_v11, %v2004_v31 }
 0x2a7   : > { %v2794_v22 = vmul.f32 %v9822_v7, %v15820_v60  ;;  %v2793_v58 = vmul.f32 %v9822_v7, %v15821_v3  ;;  %v1805_v2 = vadd.f32 %v15822_v28, %v1605_v52  ;;  %v6993_v47 = vld [vmem:[%s7139_s9 + $0x68] sm:$0xff]  ;;  %v10287_v27 = vadd.f32 %v10163_v21, %v1535_v61  ;;  %v15824_v60 = vld [vmem:[#allocation13_spill] sm:$0xff]  ;;  %v6994_v3 = vld [vmem:[%s7139_s9 + $0x118] sm:$0xff]  ;;  %v10295_v52 = vpop.permute.xlu0 %2422 }
 0x2a8   : > { %v10282_v37 = vmul.f32 %v6993_v47, %v10109_v55  ;;  %v1536_v1 = vadd.f32 %v15824_v60, %v10136_v35  ;;  %v2040_v9 = vmul.f32 %v6994_v3, %v10223_v5  ;;  %v10293_v41 = vpop.permute.xlu1 %2424  ;;  %15826 = vst [vmem:[#allocation37_spill] sm:$0xff] %v10295_v52  ;;  %v15827_v47 = vld [vmem:[#allocation147_spill] sm:$0xff]  ;;  %v15828_v11 = vld [vmem:[#allocation182_spill] sm:$0xff]  ;;  %v15829_v49 = vld [vmem:[#allocation268_spill] sm:$0xff]  ;;  %v2071_v23 = vadd.f32 %v2038_v54, %v2003_v59 }
 0x2a9   : > { %15823 = vst [vmem:[#allocation36_spill] sm:$0xff] %v10287_v27  ;;  %15825 = vst [vmem:[#allocation218_spill] sm:$0xff] %v10293_v41  ;;  %v1806_v31 = vadd.f32 %v15827_v47, %v10158_v18  ;;  %v2005_v28 = vadd.f32 %v15828_v11, %v1805_v2  ;;  %v2272_v61 = vadd.f32 %v15829_v49, %v2072_v16  ;;  %2878 = vrot.lane.b32.xlu1 %v2794_v22, %s7074_s12  ;;  %v15830_v35 = vld [vmem:[#allocation301_spill] sm:$0xff]  ;;  %v15834_v59 = vld [vmem:[#allocation319_spill] sm:$0xff] }
 0x2aa   : > { %v3482_v0 = vadd.f32 %v3481_v34, %v3480_v13  ;;  %2876 = vrot.lane.b32.xlu0 %v2793_v58, %s7074_s12  ;;  %v2796_v60 = vmul.f32 %v9822_v7, %v15830_v35  ;;  %v15831_v3 = vld [vmem:[#allocation297_spill] sm:$0xff]  ;;  %v15836_v58 = vld [vmem:[#allocation98_spill] sm:$0xff]  ;;  %v10321_v13 = vadd.f32 %v10163_v21, %v1536_v1 }
 0x2ab   : > { %v2795_v41 = vmul.f32 %v9822_v7, %v15831_v3  ;;  %v15832_v52 = vld [vmem:[#allocation185_spill] sm:$0xff]  ;;  %v2472_v54 = vadd.f32 %v15834_v59, %v2272_v61  ;;  %v10318_v16 = vadd.f32 %v15836_v58, %v10019_v56  ;;  %v10329_v11 = vpop.permute.xlu0 %2426  ;;  %v3483_v61 = vsel %vm3479_vm2, %v10287_v27, 0.0  ;;  %v15842_v58 = vld [vmem:[#allocation304_spill] sm:$0xff] }
 0x2ac   : > { %v2006_v43 = vadd.f32 %v15832_v52, %v1806_v31  ;;  %v15833_v18 = vld [vmem:[#allocation269_spill] sm:$0xff]  ;;  %15837 = vst [vmem:[#allocation131_spill] sm:$0xff] %v10321_v13  ;;  %v10327_v31 = vpop.permute.xlu1 %2428  ;;  %15839 = vst [vmem:[#allocation138_spill] sm:$0xff] %v10329_v11  ;;  %v2073_v56 = vadd.f32 %v2040_v9, %v2005_v28  ;;  %v3484_v1 = vadd.f32 %v3483_v61, %v3482_v0  ;;  %v15844_v11 = vld [vmem:[#allocation152_spill] sm:$0xff] }
 0x2ad   : > { %v2271_v47 = vadd.f32 %v15833_v18, %v2071_v23  ;;  %v6995_v2 = vld [vmem:[%s7139_s9 + $0x120] sm:$0xff]  ;;  %15838 = vst [vmem:[#allocation38_spill] sm:$0xff] %v10327_v31  ;;  %2882 = vrot.lane.b32.xlu1 %v2796_v60, %s7074_s12  ;;  %v15843_v31 = vld [vmem:[#allocation300_spill] sm:$0xff]  ;;  %v15845_v9 = vld [vmem:[#allocation271_spill] sm:$0xff]  ;;  %v3485_v60 = vsel %vm3479_vm2, %v10321_v13, 0.0 }
 0x2ae   : > { %v2041_v49 = vmul.f32 %v6995_v2, %v10223_v5  ;;  %v15835_v22 = vld [vmem:[#allocation97_spill] sm:$0xff]  ;;  %2880 = vrot.lane.b32.xlu0 %v2795_v41, %s7074_s12  ;;  %v2797_v27 = vmul.f32 %v9822_v7, %v15843_v31  ;;  %v2273_v28 = vadd.f32 %v15845_v9, %v2073_v56  ;;  %v15847_v41 = vld [vmem:[#allocation15_spill] sm:$0xff] }
 0x2af   : > { %v10314_v34 = vadd.f32 %v15835_v22, %v10016_v20  ;;  %v6996_v52 = vld [vmem:[%s7139_s9 + $0x60] sm:$0xff]  ;;  %v15840_v20 = vld [vmem:[#allocation12_spill] sm:$0xff]  ;;  %v10337_v22 = vstv %s10269_s28  ;;  %v15848_v61 = vld [vmem:[#allocation151_spill] sm:$0xff] }
 0x2b0   : > { %v10325_v23 = vmul.f32 %v6996_v52, %v10109_v55  ;;  %v1537_v18 = vadd.f32 %v15840_v20, %v10154_v63  ;;  %v15841_v2 = vld [vmem:[#allocation313_spill] sm:$0xff]  ;;  %v2798_v52 = vmul.f32 %v9822_v7, %v15842_v58  ;;  %v1807_v63 = vadd.f32 %v15844_v11, %v10186_v46  ;;  %v6997_v58 = vld [vmem:[%s7139_s9 + $0x128] sm:$0xff]  ;;  %v10359_v46 = vpop.permute.xlu1 %2432 }
 0x2b1   : > { %v2471_v59 = vadd.f32 %v15841_v2, %v2271_v47  ;;  %v2074_v20 = vadd.f32 %v2041_v49, %v2006_v43  ;;  %v10349_v0 = vadd.f32 %v10337_v22, %v2472_v54  ;;  %v1538_v47 = vadd.f32 %v15847_v41, %v10150_v8  ;;  %15849 = vst [vmem:[#allocation134_spill] sm:$0xff] %v10359_v46  ;;  %v10361_v43 = vpop.permute.xlu0 %2430  ;;  %v15851_v49 = vld [vmem:[#allocation184_spill] sm:$0xff]  ;;  %v15852_v11 = vld [vmem:[#allocation270_spill] sm:$0xff] }
 0x2b2   : > { %v1808_v2 = vadd.f32 %v15848_v61, %v10167_v44  ;;  %v2042_v35 = vmul.f32 %v6997_v58, %v10223_v5  ;;  %15850 = vst [vmem:[#allocation40_spill] sm:$0xff] %v10361_v43  ;;  %v2007_v54 = vadd.f32 %v15851_v49, %v1807_v63  ;;  %v15854_v8 = vld [vmem:[#allocation318_spill] sm:$0xff]  ;;  %v10370_v44 = vadd.f32 %v10163_v21, %v1537_v18  ;;  %v15856_v58 = vld [vmem:[#allocation308_spill] sm:$0xff]  ;;  %v15857_v63 = vld [vmem:[#allocation221_spill] sm:$0xff] }
 0x2b3   : > { %15846 = vst [vmem:[#allocation39_spill] sm:$0xff] %v10349_v0  ;;  %v2274_v56 = vadd.f32 %v15852_v11, %v2074_v20  ;;  %v10366_v9 = vadd.f32 %v10337_v22, %v2471_v59  ;;  %v2473_v41 = vadd.f32 %v15854_v8, %v2273_v28  ;;  %2886 = vrot.lane.b32.xlu1 %v2798_v52, %s7074_s12  ;;  %v15858_v20 = vld [vmem:[#allocation187_spill] sm:$0xff]  ;;  %v3553_v28 = vsel %vm3479_vm2, %v10349_v0, 0.0  ;;  %v15859_v18 = vld [vmem:[#allocation17_spill] sm:$0xff]  ;;  %v6999_v43 = vld [vmem:[%s7139_s9 + $0x78] sm:$0xff] }
 0x2b4   : > { %15855 = vst [vmem:[#allocation41_spill] sm:$0xff] %v10370_v44  ;;  %2884 = vrot.lane.b32.xlu0 %v2797_v27, %s7074_s12  ;;  %v2800_v61 = vmul.f32 %v9822_v7, %v15856_v58  ;;  %v2799_v49 = vmul.f32 %v9822_v7, %v15857_v63  ;;  %v2008_v11 = vadd.f32 %v15858_v20, %v1808_v2  ;;  %v6998_v59 = vld [vmem:[%s7139_s9 + $0x130] sm:$0xff]  ;;  %v10396_v20 = vpop.permute.xlu1 %2436 }
 0x2b5   : > { %15853 = vst [vmem:[#allocation142_spill] sm:$0xff] %v10366_v9  ;;  %v2043_v13 = vmul.f32 %v6998_v59, %v10223_v5  ;;  %v2474_v8 = vadd.f32 %v15859_v18, %v2274_v56  ;;  %v15860_v52 = vld [vmem:[#allocation99_spill] sm:$0xff]  ;;  %v3486_v27 = vadd.f32 %v3485_v60, %v3484_v1  ;;  %v10390_v58 = vmul.f32 %v6999_v43, %v10109_v55  ;;  %v10398_v59 = vpop.permute.xlu0 %2434 }
 0x2b6   : > { %v10386_v46 = vadd.f32 %v15860_v52, %v10059_v12  ;;  %v7000_v63 = vld [vmem:[%s7139_s9 + $0x70] sm:$0xff]  ;;  %15861 = vst [vmem:[#allocation49_spill] sm:$0xff] %v10396_v20  ;;  %15862 = vst [vmem:[#allocation51_spill] sm:$0xff] %v10398_v59  ;;  %v10401_v0 = vadd.f32 %v10163_v21, %v1538_v47  ;;  %v2075_v56 = vadd.f32 %v2042_v35, %v2007_v54  ;;  %v3552_v12 = vsel %vm3479_vm2, %v10366_v9, 0.0 }
 0x2b7   : > { %v10394_v2 = vmul.f32 %v7000_v63, %v10109_v55  ;;  %v10406_v1 = vadd.f32 %v10337_v22, %v2473_v41  ;;  %v3487_v60 = vsel %vm3479_vm2, %v10370_v44, 0.0  ;;  %v3554_v43 = vadd.f32 %v3553_v28, %v3552_v12  ;;  %2890 = vrot.lane.b32.xlu1 %v2800_v61, %s7074_s12  ;;  %v15865_v63 = vld [vmem:[#allocation312_spill] sm:$0xff]  ;;  %v15866_v18 = vld [vmem:[#allocation307_spill] sm:$0xff]  ;;  %v15870_v28 = vld [vmem:[#allocation14_spill] sm:$0xff] }
 0x2b8   : > { %15863 = vst [vmem:[#allocation52_spill] sm:$0xff] %v10401_v0  ;;  %2888 = vrot.lane.b32.xlu0 %v2799_v49, %s7074_s12  ;;  %v2802_v47 = vmul.f32 %v9822_v7, %v15865_v63  ;;  %v2801_v35 = vmul.f32 %v9822_v7, %v15866_v18  ;;  %v15867_v54 = vld [vmem:[#allocation155_spill] sm:$0xff]  ;;  %v2076_v9 = vadd.f32 %v2043_v13, %v2008_v11  ;;  %v15871_v49 = vld [vmem:[#allocation154_spill] sm:$0xff]  ;;  %v7001_v63 = vld [vmem:[%s7139_s9 + $0x138] sm:$0xff]  ;;  %v10428_v31 = vpop.permute.xlu1 %2644 }
 0x2b9   : > { %15864 = vst [vmem:[#allocation137_spill] sm:$0xff] %v10406_v1  ;;  %v1809_v52 = vadd.f32 %v15867_v54, %v10199_v6  ;;  %v15868_v41 = vld [vmem:[#allocation275_spill] sm:$0xff]  ;;  %v10420_v59 = vadd.f32 %v10337_v22, %v2474_v8  ;;  %v1539_v61 = vadd.f32 %v15870_v28, %v10181_v39  ;;  %v3488_v12 = vadd.f32 %v3487_v60, %v3486_v27  ;;  %v10430_v6 = vpop.permute.xlu0 %2642  ;;  %v15874_v13 = vld [vmem:[#allocation186_spill] sm:$0xff]  ;;  %v15879_v28 = vld [vmem:[#allocation189_spill] sm:$0xff] }
 0x2ba   : > { %v2275_v20 = vadd.f32 %v15868_v41, %v2075_v56  ;;  %v1810_v44 = vadd.f32 %v15871_v49, %v10195_v10  ;;  %v2044_v18 = vmul.f32 %v7001_v63, %v10223_v5  ;;  %15872 = vst [vmem:[#allocation146_spill] sm:$0xff] %v10428_v31  ;;  %15873 = vst [vmem:[#allocation43_spill] sm:$0xff] %v10430_v6  ;;  %v15875_v56 = vld [vmem:[#allocation274_spill] sm:$0xff]  ;;  %v3555_v54 = vsel %vm3479_vm2, %v10406_v1, 0.0  ;;  %v15877_v63 = vld [vmem:[#allocation317_spill] sm:$0xff] }
 0x2bb   : > { %15869 = vst [vmem:[#allocation42_spill] sm:$0xff] %v10420_v59  ;;  %v2009_v11 = vadd.f32 %v15874_v13, %v1809_v52  ;;  %v2276_v8 = vadd.f32 %v15875_v56, %v2076_v9  ;;  %v15876_v39 = vld [vmem:[#allocation194_spill] sm:$0xff]  ;;  %v3489_v10 = vsel %vm3479_vm2, %v10401_v0, 0.0  ;;  %v3556_v60 = vadd.f32 %v3555_v54, %v3554_v43  ;;  %2894 = vrot.lane.b32.xlu1 %v2802_v47, %s7074_s12  ;;  %v15878_v52 = vld [vmem:[#allocation311_spill] sm:$0xff]  ;;  %v7002_v13 = vld [vmem:[%s7139_s9 + $0x140] sm:$0xff] }
 0x2bc   : > { %v2475_v27 = vadd.f32 %v15876_v39, %v2275_v20  ;;  %2892 = vrot.lane.b32.xlu0 %v2801_v35, %s7074_s12  ;;  %v2804_v41 = vmul.f32 %v9822_v7, %v15877_v63  ;;  %v2803_v9 = vmul.f32 %v9822_v7, %v15878_v52  ;;  %v2010_v49 = vadd.f32 %v15879_v28, %v1810_v44  ;;  %v15880_v39 = vld [vmem:[#allocation197_spill] sm:$0xff]  ;;  %v15881_v47 = vld [vmem:[#allocation100_spill] sm:$0xff]  ;;  %v7003_v28 = vld [vmem:[%s7139_s9 + $0x88] sm:$0xff]  ;;  %v10466_v31 = vpop.permute.xlu1 %2648 }
 0x2bd   : > { %v2045_v20 = vmul.f32 %v7002_v13, %v10223_v5  ;;  %v3557_v56 = vsel %vm3479_vm2, %v10420_v59, 0.0  ;;  %v2476_v43 = vadd.f32 %v15880_v39, %v2276_v8  ;;  %v10455_v35 = vadd.f32 %v15881_v47, %v10038_v25  ;;  %v15883_v6 = vld [vmem:[#allocation112_spill] sm:$0xff]  ;;  %15884 = vst [vmem:[#allocation44_spill] sm:$0xff] %v10466_v31  ;;  %v10468_v0 = vpop.permute.xlu0 %2646  ;;  %v7005_v31 = vld [vmem:[%s7139_s9 + $0x148] sm:$0xff] }
 0x2be   : > { %v10458_v54 = vadd.f32 %v10163_v21, %v1539_v61  ;;  %v1540_v44 = vadd.f32 %v15883_v6, %v10177_v53  ;;  %v10464_v13 = vmul.f32 %v7003_v28, %v10109_v55  ;;  %15885 = vst [vmem:[#allocation150_spill] sm:$0xff] %v10468_v0  ;;  %v3490_v8 = vadd.f32 %v3489_v10, %v3488_v12  ;;  %v15886_v39 = vld [vmem:[#allocation16_spill] sm:$0xff]  ;;  %v15888_v53 = vld [vmem:[#allocation326_spill] sm:$0xff]  ;;  %v15890_v12 = vld [vmem:[#allocation157_spill] sm:$0xff] }
 0x2bf   : > { %v1541_v25 = vadd.f32 %v15886_v39, %v10207_v29  ;;  %v2077_v47 = vadd.f32 %v2044_v18, %v2009_v11  ;;  %v10473_v61 = vadd.f32 %v10337_v22, %v2475_v27  ;;  %v3558_v59 = vadd.f32 %v3557_v56, %v3556_v60  ;;  %2898 = vrot.lane.b32.xlu1 %v2804_v41, %s7074_s12  ;;  %v15889_v28 = vld [vmem:[#allocation316_spill] sm:$0xff]  ;;  %v15891_v39 = vld [vmem:[#allocation278_spill] sm:$0xff] }
 0x2c0   : > { %15882 = vst [vmem:[#allocation141_spill] sm:$0xff] %v10458_v54  ;;  %2896 = vrot.lane.b32.xlu0 %v2803_v9, %s7074_s12  ;;  %v2806_v6 = vmul.f32 %v9822_v7, %v15888_v53  ;;  %v2805_v0 = vmul.f32 %v9822_v7, %v15889_v28  ;;  %v1811_v10 = vadd.f32 %v15890_v12, %v10216_v24  ;;  %v15894_v60 = vld [vmem:[#allocation156_spill] sm:$0xff]  ;;  %v7004_v9 = vld [vmem:[%s7139_s9 + $0x150] sm:$0xff]  ;;  %v10496_v24 = vpop.permute.xlu1 %2652 }
 0x2c1   : > { %15887 = vst [vmem:[#allocation45_spill] sm:$0xff] %v10473_v61  ;;  %v2078_v29 = vadd.f32 %v2045_v20, %v2010_v49  ;;  %v2277_v18 = vadd.f32 %v15891_v39, %v2077_v47  ;;  %v10485_v11 = vadd.f32 %v10337_v22, %v2476_v43  ;;  %v10488_v27 = vadd.f32 %v10163_v21, %v1540_v44  ;;  %v10498_v49 = vpop.permute.xlu0 %2650  ;;  %v15897_v20 = vld [vmem:[#allocation188_spill] sm:$0xff]  ;;  %v15898_v47 = vld [vmem:[#allocation277_spill] sm:$0xff] }
 0x2c2   : > { %v1812_v41 = vadd.f32 %v15894_v60, %v10212_v42  ;;  %v2047_v56 = vmul.f32 %v7004_v9, %v10223_v5  ;;  %v2046_v1 = vmul.f32 %v7005_v31, %v10223_v5  ;;  %15895 = vst [vmem:[#allocation46_spill] sm:$0xff] %v10496_v24  ;;  %15896 = vst [vmem:[#allocation222_spill] sm:$0xff] %v10498_v49  ;;  %v3559_v44 = vsel %vm3479_vm2, %v10473_v61, 0.0  ;;  %v15899_v42 = vld [vmem:[#allocation19_spill] sm:$0xff]  ;;  %v15900_v31 = vld [vmem:[#allocation196_spill] sm:$0xff] }
 0x2c3   : > { %15892 = vst [vmem:[#allocation54_spill] sm:$0xff] %v10485_v11  ;;  %15893 = vst [vmem:[#allocation145_spill] sm:$0xff] %v10488_v27  ;;  %v2011_v43 = vadd.f32 %v15897_v20, %v1811_v10  ;;  %v2278_v12 = vadd.f32 %v15898_v47, %v2078_v29  ;;  %v2477_v39 = vadd.f32 %v15899_v42, %v2277_v18  ;;  %v3491_v60 = vsel %vm3479_vm2, %v10458_v54, 0.0  ;;  %v15901_v10 = vld [vmem:[#allocation325_spill] sm:$0xff]  ;;  %v15902_v20 = vld [vmem:[#allocation191_spill] sm:$0xff] }
 0x2c4   : > { %v3560_v9 = vadd.f32 %v3559_v44, %v3558_v59  ;;  %2902 = vrot.lane.b32.xlu1 %v2806_v6, %s7074_s12  ;;  %2900 = vrot.lane.b32.xlu0 %v2805_v0, %s7074_s12  ;;  %v2808_v49 = vmul.f32 %v9822_v7, %v15900_v31  ;;  %v2807_v29 = vmul.f32 %v9822_v7, %v15901_v10  ;;  %v3561_v24 = vsel %vm3479_vm2, %v10485_v11, 0.0  ;;  %v15903_v18 = vld [vmem:[#allocation198_spill] sm:$0xff]  ;;  %v7006_v54 = vld [vmem:[%s7139_s9 + $0x80] sm:$0xff]  ;;  %v10529_v7 = vpop.permute.xlu1 %2656 }
 0x2c5   : > { %v2012_v47 = vadd.f32 %v15902_v20, %v1812_v41  ;;  %v2478_v42 = vadd.f32 %v15903_v18, %v2278_v12  ;;  %v10518_v61 = vstv %s10451_s29  ;;  %v10521_v59 = vadd.f32 %v10163_v21, %v1541_v25  ;;  %v15905_v0 = vld [vmem:[#allocation114_spill] sm:$0xff]  ;;  %15906 = vst [vmem:[#allocation149_spill] sm:$0xff] %v10529_v7  ;;  %v10531_v41 = vpop.permute.xlu0 %2654  ;;  %v15908_v20 = vld [vmem:[#allocation113_spill] sm:$0xff]  ;;  %v15912_v7 = vld [vmem:[#allocation159_spill] sm:$0xff] }
 0x2c6   : > { %v3492_v6 = vadd.f32 %v3491_v60, %v3490_v8  ;;  %v1542_v44 = vadd.f32 %v15905_v0, %v10190_v62  ;;  %v10527_v31 = vmul.f32 %v7006_v54, %v10109_v55  ;;  %15907 = vst [vmem:[#allocation48_spill] sm:$0xff] %v10531_v41  ;;  %v3493_v12 = vsel %vm3479_vm2, %v10488_v27, 0.0  ;;  %v15910_v54 = vld [vmem:[#allocation262_spill] sm:$0xff]  ;;  %v15911_v0 = vld [vmem:[#allocation263_spill] sm:$0xff] }
 0x2c7   : > { %15904 = vst [vmem:[#allocation47_spill] sm:$0xff] %v10521_v59  ;;  %v1543_v25 = vadd.f32 %v15908_v20, %v10240_v17  ;;  %v2079_v18 = vadd.f32 %v2046_v1, %v2011_v43  ;;  %v10538_v8 = vadd.f32 %v10337_v22, %v2477_v39  ;;  %v3562_v62 = vadd.f32 %v3561_v24, %v3560_v9  ;;  %v15913_v1 = vld [vmem:[#allocation281_spill] sm:$0xff]  ;;  %v15916_v9 = vld [vmem:[#allocation158_spill] sm:$0xff]  ;;  %v7007_v20 = vld [vmem:[%s7139_s9 + $0x158] sm:$0xff] }
 0x2c8   : > { %2906 = vrot.lane.b32.xlu1 %v2808_v49, %s7074_s12  ;;  %2904 = vrot.lane.b32.xlu0 %v2807_v29, %s7074_s12  ;;  %v3047_v60 = vmul.f32 %v10518_v61, %v15910_v54  ;;  %v3046_v41 = vmul.f32 %v10518_v61, %v15911_v0  ;;  %v1813_v27 = vadd.f32 %v15912_v7, %v10260_v33  ;;  %v10559_v54 = vpop.permute.xlu1 %2660  ;;  %v15920_v7 = vld [vmem:[#allocation280_spill] sm:$0xff] }
 0x2c9   : > { %15909 = vst [vmem:[#allocation153_spill] sm:$0xff] %v10538_v8  ;;  %v2080_v17 = vadd.f32 %v2047_v56, %v2012_v47  ;;  %v2279_v43 = vadd.f32 %v15913_v1, %v2079_v18  ;;  %v10550_v39 = vadd.f32 %v10337_v22, %v2478_v42  ;;  %v3494_v24 = vadd.f32 %v3493_v12, %v3492_v6  ;;  %v10561_v33 = vpop.permute.xlu0 %2658  ;;  %v15919_v56 = vld [vmem:[#allocation190_spill] sm:$0xff]  ;;  %v15921_v6 = vld [vmem:[#allocation20_spill] sm:$0xff] }
 0x2ca   : > { %v10553_v49 = vadd.f32 %v10163_v21, %v1542_v44  ;;  %v1814_v29 = vadd.f32 %v15916_v9, %v10248_v15  ;;  %v2048_v11 = vmul.f32 %v7007_v20, %v10223_v5  ;;  %15917 = vst [vmem:[#allocation223_spill] sm:$0xff] %v10559_v54  ;;  %15918 = vst [vmem:[#allocation224_spill] sm:$0xff] %v10561_v33  ;;  %v3563_v42 = vsel %vm3479_vm2, %v10538_v8, 0.0  ;;  %v7008_v15 = vld [vmem:[%s7139_s9 + $0x160] sm:$0xff]  ;;  %v15922_v20 = vld [vmem:[#allocation266_spill] sm:$0xff] }
 0x2cb   : > { %15914 = vst [vmem:[#allocation50_spill] sm:$0xff] %v10550_v39  ;;  %v2013_v47 = vadd.f32 %v15919_v56, %v1813_v27  ;;  %v2280_v18 = vadd.f32 %v15920_v7, %v2080_v17  ;;  %v2479_v44 = vadd.f32 %v15921_v6, %v2279_v43  ;;  %v3495_v12 = vsel %vm3479_vm2, %v10521_v59, 0.0  ;;  %v15923_v17 = vld [vmem:[#allocation193_spill] sm:$0xff]  ;;  %v15924_v43 = vld [vmem:[#allocation200_spill] sm:$0xff]  ;;  %v15925_v33 = vld [vmem:[#allocation267_spill] sm:$0xff] }
 0x2cc   : > { %15915 = vst [vmem:[#allocation53_spill] sm:$0xff] %v10553_v49  ;;  %v2049_v1 = vmul.f32 %v7008_v15, %v10223_v5  ;;  %v3564_v9 = vadd.f32 %v3563_v42, %v3562_v62  ;;  %3114 = vrot.lane.b32.xlu1 %v3047_v60, %s7073_s10  ;;  %3112 = vrot.lane.b32.xlu0 %v3046_v41, %s7073_s10  ;;  %v3565_v7 = vsel %vm3479_vm2, %v10550_v39, 0.0  ;;  %v15926_v15 = vld [vmem:[#allocation101_spill] sm:$0xff]  ;;  %v15927_v60 = vld [vmem:[#allocation102_spill] sm:$0xff]  ;;  %v15928_v59 = vld [vmem:[#allocation116_spill] sm:$0xff] }
 0x2cd   : > { %v3049_v27 = vmul.f32 %v10518_v61, %v15922_v20  ;;  %v2014_v56 = vadd.f32 %v15923_v17, %v1814_v29  ;;  %v2480_v6 = vadd.f32 %v15924_v43, %v2280_v18  ;;  %v3048_v54 = vmul.f32 %v10518_v61, %v15925_v33  ;;  %v10592_v17 = vpop.permute.xlu1 %2664  ;;  %v10594_v39 = vpop.permute.xlu0 %2662 }
 0x2ce   : > { %v10584_v62 = vadd.f32 %v15926_v15, %v10075_v14  ;;  %v10588_v41 = vadd.f32 %v15927_v60, %v10062_v48  ;;  %v3496_v42 = vadd.f32 %v3495_v12, %v3494_v24  ;;  %v1544_v29 = vadd.f32 %v15928_v59, %v10220_v51  ;;  %15929 = vst [vmem:[#allocation228_spill] sm:$0xff] %v10592_v17  ;;  %v15933_v48 = vld [vmem:[#allocation115_spill] sm:$0xff]  ;;  %v15934_v51 = vld [vmem:[#allocation161_spill] sm:$0xff] }
 0x2cf   : > { %15930 = vst [vmem:[#allocation56_spill] sm:$0xff] %v10594_v39  ;;  %v10597_v18 = vadd.f32 %v10163_v21, %v1543_v25  ;;  %v3497_v43 = vsel %vm3479_vm2, %v10553_v49, 0.0  ;;  %v2081_v14 = vadd.f32 %v2048_v11, %v2013_v47  ;;  %v10602_v15 = vadd.f32 %v10337_v22, %v2479_v44  ;;  %v15935_v39 = vld [vmem:[#allocation284_spill] sm:$0xff] }
 0x2d0   : > { %v1545_v24 = vadd.f32 %v15933_v48, %v10267_v4  ;;  %v1815_v59 = vadd.f32 %v15934_v51, %v10325_v23  ;;  %v3566_v12 = vadd.f32 %v3565_v7, %v3564_v9  ;;  %3118 = vrot.lane.b32.xlu1 %v3049_v27, %s7073_s10  ;;  %v3051_v25 = vmul.f32 %v10518_v61, %v9170_v38  ;;  %v15937_v47 = vld [vmem:[#allocation272_spill] sm:$0xff]  ;;  %v7009_v7 = vld [vmem:[%s7139_s9 + $0x168] sm:$0xff]  ;;  %v7010_v51 = vld [vmem:[%s7139_s9 + $0x170] sm:$0xff] }
 0x2d1   : > { %15931 = vst [vmem:[#allocation55_spill] sm:$0xff] %v10597_v18  ;;  %15932 = vst [vmem:[#allocation57_spill] sm:$0xff] %v10602_v15  ;;  %v2082_v60 = vadd.f32 %v2049_v1, %v2014_v56  ;;  %v2281_v17 = vadd.f32 %v15935_v39, %v2081_v14  ;;  %v10613_v11 = vadd.f32 %v10337_v22, %v2480_v6  ;;  %3116 = vrot.lane.b32.xlu0 %v3048_v54, %s7073_s10  ;;  %v15939_v9 = vld [vmem:[#allocation160_spill] sm:$0xff]  ;;  %v10625_v39 = vpop.permute.xlu1 %2668  ;;  %v10627_v56 = vpop.permute.xlu0 %2666  ;;  %v15943_v54 = vld [vmem:[#allocation283_spill] sm:$0xff] }
 0x2d2   : > { %v3050_v4 = vmul.f32 %v10518_v61, %v15937_v47  ;;  %v3498_v44 = vadd.f32 %v3497_v43, %v3496_v42  ;;  %v10619_v23 = vadd.f32 %v10163_v21, %v1544_v29  ;;  %v1816_v27 = vadd.f32 %v15939_v9, %v10282_v37  ;;  %15940 = vst [vmem:[#allocation59_spill] sm:$0xff] %v10625_v39  ;;  %v15942_v6 = vld [vmem:[#allocation192_spill] sm:$0xff]  ;;  %v15944_v29 = vld [vmem:[#allocation22_spill] sm:$0xff] }
 0x2d3   : > { %15936 = vst [vmem:[#allocation58_spill] sm:$0xff] %v10613_v11  ;;  %v2050_v1 = vmul.f32 %v7009_v7, %v10223_v5  ;;  %15941 = vst [vmem:[#allocation60_spill] sm:$0xff] %v10627_v56  ;;  %v2015_v14 = vadd.f32 %v15942_v6, %v1815_v59  ;;  %v2282_v48 = vadd.f32 %v15943_v54, %v2082_v60  ;;  %v3567_v42 = vsel %vm3479_vm2, %v10602_v15, 0.0  ;;  %v15945_v60 = vld [vmem:[#allocation206_spill] sm:$0xff]  ;;  %v7012_v56 = vld [vmem:[%s7139_s9 + $0x90] sm:$0xff] }
 0x2d4   : > { %15938 = vst [vmem:[#allocation227_spill] sm:$0xff] %v10619_v23  ;;  %v2481_v43 = vadd.f32 %v15944_v29, %v2281_v17  ;;  %v3499_v37 = vsel %vm3479_vm2, %v10597_v18, 0.0  ;;  %v2051_v9 = vmul.f32 %v7010_v51, %v10223_v5  ;;  %v3568_v7 = vadd.f32 %v3567_v42, %v3566_v12  ;;  %3122 = vrot.lane.b32.xlu1 %v3051_v25, %s7073_s10  ;;  %v15946_v12 = vld [vmem:[#allocation118_spill] sm:$0xff]  ;;  %v7011_v25 = vld [vmem:[%s7139_s9 + $0x98] sm:$0xff] }
 0x2d5   : > { %v3053_v59 = vmul.f32 %v10518_v61, %v9178_v36  ;;  %v2016_v6 = vadd.f32 %v15945_v60, %v1816_v27  ;;  %v3569_v54 = vsel %vm3479_vm2, %v10613_v11, 0.0  ;;  %v2482_v17 = vadd.f32 %v9967_v32, %v2282_v48  ;;  %3120 = vrot.lane.b32.xlu0 %v3050_v4, %s7073_s10  ;;  %v10658_v60 = vpop.permute.xlu1 %2672  ;;  %v10660_v32 = vpop.permute.xlu0 %2670  ;;  %v15953_v18 = vld [vmem:[#allocation286_spill] sm:$0xff]  ;;  %v15998_v11 = vld [vmem:[#allocation247_spill] sm:$0xff] }
 0x2d6   : > { %v3052_v29 = vmul.f32 %v10518_v61, %v9194_v19  ;;  %v3500_v39 = vadd.f32 %v3499_v37, %v3498_v44  ;;  %v1546_v42 = vadd.f32 %v15946_v12, %v10256_v57  ;;  %v10652_v51 = vmul.f32 %v7011_v25, %v10109_v55  ;;  %15947 = vst [vmem:[#allocation61_spill] sm:$0xff] %v10658_v60  ;;  %v15951_v37 = vld [vmem:[#allocation117_spill] sm:$0xff] }
 0x2d7   : > { %v10656_v27 = vmul.f32 %v7012_v56, %v10109_v55  ;;  %15948 = vst [vmem:[#allocation62_spill] sm:$0xff] %v10660_v32  ;;  %v10663_v4 = vadd.f32 %v10163_v21, %v1545_v24  ;;  %v3501_v44 = vsel %vm3479_vm2, %v10619_v23, 0.0  ;;  %v2083_v57 = vadd.f32 %v2050_v1, %v2015_v14  ;;  %v15952_v56 = vld [vmem:[#allocation163_spill] sm:$0xff] }
 0x2d8   : > { %v10668_v48 = vadd.f32 %v10337_v22, %v2481_v43  ;;  %v1547_v12 = vadd.f32 %v15951_v37, %v10318_v16  ;;  %v1817_v25 = vadd.f32 %v15952_v56, %v10394_v2  ;;  %v3570_v60 = vadd.f32 %v3569_v54, %v3568_v7  ;;  %3126 = vrot.lane.b32.xlu1 %v3053_v59, %s7073_s10  ;;  %v15956_v43 = vld [vmem:[#allocation162_spill] sm:$0xff]  ;;  %v7013_v59 = vld [vmem:[%s7139_s9 + $0x178] sm:$0xff]  ;;  %v15959_v54 = vld [vmem:[#allocation205_spill] sm:$0xff] }
 0x2d9   : > { %15949 = vst [vmem:[#allocation63_spill] sm:$0xff] %v10663_v4  ;;  %v3055_v24 = vmul.f32 %v10518_v61, %v9258_v26  ;;  %v2084_v32 = vadd.f32 %v2051_v9, %v2016_v6  ;;  %v2283_v23 = vadd.f32 %v15953_v18, %v2083_v57  ;;  %v10679_v1 = vadd.f32 %v10337_v22, %v2482_v17  ;;  %v10691_v18 = vpop.permute.xlu1 %2676  ;;  %v10693_v6 = vpop.permute.xlu0 %2674 }
 0x2da   : > { %15950 = vst [vmem:[#allocation64_spill] sm:$0xff] %v10668_v48  ;;  %3124 = vrot.lane.b32.xlu0 %v3052_v29, %s7073_s10  ;;  %v3054_v16 = vmul.f32 %v10518_v61, %v9288_v30  ;;  %v3502_v14 = vadd.f32 %v3501_v44, %v3500_v39  ;;  %v10685_v2 = vadd.f32 %v10163_v21, %v1546_v42  ;;  %15957 = vst [vmem:[#allocation230_spill] sm:$0xff] %v10691_v18  ;;  %v15960_v29 = vld [vmem:[#allocation285_spill] sm:$0xff] }
 0x2db   : > { %15954 = vst [vmem:[#allocation66_spill] sm:$0xff] %v10679_v1  ;;  %v1818_v7 = vadd.f32 %v15956_v43, %v10390_v58  ;;  %v2052_v9 = vmul.f32 %v7013_v59, %v10223_v5  ;;  %15958 = vst [vmem:[#allocation65_spill] sm:$0xff] %v10693_v6  ;;  %v2017_v17 = vadd.f32 %v15959_v54, %v1817_v25  ;;  %v3571_v39 = vsel %vm3479_vm2, %v10668_v48, 0.0  ;;  %v7014_v58 = vld [vmem:[%s7139_s9 + $0x180] sm:$0xff] }
 0x2dc   : > { %15955 = vst [vmem:[#allocation229_spill] sm:$0xff] %v10685_v2  ;;  %v2284_v57 = vadd.f32 %v15960_v29, %v2084_v32  ;;  %v2483_v42 = vadd.f32 %v9965_v40, %v2283_v23  ;;  %v3503_v44 = vsel %vm3479_vm2, %v10663_v4, 0.0  ;;  %v2053_v37 = vmul.f32 %v7014_v58, %v10223_v5  ;;  %3130 = vrot.lane.b32.xlu1 %v3055_v24, %s7073_s10  ;;  %v15961_v25 = vld [vmem:[#allocation217_spill] sm:$0xff]  ;;  %v15962_v40 = vld [vmem:[#allocation288_spill] sm:$0xff]  ;;  %v15964_v58 = vld [vmem:[#allocation103_spill] sm:$0xff] }
 0x2dd   : > { %v3572_v56 = vadd.f32 %v3571_v39, %v3570_v60  ;;  %v3057_v43 = vmul.f32 %v10518_v61, %v15780_v45  ;;  %v2018_v59 = vadd.f32 %v15961_v25, %v1818_v7  ;;  %v3573_v32 = vsel %vm3479_vm2, %v10679_v1, 0.0  ;;  %v15963_v29 = vld [vmem:[#allocation25_spill] sm:$0xff]  ;;  %v15965_v24 = vld [vmem:[#allocation203_spill] sm:$0xff]  ;;  %v15966_v39 = vld [vmem:[#allocation104_spill] sm:$0xff]  ;;  %v10724_v4 = vpop.permute.xlu1 %2680 }
 0x2de   : > { %v2484_v54 = vadd.f32 %v10008_v50, %v2284_v57  ;;  %3128 = vrot.lane.b32.xlu0 %v3054_v16, %s7073_s10  ;;  %v3056_v23 = vmul.f32 %v10518_v61, %v15962_v40  ;;  %v10716_v60 = vadd.f32 %v15964_v58, %v15963_v29  ;;  %v10720_v18 = vadd.f32 %v15966_v39, %v15965_v24  ;;  %v15967_v7 = vld [vmem:[#allocation120_spill] sm:$0xff]  ;;  %v10726_v50 = vpop.permute.xlu0 %2678 }
 0x2df   : > { %v3504_v6 = vadd.f32 %v3503_v44, %v3502_v14  ;;  %v1548_v25 = vadd.f32 %v15967_v7, %v10314_v34  ;;  %15968 = vst [vmem:[#allocation231_spill] sm:$0xff] %v10724_v4  ;;  %15969 = vst [vmem:[#allocation232_spill] sm:$0xff] %v10726_v50  ;;  %v10729_v16 = vadd.f32 %v10163_v21, %v1547_v12  ;;  %v3505_v57 = vsel %vm3479_vm2, %v10685_v2, 0.0  ;;  %v15972_v14 = vld [vmem:[#allocation119_spill] sm:$0xff]  ;;  %v15973_v34 = vld [vmem:[#allocation165_spill] sm:$0xff] }
 0x2e0   : > { %v2085_v29 = vadd.f32 %v2052_v9, %v2017_v17  ;;  %v10734_v58 = vadd.f32 %v10337_v22, %v2483_v42  ;;  %v1549_v44 = vadd.f32 %v15972_v14, %v10455_v35  ;;  %v1819_v24 = vadd.f32 %v15973_v34, %v10527_v31  ;;  %3134 = vrot.lane.b32.xlu1 %v3057_v43, %s7073_s10  ;;  %v15974_v7 = vld [vmem:[#allocation289_spill] sm:$0xff]  ;;  %v15975_v50 = vld [vmem:[#allocation292_spill] sm:$0xff]  ;;  %v15977_v17 = vld [vmem:[#allocation290_spill] sm:$0xff] }
 0x2e1   : > { %15970 = vst [vmem:[#allocation234_spill] sm:$0xff] %v10729_v16  ;;  %v3574_v39 = vadd.f32 %v3573_v32, %v3572_v56  ;;  %v3059_v12 = vmul.f32 %v10518_v61, %v15974_v7  ;;  %v2086_v4 = vadd.f32 %v2053_v37, %v2018_v59  ;;  %v10745_v9 = vadd.f32 %v10337_v22, %v2484_v54  ;;  %v15979_v56 = vld [vmem:[#allocation164_spill] sm:$0xff]  ;;  %v7015_v32 = vld [vmem:[%s7139_s9 + $0x188] sm:$0xff]  ;;  %v10757_v59 = vpop.permute.xlu1 %2684  ;;  %v7016_v34 = vld [vmem:[%s7139_s9 + $0x190] sm:$0xff] }
 0x2e2   : > { %15971 = vst [vmem:[#allocation233_spill] sm:$0xff] %v10734_v58  ;;  %v2285_v2 = vadd.f32 %v15975_v50, %v2085_v29  ;;  %3132 = vrot.lane.b32.xlu0 %v3056_v23, %s7073_s10  ;;  %v3058_v35 = vmul.f32 %v10518_v61, %v15977_v17  ;;  %v3506_v42 = vadd.f32 %v3505_v57, %v3504_v6  ;;  %15980 = vst [vmem:[#allocation240_spill] sm:$0xff] %v10757_v59  ;;  %v10759_v50 = vpop.permute.xlu0 %2682  ;;  %v15982_v54 = vld [vmem:[#allocation216_spill] sm:$0xff]  ;;  %v15983_v23 = vld [vmem:[#allocation291_spill] sm:$0xff] }
 0x2e3   : > { %15976 = vst [vmem:[#allocation238_spill] sm:$0xff] %v10745_v9  ;;  %v10751_v31 = vadd.f32 %v10163_v21, %v1548_v25  ;;  %v1820_v43 = vadd.f32 %v15979_v56, %v10464_v13  ;;  %v2054_v37 = vmul.f32 %v7015_v32, %v10223_v5  ;;  %15981 = vst [vmem:[#allocation68_spill] sm:$0xff] %v10759_v50  ;;  %v3575_v6 = vsel %vm3479_vm2, %v10734_v58, 0.0  ;;  %v15984_v25 = vld [vmem:[#allocation201_spill] sm:$0xff]  ;;  %v15987_v50 = vld [vmem:[#allocation202_spill] sm:$0xff] }
 0x2e4   : > { %v2019_v29 = vadd.f32 %v15982_v54, %v1819_v24  ;;  %v2286_v14 = vadd.f32 %v15983_v23, %v2086_v4  ;;  %v2485_v57 = vadd.f32 %v15984_v25, %v2285_v2  ;;  %v3507_v13 = vsel %vm3479_vm2, %v10729_v16, 0.0  ;;  %3138 = vrot.lane.b32.xlu1 %v3059_v12, %s7073_s10  ;;  %v15985_v59 = vld [vmem:[#allocation293_spill] sm:$0xff]  ;;  %v15986_v4 = vld [vmem:[#allocation220_spill] sm:$0xff]  ;;  %v15988_v25 = vld [vmem:[#allocation294_spill] sm:$0xff] }
 0x2e5   : > { %15978 = vst [vmem:[#allocation235_spill] sm:$0xff] %v10751_v31  ;;  %v2055_v56 = vmul.f32 %v7016_v34, %v10223_v5  ;;  %v3576_v32 = vadd.f32 %v3575_v6, %v3574_v39  ;;  %v3061_v24 = vmul.f32 %v10518_v61, %v15985_v59  ;;  %v2020_v54 = vadd.f32 %v15986_v4, %v1820_v43  ;;  %v15989_v58 = vld [vmem:[#allocation26_spill] sm:$0xff]  ;;  %v15990_v34 = vld [vmem:[#allocation105_spill] sm:$0xff] }
 0x2e6   : > { %v3577_v23 = vsel %vm3479_vm2, %v10745_v9, 0.0  ;;  %v2486_v2 = vadd.f32 %v15987_v50, %v2286_v14  ;;  %3136 = vrot.lane.b32.xlu0 %v3058_v35, %s7073_s10  ;;  %v3060_v16 = vmul.f32 %v10518_v61, %v15988_v25  ;;  %v10782_v39 = vadd.f32 %v15990_v34, %v15989_v58  ;;  %v7017_v6 = vld [vmem:[%s7139_s9 + $0xa8] sm:$0xff]  ;;  %v7018_v43 = vld [vmem:[%s7139_s9 + $0xa0] sm:$0xff]  ;;  %v10790_v9 = vpop.permute.xlu1 %2688  ;;  %v10792_v50 = vpop.permute.xlu0 %2686 }
 0x2e7   : > { %v3508_v12 = vadd.f32 %v3507_v13, %v3506_v42  ;;  %v10786_v1 = vmul.f32 %v7017_v6, %v10109_v55  ;;  %v1623_v4 = vmul.f32 %v7018_v43, %v10109_v55  ;;  %15991 = vst [vmem:[#allocation239_spill] sm:$0xff] %v10790_v9  ;;  %15992 = vst [vmem:[#allocation242_spill] sm:$0xff] %v10792_v50  ;;  %v3509_v14 = vsel %vm3479_vm2, %v10751_v31, 0.0  ;;  %v15995_v13 = vld [vmem:[#allocation122_spill] sm:$0xff]  ;;  %v15996_v6 = vld [vmem:[#allocation167_spill] sm:$0xff] }
 0x2e8   : > { %v10795_v35 = vadd.f32 %v10163_v21, %v1549_v44  ;;  %v2087_v58 = vadd.f32 %v2054_v37, %v2019_v29  ;;  %v10800_v42 = vadd.f32 %v10337_v22, %v2485_v57  ;;  %v1550_v34 = vadd.f32 %v15995_v13, %v10386_v46  ;;  %3142 = vrot.lane.b32.xlu1 %v3061_v24, %s7073_s10  ;;  %v15997_v50 = vld [vmem:[#allocation295_spill] sm:$0xff]  ;;  %v16000_v29 = vld [vmem:[#allocation296_spill] sm:$0xff]  ;;  %v16002_v24 = vld [vmem:[#allocation166_spill] sm:$0xff] }
 0x2e9   : > { %v1821_v43 = vadd.f32 %v15996_v6, %v10656_v27  ;;  %v3578_v9 = vadd.f32 %v3577_v23, %v3576_v32  ;;  %v3063_v44 = vmul.f32 %v10518_v61, %v15997_v50  ;;  %v2088_v48 = vadd.f32 %v2055_v56, %v2020_v54  ;;  %v16001_v27 = vld [vmem:[#allocation121_spill] sm:$0xff]  ;;  %v7019_v13 = vld [vmem:[%s7139_s9 + $0x198] sm:$0xff] }
 0x2ea   : > { %15993 = vst [vmem:[#allocation241_spill] sm:$0xff] %v10795_v35  ;;  %15994 = vst [vmem:[#allocation67_spill] sm:$0xff] %v10800_v42  ;;  %v2287_v31 = vadd.f32 %v15998_v11, %v2087_v58  ;;  %v10811_v37 = vadd.f32 %v10337_v22, %v2486_v2  ;;  %3140 = vrot.lane.b32.xlu0 %v3060_v16, %s7073_s10  ;;  %v3062_v46 = vmul.f32 %v10518_v61, %v16000_v29  ;;  %v10822_v11 = vpop.permute.xlu1 %2692  ;;  %v10824_v54 = vpop.permute.xlu0 %2690  ;;  %v16005_v2 = vld [vmem:[#allocation219_spill] sm:$0xff] }
 0x2eb   : > { %v3510_v57 = vadd.f32 %v3509_v14, %v3508_v12  ;;  %v1551_v32 = vadd.f32 %v16001_v27, %v10588_v41  ;;  %v1822_v23 = vadd.f32 %v16002_v24, %v10652_v51  ;;  %v2056_v56 = vmul.f32 %v7019_v13, %v10223_v5  ;;  %16003 = vst [vmem:[#allocation70_spill] sm:$0xff] %v10822_v11  ;;  %v16006_v16 = vld [vmem:[#allocation251_spill] sm:$0xff]  ;;  %v16007_v14 = vld [vmem:[#allocation24_spill] sm:$0xff]  ;;  %v7020_v27 = vld [vmem:[%s7139_s9 + $0x1a0] sm:$0xff] }
 0x2ec   : > { %15999 = vst [vmem:[#allocation69_spill] sm:$0xff] %v10811_v37  ;;  %16004 = vst [vmem:[#allocation72_spill] sm:$0xff] %v10824_v54  ;;  %v2021_v58 = vadd.f32 %v16005_v2, %v1821_v43  ;;  %v2288_v6 = vadd.f32 %v16006_v16, %v2088_v48  ;;  %v3579_v12 = vsel %vm3479_vm2, %v10800_v42, 0.0  ;;  %v2487_v41 = vadd.f32 %v16007_v14, %v2287_v31  ;;  %v16009_v48 = vld [vmem:[#allocation226_spill] sm:$0xff]  ;;  %v16010_v11 = vld [vmem:[#allocation208_spill] sm:$0xff] }
 0x2ed   : > { %v10832_v51 = vadd.f32 %v10163_v21, %v1550_v34  ;;  %v2057_v24 = vmul.f32 %v7020_v27, %v10223_v5  ;;  %v3580_v13 = vadd.f32 %v3579_v12, %v3578_v9  ;;  %3146 = vrot.lane.b32.xlu1 %v3063_v44, %s7073_s10  ;;  %v3065_v43 = vmul.f32 %v10518_v61, %v15831_v3  ;;  %v16011_v34 = vld [vmem:[#allocation298_spill] sm:$0xff]  ;;  %v16012_v54 = vld [vmem:[#allocation204_spill] sm:$0xff] }
 0x2ee   : > { %v2022_v2 = vadd.f32 %v16009_v48, %v1822_v23  ;;  %v3581_v16 = vsel %vm3479_vm2, %v10811_v37, 0.0  ;;  %v2488_v31 = vadd.f32 %v16010_v11, %v2288_v6  ;;  %3144 = vrot.lane.b32.xlu0 %v3062_v46, %s7073_s10  ;;  %v3064_v14 = vmul.f32 %v10518_v61, %v16011_v34  ;;  %v16013_v27 = vld [vmem:[#allocation106_spill] sm:$0xff]  ;;  %v7021_v12 = vld [vmem:[%s7139_s9 + $0xb8] sm:$0xff]  ;;  %v7022_v48 = vld [vmem:[%s7139_s9 + $0xb0] sm:$0xff]  ;;  %v10858_v11 = vpop.permute.xlu1 %2696  ;;  %v10860_v46 = vpop.permute.xlu0 %2694 }
 0x2ef   : > { %16008 = vst [vmem:[#allocation243_spill] sm:$0xff] %v10832_v51  ;;  %v10848_v9 = vadd.f32 %v16013_v27, %v16012_v54  ;;  %v3511_v44 = vsel %vm3479_vm2, %v10795_v35, 0.0  ;;  %v10854_v23 = vmul.f32 %v7021_v12, %v10109_v55  ;;  %v1625_v37 = vmul.f32 %v7022_v48, %v10109_v55  ;;  %16014 = vst [vmem:[#allocation71_spill] sm:$0xff] %v10858_v11  ;;  %v16018_v35 = vld [vmem:[#allocation169_spill] sm:$0xff]  ;;  %v16019_v48 = vld [vmem:[#allocation300_spill] sm:$0xff] }
 0x2f0   : > { %16015 = vst [vmem:[#allocation73_spill] sm:$0xff] %v10860_v46  ;;  %v10863_v6 = vadd.f32 %v10163_v21, %v1551_v32  ;;  %v3512_v42 = vadd.f32 %v3511_v44, %v3510_v57  ;;  %v2089_v54 = vadd.f32 %v2056_v56, %v2021_v58  ;;  %v10866_v27 = vadd.f32 %v10337_v22, %v2487_v41  ;;  %v16020_v32 = vld [vmem:[#allocation250_spill] sm:$0xff]  ;;  %v16022_v56 = vld [vmem:[#allocation301_spill] sm:$0xff]  ;;  %v16024_v41 = vld [vmem:[#allocation124_spill] sm:$0xff] }
 0x2f1   : > { %v3513_v12 = vsel %vm3479_vm2, %v10832_v51, 0.0  ;;  %v1823_v49 = vadd.f32 %v16018_v35, %v1623_v4  ;;  %v3582_v15 = vadd.f32 %v3581_v16, %v3580_v13  ;;  %3150 = vrot.lane.b32.xlu1 %v3065_v43, %s7073_s10  ;;  %v3067_v11 = vmul.f32 %v10518_v61, %v16019_v48  ;;  %v16023_v4 = vld [vmem:[#allocation123_spill] sm:$0xff]  ;;  %v16025_v43 = vld [vmem:[#allocation168_spill] sm:$0xff] }
 0x2f2   : > { %16016 = vst [vmem:[#allocation74_spill] sm:$0xff] %v10863_v6  ;;  %16017 = vst [vmem:[#allocation76_spill] sm:$0xff] %v10866_v27  ;;  %v2090_v46 = vadd.f32 %v2057_v24, %v2022_v2  ;;  %v2289_v8 = vadd.f32 %v16020_v32, %v2089_v54  ;;  %v10876_v57 = vadd.f32 %v10337_v22, %v2488_v31  ;;  %3148 = vrot.lane.b32.xlu0 %v3064_v14, %s7073_s10  ;;  %v7023_v2 = vld [vmem:[%s7139_s9 + $0x1a8] sm:$0xff]  ;;  %v10889_v44 = vpop.permute.xlu1 %2700  ;;  %v10891_v31 = vpop.permute.xlu0 %2698  ;;  %v16028_v14 = vld [vmem:[#allocation225_spill] sm:$0xff] }
 0x2f3   : > { %v3066_v58 = vmul.f32 %v10518_v61, %v16022_v56  ;;  %v1553_v35 = vadd.f32 %v16023_v4, %v10720_v18  ;;  %v1552_v13 = vadd.f32 %v16024_v41, %v10584_v62  ;;  %v1824_v24 = vadd.f32 %v16025_v43, %v10786_v1  ;;  %16026 = vst [vmem:[#allocation77_spill] sm:$0xff] %v10889_v44  ;;  %v16029_v32 = vld [vmem:[#allocation253_spill] sm:$0xff]  ;;  %v16030_v4 = vld [vmem:[#allocation28_spill] sm:$0xff]  ;;  %v7024_v48 = vld [vmem:[%s7139_s9 + $0x1b0] sm:$0xff] }
 0x2f4   : > { %16021 = vst [vmem:[#allocation75_spill] sm:$0xff] %v10876_v57  ;;  %v2058_v16 = vmul.f32 %v7023_v2, %v10223_v5  ;;  %16027 = vst [vmem:[#allocation78_spill] sm:$0xff] %v10891_v31  ;;  %v2023_v54 = vadd.f32 %v16028_v14, %v1823_v49  ;;  %v2290_v51 = vadd.f32 %v16029_v32, %v2090_v46  ;;  %v3583_v18 = vsel %vm3479_vm2, %v10866_v27, 0.0  ;;  %v16031_v2 = vld [vmem:[#allocation221_spill] sm:$0xff]  ;;  %v16033_v14 = vld [vmem:[#allocation212_spill] sm:$0xff] }
 0x2f5   : > { %v2489_v62 = vadd.f32 %v16030_v4, %v2289_v8  ;;  %v3514_v41 = vadd.f32 %v3513_v12, %v3512_v42  ;;  %v2059_v1 = vmul.f32 %v7024_v48, %v10223_v5  ;;  %v3584_v43 = vadd.f32 %v3583_v18, %v3582_v15  ;;  %3154 = vrot.lane.b32.xlu1 %v3067_v11, %s7073_s10  ;;  %v16032_v44 = vld [vmem:[#allocation237_spill] sm:$0xff]  ;;  %v16034_v8 = vld [vmem:[#allocation304_spill] sm:$0xff]  ;;  %v16035_v12 = vld [vmem:[#allocation27_spill] sm:$0xff] }
 0x2f6   : > { %v3069_v31 = vmul.f32 %v10518_v61, %v16031_v2  ;;  %v2024_v49 = vadd.f32 %v16032_v44, %v1824_v24  ;;  %v3585_v46 = vsel %vm3479_vm2, %v10876_v57, 0.0  ;;  %v2490_v32 = vadd.f32 %v16033_v14, %v2290_v51  ;;  %3152 = vrot.lane.b32.xlu0 %v3066_v58, %s7073_s10  ;;  %v16036_v48 = vld [vmem:[#allocation107_spill] sm:$0xff]  ;;  %v16038_v18 = vld [vmem:[#allocation108_spill] sm:$0xff]  ;;  %v7025_v44 = vld [vmem:[%s7139_s9 + $0xc8] sm:$0xff]  ;;  %v10925_v51 = vpop.permute.xlu1 %2704  ;;  %v10927_v58 = vpop.permute.xlu0 %2702 }
 0x2f7   : > { %v3068_v42 = vmul.f32 %v10518_v61, %v16034_v8  ;;  %v10912_v15 = vadd.f32 %v16036_v48, %v16035_v12  ;;  %v16037_v11 = vld [vmem:[#allocation207_spill] sm:$0xff]  ;;  %v10919_v24 = vadd.f32 %v10163_v21, %v1552_v13  ;;  %v10923_v57 = vmul.f32 %v7025_v44, %v10109_v55  ;;  %16040 = vst [vmem:[#allocation80_spill] sm:$0xff] %v10925_v51  ;;  %v16046_v8 = vld [vmem:[#allocation252_spill] sm:$0xff] }
 0x2f8   : > { %v10916_v4 = vadd.f32 %v16038_v18, %v16037_v11  ;;  %16041 = vst [vmem:[#allocation315_spill] sm:$0xff] %v10927_v58  ;;  %v3515_v14 = vsel %vm3479_vm2, %v10863_v6, 0.0  ;;  %v10932_v12 = vadd.f32 %v10163_v21, %v1553_v35  ;;  %v2091_v48 = vadd.f32 %v2058_v16, %v2023_v54  ;;  %v16044_v18 = vld [vmem:[#allocation171_spill] sm:$0xff]  ;;  %v16048_v16 = vld [vmem:[#allocation308_spill] sm:$0xff] }
 0x2f9   : > { %16039 = vst [vmem:[#allocation246_spill] sm:$0xff] %v10919_v24  ;;  %v10935_v11 = vadd.f32 %v10337_v22, %v2489_v62  ;;  %v3516_v13 = vadd.f32 %v3515_v14, %v3514_v41  ;;  %v1825_v27 = vadd.f32 %v16044_v18, %v1625_v37  ;;  %v3586_v44 = vadd.f32 %v3585_v46, %v3584_v43  ;;  %v16045_v51 = vld [vmem:[#allocation307_spill] sm:$0xff]  ;;  %v16050_v41 = vld [vmem:[#allocation170_spill] sm:$0xff]  ;;  %v7026_v43 = vld [vmem:[%s7139_s9 + $0x1b8] sm:$0xff] }
 0x2fa   : > { %16042 = vst [vmem:[#allocation320_spill] sm:$0xff] %v10932_v12  ;;  %3158 = vrot.lane.b32.xlu1 %v3069_v31, %s7073_s10  ;;  %v3071_v58 = vmul.f32 %v10518_v61, %v16045_v51  ;;  %v2092_v2 = vadd.f32 %v2059_v1, %v2024_v49  ;;  %v2291_v6 = vadd.f32 %v16046_v8, %v2091_v48  ;;  %v3517_v37 = vsel %vm3479_vm2, %v10919_v24, 0.0  ;;  %v16049_v31 = vld [vmem:[#allocation126_spill] sm:$0xff]  ;;  %v10956_v46 = vpop.permute.xlu1 %2842  ;;  %v16053_v8 = vld [vmem:[#allocation236_spill] sm:$0xff]  ;;  %v16054_v14 = vld [vmem:[#allocation257_spill] sm:$0xff] }
 0x2fb   : > { %16043 = vst [vmem:[#allocation321_spill] sm:$0xff] %v10935_v11  ;;  %v10943_v35 = vadd.f32 %v10337_v22, %v2490_v32  ;;  %3156 = vrot.lane.b32.xlu0 %v3068_v42, %s7073_s10  ;;  %v3070_v54 = vmul.f32 %v10518_v61, %v16048_v16  ;;  %v1554_v62 = vadd.f32 %v16049_v31, %v10716_v60  ;;  %16051 = vst [vmem:[#allocation79_spill] sm:$0xff] %v10956_v46  ;;  %v10958_v32 = vpop.permute.xlu0 %2706  ;;  %v16055_v24 = vld [vmem:[#allocation32_spill] sm:$0xff]  ;;  %v7027_v60 = vld [vmem:[%s7139_s9 + $0xc0] sm:$0xff] }
 0x2fc   : > { %v1826_v1 = vadd.f32 %v16050_v41, %v10854_v23  ;;  %v2060_v49 = vmul.f32 %v7026_v43, %v10223_v5  ;;  %16052 = vst [vmem:[#allocation21_spill] sm:$0xff] %v10958_v32  ;;  %v2025_v42 = vadd.f32 %v16053_v8, %v1825_v27  ;;  %v2292_v48 = vadd.f32 %v16054_v14, %v2092_v2  ;;  %v7028_v23 = vld [vmem:[%s7139_s9 + $0x1c0] sm:$0xff]  ;;  %v16062_v46 = vld [vmem:[#allocation110_spill] sm:$0xff] }
 0x2fd   : > { %16047 = vst [vmem:[#allocation322_spill] sm:$0xff] %v10943_v35  ;;  %v3587_v18 = vsel %vm3479_vm2, %v10935_v11, 0.0  ;;  %v2491_v51 = vadd.f32 %v16055_v24, %v2291_v6  ;;  %v1627_v31 = vmul.f32 %v7027_v60, %v10109_v55  ;;  %v2061_v41 = vmul.f32 %v7028_v23, %v10223_v5  ;;  %v16056_v8 = vld [vmem:[#allocation245_spill] sm:$0xff]  ;;  %v16058_v24 = vld [vmem:[#allocation312_spill] sm:$0xff] }
 0x2fe   : > { %v3588_v43 = vadd.f32 %v3587_v18, %v3586_v44  ;;  %3162 = vrot.lane.b32.xlu1 %v3071_v58, %s7073_s10  ;;  %v3073_v27 = vmul.f32 %v10518_v61, %v15878_v52  ;;  %v2026_v2 = vadd.f32 %v16056_v8, %v1826_v1  ;;  %v3589_v14 = vsel %vm3479_vm2, %v10943_v35, 0.0  ;;  %v16057_v32 = vld [vmem:[#allocation213_spill] sm:$0xff]  ;;  %v7029_v35 = vld [vmem:[%s7139_s9 + $0xd0] sm:$0xff] }
 0x2ff   : > { %v2492_v6 = vadd.f32 %v16057_v32, %v2292_v48  ;;  %3160 = vrot.lane.b32.xlu0 %v3070_v54, %s7073_s10  ;;  %v3072_v60 = vmul.f32 %v10518_v61, %v16058_v24  ;;  %v16059_v44 = vld [vmem:[#allocation29_spill] sm:$0xff]  ;;  %v3518_v1 = vadd.f32 %v3517_v37, %v3516_v13  ;;  %v10990_v8 = vadd.f32 %v10163_v21, %v1554_v62  ;;  %v10992_v32 = vpop.permute.xlu1 %2846  ;;  %v10994_v54 = vpop.permute.xlu0 %2844 }
 0x300   : > { %v16060_v18 = vld [vmem:[#allocation109_spill] sm:$0xff]  ;;  %16064 = vst [vmem:[#allocation83_spill] sm:$0xff] %v10992_v32  ;;  %16065 = vst [vmem:[#allocation84_spill] sm:$0xff] %v10994_v54  ;;  %v3519_v48 = vsel %vm3479_vm2, %v10932_v12, 0.0  ;;  %v1629_v52 = vmul.f32 %v7029_v35, %v10109_v55  ;;  %v3075_v32 = vmul.f32 %v10518_v61, %v15889_v28  ;;  %v2094_v54 = vadd.f32 %v2061_v41, %v2026_v2  ;;  %v16069_v12 = vld [vmem:[#allocation254_spill] sm:$0xff] }
 0x301   : > { %v10983_v58 = vadd.f32 %v16060_v18, %v16059_v44  ;;  %v16061_v23 = vld [vmem:[#allocation209_spill] sm:$0xff]  ;;  %16063 = vst [vmem:[#allocation82_spill] sm:$0xff] %v10990_v8  ;;  %v2093_v44 = vadd.f32 %v2060_v49, %v2025_v42  ;;  %v11001_v18 = vadd.f32 %v10337_v22, %v2491_v51  ;;  %v11011_v35 = vadd.f32 %v10337_v22, %v2492_v6  ;;  %v16071_v42 = vld [vmem:[#allocation172_spill] sm:$0xff]  ;;  %v16075_v6 = vld [vmem:[#allocation259_spill] sm:$0xff] }
 0x302   : > { %v10987_v11 = vadd.f32 %v16062_v46, %v16061_v23  ;;  %v16067_v13 = vld [vmem:[#allocation125_spill] sm:$0xff]  ;;  %v3590_v23 = vadd.f32 %v3589_v14, %v3588_v43  ;;  %3166 = vrot.lane.b32.xlu1 %v3073_v27, %s7073_s10  ;;  %v3520_v51 = vadd.f32 %v3519_v48, %v3518_v1  ;;  %v3521_v49 = vsel %vm3479_vm2, %v10990_v8, 0.0  ;;  %v7030_v43 = vld [vmem:[%s7139_s9 + $0x1c8] sm:$0xff]  ;;  %v16074_v2 = vld [vmem:[#allocation244_spill] sm:$0xff] }
 0x303   : > { %16066 = vst [vmem:[#allocation323_spill] sm:$0xff] %v11001_v18  ;;  %v1555_v37 = vadd.f32 %v16067_v13, %v10848_v9  ;;  %v16068_v62 = vld [vmem:[#allocation173_spill] sm:$0xff]  ;;  %v2293_v24 = vadd.f32 %v16069_v12, %v2093_v44  ;;  %16070 = vst [vmem:[#allocation85_spill] sm:$0xff] %v11011_v35  ;;  %3164 = vrot.lane.b32.xlu0 %v3072_v60, %s7073_s10  ;;  %v3074_v9 = vmul.f32 %v10518_v61, %v15877_v63  ;;  %v11022_v12 = vpop.permute.xlu1 %2850  ;;  %v11024_v27 = vpop.permute.xlu0 %2848 }
 0x304   : > { %v1827_v46 = vadd.f32 %v16068_v62, %v1627_v31  ;;  %v1828_v31 = vadd.f32 %v16071_v42, %v10923_v57  ;;  %v2062_v41 = vmul.f32 %v7030_v43, %v10223_v5  ;;  %16072 = vst [vmem:[#allocation23_spill] sm:$0xff] %v11022_v12  ;;  %16073 = vst [vmem:[#allocation86_spill] sm:$0xff] %v11024_v27  ;;  %v3591_v1 = vsel %vm3479_vm2, %v11001_v18, 0.0  ;;  %v16076_v48 = vld [vmem:[#allocation33_spill] sm:$0xff]  ;;  %v7031_v62 = vld [vmem:[%s7139_s9 + $0x1d0] sm:$0xff] }
 0x305   : > { %v2294_v60 = vadd.f32 %v16075_v6, %v2094_v54  ;;  %v2493_v44 = vadd.f32 %v16076_v48, %v2293_v24  ;;  %v16077_v13 = vld [vmem:[#allocation249_spill] sm:$0xff]  ;;  %v2063_v42 = vmul.f32 %v7031_v62, %v10223_v5  ;;  %v3592_v43 = vadd.f32 %v3591_v1, %v3590_v23  ;;  %v16079_v48 = vld [vmem:[#allocation211_spill] sm:$0xff]  ;;  %v16082_v62 = vld [vmem:[#allocation128_spill] sm:$0xff] }
 0x306   : > { %v2027_v14 = vadd.f32 %v16074_v2, %v1827_v46  ;;  %v2028_v57 = vadd.f32 %v16077_v13, %v1828_v31  ;;  %3170 = vrot.lane.b32.xlu1 %v3075_v32, %s7073_s10  ;;  %v3077_v46 = vmul.f32 %v10518_v61, %v15901_v10  ;;  %v3593_v54 = vsel %vm3479_vm2, %v11011_v35, 0.0  ;;  %v16078_v2 = vld [vmem:[#allocation215_spill] sm:$0xff]  ;;  %v16080_v23 = vld [vmem:[#allocation5_spill] sm:$0xff]  ;;  %v7032_v27 = vld [vmem:[%s7139_s9 + $0xd8] sm:$0xff] }
 0x307   : > { %v2494_v6 = vadd.f32 %v16078_v2, %v2294_v60  ;;  %3168 = vrot.lane.b32.xlu0 %v3074_v9, %s7073_s10  ;;  %v3076_v24 = vmul.f32 %v10518_v61, %v15888_v53  ;;  %v11044_v31 = vstv %s10979_s30  ;;  %v11048_v1 = vadd.f32 %v16080_v23, %v16079_v48  ;;  %v16081_v32 = vld [vmem:[#allocation127_spill] sm:$0xff]  ;;  %v11056_v2 = vpop.permute.xlu1 %2854  ;;  %v11058_v9 = vpop.permute.xlu0 %2852  ;;  %v7033_v18 = vld [vmem:[%s7139_s9 + $0xe0] sm:$0xff] }
 0x308   : > { %v1557_v13 = vadd.f32 %v16081_v32, %v10916_v4  ;;  %v1556_v12 = vadd.f32 %v16082_v62, %v10782_v39  ;;  %v1630_v60 = vmul.f32 %v7032_v27, %v10109_v55  ;;  %16083 = vst [vmem:[#allocation87_spill] sm:$0xff] %v11056_v2  ;;  %16084 = vst [vmem:[#allocation88_spill] sm:$0xff] %v11058_v9  ;;  %v16087_v39 = vld [vmem:[#allocation175_spill] sm:$0xff] }
 0x309   : > { %v11061_v35 = vadd.f32 %v10163_v21, %v1555_v37  ;;  %v1631_v48 = vmul.f32 %v7033_v18, %v10109_v55  ;;  %v2095_v23 = vadd.f32 %v2062_v41, %v2027_v14  ;;  %v11066_v4 = vadd.f32 %v10337_v22, %v2493_v44  ;;  %v16088_v37 = vld [vmem:[#allocation299_spill] sm:$0xff]  ;;  %v16090_v41 = vld [vmem:[#allocation196_spill] sm:$0xff]  ;;  %v16092_v14 = vld [vmem:[#allocation174_spill] sm:$0xff] }
 0x30a   : > { %v3522_v32 = vadd.f32 %v3521_v49, %v3520_v51  ;;  %v1829_v62 = vadd.f32 %v16087_v39, %v1629_v52  ;;  %v3594_v8 = vadd.f32 %v3593_v54, %v3592_v43  ;;  %3174 = vrot.lane.b32.xlu1 %v3077_v46, %s7073_s10  ;;  %v3246_v27 = vmul.f32 %v11044_v31, %v15911_v0  ;;  %v16095_v54 = vld [vmem:[#allocation248_spill] sm:$0xff]  ;;  %v7035_v39 = vld [vmem:[%s7139_s9 + $0x1e0] sm:$0xff] }
 0x30b   : > { %16085 = vst [vmem:[#allocation89_spill] sm:$0xff] %v11061_v35  ;;  %16086 = vst [vmem:[#allocation90_spill] sm:$0xff] %v11066_v4  ;;  %v2096_v2 = vadd.f32 %v2063_v42, %v2028_v57  ;;  %v2295_v9 = vadd.f32 %v16088_v37, %v2095_v23  ;;  %v11074_v18 = vadd.f32 %v10337_v22, %v2494_v6  ;;  %3172 = vrot.lane.b32.xlu0 %v3076_v24, %s7073_s10  ;;  %v7034_v57 = vld [vmem:[%s7139_s9 + $0x1d8] sm:$0xff]  ;;  %v11088_v43 = vpop.permute.xlu1 %2858  ;;  %v11090_v46 = vpop.permute.xlu0 %2856  ;;  %v16096_v24 = vld [vmem:[#allocation258_spill] sm:$0xff] }
 0x30c   : > { %v3078_v51 = vmul.f32 %v10518_v61, %v16090_v41  ;;  %v11080_v52 = vadd.f32 %v10163_v21, %v1557_v13  ;;  %v11083_v49 = vadd.f32 %v10163_v21, %v1556_v12  ;;  %v1830_v44 = vadd.f32 %v16092_v14, %v1630_v60  ;;  %16093 = vst [vmem:[#allocation8_spill] sm:$0xff] %v11088_v43  ;;  %v16097_v13 = vld [vmem:[#allocation35_spill] sm:$0xff] }
 0x30d   : > { %16089 = vst [vmem:[#allocation11_spill] sm:$0xff] %v11074_v18  ;;  %v2064_v42 = vmul.f32 %v7034_v57, %v10223_v5  ;;  %16094 = vst [vmem:[#allocation92_spill] sm:$0xff] %v11090_v46  ;;  %v2029_v6 = vadd.f32 %v16095_v54, %v1829_v62  ;;  %v2296_v23 = vadd.f32 %v16096_v24, %v2096_v2  ;;  %v3595_v61 = vsel %vm3479_vm2, %v11066_v4, 0.0  ;;  %v16098_v2 = vld [vmem:[#allocation256_spill] sm:$0xff]  ;;  %v16099_v24 = vld [vmem:[#allocation37_spill] sm:$0xff] }
 0x30e   : > { %16091 = vst [vmem:[#allocation91_spill] sm:$0xff] %v11080_v52  ;;  %v2495_v12 = vadd.f32 %v16097_v13, %v2295_v9  ;;  %v3523_v60 = vsel %vm3479_vm2, %v11061_v35, 0.0  ;;  %v2065_v37 = vmul.f32 %v7035_v39, %v10223_v5  ;;  %v3596_v14 = vadd.f32 %v3595_v61, %v3594_v8  ;;  %3312 = vrot.lane.b32.xlu1 %v3246_v27, %s7074_s12  ;;  %v16100_v13 = vld [vmem:[#allocation262_spill] sm:$0xff]  ;;  %v7037_v4 = vld [vmem:[%s7139_s9 + $0xf0] sm:$0xff] }
 0x30f   : > { %v3248_v62 = vmul.f32 %v11044_v31, %v15925_v33  ;;  %v2030_v57 = vadd.f32 %v16098_v2, %v1830_v44  ;;  %v3597_v54 = vsel %vm3479_vm2, %v11074_v18, 0.0  ;;  %v2496_v9 = vadd.f32 %v16099_v24, %v2296_v23  ;;  %3176 = vrot.lane.b32.xlu0 %v3078_v51, %s7073_s10  ;;  %v16101_v8 = vld [vmem:[#allocation130_spill] sm:$0xff]  ;;  %v11117_v2 = vpop.permute.xlu1 %2862  ;;  %v11119_v18 = vpop.permute.xlu0 %2860  ;;  %s11808_s10 = sld [smem:[#allocation2 + $0x14]] }
 0x310   : > { %v3247_v43 = vmul.f32 %v11044_v31, %v16100_v13  ;;  %v3524_v46 = vadd.f32 %v3523_v60, %v3522_v32  ;;  %v1558_v61 = vadd.f32 %v16101_v8, %v10912_v15  ;;  %v7036_v27 = vld [vmem:[%s7139_s9 + $0xe8] sm:$0xff]  ;;  %v1633_v44 = vmul.f32 %v7037_v4, %v10109_v55  ;;  %16102 = vst [vmem:[#allocation143_spill] sm:$0xff] %v11117_v2  ;;  %v16105_v60 = vld [vmem:[#allocation129_spill] sm:$0xff] }
 0x311   : > { %v1632_v39 = vmul.f32 %v7036_v27, %v10109_v55  ;;  %16103 = vst [vmem:[#allocation93_spill] sm:$0xff] %v11119_v18  ;;  %v3527_v51 = vsel %vm3479_vm2, %v11080_v52, 0.0  ;;  %v3525_v23 = vsel %vm3479_vm2, %v11083_v49, 0.0  ;;  %v2097_v32 = vadd.f32 %v2064_v42, %v2029_v6  ;;  %v16106_v8 = vld [vmem:[#allocation177_spill] sm:$0xff]  ;;  %v16107_v52 = vld [vmem:[#allocation303_spill] sm:$0xff] }
 0x312   : > { %v11126_v15 = vadd.f32 %v10337_v22, %v2495_v12  ;;  %v1559_v24 = vadd.f32 %v16105_v60, %v10987_v11  ;;  %v1831_v4 = vadd.f32 %v16106_v8, %v1631_v48  ;;  %v3598_v27 = vadd.f32 %v3597_v54, %v3596_v14  ;;  %3316 = vrot.lane.b32.xlu1 %v3248_v62, %s7074_s12  ;;  %v16110_v12 = vld [vmem:[#allocation176_spill] sm:$0xff]  ;;  %v7038_v62 = vld [vmem:[%s7139_s9 + $0x1e8] sm:$0xff]  ;;  %v16113_v54 = vld [vmem:[#allocation255_spill] sm:$0xff] }
 0x313   : > { %v3250_v2 = vmul.f32 %v11044_v31, %v15937_v47  ;;  %v2098_v18 = vadd.f32 %v2065_v37, %v2030_v57  ;;  %v2297_v35 = vadd.f32 %v16107_v52, %v2097_v32  ;;  %v11136_v42 = vadd.f32 %v10337_v22, %v2496_v9  ;;  %3314 = vrot.lane.b32.xlu0 %v3247_v43, %s7074_s12  ;;  %v11147_v57 = vpop.permute.xlu1 %2866  ;;  %v11149_v52 = vpop.permute.xlu0 %2864  ;;  %v16114_v32 = vld [vmem:[#allocation302_spill] sm:$0xff] }
 0x314   : > { %16104 = vst [vmem:[#allocation144_spill] sm:$0xff] %v11126_v15  ;;  %v3249_v11 = vmul.f32 %v11044_v31, %v15922_v20  ;;  %v3526_v6 = vadd.f32 %v3525_v23, %v3524_v46  ;;  %v11142_v48 = vadd.f32 %v10163_v21, %v1558_v61  ;;  %v1832_v14 = vadd.f32 %v16110_v12, %v1632_v39  ;;  %v16115_v46 = vld [vmem:[#allocation218_spill] sm:$0xff]  ;;  %v7039_v39 = vld [vmem:[%s7139_s9 + $0x1f0] sm:$0xff] }
 0x315   : > { %16108 = vst [vmem:[#allocation183_spill] sm:$0xff] %v11136_v42  ;;  %v2066_v37 = vmul.f32 %v7038_v62, %v10223_v5  ;;  %16111 = vst [vmem:[#allocation10_spill] sm:$0xff] %v11147_v57  ;;  %v2031_v9 = vadd.f32 %v16113_v54, %v1831_v4  ;;  %v2298_v43 = vadd.f32 %v16114_v32, %v2098_v18  ;;  %v3599_v60 = vsel %vm3479_vm2, %v11126_v15, 0.0  ;;  %v16117_v18 = vld [vmem:[#allocation261_spill] sm:$0xff]  ;;  %v16118_v32 = vld [vmem:[#allocation138_spill] sm:$0xff] }
 0x316   : > { %16109 = vst [vmem:[#allocation94_spill] sm:$0xff] %v11142_v48  ;;  %16112 = vst [vmem:[#allocation95_spill] sm:$0xff] %v11149_v52  ;;  %v2497_v61 = vadd.f32 %v16115_v46, %v2297_v35  ;;  %v11157_v23 = vadd.f32 %v10163_v21, %v1559_v24  ;;  %v2067_v8 = vmul.f32 %v7039_v39, %v10223_v5  ;;  %3320 = vrot.lane.b32.xlu1 %v3250_v2, %s7074_s12  ;;  %v16119_v46 = vld [vmem:[#allocation30_spill] sm:$0xff]  ;;  %v16121_v2 = vld [vmem:[#allocation133_spill] sm:$0xff] }
 0x317   : > { %v3600_v12 = vadd.f32 %v3599_v60, %v3598_v27  ;;  %v3252_v4 = vmul.f32 %v11044_v31, %v9194_v19  ;;  %v2032_v62 = vadd.f32 %v16117_v18, %v1832_v14  ;;  %v3601_v54 = vsel %vm3479_vm2, %v11136_v42, 0.0  ;;  %3318 = vrot.lane.b32.xlu0 %v3249_v11, %s7074_s12  ;;  %v16120_v27 = vld [vmem:[#allocation111_spill] sm:$0xff]  ;;  %v7040_v52 = vld [vmem:[%s7139_s9 + $0xf8] sm:$0xff]  ;;  %v11177_v18 = vpop.permute.xlu1 %2870  ;;  %v11179_v42 = vpop.permute.xlu0 %2868 }
 0x318   : > { %16116 = vst [vmem:[#allocation180_spill] sm:$0xff] %v11157_v23  ;;  %v2498_v35 = vadd.f32 %v16118_v32, %v2298_v43  ;;  %v3251_v24 = vmul.f32 %v11044_v31, %v9170_v38  ;;  %v1361_v60 = vadd.f32 %v16120_v27, %v16119_v46  ;;  %v3528_v39 = vadd.f32 %v3527_v51, %v3526_v6  ;;  %v7041_v43 = vld [vmem:[%s7139_s9 + $0x100] sm:$0x1]  ;;  %v16125_v6 = vld [vmem:[#allocation179_spill] sm:$0xff] }
 0x319   : > { %v1560_v57 = vadd.f32 %v16121_v2, %v10983_v58  ;;  %v1634_v14 = vmul.f32 %v7040_v52, %v10109_v55  ;;  %16122 = vst [vmem:[#allocation96_spill] sm:$0xff] %v11177_v18  ;;  %16123 = vst [vmem:[#allocation148_spill] sm:$0xff] %v11179_v42  ;;  %v3529_v11 = vsel %vm3479_vm2, %v11142_v48, 0.0  ;;  %v1635_v32 = vmul.f32 %v7041_v43, %v10109_v55  ;;  %v16126_v18 = vld [vmem:[#allocation306_spill] sm:$0xff] }
 0x31a   : > { %v2099_v15 = vadd.f32 %v2066_v37, %v2031_v9  ;;  %v11186_v51 = vadd.f32 %v10337_v22, %v2497_v61  ;;  %v3531_v58 = vsel %vm3479_vm2, %v11157_v23, 0.0  ;;  %v1833_v52 = vadd.f32 %v16125_v6, %v1633_v44  ;;  %3324 = vrot.lane.b32.xlu1 %v3252_v4, %s7074_s12  ;;  %v16128_v61 = vld [vmem:[#allocation178_spill] sm:$0xff]  ;;  %v7042_v4 = vld [vmem:[%s7139_s9 + $0x1f8] sm:$0xff]  ;;  %v7043_v23 = vld [vmem:[%s7139_s9 + $0x200] sm:$0xff] }
 0x31b   : > { %v3602_v46 = vadd.f32 %v3601_v54, %v3600_v12  ;;  %v3254_v27 = vmul.f32 %v11044_v31, %v9288_v30  ;;  %v2100_v2 = vadd.f32 %v2067_v8, %v2032_v62  ;;  %v11196_v55 = vadd.f32 %v10337_v22, %v2498_v35  ;;  %3322 = vrot.lane.b32.xlu0 %v3251_v24, %s7074_s12  ;;  %v11207_v62 = vpop.permute.xlu1 %2874  ;;  %v16131_v54 = vld [vmem:[#allocation260_spill] sm:$0xff] }
 0x31c   : > { %16124 = vst [vmem:[#allocation13_spill] sm:$0xff] %v11186_v51  ;;  %v2299_v42 = vadd.f32 %v16126_v18, %v2099_v15  ;;  %v3253_v37 = vmul.f32 %v11044_v31, %v9178_v36  ;;  %v3530_v9 = vadd.f32 %v3529_v11, %v3528_v39  ;;  %v11202_v44 = vadd.f32 %v10163_v21, %v1560_v57  ;;  %v11209_v15 = vpop.permute.xlu0 %2872  ;;  %v16132_v18 = vld [vmem:[#allocation305_spill] sm:$0xff]  ;;  %v16133_v39 = vld [vmem:[#allocation38_spill] sm:$0xff]  ;;  %v16134_v57 = vld [vmem:[#allocation132_spill] sm:$0xff] }
 0x31d   : > { %16127 = vst [vmem:[#allocation147_spill] sm:$0xff] %v11196_v55  ;;  %v1834_v12 = vadd.f32 %v16128_v61, %v1634_v14  ;;  %v2068_v8 = vmul.f32 %v7042_v4, %v10223_v5  ;;  %16129 = vst [vmem:[#allocation182_spill] sm:$0xff] %v11207_v62  ;;  %v2033_v35 = vadd.f32 %v16131_v54, %v1833_v52  ;;  %v3603_v43 = vsel %vm3479_vm2, %v11186_v51, 0.0  ;;  %v16135_v62 = vld [vmem:[#allocation265_spill] sm:$0xff]  ;;  %v16136_v54 = vld [vmem:[#allocation40_spill] sm:$0xff] }
 0x31e   : > { %16130 = vst [vmem:[#allocation268_spill] sm:$0xff] %v11209_v15  ;;  %v2300_v24 = vadd.f32 %v16132_v18, %v2100_v2  ;;  %v2499_v11 = vadd.f32 %v16133_v39, %v2299_v42  ;;  %v1561_v6 = vadd.f32 %v16134_v57, %v1361_v60  ;;  %v2069_v14 = vmul.f32 %v7043_v23, %v10223_v5  ;;  %v16137_v60 = vld [vmem:[#allocation199_spill] sm:$0xff]  ;;  %v16138_v23 = vld [vmem:[#allocation81_spill] sm:$0xff]  ;;  %v16141_v15 = vld [vmem:[#allocation136_spill] sm:$0xff] }
 0x31f   : > { %v3604_v61 = vadd.f32 %v3603_v43, %v3602_v46  ;;  %3328 = vrot.lane.b32.xlu1 %v3254_v27, %s7074_s12  ;;  %v3256_v4 = vmul.f32 %v11044_v31, %v15962_v40  ;;  %v2034_v52 = vadd.f32 %v16135_v62, %v1834_v12  ;;  %v3605_v2 = vsel %vm3479_vm2, %v11196_v55, 0.0  ;;  %3326 = vrot.lane.b32.xlu0 %v3253_v37, %s7074_s12  ;;  %v16139_v43 = vld [vmem:[#allocation210_spill] sm:$0xff]  ;;  %v16140_v27 = vld [vmem:[#allocation324_spill] sm:$0xff]  ;;  %v11235_v62 = vpop.permute.xlu1 %2878 }
 0x320   : > { %v2500_v18 = vadd.f32 %v16136_v54, %v2300_v24  ;;  %v3255_v42 = vmul.f32 %v11044_v31, %v9258_v26  ;;  %v1097_v46 = vadd.f32 %v16138_v23, %v16137_v60  ;;  %v1163_v39 = vadd.f32 %v16140_v27, %v16139_v43  ;;  %16142 = vst [vmem:[#allocation185_spill] sm:$0xff] %v11235_v62  ;;  %v11237_v55 = vpop.permute.xlu0 %2876  ;;  %v16144_v24 = vld [vmem:[#allocation31_spill] sm:$0xff]  ;;  %v16147_v27 = vld [vmem:[#allocation310_spill] sm:$0xff] }
 0x321   : > { %v3532_v57 = vadd.f32 %v3531_v58, %v3530_v9  ;;  %v1562_v12 = vadd.f32 %v16141_v15, %v11048_v1  ;;  %16143 = vst [vmem:[#allocation269_spill] sm:$0xff] %v11237_v55  ;;  %v16145_v54 = vld [vmem:[#allocation195_spill] sm:$0xff]  ;;  %v3533_v51 = vsel %vm3479_vm2, %v11202_v44, 0.0  ;;  %v2101_v48 = vadd.f32 %v2068_v8, %v2033_v35  ;;  %v16146_v9 = vld [vmem:[#allocation181_spill] sm:$0xff] }
 0x322   : > { %v1164_v37 = vadd.f32 %v16145_v54, %v16144_v24  ;;  %v11244_v60 = vadd.f32 %v10337_v22, %v2499_v11  ;;  %v11247_v58 = vadd.f32 %v10163_v21, %v1561_v6  ;;  %v1835_v1 = vadd.f32 %v16146_v9, %v1635_v32  ;;  %v16148_v35 = vld [vmem:[#allocation7_spill] sm:$0xff] }
 0x323   : > { %v3606_v15 = vadd.f32 %v3605_v2, %v3604_v61  ;;  %3332 = vrot.lane.b32.xlu1 %v3256_v4, %s7074_s12  ;;  %v3258_v23 = vmul.f32 %v11044_v31, %v15977_v17  ;;  %v2102_v43 = vadd.f32 %v2069_v14, %v2034_v52  ;;  %v2301_v24 = vadd.f32 %v16147_v27, %v2101_v48  ;;  %v7044_v61 = vld [vmem:[%s7139_s9 + $0x208] sm:$0x1]  ;;  %v11266_v14 = vpop.permute.xlu1 %2882  ;;  %v16151_v52 = vld [vmem:[#allocation264_spill] sm:$0xff] }
 0x324   : > { %v11255_v54 = vadd.f32 %v10337_v22, %v2500_v18  ;;  %3330 = vrot.lane.b32.xlu0 %v3255_v42, %s7074_s12  ;;  %v3257_v8 = vmul.f32 %v11044_v31, %v15780_v45  ;;  %v1363_v11 = vadd.f32 %v16148_v35, %v1163_v39  ;;  %v3534_v32 = vadd.f32 %v3533_v51, %v3532_v57  ;;  %v11268_v48 = vpop.permute.xlu0 %2880  ;;  %v16152_v18 = vld [vmem:[#allocation309_spill] sm:$0xff]  ;;  %v16153_v27 = vld [vmem:[#allocation134_spill] sm:$0xff] }
 0x325   : > { %v11262_v6 = vadd.f32 %v10163_v21, %v1562_v12  ;;  %v2070_v4 = vmul.f32 %v7044_v61, %v10223_v5  ;;  %16149 = vst [vmem:[#allocation319_spill] sm:$0xff] %v11266_v14  ;;  %16150 = vst [vmem:[#allocation97_spill] sm:$0xff] %v11268_v48  ;;  %v2035_v2 = vadd.f32 %v16151_v52, %v1835_v1  ;;  %v3607_v9 = vsel %vm3479_vm2, %v11244_v60, 0.0  ;;  %v16154_v51 = vld [vmem:[#allocation6_spill] sm:$0xff]  ;;  %v16155_v61 = vld [vmem:[#allocation135_spill] sm:$0xff] }
 0x326   : > { %v2302_v42 = vadd.f32 %v16152_v18, %v2102_v43  ;;  %v2501_v39 = vadd.f32 %v16153_v27, %v2301_v24  ;;  %v1364_v57 = vadd.f32 %v16154_v51, %v1164_v37  ;;  %v3535_v12 = vsel %vm3479_vm2, %v11247_v58, 0.0  ;;  %v16156_v52 = vld [vmem:[#allocation51_spill] sm:$0xff]  ;;  %v16201_v48 = vld [vmem:[#allocation36_spill] sm:$0xff] }
 0x327   : > { %v3608_v35 = vadd.f32 %v3607_v9, %v3606_v15  ;;  %3336 = vrot.lane.b32.xlu1 %v3258_v23, %s7074_s12  ;;  %v3260_v5 = vmul.f32 %v11044_v31, %v15988_v25  ;;  %v1563_v1 = vadd.f32 %v16155_v61, %v1363_v11  ;;  %v3609_v43 = vsel %vm3479_vm2, %v11255_v54, 0.0  ;;  %v11288_v27 = vpop.permute.xlu1 %2886  ;;  %v16159_v9 = vld [vmem:[#allocation140_spill] sm:$0xff] }
 0x328   : > { %v2502_v18 = vadd.f32 %v16156_v52, %v2302_v42  ;;  %3334 = vrot.lane.b32.xlu0 %v3257_v8, %s7074_s12  ;;  %v3259_v37 = vmul.f32 %v11044_v31, %v15974_v7  ;;  %v3536_v24 = vadd.f32 %v3535_v12, %v3534_v32  ;;  %16157 = vst [vmem:[#allocation98_spill] sm:$0xff] %v11288_v27  ;;  %v11290_v15 = vpop.permute.xlu0 %2884  ;;  %v3537_v23 = vsel %vm3479_vm2, %v11262_v6, 0.0  ;;  %v16160_v42 = vld [vmem:[#allocation18_spill] sm:$0xff] }
 0x329   : > { %16158 = vst [vmem:[#allocation12_spill] sm:$0xff] %v11290_v15  ;;  %v1564_v11 = vadd.f32 %v16159_v9, %v1364_v57  ;;  %v2103_v51 = vadd.f32 %v2070_v4, %v2035_v2  ;;  %v11296_v61 = vadd.f32 %v10337_v22, %v2501_v39  ;;  %v1165_v52 = vadd.f32 %v16160_v42, %v1097_v46  ;;  %v16161_v27 = vld [vmem:[#allocation314_spill] sm:$0xff]  ;;  %v16164_v57 = vld [vmem:[#allocation9_spill] sm:$0xff] }
 0x32a   : > { %v3610_v8 = vadd.f32 %v3609_v43, %v3608_v35  ;;  %v3262_v32 = vmul.f32 %v11044_v31, %v16000_v29  ;;  %v11303_v12 = vadd.f32 %v10163_v21, %v1563_v1  ;;  %v11307_v14 = vadd.f32 %v10337_v22, %v2502_v18  ;;  %v16165_v43 = vld [vmem:[#allocation49_spill] sm:$0xff] }
 0x32b   : > { %3340 = vrot.lane.b32.xlu1 %v3260_v5, %s7074_s12  ;;  %v2303_v15 = vadd.f32 %v16161_v27, %v2103_v51  ;;  %v3261_v4 = vmul.f32 %v11044_v31, %v15985_v59  ;;  %v3538_v46 = vadd.f32 %v3537_v23, %v3536_v24  ;;  %v11312_v2 = vpop.permute.xlu1 %2890  ;;  %v1365_v35 = vadd.f32 %v16164_v57, %v1165_v52  ;;  %v16166_v23 = vld [vmem:[#allocation139_spill] sm:$0xff] }
 0x32c   : > { %3338 = vrot.lane.b32.xlu0 %v3259_v37, %s7074_s12  ;;  %16162 = vst [vmem:[#allocation313_spill] sm:$0xff] %v11312_v2  ;;  %v11314_v39 = vpop.permute.xlu0 %2888  ;;  %v11318_v5 = vadd.f32 %v10163_v21, %v1564_v11  ;;  %v3611_v1 = vsel %vm3479_vm2, %v11296_v61, 0.0  ;;  %v3264_v37 = vmul.f32 %v11044_v31, %v16011_v34  ;;  %v3539_v24 = vsel %vm3479_vm2, %v11303_v12, 0.0 }
 0x32d   : > { %16163 = vst [vmem:[#allocation152_spill] sm:$0xff] %v11314_v39  ;;  %v2503_v18 = vadd.f32 %v16165_v43, %v2303_v15  ;;  %v3612_v27 = vadd.f32 %v3611_v1, %v3610_v8  ;;  %v1565_v9 = vadd.f32 %v16166_v23, %v1365_v35  ;;  %v3613_v11 = vsel %vm3479_vm2, %v11307_v14, 0.0  ;;  %v16172_v23 = vld [vmem:[#allocation300_spill] sm:$0xff] }
 0x32e   : > { %v3263_v51 = vmul.f32 %v11044_v31, %v15997_v50  ;;  %v3540_v15 = vadd.f32 %v3539_v24, %v3538_v46  ;;  %v3541_v8 = vsel %vm3479_vm2, %v11318_v5, 0.0  ;;  %v3265_v46 = vmul.f32 %v11044_v31, %v15831_v3 }
 0x32f   : > { %3344 = vrot.lane.b32.xlu1 %v3262_v32, %s7074_s12  ;;  %v11334_v42 = vpop.permute.xlu1 %2894  ;;  %v11341_v32 = vadd.f32 %v10337_v22, %v2503_v18  ;;  %v3614_v57 = vadd.f32 %v3613_v11, %v3612_v27  ;;  %v11347_v35 = vadd.f32 %v10163_v21, %v1565_v9  ;;  %v3267_v9 = vmul.f32 %v11044_v31, %v16172_v23  ;;  %v3944_v23 = vld [vmem:[%s14886_s2 + $0x40] sm:$0xff] }
 0x330   : > { %3342 = vrot.lane.b32.xlu0 %v3261_v4, %s7074_s12  ;;  %16167 = vst [vmem:[#allocation271_spill] sm:$0xff] %v11334_v42  ;;  %v11336_v52 = vpop.permute.xlu0 %2892  ;;  %v3266_v4 = vmul.f32 %v11044_v31, %v16022_v56  ;;  %v3542_v1 = vadd.f32 %v3541_v8, %v3540_v15  ;;  %v7075_v2 = vmov 0  }
 0x331   : > { %16168 = vst [vmem:[#allocation15_spill] sm:$0xff] %v11336_v52  ;;  %v3615_v18 = vsel %vm3543_vm3, %v11341_v32, 0.0  ;;  %v3544_v24 = vsel %vm3543_vm3, %v11347_v35, 0.0  ;;  %6832 = vset.pattern.permute.xlu1 %v7075_v2  ;;  %6831 = vset.pattern.permute.xlu0 %v7075_v2  ;;  %v3276_v2 = vmul.f32 %v11044_v31, %v15888_v53 }
 0x332   : > { %v3616_v27 = vadd.f32 %v3615_v18, %v3614_v57  ;;  %v3545_v11 = vadd.f32 %v3544_v24, %v3542_v1  ;;  %v3270_v57 = vmul.f32 %v11044_v31, %v16048_v16  ;;  %v16178_v24 = vld [vmem:[#allocation312_spill] sm:$0xff] }
 0x333   : > { %3348 = vrot.lane.b32.xlu1 %v3264_v37, %s7074_s12  ;;  %v11352_v43 = vpop.permute.xlu1 %2898  ;;  %v16171_v37 = vld [vmem:[#allocation304_spill] sm:$0xff] }
 0x334   : > { %3346 = vrot.lane.b32.xlu0 %v3263_v51, %s7074_s12  ;;  %16169 = vst [vmem:[#allocation151_spill] sm:$0xff] %v11352_v43  ;;  %v11354_v22 = vpop.permute.xlu0 %2896  ;;  %v3268_v21 = vmul.f32 %v11044_v31, %v16171_v37  ;;  %v3617_v8 = vrot.slane %v3616_v27, 4 }
 0x335   : > { %16170 = vst [vmem:[#allocation184_spill] sm:$0xff] %v11354_v22 }
 0x336   : > { %v3618_v1 = vadd.f32 %v3617_v8, %v3616_v27  ;;  %v3274_v27 = vmul.f32 %v11044_v31, %v15877_v63  ;;  %v16180_v8 = vld [vmem:[#allocation311_spill] sm:$0xff] }
 0x337   : > { %3352 = vrot.lane.b32.xlu1 %v3266_v4, %s7074_s12  ;;  %v11366_v51 = vpop.permute.xlu1 %2902  ;;  %v16175_v4 = vld [vmem:[#allocation221_spill] sm:$0xff] }
 0x338   : > { %3350 = vrot.lane.b32.xlu0 %v3265_v46, %s7074_s12  ;;  %16173 = vst [vmem:[#allocation270_spill] sm:$0xff] %v11366_v51  ;;  %v11368_v15 = vpop.permute.xlu0 %2900  ;;  %v3269_v18 = vmul.f32 %v11044_v31, %v16175_v4  ;;  %v3546_v46 = vrot.slane %v3545_v11, 4  ;;  %v3272_v51 = vmul.f32 %v11044_v31, %v16178_v24  ;;  %v16197_v24 = vld [vmem:[#allocation39_spill] sm:$0xff] }
 0x339   : > { %16174 = vst [vmem:[#allocation318_spill] sm:$0xff] %v11368_v15  ;;  %v3942_v4 = vld [vmem:[%s14886_s2 + $0x30] sm:$0xff] }
 0x33b   : > { %3356 = vrot.lane.b32.xlu1 %v3268_v21, %s7074_s12  ;;  %v11376_v22 = vpop.permute.xlu1 %2906  ;;  %v16179_v21 = vld [vmem:[#allocation307_spill] sm:$0xff] }
 0x33c   : > { %3354 = vrot.lane.b32.xlu0 %v3267_v9, %s7074_s12  ;;  %16176 = vst [vmem:[#allocation187_spill] sm:$0xff] %v11376_v22  ;;  %v11378_v43 = vpop.permute.xlu0 %2904  ;;  %v3271_v15 = vmul.f32 %v11044_v31, %v16179_v21  ;;  %v3547_v9 = vadd.f32 %v3546_v46, %v3545_v11  ;;  %v3619_v22 = vrot.slane %v3618_v1, 2 }
 0x33d   : > { %16177 = vst [vmem:[#allocation17_spill] sm:$0xff] %v11378_v43 }
 0x33e   : > { %v3620_v43 = vadd.f32 %v3619_v22, %v3618_v1  ;;  %v3278_v22 = vmul.f32 %v11044_v31, %v16090_v41  ;;  %v3277_v1 = vmul.f32 %v11044_v31, %v15901_v10 }
 0x33f   : > { %3360 = vrot.lane.b32.xlu1 %v3270_v57, %s7074_s12  ;;  %v11386_v52 = vpop.permute.xlu1 %3114  ;;  %v3273_v57 = vmul.f32 %v11044_v31, %v16180_v8 }
 0x340   : > { %3358 = vrot.lane.b32.xlu0 %v3269_v18, %s7074_s12  ;;  %v11388_v42 = vpop.permute.xlu0 %3112  ;;  %v3548_v18 = vrot.slane %v3547_v9, 2  ;;  %v3621_v21 = vrot.slane %v3620_v43, 1 }
 0x343   : > { %3364 = vrot.lane.b32.xlu1 %v3272_v51, %s7074_s12  ;;  %v11396_v11 = vpop.permute.xlu1 %3118  ;;  %v3275_v51 = vmul.f32 %v11044_v31, %v15889_v28  ;;  %v3936_v31 = vld [vmem:[%s14886_s2] sm:$0xff] }
 0x344   : > { %3362 = vrot.lane.b32.xlu0 %v3271_v15, %s7074_s12  ;;  %v11398_v46 = vpop.permute.xlu0 %3116  ;;  %v3549_v15 = vadd.f32 %v3548_v18, %v3547_v9  ;;  %v3622_v9 = vadd.f32 %v3621_v21, %v3620_v43  ;;  %v3937_v18 = vld [vmem:[%s14886_s2 + $0x8] sm:$0xff]  ;;  %v3938_v43 = vld [vmem:[%s14886_s2 + $0x10] sm:$0xff] }
 0x347   : > { %3368 = vrot.lane.b32.xlu1 %v3274_v27, %s7074_s12  ;;  %v11406_v63 = vpop.permute.xlu1 %3122  ;;  %v3550_v27 = vrot.slane %v3549_v15, 1 }
 0x348   : > { %3366 = vrot.lane.b32.xlu0 %v3273_v57, %s7074_s12  ;;  %16181 = vst [vmem:[#allocation99_spill] sm:$0xff] %v11406_v63  ;;  %v11408_v8 = vpop.permute.xlu0 %3120 }
 0x349   : > { %16182 = vst [vmem:[#allocation155_spill] sm:$0xff] %v11408_v8  ;;  %v16303_v8 = vld [vmem:[#allocation149_spill] sm:$0xff] }
 0x34b   : > { %3372 = vrot.lane.b32.xlu1 %v3276_v2, %s7074_s12  ;;  %v11416_v57 = vpop.permute.xlu1 %3126  ;;  %v3551_v2 = vadd.f32 %v3550_v27, %v3549_v15  ;;  %v3939_v15 = vld [vmem:[%s14886_s2 + $0x18] sm:$0xff]  ;;  %v3940_v27 = vld [vmem:[%s14886_s2 + $0x20] sm:$0xff] }
 0x34c   : > { %3370 = vrot.lane.b32.xlu0 %v3275_v51, %s7074_s12  ;;  %16183 = vst [vmem:[#allocation275_spill] sm:$0xff] %v11416_v57  ;;  %v11418_v53 = vpop.permute.xlu0 %3124  ;;  %v4170_v57 = vld [vmem:[%s14887_s3 + $0x18] sm:$0xff] }
 0x34d   : > { %16184 = vst [vmem:[#allocation14_spill] sm:$0xff] %v11418_v53  ;;  %v3623_v10 = vadd.f32 %v3622_v9, %v3551_v2 }
 0x34f   : > { %3376 = vrot.lane.b32.xlu1 %v3278_v22, %s7074_s12  ;;  %v11425_v41 = vpop.permute.xlu1 %3130 }
 0x350   : > { %3374 = vrot.lane.b32.xlu0 %v3277_v1, %s7074_s12  ;;  %16185 = vst [vmem:[#allocation154_spill] sm:$0xff] %v11425_v41  ;;  %v11430_v51 = vpop.permute.xlu0 %3128  ;;  %v11442_v1 = vmul.f32 0.0019455253, %v3623_v10  ;;  %v16193_v10 = vld [vmem:[#allocation34_spill] sm:$0xff]  ;;  %s6808_s12 = smul.u32 1056, %s16819_s22 }
 0x351   : > { %16186 = vst [vmem:[#allocation186_spill] sm:$0xff] %v11430_v51 }
 0x352   : > { %v11468_v16 = vsub.f32 %v16197_v24, %v11442_v1  ;;  %v11493_v62 = vsub.f32 %v16201_v48, %v11442_v1 }
 0x353   : > { %3976 = vperm.xlu1 %6832, %v3937_v18   ;;  %v11435_v21 = vpop.permute.xlu1 %3134  ;;  %v3941_v18 = vld [vmem:[%s14886_s2 + $0x28] sm:$0xff] }
 0x354   : > { %3971 = vperm.xlu0 %6831, %v3936_v31   ;;  %16187 = vst [vmem:[#allocation274_spill] sm:$0xff] %v11435_v21  ;;  %v11440_v22 = vpop.permute.xlu0 %3132  ;;  %v16191_v31 = vld [vmem:[#allocation214_spill] sm:$0xff]  ;;  %16198 = vst [vmem:[#allocation157_spill] sm:$0xff] %v11468_v16  ;;  %v3968_v21 = vld [vmem:[%s14886_s2 + $0x100] sm:$0x1] }
 0x355   : > { %16188 = vst [vmem:[#allocation194_spill] sm:$0xff] %v11440_v22  ;;  %v11456_v28 = vsub.f32 %v16191_v31, %v11442_v1  ;;  %16202 = vst [vmem:[#allocation188_spill] sm:$0xff] %v11493_v62 }
 0x357   : > { %3981 = vperm.xlu1 %6832, %v3938_v43   ;;  %v11447_v9 = vpop.permute.xlu1 %3138  ;;  %16192 = vst [vmem:[#allocation100_spill] sm:$0xff] %v11456_v28  ;;  %v11460_v43 = vsub.f32 %v16193_v10, %v11442_v1  ;;  %v3943_v10 = vld [vmem:[%s14886_s2 + $0x38] sm:$0xff] }
 0x358   : > { %3986 = vperm.xlu0 %6831, %v3939_v15   ;;  %16189 = vst [vmem:[#allocation189_spill] sm:$0xff] %v11447_v9  ;;  %v11452_v2 = vpop.permute.xlu0 %3136  ;;  %v16195_v15 = vld [vmem:[#allocation142_spill] sm:$0xff] }
 0x359   : > { %16190 = vst [vmem:[#allocation197_spill] sm:$0xff] %v11452_v2  ;;  %16194 = vst [vmem:[#allocation112_spill] sm:$0xff] %v11460_v43  ;;  %v11464_v39 = vsub.f32 %v16195_v15, %v11442_v1  ;;  %v3691_v15 = vmul.f32 %v11456_v28, %v11456_v28  ;;  %v3692_v24 = vmul.f32 %v11460_v43, %v11460_v43  ;;  %v16203_v28 = vld [vmem:[#allocation137_spill] sm:$0xff] }
 0x35a   : > { %v11497_v56 = vsub.f32 %v16203_v28, %v11442_v1  ;;  %v3946_v28 = vld [vmem:[%s14886_s2 + $0x50] sm:$0xff] }
 0x35b   : > { %16196 = vst [vmem:[#allocation16_spill] sm:$0xff] %v11464_v39  ;;  %3991 = vperm.xlu1 %6832, %v3940_v27   ;;  %v11473_v31 = vpop.permute.xlu1 %3142  ;;  %v3795_v27 = vmul.f32 %v11464_v39, %v11464_v39  ;;  %v3725_v39 = vsel %vm3479_vm2, %v3692_v24, 0.0 }
 0x35c   : > { %3996 = vperm.xlu0 %6831, %v3941_v18   ;;  %16199 = vst [vmem:[#allocation278_spill] sm:$0xff] %v11473_v31  ;;  %v11478_v37 = vpop.permute.xlu0 %3140  ;;  %v3796_v18 = vmul.f32 %v11468_v16, %v11468_v16  ;;  %16204 = vst [vmem:[#allocation277_spill] sm:$0xff] %v11497_v56  ;;  %v3945_v16 = vld [vmem:[%s14886_s2 + $0x48] sm:$0xff]  ;;  %v3797_v24 = vmul.f32 %v11497_v56, %v11497_v56  ;;  %v3948_v56 = vld [vmem:[%s14886_s2 + $0x60] sm:$0xff] }
 0x35d   : > { %16200 = vst [vmem:[#allocation156_spill] sm:$0xff] %v11478_v37  ;;  %v3828_v3 = vsel %vm3479_vm2, %v3795_v27, 0.0 }
 0x35e   : > { %v3829_v48 = vsel %vm3479_vm2, %v3796_v18, 0.0 }
 0x35f   : > { %4001 = vperm.xlu1 %6832, %v3942_v4   ;;  %v11499_v43 = vpop.permute.xlu1 %3146  ;;  %v3830_v18 = vadd.f32 %v3829_v48, %v3828_v3  ;;  %v3831_v48 = vsel %vm3479_vm2, %v3797_v24, 0.0  ;;  %v3950_v24 = vld [vmem:[%s14886_s2 + $0x70] sm:$0xff] }
 0x360   : > { %4006 = vperm.xlu0 %6831, %v3943_v10   ;;  %16205 = vst [vmem:[#allocation19_spill] sm:$0xff] %v11499_v43  ;;  %v11504_v4 = vpop.permute.xlu0 %3144  ;;  %v3724_v10 = vsel %vm3479_vm2, %v3691_v15, 0.0  ;;  %v16207_v43 = vld [vmem:[#allocation131_spill] sm:$0xff]  ;;  %v3693_v15 = vmul.f32 %v11493_v62, %v11493_v62  ;;  %v16215_v62 = vld [vmem:[#allocation45_spill] sm:$0xff] }
 0x361   : > { %16206 = vst [vmem:[#allocation191_spill] sm:$0xff] %v11504_v4  ;;  %v11515_v55 = vsub.f32 %v16207_v43, %v11442_v1  ;;  %v16209_v4 = vld [vmem:[#allocation42_spill] sm:$0xff]  ;;  %v3726_v27 = vadd.f32 %v3725_v39, %v3724_v10  ;;  %v11538_v31 = vsub.f32 %v16215_v62, %v11442_v1 }
 0x362   : > { %v11519_v34 = vsub.f32 %v16209_v4, %v11442_v1  ;;  %v16213_v4 = vld [vmem:[#allocation41_spill] sm:$0xff]  ;;  %v3727_v3 = vsel %vm3479_vm2, %v3693_v15, 0.0  ;;  %v3949_v62 = vld [vmem:[%s14886_s2 + $0x68] sm:$0xff] }
 0x363   : > { %4011 = vperm.xlu1 %6832, %v3944_v23   ;;  %16208 = vst [vmem:[#allocation198_spill] sm:$0xff] %v11515_v55  ;;  %v11525_v23 = vpop.permute.xlu1 %3150  ;;  %v11534_v50 = vsub.f32 %v16213_v4, %v11442_v1  ;;  %16216 = vst [vmem:[#allocation281_spill] sm:$0xff] %v11538_v31  ;;  %v3694_v39 = vmul.f32 %v11515_v55, %v11515_v55  ;;  %v3832_v4 = vadd.f32 %v3831_v48, %v3830_v18  ;;  %v16219_v55 = vld [vmem:[#allocation52_spill] sm:$0xff]  ;;  %v16221_v15 = vld [vmem:[#allocation54_spill] sm:$0xff] }
 0x364   : > { %4016 = vperm.xlu0 %6831, %v3945_v16   ;;  %16210 = vst [vmem:[#allocation114_spill] sm:$0xff] %v11519_v34  ;;  %16211 = vst [vmem:[#allocation113_spill] sm:$0xff] %v11525_v23  ;;  %v3947_v16 = vld [vmem:[%s14886_s2 + $0x58] sm:$0xff]  ;;  %v11530_v43 = vpop.permute.xlu0 %3148  ;;  %v3798_v10 = vmul.f32 %v11519_v34, %v11519_v34  ;;  %v11562_v34 = vsub.f32 %v16221_v15, %v11442_v1 }
 0x365   : > { %16212 = vst [vmem:[#allocation263_spill] sm:$0xff] %v11530_v43  ;;  %16214 = vst [vmem:[#allocation159_spill] sm:$0xff] %v11534_v50  ;;  %v11558_v43 = vsub.f32 %v16219_v55, %v11442_v1  ;;  %v3729_v18 = vsel %vm3479_vm2, %v3694_v39, 0.0  ;;  %v3951_v48 = vld [vmem:[%s14886_s2 + $0x78] sm:$0xff]  ;;  %v16227_v39 = vld [vmem:[#allocation153_spill] sm:$0xff] }
 0x366   : > { %16222 = vst [vmem:[#allocation20_spill] sm:$0xff] %v11562_v34  ;;  %v3833_v55 = vsel %vm3479_vm2, %v3798_v10, 0.0  ;;  %v3952_v10 = vld [vmem:[%s14886_s2 + $0x80] sm:$0xff] }
 0x367   : > { %4021 = vperm.xlu1 %6832, %v3946_v28   ;;  %v11549_v28 = vpop.permute.xlu1 %3154  ;;  %16220 = vst [vmem:[#allocation280_spill] sm:$0xff] %v11558_v43  ;;  %v3834_v15 = vadd.f32 %v3833_v55, %v3832_v4  ;;  %v3953_v55 = vld [vmem:[%s14886_s2 + $0x88] sm:$0xff] }
 0x368   : > { %4026 = vperm.xlu0 %6831, %v3947_v16   ;;  %16217 = vst [vmem:[#allocation158_spill] sm:$0xff] %v11549_v28  ;;  %v3728_v16 = vadd.f32 %v3727_v3, %v3726_v27  ;;  %v11554_v23 = vpop.permute.xlu0 %3152  ;;  %v3695_v27 = vmul.f32 %v11534_v50, %v11534_v50  ;;  %v16225_v50 = vld [vmem:[#allocation141_spill] sm:$0xff] }
 0x369   : > { %16218 = vst [vmem:[#allocation190_spill] sm:$0xff] %v11554_v23  ;;  %v11582_v23 = vsub.f32 %v16225_v50, %v11442_v1 }
 0x36a   : > { %v3731_v4 = vsel %vm3479_vm2, %v3695_v27, 0.0  ;;  %v16233_v27 = vld [vmem:[#allocation50_spill] sm:$0xff] }
 0x36b   : > { %4031 = vperm.xlu1 %6832, %v3948_v56   ;;  %v3799_v56 = vmul.f32 %v11538_v31, %v11538_v31  ;;  %16226 = vst [vmem:[#allocation200_spill] sm:$0xff] %v11582_v23  ;;  %v11586_v31 = vsub.f32 %v16227_v39, %v11442_v1 }
 0x36c   : > { %4036 = vperm.xlu0 %6831, %v3949_v62   ;;  %v11573_v3 = vpop.permute.xlu1 %3158  ;;  %v3730_v62 = vadd.f32 %v3729_v18, %v3728_v16  ;;  %v3696_v16 = vmul.f32 %v11558_v43, %v11558_v43  ;;  %v16231_v43 = vld [vmem:[#allocation145_spill] sm:$0xff] }
 0x36d   : > { %16223 = vst [vmem:[#allocation266_spill] sm:$0xff] %v11573_v3  ;;  %v11578_v28 = vpop.permute.xlu0 %3156  ;;  %16228 = vst [vmem:[#allocation267_spill] sm:$0xff] %v11586_v31  ;;  %v3835_v50 = vsel %vm3479_vm2, %v3799_v56, 0.0  ;;  %v3954_v56 = vld [vmem:[%s14886_s2 + $0x90] sm:$0xff] }
 0x36e   : > { %16224 = vst [vmem:[#allocation193_spill] sm:$0xff] %v11578_v28  ;;  %v3836_v39 = vadd.f32 %v3835_v50, %v3834_v15  ;;  %v11606_v28 = vsub.f32 %v16231_v43, %v11442_v1  ;;  %v3733_v15 = vsel %vm3479_vm2, %v3696_v16, 0.0  ;;  %v3955_v50 = vld [vmem:[%s14886_s2 + $0x98] sm:$0xff]  ;;  %v16239_v16 = vld [vmem:[#allocation57_spill] sm:$0xff] }
 0x36f   : > { %4041 = vperm.xlu1 %6832, %v3950_v24   ;;  %v3800_v24 = vmul.f32 %v11562_v34, %v11562_v34  ;;  %v11610_v34 = vsub.f32 %v16233_v27, %v11442_v1 }
 0x370   : > { %4046 = vperm.xlu0 %6831, %v3951_v48   ;;  %v11597_v18 = vpop.permute.xlu1 %3162  ;;  %v3732_v48 = vadd.f32 %v3731_v4, %v3730_v62  ;;  %16232 = vst [vmem:[#allocation116_spill] sm:$0xff] %v11606_v28  ;;  %v3697_v62 = vmul.f32 %v11582_v23, %v11582_v23  ;;  %v16237_v23 = vld [vmem:[#allocation47_spill] sm:$0xff] }
 0x371   : > { %16229 = vst [vmem:[#allocation101_spill] sm:$0xff] %v11597_v18  ;;  %v11602_v3 = vpop.permute.xlu0 %3160  ;;  %16234 = vst [vmem:[#allocation115_spill] sm:$0xff] %v11610_v34  ;;  %v3837_v43 = vsel %vm3479_vm2, %v3800_v24, 0.0  ;;  %v3956_v24 = vld [vmem:[%s14886_s2 + $0xa0] sm:$0xff] }
 0x372   : > { %16230 = vst [vmem:[#allocation102_spill] sm:$0xff] %v11602_v3  ;;  %v3838_v27 = vadd.f32 %v3837_v43, %v3836_v39  ;;  %v11630_v3 = vsub.f32 %v16237_v23, %v11442_v1  ;;  %v3735_v39 = vsel %vm3479_vm2, %v3697_v62, 0.0  ;;  %v3957_v43 = vld [vmem:[%s14886_s2 + $0xa8] sm:$0xff] }
 0x373   : > { %4051 = vperm.xlu1 %6832, %v3952_v10   ;;  %v3801_v10 = vmul.f32 %v11586_v31, %v11586_v31  ;;  %v11634_v31 = vsub.f32 %v16239_v16, %v11442_v1  ;;  %v16245_v62 = vld [vmem:[#allocation58_spill] sm:$0xff] }
 0x374   : > { %4056 = vperm.xlu0 %6831, %v3953_v55   ;;  %v11621_v4 = vpop.permute.xlu1 %3166  ;;  %v3734_v55 = vadd.f32 %v3733_v15, %v3732_v48  ;;  %16238 = vst [vmem:[#allocation272_spill] sm:$0xff] %v11630_v3  ;;  %v3698_v48 = vmul.f32 %v11606_v28, %v11606_v28  ;;  %v16243_v28 = vld [vmem:[#allocation53_spill] sm:$0xff] }
 0x375   : > { %16235 = vst [vmem:[#allocation161_spill] sm:$0xff] %v11621_v4  ;;  %v11626_v18 = vpop.permute.xlu0 %3164  ;;  %16240 = vst [vmem:[#allocation160_spill] sm:$0xff] %v11634_v31  ;;  %v3839_v23 = vsel %vm3479_vm2, %v3801_v10, 0.0  ;;  %v3958_v10 = vld [vmem:[%s14886_s2 + $0xb0] sm:$0xff] }
 0x376   : > { %16236 = vst [vmem:[#allocation284_spill] sm:$0xff] %v11626_v18  ;;  %v3840_v16 = vadd.f32 %v3839_v23, %v3838_v27  ;;  %v11654_v18 = vsub.f32 %v16243_v28, %v11442_v1  ;;  %v3737_v27 = vsel %vm3479_vm2, %v3698_v48, 0.0  ;;  %v3959_v23 = vld [vmem:[%s14886_s2 + $0xb8] sm:$0xff] }
 0x377   : > { %4061 = vperm.xlu1 %6832, %v3954_v56   ;;  %v3802_v56 = vmul.f32 %v11610_v34, %v11610_v34  ;;  %v11658_v34 = vsub.f32 %v16245_v62, %v11442_v1  ;;  %v16251_v48 = vld [vmem:[#allocation64_spill] sm:$0xff] }
 0x378   : > { %4066 = vperm.xlu0 %6831, %v3955_v50   ;;  %v11645_v15 = vpop.permute.xlu1 %3170  ;;  %v3736_v50 = vadd.f32 %v3735_v39, %v3734_v55  ;;  %16244 = vst [vmem:[#allocation22_spill] sm:$0xff] %v11654_v18  ;;  %v3699_v55 = vmul.f32 %v11630_v3, %v11630_v3  ;;  %v16249_v3 = vld [vmem:[#allocation55_spill] sm:$0xff] }
 0x379   : > { %16241 = vst [vmem:[#allocation192_spill] sm:$0xff] %v11645_v15  ;;  %v11650_v4 = vpop.permute.xlu0 %3168  ;;  %16246 = vst [vmem:[#allocation206_spill] sm:$0xff] %v11658_v34  ;;  %v3841_v28 = vsel %vm3479_vm2, %v3802_v56, 0.0  ;;  %v3960_v56 = vld [vmem:[%s14886_s2 + $0xc0] sm:$0xff] }
 0x37a   : > { %16242 = vst [vmem:[#allocation283_spill] sm:$0xff] %v11650_v4  ;;  %v3842_v62 = vadd.f32 %v3841_v28, %v3840_v16  ;;  %v11678_v4 = vsub.f32 %v16249_v3, %v11442_v1  ;;  %v3739_v16 = vsel %vm3479_vm2, %v3699_v55, 0.0  ;;  %v3961_v28 = vld [vmem:[%s14886_s2 + $0xc8] sm:$0xff] }
 0x37b   : > { %4071 = vperm.xlu1 %6832, %v3956_v24   ;;  %v3803_v24 = vmul.f32 %v11634_v31, %v11634_v31  ;;  %v11682_v31 = vsub.f32 %v16251_v48, %v11442_v1  ;;  %v16256_v55 = vld [vmem:[#allocation66_spill] sm:$0xff] }
 0x37c   : > { %4076 = vperm.xlu0 %6831, %v3957_v43   ;;  %v11669_v39 = vpop.permute.xlu1 %3174  ;;  %v3738_v43 = vadd.f32 %v3737_v27, %v3736_v50  ;;  %16250 = vst [vmem:[#allocation163_spill] sm:$0xff] %v11678_v4  ;;  %v3700_v50 = vmul.f32 %v11654_v18, %v11654_v18 }
 0x37d   : > { %16247 = vst [vmem:[#allocation118_spill] sm:$0xff] %v11669_v39  ;;  %v11674_v15 = vpop.permute.xlu0 %3172  ;;  %16252 = vst [vmem:[#allocation286_spill] sm:$0xff] %v11682_v31  ;;  %v3843_v3 = vsel %vm3479_vm2, %v3803_v24, 0.0  ;;  %v3962_v24 = vld [vmem:[%s14886_s2 + $0xd0] sm:$0xff] }
 0x37e   : > { %16248 = vst [vmem:[#allocation117_spill] sm:$0xff] %v11674_v15  ;;  %v3844_v48 = vadd.f32 %v3843_v3, %v3842_v62  ;;  %v16254_v15 = vld [vmem:[#allocation227_spill] sm:$0xff]  ;;  %v3741_v62 = vsel %vm3479_vm2, %v3700_v50, 0.0  ;;  %v3963_v3 = vld [vmem:[%s14886_s2 + $0xd8] sm:$0xff]  ;;  %v16260_v50 = vld [vmem:[#allocation233_spill] sm:$0xff] }
 0x37f   : > { %4081 = vperm.xlu1 %6832, %v3958_v10   ;;  %v3804_v10 = vmul.f32 %v11658_v34, %v11658_v34  ;;  %v11702_v18 = vsub.f32 %v16254_v15, %v11442_v1  ;;  %v11706_v34 = vsub.f32 %v16256_v55, %v11442_v1 }
 0x380   : > { %4086 = vperm.xlu0 %6831, %v3959_v23   ;;  %v11693_v27 = vpop.permute.xlu1 %3312  ;;  %v3740_v23 = vadd.f32 %v3739_v16, %v3738_v43  ;;  %v3701_v43 = vmul.f32 %v11678_v4, %v11678_v4  ;;  %v16258_v4 = vld [vmem:[#allocation63_spill] sm:$0xff] }
 0x381   : > { %v11698_v39 = vpop.permute.xlu0 %3176  ;;  %16255 = vst [vmem:[#allocation205_spill] sm:$0xff] %v11702_v18  ;;  %16257 = vst [vmem:[#allocation285_spill] sm:$0xff] %v11706_v34  ;;  %v3845_v15 = vsel %vm3479_vm2, %v3804_v10, 0.0  ;;  %v11726_v37 = vsub.f32 %v16258_v4, %v11442_v1  ;;  %v3964_v10 = vld [vmem:[%s14886_s2 + $0xe0] sm:$0xff] }
 0x382   : > { %16253 = vst [vmem:[#allocation162_spill] sm:$0xff] %v11698_v39  ;;  %v3846_v55 = vadd.f32 %v3845_v15, %v3844_v48  ;;  %v3743_v48 = vsel %vm3479_vm2, %v3701_v43, 0.0  ;;  %v3965_v15 = vld [vmem:[%s14886_s2 + $0xe8] sm:$0xff] }
 0x383   : > { %4091 = vperm.xlu1 %6832, %v3960_v56   ;;  %v3805_v56 = vmul.f32 %v11682_v31, %v11682_v31  ;;  %16259 = vst [vmem:[#allocation217_spill] sm:$0xff] %v11726_v37  ;;  %v11730_v31 = vsub.f32 %v16260_v50, %v11442_v1  ;;  %v16265_v43 = vld [vmem:[#allocation238_spill] sm:$0xff] }
 0x384   : > { %4096 = vperm.xlu0 %6831, %v3961_v28   ;;  %v11717_v16 = vpop.permute.xlu1 %3316  ;;  %v3742_v28 = vadd.f32 %v3741_v62, %v3740_v23  ;;  %v3702_v23 = vmul.f32 %v11702_v18, %v11702_v18  ;;  %v16263_v18 = vld [vmem:[#allocation229_spill] sm:$0xff] }
 0x385   : > { %v11722_v39 = vpop.permute.xlu0 %3314  ;;  %16261 = vst [vmem:[#allocation25_spill] sm:$0xff] %v11730_v31  ;;  %v3847_v4 = vsel %vm3479_vm2, %v3805_v56, 0.0  ;;  %v11750_v59 = vsub.f32 %v16263_v18, %v11442_v1  ;;  %v3966_v56 = vld [vmem:[%s14886_s2 + $0xf0] sm:$0xff] }
 0x386   : > { %v3848_v50 = vadd.f32 %v3847_v4, %v3846_v55  ;;  %v3745_v55 = vsel %vm3479_vm2, %v3702_v23, 0.0  ;;  %v3967_v4 = vld [vmem:[%s14886_s2 + $0xf8] sm:$0xff]  ;;  %v16271_v23 = vld [vmem:[#allocation67_spill] sm:$0xff] }
 0x387   : > { %4101 = vperm.xlu1 %6832, %v3962_v24   ;;  %v3806_v24 = vmul.f32 %v11706_v34, %v11706_v34  ;;  %16264 = vst [vmem:[#allocation203_spill] sm:$0xff] %v11750_v59  ;;  %v11754_v34 = vsub.f32 %v16265_v43, %v11442_v1 }
 0x388   : > { %4106 = vperm.xlu0 %6831, %v3963_v3   ;;  %v11741_v62 = vpop.permute.xlu1 %3320  ;;  %v3744_v3 = vadd.f32 %v3743_v48, %v3742_v28  ;;  %v3703_v28 = vmul.f32 %v11726_v37, %v11726_v37  ;;  %v16269_v37 = vld [vmem:[#allocation234_spill] sm:$0xff] }
 0x389   : > { %16262 = vst [vmem:[#allocation103_spill] sm:$0xff] %v11741_v62  ;;  %v11746_v29 = vpop.permute.xlu0 %3318  ;;  %16266 = vst [vmem:[#allocation104_spill] sm:$0xff] %v11754_v34  ;;  %v3849_v18 = vsel %vm3479_vm2, %v3806_v24, 0.0  ;;  %v11774_v2 = vsub.f32 %v16269_v37, %v11442_v1  ;;  %v11780_v24 = vstv %s6566_s19  ;;  %v3808_v37 = vmul.f32 %v11754_v34, %v11754_v34  ;;  %s12992_s19 = scalar_lea.vmem %s14890_s6, %s6808_s12 }
 0x38a   : > { %v3850_v43 = vadd.f32 %v3849_v18, %v3848_v50  ;;  %16273 = vst [vmem:[#allocation164_spill] sm:$0xff] %v11780_v24  ;;  %v3747_v50 = vsel %vm3479_vm2, %v3703_v28, 0.0  ;;  %v4167_v18 = vld [vmem:[%s14887_s3] sm:$0xff]  ;;  %v2541_v51 = vmul.f32 %v11780_v24, %v15911_v0 }
 0x38b   : > { %4111 = vperm.xlu1 %6832, %v3964_v10   ;;  %v3807_v10 = vmul.f32 %v11730_v31, %v11730_v31  ;;  %16270 = vst [vmem:[#allocation165_spill] sm:$0xff] %v11774_v2  ;;  %v11778_v31 = vsub.f32 %v16271_v23, %v11442_v1  ;;  %v16278_v28 = vld [vmem:[#allocation69_spill] sm:$0xff] }
 0x38c   : > { %4116 = vperm.xlu0 %6831, %v3965_v15   ;;  %v11765_v48 = vpop.permute.xlu1 %3324  ;;  %v3746_v15 = vadd.f32 %v3745_v55, %v3744_v3  ;;  %v3704_v3 = vmul.f32 %v11750_v59, %v11750_v59  ;;  %v16276_v59 = vld [vmem:[#allocation235_spill] sm:$0xff]  ;;  %v11804_v34 = vsub.f32 %v16278_v28, %v11442_v1 }
 0x38d   : > { %16267 = vst [vmem:[#allocation120_spill] sm:$0xff] %v11765_v48  ;;  %v11770_v9 = vpop.permute.xlu0 %3322  ;;  %16272 = vst [vmem:[#allocation292_spill] sm:$0xff] %v11778_v31  ;;  %v11800_v41 = vsub.f32 %v16276_v59, %v11442_v1  ;;  %v2550_v48 = vmul.f32 %v11780_v24, %v9258_v26 }
 0x38e   : > { %16268 = vst [vmem:[#allocation119_spill] sm:$0xff] %v11770_v9  ;;  %16279 = vst [vmem:[#allocation220_spill] sm:$0xff] %v11804_v34  ;;  %v3749_v59 = vsel %vm3479_vm2, %v3704_v3, 0.0 }
 0x38f   : > { %4121 = vperm.xlu1 %6832, %v3966_v56   ;;  %v3851_v56 = vsel %vm3479_vm2, %v3807_v10, 0.0  ;;  %16277 = vst [vmem:[#allocation201_spill] sm:$0xff] %v11800_v41  ;;  %v2542_v10 = vmul.f32 %v11780_v24, %v16100_v13 }
 0x390   : > { %4126 = vperm.xlu0 %6831, %v3967_v4   ;;  %v3748_v4 = vadd.f32 %v3747_v50, %v3746_v15  ;;  %v3852_v23 = vadd.f32 %v3851_v56, %v3850_v43  ;;  %v4168_v15 = vld [vmem:[%s14887_s3 + $0x8] sm:$0xff]  ;;  %v3809_v43 = vmul.f32 %v11778_v31, %v11778_v31  ;;  %v3853_v50 = vsel %vm3479_vm2, %v3808_v37, 0.0 }
 0x391   : > { %v11791_v55 = vpop.permute.xlu1 %3328  ;;  %v11796_v22 = vpop.permute.xlu0 %3326  ;;  %v2543_v31 = vmul.f32 %v11780_v24, %v15925_v33  ;;  %v2546_v37 = vmul.f32 %v11780_v24, %v9170_v38 }
 0x392   : > { %16274 = vst [vmem:[#allocation216_spill] sm:$0xff] %v11791_v55  ;;  %16275 = vst [vmem:[#allocation291_spill] sm:$0xff] %v11796_v22  ;;  %v3750_v28 = vadd.f32 %v3749_v59, %v3748_v4  ;;  %v3854_v55 = vadd.f32 %v3853_v50, %v3852_v23  ;;  %v2548_v4 = vmul.f32 %v11780_v24, %v9178_v36  ;;  %v16282_v23 = vld [vmem:[#allocation241_spill] sm:$0xff]  ;;  %v16284_v50 = vld [vmem:[#allocation76_spill] sm:$0xff]  ;;  %v3855_v53 = vsel %vm3479_vm2, %v3809_v43, 0.0 }
 0x393   : > { %4131 = vperm.xlu1 %6832, %v3968_v21   ;;  %v3705_v21 = vmul.f32 %v11774_v2, %v11774_v2  ;;  %v2544_v2 = vmul.f32 %v11780_v24, %v15922_v20  ;;  %v11840_v59 = vsub.f32 %v16282_v23, %v11442_v1  ;;  %v2547_v22 = vmul.f32 %v11780_v24, %v9194_v19 }
 0x394   : > { %4202 = vperm.xlu0 %6831, %v4167_v18   ;;  %v4169_v18 = vld [vmem:[%s14887_s3 + $0x10] sm:$0xff]  ;;  %v3856_v9 = vadd.f32 %v3855_v53, %v3854_v55  ;;  %v2549_v19 = vmul.f32 %v11780_v24, %v9288_v30  ;;  %v2551_v43 = vmul.f32 %v11780_v24, %v15962_v40  ;;  %v11882_v53 = vmul.f32 %v11780_v24, %v15988_v25  ;;  %v4172_v25 = vld [vmem:[%s14887_s3 + $0x28] sm:$0xff]  ;;  %v16298_v40 = vld [vmem:[#allocation44_spill] sm:$0xff] }
 0x395   : > { %v11819_v56 = vpop.permute.xlu1 %3332  ;;  %16283 = vst [vmem:[#allocation105_spill] sm:$0xff] %v11840_v59  ;;  %v3751_v23 = vsel %vm3479_vm2, %v3705_v21, 0.0  ;;  %v2552_v21 = vmul.f32 %v11780_v24, %v15780_v45  ;;  %v16291_v55 = vld [vmem:[#allocation243_spill] sm:$0xff]  ;;  %v16295_v45 = vld [vmem:[#allocation146_spill] sm:$0xff] }
 0x396   : > { %16280 = vst [vmem:[#allocation202_spill] sm:$0xff] %v11819_v56  ;;  %v11828_v3 = vpop.permute.xlu0 %3330  ;;  %v2545_v56 = vmul.f32 %v11780_v24, %v15937_v47  ;;  %v3752_v26 = vadd.f32 %v3751_v23, %v3750_v28  ;;  %16290 = vst [vmem:[#allocation219_spill] sm:$0xff] %v11882_v53  ;;  %v11886_v28 = vsub.f32 %v16291_v55, %v11442_v1  ;;  %v16293_v23 = vld [vmem:[#allocation75_spill] sm:$0xff]  ;;  %v16300_v30 = vld [vmem:[#allocation150_spill] sm:$0xff] }
 0x397   : > { %16281 = vst [vmem:[#allocation26_spill] sm:$0xff] %v11828_v3  ;;  %4207 = vperm.xlu1 %6832, %v4168_v15   ;;  %v11844_v3 = vsub.f32 %v16284_v50, %v11442_v1  ;;  %v3706_v15 = vmul.f32 %v11800_v41, %v11800_v41  ;;  %v3810_v50 = vmul.f32 %v11804_v34, %v11804_v34 }
 0x398   : > { %4212 = vperm.xlu0 %6831, %v4169_v18   ;;  %v4171_v18 = vld [vmem:[%s14887_s3 + $0x20] sm:$0xff]  ;;  %v11874_v34 = vmul.f32 %v11780_v24, %v15974_v7  ;;  %16292 = vst [vmem:[#allocation251_spill] sm:$0xff] %v11886_v28  ;;  %v11893_v7 = vadd.f32 %v16295_v45, %v2542_v10  ;;  %v4173_v45 = vld [vmem:[%s14887_s3 + $0x30] sm:$0xff] }
 0x399   : > { %16285 = vst [vmem:[#allocation122_spill] sm:$0xff] %v11844_v3  ;;  %v11859_v36 = vpop.permute.xlu1 %3336  ;;  %v3753_v55 = vsel %vm3479_vm2, %v3706_v15, 0.0  ;;  %v3811_v53 = vmul.f32 %v11844_v3, %v11844_v3  ;;  %v11921_v3 = vadd.f32 %v16300_v30, %v2543_v31  ;;  %v16308_v30 = vld [vmem:[#allocation48_spill] sm:$0xff]  ;;  %v16309_v31 = vld [vmem:[#allocation223_spill] sm:$0xff] }
 0x39a   : > { %16286 = vst [vmem:[#allocation167_spill] sm:$0xff] %v11859_v36  ;;  %v11868_v41 = vpop.permute.xlu0 %3334  ;;  %16288 = vst [vmem:[#allocation121_spill] sm:$0xff] %v11874_v34  ;;  %v11878_v36 = vmul.f32 %v11780_v24, %v15977_v17  ;;  %v11896_v34 = vstv %s11808_s10  ;;  %v3754_v10 = vadd.f32 %v3753_v55, %v3752_v26  ;;  %v11930_v26 = vadd.f32 %v16303_v8, %v2548_v4 }
 0x39b   : > { %16287 = vst [vmem:[#allocation247_spill] sm:$0xff] %v11868_v41  ;;  %4217 = vperm.xlu1 %6832, %v4170_v57   ;;  %v11890_v41 = vsub.f32 %v16293_v23, %v11442_v1  ;;  %v3707_v57 = vmul.f32 %v11840_v59, %v11840_v59  ;;  %v3857_v23 = vsel %vm3479_vm2, %v3810_v50, 0.0  ;;  %v11916_v59 = vadd.f32 %v16298_v40, %v2544_v2  ;;  %v16301_v50 = vld [vmem:[#allocation46_spill] sm:$0xff]  ;;  %v16306_v40 = vld [vmem:[#allocation321_spill] sm:$0xff] }
 0x39c   : > { %16289 = vst [vmem:[#allocation166_spill] sm:$0xff] %v11878_v36  ;;  %4222 = vperm.xlu0 %6831, %v4171_v18   ;;  %v3858_v18 = vadd.f32 %v3857_v23, %v3856_v9  ;;  %v16297_v36 = vld [vmem:[#allocation43_spill] sm:$0xff]  ;;  %v11924_v62 = vadd.f32 %v16301_v50, %v2546_v37  ;;  %v11938_v9 = vsub.f32 %v16306_v40, %v11442_v1 }
 0x39d   : > { %16294 = vst [vmem:[#allocation24_spill] sm:$0xff] %v11890_v41  ;;  %v11907_v24 = vpop.permute.xlu1 %3340  ;;  %v11913_v17 = vadd.f32 %v16297_v36, %v2541_v51  ;;  %v16304_v36 = vld [vmem:[#allocation74_spill] sm:$0xff]  ;;  %v11941_v2 = vadd.f32 %v16308_v30, %v2547_v22  ;;  %v11944_v37 = vadd.f32 %v16309_v31, %v2550_v48  ;;  %v3708_v8 = vmul.f32 %v11886_v28, %v11886_v28  ;;  %v4175_v48 = vld [vmem:[%s14887_s3 + $0x40] sm:$0xff] }
 0x39e   : > { %16296 = vst [vmem:[#allocation226_spill] sm:$0xff] %v11907_v24  ;;  %v11918_v15 = vpop.permute.xlu0 %3338  ;;  %v16302_v24 = vld [vmem:[#allocation222_spill] sm:$0xff]  ;;  %v11934_v51 = vsub.f32 %v16304_v36, %v11442_v1  ;;  %16307 = vst [vmem:[#allocation106_spill] sm:$0xff] %v11938_v9  ;;  %v3859_v22 = vsel %vm3479_vm2, %v3811_v53, 0.0  ;;  %v16313_v36 = vld [vmem:[#allocation228_spill] sm:$0xff] }
 0x39f   : > { %16299 = vst [vmem:[#allocation208_spill] sm:$0xff] %v11918_v15  ;;  %v11927_v63 = vadd.f32 %v16302_v24, %v2545_v56  ;;  %4227 = vperm.xlu1 %6832, %v4172_v25   ;;  %16310 = vst [vmem:[#allocation169_spill] sm:$0xff] %v11944_v37  ;;  %v4174_v25 = vld [vmem:[%s14887_s3 + $0x38] sm:$0xff]  ;;  %v3755_v24 = vsel %vm3479_vm2, %v3707_v57, 0.0  ;;  %v3812_v56 = vmul.f32 %v11890_v41, %v11890_v41  ;;  %v16316_v30 = vld [vmem:[#allocation246_spill] sm:$0xff] }
 0x3a0   : > { %16305 = vst [vmem:[#allocation204_spill] sm:$0xff] %v11934_v51  ;;  %4232 = vperm.xlu0 %6831, %v4173_v45   ;;  %v3756_v55 = vadd.f32 %v3755_v24, %v3754_v10  ;;  %v3860_v23 = vadd.f32 %v3859_v22, %v3858_v18  ;;  %v16312_v45 = vld [vmem:[#allocation224_spill] sm:$0xff]  ;;  %v11966_v40 = vadd.f32 %v16313_v36, %v2552_v21  ;;  %v16320_v28 = vld [vmem:[#allocation82_spill] sm:$0xff]  ;;  %v16324_v21 = vld [vmem:[#allocation89_spill] sm:$0xff] }
 0x3a1   : > { %v11957_v4 = vpop.permute.xlu1 %3344  ;;  %v11963_v50 = vadd.f32 %v16312_v45, %v2549_v19  ;;  %v11972_v31 = vsub.f32 %v16316_v30, %v11442_v1  ;;  %v16318_v53 = vld [vmem:[#allocation320_spill] sm:$0xff]  ;;  %v11980_v10 = vsub.f32 %v16320_v28, %v11442_v1  ;;  %v11987_v24 = vsub.f32 %v16324_v21, %v11442_v1  ;;  %v16327_v45 = vld [vmem:[#allocation91_spill] sm:$0xff]  ;;  %v16329_v30 = vld [vmem:[#allocation322_spill] sm:$0xff] }
 0x3a2   : > { %16311 = vst [vmem:[#allocation250_spill] sm:$0xff] %v11957_v4  ;;  %16314 = vst [vmem:[#allocation123_spill] sm:$0xff] %v11966_v40  ;;  %v11968_v57 = vpop.permute.xlu0 %3342  ;;  %v11976_v41 = vsub.f32 %v16318_v53, %v11442_v1  ;;  %v16322_v18 = vld [vmem:[#allocation56_spill] sm:$0xff]  ;;  %v11991_v22 = vsub.f32 %v11083_v49, %v11442_v1  ;;  %v11995_v36 = vsub.f32 %v16327_v45, %v11442_v1  ;;  %v3757_v53 = vsel %vm3479_vm2, %v3708_v8, 0.0  ;;  %v16332_v45 = vld [vmem:[#allocation94_spill] sm:$0xff] }
 0x3a3   : > { %16315 = vst [vmem:[#allocation124_spill] sm:$0xff] %v11968_v57  ;;  %16317 = vst [vmem:[#allocation168_spill] sm:$0xff] %v11972_v31  ;;  %v11983_v19 = vadd.f32 %v16322_v18, %v2551_v43  ;;  %4237 = vperm.xlu1 %6832, %v4174_v25   ;;  %v11999_v28 = vsub.f32 %v16329_v30, %v11442_v1  ;;  %v4176_v43 = vld [vmem:[%s14887_s3 + $0x48] sm:$0xff]  ;;  %v3709_v25 = vmul.f32 %v11934_v51, %v11934_v51  ;;  %v16334_v51 = vld [vmem:[#allocation180_spill] sm:$0xff] }
 0x3a4   : > { %16319 = vst [vmem:[#allocation225_spill] sm:$0xff] %v11976_v41  ;;  %16321 = vst [vmem:[#allocation253_spill] sm:$0xff] %v11980_v10  ;;  %4242 = vperm.xlu0 %6831, %v4175_v48   ;;  %v3813_v49 = vmul.f32 %v11938_v9, %v11938_v9  ;;  %v3861_v18 = vsel %vm3479_vm2, %v3812_v56, 0.0  ;;  %v4177_v48 = vld [vmem:[%s14887_s3 + $0x50] sm:$0xff]  ;;  %v12017_v30 = vsub.f32 %v16332_v45, %v11442_v1 }
 0x3a5   : > { %16323 = vst [vmem:[#allocation28_spill] sm:$0xff] %v11983_v19  ;;  %16325 = vst [vmem:[#allocation237_spill] sm:$0xff] %v11987_v24  ;;  %v12010_v21 = vpop.permute.xlu1 %3348  ;;  %v12021_v4 = vsub.f32 %v16334_v51, %v11442_v1  ;;  %v3758_v8 = vadd.f32 %v3757_v53, %v3756_v55  ;;  %v3862_v57 = vadd.f32 %v3861_v18, %v3860_v23  ;;  %v12054_v53 = vstv %s11946_s25  ;;  %v4179_v18 = vld [vmem:[%s14887_s3 + $0x60] sm:$0xff] }
 0x3a6   : > { %16326 = vst [vmem:[#allocation212_spill] sm:$0xff] %v11991_v22  ;;  %16328 = vst [vmem:[#allocation27_spill] sm:$0xff] %v11995_v36  ;;  %v12023_v9 = vpop.permute.xlu0 %3346  ;;  %v12027_v56 = vsub.f32 %v11202_v44, %v11442_v1  ;;  %v12035_v45 = vsub.f32 %v11262_v6, %v11442_v1  ;;  %v12039_v51 = vsub.f32 %v11303_v12, %v11442_v1  ;;  %v4178_v6 = vld [vmem:[%s14887_s3 + $0x58] sm:$0xff] }
 0x3a7   : > { %16330 = vst [vmem:[#allocation107_spill] sm:$0xff] %v11999_v28  ;;  %16331 = vst [vmem:[#allocation207_spill] sm:$0xff] %v12010_v21  ;;  %v12031_v21 = vsub.f32 %v11247_v58, %v11442_v1  ;;  %4247 = vperm.xlu1 %6832, %v4176_v43   ;;  %v12043_v55 = vsub.f32 %v11318_v5, %v11442_v1  ;;  %v12047_v44 = vsub.f32 %v11347_v35, %v11442_v1  ;;  %v16343_v58 = vld [vmem:[#allocation323_spill] sm:$0xff] }
 0x3a8   : > { %16333 = vst [vmem:[#allocation108_spill] sm:$0xff] %v12017_v30  ;;  %16335 = vst [vmem:[#allocation171_spill] sm:$0xff] %v12021_v4  ;;  %v12051_v23 = vsub.f32 %v16343_v58, %v11442_v1  ;;  %4252 = vperm.xlu0 %6831, %v4177_v48   ;;  %v3710_v12 = vmul.f32 %v11972_v31, %v11972_v31  ;;  %v3759_v5 = vsel %vm3479_vm2, %v3709_v25, 0.0  ;;  %v3863_v43 = vsel %vm3479_vm2, %v3813_v49, 0.0  ;;  %v16345_v48 = vld [vmem:[#allocation85_spill] sm:$0xff]  ;;  %v16352_v49 = vld [vmem:[#allocation144_spill] sm:$0xff] }
 0x3a9   : > { %16336 = vst [vmem:[#allocation252_spill] sm:$0xff] %v12023_v9  ;;  %16337 = vst [vmem:[#allocation126_spill] sm:$0xff] %v12027_v56  ;;  %v3814_v35 = vmul.f32 %v11999_v28, %v11999_v28  ;;  %v12070_v58 = vsub.f32 %v16345_v48, %v11442_v1  ;;  %v16347_v9 = vld [vmem:[#allocation90_spill] sm:$0xff]  ;;  %v3760_v31 = vadd.f32 %v3759_v5, %v3758_v8  ;;  %v12076_v25 = vpop.permute.xlu1 %3352  ;;  %v16350_v28 = vld [vmem:[#allocation11_spill] sm:$0xff] }
 0x3aa   : > { %16338 = vst [vmem:[#allocation170_spill] sm:$0xff] %v12031_v21  ;;  %16339 = vst [vmem:[#allocation236_spill] sm:$0xff] %v12035_v45  ;;  %v12074_v15 = vsub.f32 %v16347_v9, %v11442_v1  ;;  %v3864_v40 = vadd.f32 %v3863_v43, %v3862_v57  ;;  %v12080_v19 = vsub.f32 %v16350_v28, %v11442_v1  ;;  %v12092_v37 = vpop.permute.xlu0 %3350  ;;  %v16357_v57 = vld [vmem:[#allocation13_spill] sm:$0xff]  ;;  %v16359_v28 = vld [vmem:[#allocation147_spill] sm:$0xff] }
 0x3ab   : > { %16340 = vst [vmem:[#allocation257_spill] sm:$0xff] %v12039_v51  ;;  %16341 = vst [vmem:[#allocation32_spill] sm:$0xff] %v12043_v55  ;;  %v16354_v55 = vld [vmem:[#allocation183_spill] sm:$0xff]  ;;  %v3012_v9 = vmul.f32 %v12054_v53, %v16100_v13  ;;  %4257 = vperm.xlu1 %6832, %v4178_v6   ;;  %v12096_v8 = vsub.f32 %v16357_v57, %v11442_v1  ;;  %v12100_v5 = vsub.f32 %v16359_v28, %v11442_v1  ;;  %v4180_v13 = vld [vmem:[%s14887_s3 + $0x68] sm:$0xff] }
 0x3ac   : > { %16342 = vst [vmem:[#allocation245_spill] sm:$0xff] %v12047_v44  ;;  %16344 = vst [vmem:[#allocation213_spill] sm:$0xff] %v12051_v23  ;;  %v12084_v44 = vsub.f32 %v16352_v49, %v11442_v1  ;;  %v12088_v48 = vsub.f32 %v16354_v55, %v11442_v1  ;;  %v3711_v43 = vmul.f32 %v11976_v41, %v11976_v41  ;;  %4262 = vperm.xlu0 %6831, %v4179_v18  }
 0x3ad   : > { %16346 = vst [vmem:[#allocation29_spill] sm:$0xff] %v12070_v58  ;;  %16348 = vst [vmem:[#allocation109_spill] sm:$0xff] %v12074_v15  ;;  %v3815_v55 = vmul.f32 %v12051_v23, %v12051_v23  ;;  %v12113_v6 = vsub.f32 %v11244_v60, %v11442_v1  ;;  %v3761_v49 = vsel %vm3479_vm2, %v3710_v12, 0.0  ;;  %v3865_v57 = vsel %vm3479_vm2, %v3814_v35, 0.0  ;;  %v4181_v23 = vld [vmem:[%s14887_s3 + $0x70] sm:$0xff]  ;;  %v16366_v35 = vld [vmem:[#allocation84_spill] sm:$0xff] }
 0x3ae   : > { %16349 = vst [vmem:[#allocation209_spill] sm:$0xff] %v12076_v25  ;;  %16351 = vst [vmem:[#allocation110_spill] sm:$0xff] %v12080_v19  ;;  %v3011_v28 = vmul.f32 %v12054_v53, %v15911_v0  ;;  %v12124_v18 = vsub.f32 %v11255_v54, %v11442_v1  ;;  %v12128_v41 = vsub.f32 %v11296_v61, %v11442_v1 }
 0x3af   : > { %16353 = vst [vmem:[#allocation125_spill] sm:$0xff] %v12084_v44  ;;  %16355 = vst [vmem:[#allocation173_spill] sm:$0xff] %v12088_v48  ;;  %v3762_v60 = vadd.f32 %v3761_v49, %v3760_v31  ;;  %v3866_v25 = vadd.f32 %v3865_v57, %v3864_v40  ;;  %v12132_v12 = vsub.f32 %v11307_v14, %v11442_v1  ;;  %4267 = vperm.xlu1 %6832, %v4180_v13   ;;  %v12147_v49 = vpop.permute.xlu1 %3356  ;;  %v12158_v13 = vpop.permute.xlu0 %3354 }
 0x3b0   : > { %16356 = vst [vmem:[#allocation254_spill] sm:$0xff] %v12092_v37  ;;  %16358 = vst [vmem:[#allocation172_spill] sm:$0xff] %v12096_v8  ;;  %v12136_v0 = vsub.f32 %v11341_v32, %v11442_v1  ;;  %v2942_v37 = vadd.f32 %v16366_v35, %v11893_v7  ;;  %v3212_v54 = vadd.f32 %v11386_v52, %v3012_v9  ;;  %v3763_v31 = vsel %vm3479_vm2, %v3711_v43, 0.0  ;;  %v4182_v7 = vld [vmem:[%s14887_s3 + $0x78] sm:$0xff]  ;;  %v16367_v52 = vld [vmem:[#allocation79_spill] sm:$0xff] }
 0x3b1   : > { %16360 = vst [vmem:[#allocation244_spill] sm:$0xff] %v12100_v5  ;;  %16361 = vst [vmem:[#allocation259_spill] sm:$0xff] %v12113_v6  ;;  %v3712_v61 = vmul.f32 %v11980_v10, %v11980_v10  ;;  %v3816_v40 = vmul.f32 %v12070_v58, %v12070_v58  ;;  %v3867_v14 = vsel %vm3479_vm2, %v3815_v55, 0.0  ;;  %4272 = vperm.xlu0 %6831, %v4181_v23   ;;  %v4183_v23 = vld [vmem:[%s14887_s3 + $0x80] sm:$0xff]  ;;  %v16488_v10 = vld [vmem:[#allocation300_spill] sm:$0xff] }
 0x3b2   : > { %16362 = vst [vmem:[#allocation33_spill] sm:$0xff] %v12124_v18  ;;  %16363 = vst [vmem:[#allocation249_spill] sm:$0xff] %v12128_v41  ;;  %v2941_v32 = vadd.f32 %v16367_v52, %v11913_v17  ;;  %v3211_v1 = vadd.f32 %v11388_v42, %v3011_v28  ;;  %v3013_v9 = vmul.f32 %v12054_v53, %v15925_v33 }
 0x3b3   : > { %16364 = vst [vmem:[#allocation215_spill] sm:$0xff] %v12132_v12  ;;  %16365 = vst [vmem:[#allocation211_spill] sm:$0xff] %v12136_v0  ;;  %v3412_v43 = vadd.f32 %v11722_v39, %v3212_v54  ;;  %v3713_v55 = vmul.f32 %v11987_v24, %v11987_v24  ;;  %v3714_v17 = vmul.f32 %v11991_v22, %v11991_v22  ;;  %4277 = vperm.xlu1 %6832, %v4182_v7   ;;  %v12214_v58 = vpop.permute.xlu0 %3358 }
 0x3b4   : > { %v3764_v57 = vadd.f32 %v3763_v31, %v3762_v60  ;;  %v3868_v42 = vadd.f32 %v3867_v14, %v3866_v25  ;;  %v12169_v33 = vmul.f32 %v11995_v36, %v11995_v36  ;;  %v12172_v39 = vadd.f32 %v11896_v34, %v2942_v37  ;;  %v16369_v25 = vld [vmem:[#allocation83_spill] sm:$0xff]  ;;  %v4184_v37 = vld [vmem:[%s14887_s3 + $0x88] sm:$0xff] }
 0x3b5   : > { %v3014_v28 = vmul.f32 %v12054_v53, %v15922_v20  ;;  %v3411_v35 = vadd.f32 %v11693_v27, %v3211_v1  ;;  %v3765_v54 = vsel %vm3479_vm2, %v3712_v61, 0.0  ;;  %v3817_v52 = vmul.f32 %v12074_v15, %v12074_v15  ;;  %4282 = vperm.xlu0 %6831, %v4183_v23  }
 0x3b6   : > { %16368 = vst [vmem:[#allocation5_spill] sm:$0xff] %v12172_v39  ;;  %v2943_v60 = vadd.f32 %v16369_v25, %v11921_v3  ;;  %v12183_v31 = vstv %s12106_s14  ;;  %v3869_v20 = vsel %vm3479_vm2, %v3816_v40, 0.0  ;;  %v12190_v27 = vadd.f32 %v11896_v34, %v2941_v32  ;;  %v4185_v3 = vld [vmem:[%s14887_s3 + $0x90] sm:$0xff]  ;;  %v16372_v40 = vld [vmem:[#allocation86_spill] sm:$0xff]  ;;  %v12205_v32 = vpop.permute.xlu1 %3360 }
 0x3b7   : > { %v3213_v61 = vadd.f32 %v11398_v46, %v3013_v9  ;;  %v12194_v14 = vadd.f32 %v12183_v31, %v3412_v43  ;;  %v12201_v7 = vmul.f32 %v12017_v30, %v12017_v30  ;;  %v3766_v1 = vadd.f32 %v3765_v54, %v3764_v57  ;;  %4287 = vperm.xlu1 %6832, %v4184_v37   ;;  %v16471_v30 = vld [vmem:[#allocation297_spill] sm:$0xff] }
 0x3b8   : > { %16370 = vst [vmem:[#allocation127_spill] sm:$0xff] %v12190_v27  ;;  %v3870_v23 = vadd.f32 %v3869_v20, %v3868_v42  ;;  %v2944_v25 = vadd.f32 %v16372_v40, %v11916_v59  ;;  %v4963_v46 = vsel %vm3479_vm2, %v12172_v39, 0.0  ;;  %v3214_v9 = vadd.f32 %v11396_v11, %v3014_v28  ;;  %v4186_v11 = vld [vmem:[%s14887_s3 + $0x98] sm:$0xff] }
 0x3b9   : > { %16371 = vst [vmem:[#allocation128_spill] sm:$0xff] %v12194_v14  ;;  %v12211_v43 = vadd.f32 %v12183_v31, %v3411_v35  ;;  %v3413_v15 = vadd.f32 %v11717_v16, %v3213_v61  ;;  %v3767_v57 = vsel %vm3479_vm2, %v3713_v55, 0.0  ;;  %v3818_v59 = vmul.f32 %v12080_v19, %v12080_v19  ;;  %4292 = vperm.xlu0 %6831, %v4185_v3  }
 0x3ba   : > { %v3871_v42 = vsel %vm3479_vm2, %v3817_v52, 0.0  ;;  %v12221_v54 = vadd.f32 %v11896_v34, %v2943_v60  ;;  %v4962_v16 = vsel %vm3479_vm2, %v12190_v27, 0.0  ;;  %v3015_v28 = vmul.f32 %v12054_v53, %v15937_v47  ;;  %v4187_v52 = vld [vmem:[%s14887_s3 + $0xa0] sm:$0xff] }
 0x3bb   : > { %16373 = vst [vmem:[#allocation175_spill] sm:$0xff] %v12211_v43  ;;  %v5034_v55 = vsel %vm3479_vm2, %v12194_v14, 0.0  ;;  %v3414_v35 = vadd.f32 %v11746_v29, %v3214_v9  ;;  %v3768_v60 = vadd.f32 %v3767_v57, %v3766_v1  ;;  %v3872_v37 = vadd.f32 %v3871_v42, %v3870_v23  ;;  %4297 = vperm.xlu1 %6832, %v4186_v11   ;;  %v12254_v9 = vpop.permute.xlu1 %3364  ;;  %v16377_v57 = vld [vmem:[#allocation23_spill] sm:$0xff] }
 0x3bc   : > { %16374 = vst [vmem:[#allocation299_spill] sm:$0xff] %v12221_v54  ;;  %v4964_v20 = vadd.f32 %v4963_v46, %v4962_v16  ;;  %v12237_v61 = vadd.f32 %v11896_v34, %v2944_v25  ;;  %v12241_v3 = vmul.f32 %v12021_v4, %v12021_v4  ;;  %v3016_v47 = vmul.f32 %v12054_v53, %v9170_v38  ;;  %v4188_v38 = vld [vmem:[%s14887_s3 + $0xa8] sm:$0xff] }
 0x3bd   : > { %v5033_v29 = vsel %vm3479_vm2, %v12211_v43, 0.0  ;;  %v12248_v40 = vadd.f32 %v12183_v31, %v3413_v15  ;;  %v3769_v1 = vsel %vm3479_vm2, %v3714_v17, 0.0  ;;  %v3819_v23 = vmul.f32 %v12084_v44, %v12084_v44  ;;  %4302 = vperm.xlu0 %6831, %v4187_v52   ;;  %v16378_v17 = vld [vmem:[#allocation155_spill] sm:$0xff] }
 0x3be   : > { %16375 = vst [vmem:[#allocation174_spill] sm:$0xff] %v12237_v61  ;;  %v3873_v25 = vsel %vm3479_vm2, %v3818_v59, 0.0  ;;  %v5035_v46 = vadd.f32 %v5034_v55, %v5033_v29  ;;  %v4965_v15 = vsel %vm3479_vm2, %v12221_v54, 0.0  ;;  %v2945_v42 = vadd.f32 %v16377_v57, %v11927_v63  ;;  %v12267_v59 = vpop.permute.xlu0 %3362  ;;  %v4189_v55 = vld [vmem:[%s14887_s3 + $0xb0] sm:$0xff]  ;;  %v16380_v54 = vld [vmem:[#allocation88_spill] sm:$0xff] }
 0x3bf   : > { %16376 = vst [vmem:[#allocation248_spill] sm:$0xff] %v12248_v40  ;;  %v3215_v11 = vadd.f32 %v16378_v17, %v3015_v28  ;;  %v12265_v16 = vadd.f32 %v12183_v31, %v3414_v35  ;;  %v3770_v52 = vadd.f32 %v3769_v1, %v3768_v60  ;;  %v3874_v29 = vadd.f32 %v3873_v25, %v3872_v37  ;;  %v16381_v57 = vld [vmem:[#allocation99_spill] sm:$0xff] }
 0x3c0   : > { %v4966_v44 = vadd.f32 %v4965_v15, %v4964_v20  ;;  %v4967_v19 = vsel %vm3479_vm2, %v12237_v61, 0.0  ;;  %v2946_v63 = vadd.f32 %v16380_v54, %v11924_v62  ;;  %v3216_v28 = vadd.f32 %v16381_v57, %v3016_v47  ;;  %v16382_v17 = vld [vmem:[#allocation103_spill] sm:$0xff]  ;;  %4307 = vperm.xlu1 %6832, %v4188_v38   ;;  %v4190_v62 = vld [vmem:[%s14887_s3 + $0xb8] sm:$0xff] }
 0x3c1   : > { %16379 = vst [vmem:[#allocation258_spill] sm:$0xff] %v12265_v16  ;;  %v5036_v35 = vsel %vm3479_vm2, %v12248_v40, 0.0  ;;  %v3415_v14 = vadd.f32 %v16382_v17, %v3215_v11  ;;  %v3771_v43 = vsel %vm3479_vm2, %v12169_v33, 0.0  ;;  %v3820_v60 = vmul.f32 %v12088_v48, %v12088_v48  ;;  %4312 = vperm.xlu0 %6831, %v4189_v55   ;;  %v16384_v47 = vld [vmem:[#allocation276_spill] sm:$0xff]  ;;  %v16385_v25 = vld [vmem:[#allocation119_spill] sm:$0xff] }
 0x3c2   : > { %v3875_v37 = vsel %vm3479_vm2, %v3819_v23, 0.0  ;;  %v5037_v20 = vadd.f32 %v5036_v35, %v5035_v46  ;;  %v12289_v54 = vadd.f32 %v11896_v34, %v2945_v42  ;;  %v3017_v1 = vmul.f32 %v12054_v53, %v16384_v47  ;;  %v4191_v23 = vld [vmem:[%s14887_s3 + $0xc0] sm:$0xff]  ;;  %v12301_v42 = vpop.permute.xlu1 %3368  ;;  %v16421_v40 = vld [vmem:[#allocation95_spill] sm:$0xff] }
 0x3c3   : > { %v5038_v33 = vsel %vm3479_vm2, %v12265_v16, 0.0  ;;  %v3416_v38 = vadd.f32 %v16385_v25, %v3216_v28  ;;  %v3718_v46 = vmul.f32 %v12027_v56, %v12027_v56  ;;  %v3772_v15 = vadd.f32 %v3771_v43, %v3770_v52  ;;  %v16387_v28 = vld [vmem:[#allocation273_spill] sm:$0xff]  ;;  %v12315_v25 = vpop.permute.xlu0 %3366  ;;  %v16393_v16 = vld [vmem:[#allocation275_spill] sm:$0xff] }
 0x3c4   : > { %16383 = vst [vmem:[#allocation35_spill] sm:$0xff] %v12289_v54  ;;  %v3876_v11 = vadd.f32 %v3875_v37, %v3874_v29  ;;  %v4968_v55 = vadd.f32 %v4967_v19, %v4966_v44  ;;  %v12305_v57 = vmul.f32 %v12031_v21, %v12031_v21  ;;  %v12308_v35 = vadd.f32 %v11896_v34, %v2946_v63  ;;  %v4192_v29 = vld [vmem:[%s14887_s3 + $0xc8] sm:$0xff]  ;;  %v16389_v63 = vld [vmem:[#allocation87_spill] sm:$0xff] }
 0x3c5   : > { %v3018_v17 = vmul.f32 %v12054_v53, %v16387_v28  ;;  %v12313_v47 = vadd.f32 %v12183_v31, %v3415_v14  ;;  %4317 = vperm.xlu1 %6832, %v4190_v62   ;;  %v3773_v19 = vsel %vm3479_vm2, %v12201_v7, 0.0  ;;  %v3821_v44 = vmul.f32 %v12096_v8, %v12096_v8  ;;  %4322 = vperm.xlu0 %6831, %v4191_v23   ;;  %v16390_v62 = vld [vmem:[#allocation14_spill] sm:$0xff]  ;;  %v16392_v8 = vld [vmem:[#allocation92_spill] sm:$0xff] }
 0x3c6   : > { %16386 = vst [vmem:[#allocation256_spill] sm:$0xff] %v12308_v35  ;;  %v3877_v43 = vsel %vm3479_vm2, %v3820_v60, 0.0  ;;  %v5039_v52 = vadd.f32 %v5038_v33, %v5037_v20  ;;  %v4969_v14 = vsel %vm3479_vm2, %v12289_v54, 0.0  ;;  %v2947_v37 = vadd.f32 %v16389_v63, %v11941_v2  ;;  %v4193_v60 = vld [vmem:[%s14887_s3 + $0xd0] sm:$0xff] }
 0x3c7   : > { %16388 = vst [vmem:[#allocation37_spill] sm:$0xff] %v12313_v47  ;;  %v3217_v28 = vadd.f32 %v16390_v62, %v3017_v1  ;;  %v12331_v7 = vadd.f32 %v12183_v31, %v3416_v38  ;;  %v3774_v20 = vadd.f32 %v3773_v19, %v3772_v15  ;;  %v3878_v33 = vadd.f32 %v3877_v43, %v3876_v11  ;;  %v16394_v38 = vld [vmem:[#allocation120_spill] sm:$0xff]  ;;  %v16397_v43 = vld [vmem:[#allocation291_spill] sm:$0xff] }
 0x3c8   : > { %v4970_v23 = vadd.f32 %v4969_v14, %v4968_v55  ;;  %v2948_v48 = vadd.f32 %v16392_v8, %v11930_v26  ;;  %v4971_v54 = vsel %vm3479_vm2, %v12308_v35, 0.0  ;;  %v3218_v2 = vadd.f32 %v16393_v16, %v3018_v17  ;;  %v12349_v8 = vpop.permute.xlu1 %3372  ;;  %v4194_v16 = vld [vmem:[%s14887_s3 + $0xd8] sm:$0xff]  ;;  %v16396_v17 = vld [vmem:[#allocation282_spill] sm:$0xff] }
 0x3c9   : > { %16391 = vst [vmem:[#allocation262_spill] sm:$0xff] %v12331_v7  ;;  %v5040_v1 = vsel %vm3479_vm2, %v12313_v47, 0.0  ;;  %v3417_v63 = vadd.f32 %v16394_v38, %v3217_v28  ;;  %4327 = vperm.xlu1 %6832, %v4192_v29   ;;  %v3775_v62 = vsel %vm3479_vm2, %v12241_v3, 0.0  ;;  %v3822_v15 = vmul.f32 %v12100_v5, %v12100_v5  ;;  %4332 = vperm.xlu0 %6831, %v4193_v60  }
 0x3ca   : > { %v3879_v11 = vsel %vm3479_vm2, %v3821_v44, 0.0  ;;  %v5041_v26 = vadd.f32 %v5040_v1, %v5039_v52  ;;  %v12355_v55 = vadd.f32 %v11896_v34, %v2947_v37  ;;  %v3019_v19 = vmul.f32 %v12054_v53, %v16396_v17  ;;  %v12362_v44 = vpop.permute.xlu0 %3370  ;;  %v4195_v52 = vld [vmem:[%s14887_s3 + $0xe0] sm:$0xff] }
 0x3cb   : > { %v5042_v3 = vsel %vm3479_vm2, %v12331_v7, 0.0  ;;  %v3418_v29 = vadd.f32 %v16397_v43, %v3218_v2  ;;  %v3720_v14 = vmul.f32 %v12035_v45, %v12035_v45  ;;  %v3776_v28 = vadd.f32 %v3775_v62, %v3774_v20  ;;  %v16399_v2 = vld [vmem:[#allocation279_spill] sm:$0xff] }
 0x3cc   : > { %16395 = vst [vmem:[#allocation130_spill] sm:$0xff] %v12355_v55  ;;  %v3880_v37 = vadd.f32 %v3879_v11, %v3878_v33  ;;  %v4972_v60 = vadd.f32 %v4971_v54, %v4970_v23  ;;  %v12371_v1 = vmul.f32 %v12039_v51, %v12039_v51  ;;  %v12374_v38 = vadd.f32 %v11896_v34, %v2948_v48  ;;  %v4196_v48 = vld [vmem:[%s14887_s3 + $0xe8] sm:$0xff]  ;;  %v12401_v35 = vpop.permute.xlu1 %3376  ;;  %v16457_v45 = vld [vmem:[#allocation295_spill] sm:$0xff] }
 0x3cd   : > { %v3020_v17 = vmul.f32 %v12054_v53, %v16399_v2  ;;  %v12379_v43 = vadd.f32 %v12183_v31, %v3417_v63  ;;  %4337 = vperm.xlu1 %6832, %v4194_v16   ;;  %v3777_v5 = vsel %vm3479_vm2, %v3718_v46, 0.0  ;;  %v3823_v20 = vmul.f32 %v12113_v6, %v12113_v6  ;;  %4342 = vperm.xlu0 %6831, %v4195_v52   ;;  %v16401_v63 = vld [vmem:[#allocation8_spill] sm:$0xff]  ;;  %v16402_v11 = vld [vmem:[#allocation186_spill] sm:$0xff]  ;;  %v16404_v2 = vld [vmem:[#allocation169_spill] sm:$0xff] }
 0x3ce   : > { %16398 = vst [vmem:[#allocation129_spill] sm:$0xff] %v12374_v38  ;;  %v3881_v54 = vsel %vm3479_vm2, %v3822_v15, 0.0  ;;  %v5043_v33 = vadd.f32 %v5042_v3, %v5041_v26  ;;  %v4973_v23 = vsel %vm3479_vm2, %v12355_v55, 0.0  ;;  %v2949_v62 = vadd.f32 %v16401_v63, %v11963_v50  ;;  %v4197_v15 = vld [vmem:[%s14887_s3 + $0xf0] sm:$0xff]  ;;  %v16405_v6 = vld [vmem:[#allocation93_spill] sm:$0xff]  ;;  %v16406_v63 = vld [vmem:[#allocation154_spill] sm:$0xff]  ;;  %v12409_v47 = vpop.permute.xlu0 %3374 }
 0x3cf   : > { %16400 = vst [vmem:[#allocation177_spill] sm:$0xff] %v12379_v43  ;;  %v3219_v16 = vadd.f32 %v16402_v11, %v3019_v19  ;;  %v12394_v46 = vadd.f32 %v12183_v31, %v3418_v29  ;;  %v3778_v26 = vadd.f32 %v3777_v5, %v3776_v28  ;;  %v3882_v3 = vadd.f32 %v3881_v54, %v3880_v37  ;;  %v16407_v11 = vld [vmem:[#allocation216_spill] sm:$0xff] }
 0x3d0   : > { %v4974_v52 = vadd.f32 %v4973_v23, %v4972_v60  ;;  %v2950_v7 = vadd.f32 %v16405_v6, %v16404_v2  ;;  %v4975_v50 = vsel %vm3479_vm2, %v12374_v38, 0.0  ;;  %v3220_v19 = vadd.f32 %v16406_v63, %v3020_v17  ;;  %v4198_v60 = vld [vmem:[%s14887_s3 + $0xf8] sm:$0xff]  ;;  %v16410_v23 = vld [vmem:[#allocation26_spill] sm:$0xff] }
 0x3d1   : > { %16403 = vst [vmem:[#allocation303_spill] sm:$0xff] %v12394_v46  ;;  %v5044_v29 = vsel %vm3479_vm2, %v12379_v43, 0.0  ;;  %v3419_v55 = vadd.f32 %v16407_v11, %v3219_v16  ;;  %4347 = vperm.xlu1 %6832, %v4196_v48   ;;  %v3779_v5 = vsel %vm3479_vm2, %v12305_v57, 0.0  ;;  %v3824_v6 = vmul.f32 %v12124_v18, %v12124_v18  ;;  %4352 = vperm.xlu0 %6831, %v4197_v15   ;;  %v16409_v54 = vld [vmem:[#allocation288_spill] sm:$0xff] }
 0x3d2   : > { %v3883_v28 = vsel %vm3479_vm2, %v3823_v20, 0.0  ;;  %v5045_v37 = vadd.f32 %v5044_v29, %v5043_v33  ;;  %v12420_v17 = vadd.f32 %v11896_v34, %v2949_v62  ;;  %v3021_v48 = vmul.f32 %v12054_v53, %v16409_v54  ;;  %v4199_v20 = vld [vmem:[%s14887_s3 + $0x100] sm:$0x1]  ;;  %v12433_v62 = vpop.permute.xlu1 %3976  ;;  %v16412_v29 = vld [vmem:[#allocation32_spill] sm:$0xff] }
 0x3d3   : > { %v5046_v57 = vsel %vm3479_vm2, %v12394_v46, 0.0  ;;  %v3420_v16 = vadd.f32 %v16410_v23, %v3220_v19  ;;  %v3780_v33 = vadd.f32 %v3779_v5, %v3778_v26  ;;  %v3884_v15 = vadd.f32 %v3883_v28, %v3882_v3  ;;  %v16413_v54 = vld [vmem:[#allocation245_spill] sm:$0xff]  ;;  %v16414_v19 = vld [vmem:[#allocation287_spill] sm:$0xff]  ;;  %v12446_v26 = vpop.permute.xlu0 %3971  ;;  %v6574_v5 = vld [vmem:[%s14886_s2 + $0x108] sm:$0xff] }
 0x3d4   : > { %16408 = vst [vmem:[#allocation176_spill] sm:$0xff] %v12420_v17  ;;  %v4976_v2 = vadd.f32 %v4975_v50, %v4974_v52  ;;  %v12431_v63 = vadd.f32 %v11896_v34, %v2950_v7  ;;  %v3722_v11 = vmul.f32 %v16412_v29, %v16412_v29  ;;  %v12439_v18 = vmul.f32 %v16413_v54, %v16413_v54  ;;  %v16416_v28 = vld [vmem:[#allocation28_spill] sm:$0xff] }
 0x3d5   : > { %v3022_v23 = vmul.f32 %v12054_v53, %v16414_v19  ;;  %v12444_v46 = vadd.f32 %v12183_v31, %v3419_v55  ;;  %4357 = vperm.xlu1 %6832, %v4198_v60   ;;  %v3781_v7 = vsel %vm3479_vm2, %v3720_v14, 0.0  ;;  %v3825_v3 = vmul.f32 %v12128_v41, %v12128_v41  ;;  %4362 = vperm.xlu0 %6831, %v4199_v20   ;;  %v16417_v19 = vld [vmem:[#allocation143_spill] sm:$0xff]  ;;  %v16418_v60 = vld [vmem:[#allocation194_spill] sm:$0xff] }
 0x3d6   : > { %16411 = vst [vmem:[#allocation255_spill] sm:$0xff] %v12431_v63  ;;  %v3885_v52 = vsel %vm3479_vm2, %v3824_v6, 0.0  ;;  %v5047_v50 = vadd.f32 %v5046_v57, %v5045_v37  ;;  %v4977_v55 = vsel %vm3479_vm2, %v12420_v17, 0.0  ;;  %v2951_v38 = vadd.f32 %v16417_v19, %v16416_v28  ;;  %v6575_v6 = vld [vmem:[%s14886_s2 + $0x110] sm:$0xff]  ;;  %v12468_v61 = vpop.permute.xlu1 %3981  ;;  %v16422_v19 = vld [vmem:[#allocation274_spill] sm:$0xff] }
 0x3d7   : > { %16415 = vst [vmem:[#allocation302_spill] sm:$0xff] %v12444_v46  ;;  %v3221_v43 = vadd.f32 %v16418_v60, %v3021_v48  ;;  %v12461_v14 = vadd.f32 %v12183_v31, %v3420_v16  ;;  %v3782_v37 = vadd.f32 %v3781_v7, %v3780_v33  ;;  %v3886_v57 = vadd.f32 %v3885_v52, %v3884_v15  ;;  %v16420_v17 = vld [vmem:[#allocation123_spill] sm:$0xff]  ;;  %v16423_v60 = vld [vmem:[#allocation202_spill] sm:$0xff]  ;;  %v12476_v27 = vpop.permute.xlu0 %3986 }
 0x3d8   : > { %v4978_v20 = vadd.f32 %v4977_v55, %v4976_v2  ;;  %v4979_v41 = vsel %vm3479_vm2, %v12431_v63, 0.0  ;;  %v2952_v28 = vadd.f32 %v16421_v40, %v16420_v17  ;;  %v3222_v48 = vadd.f32 %v16422_v19, %v3022_v23  ;;  %v6576_v40 = vld [vmem:[%s14886_s2 + $0x118] sm:$0xff]  ;;  %v16426_v52 = vld [vmem:[#allocation247_spill] sm:$0xff] }
 0x3d9   : > { %16419 = vst [vmem:[#allocation218_spill] sm:$0xff] %v12461_v14  ;;  %v5048_v16 = vsel %vm3479_vm2, %v12444_v46, 0.0  ;;  %v3421_v39 = vadd.f32 %v16423_v60, %v3221_v43  ;;  %4500 = vperm.xlu1 %6832, %v6574_v5   ;;  %v3783_v33 = vsel %vm3479_vm2, %v12371_v1, 0.0  ;;  %v3826_v15 = vmul.f32 %v12132_v12, %v12132_v12  ;;  %4505 = vperm.xlu0 %6831, %v6575_v6   ;;  %v16425_v43 = vld [vmem:[#allocation290_spill] sm:$0xff]  ;;  %v16428_v60 = vld [vmem:[#allocation60_spill] sm:$0xff] }
 0x3da   : > { %v3887_v2 = vsel %vm3479_vm2, %v3825_v3, 0.0  ;;  %v5049_v7 = vadd.f32 %v5048_v16, %v5047_v50  ;;  %v12487_v17 = vadd.f32 %v11896_v34, %v2951_v38  ;;  %v3023_v23 = vmul.f32 %v12054_v53, %v16425_v43  ;;  %v6577_v3 = vld [vmem:[%s14886_s2 + $0x120] sm:$0xff]  ;;  %v12498_v16 = vpop.permute.xlu1 %3991  ;;  %v16427_v38 = vld [vmem:[#allocation166_spill] sm:$0xff] }
 0x3db   : > { %v5050_v1 = vsel %vm3479_vm2, %v12461_v14, 0.0  ;;  %v3422_v5 = vadd.f32 %v16426_v52, %v3222_v48  ;;  %v3784_v50 = vadd.f32 %v3783_v33, %v3782_v37  ;;  %v3785_v55 = vsel %vm3479_vm2, %v3722_v11, 0.0  ;;  %v16430_v14 = vld [vmem:[#allocation289_spill] sm:$0xff]  ;;  %v12510_v63 = vpop.permute.xlu0 %3996 }
 0x3dc   : > { %16424 = vst [vmem:[#allocation261_spill] sm:$0xff] %v12487_v17  ;;  %v3888_v6 = vadd.f32 %v3887_v2, %v3886_v57  ;;  %v4980_v19 = vadd.f32 %v4979_v41, %v4978_v20  ;;  %v2753_v12 = vadd.f32 %v16428_v60, %v16427_v38  ;;  %v12503_v43 = vadd.f32 %v11896_v34, %v2952_v28  ;;  %v16432_v37 = vld [vmem:[#allocation121_spill] sm:$0xff]  ;;  %v16433_v57 = vld [vmem:[#allocation59_spill] sm:$0xff]  ;;  %v16434_v28 = vld [vmem:[#allocation10_spill] sm:$0xff] }
 0x3dd   : > { %v3024_v48 = vmul.f32 %v12054_v53, %v16430_v14  ;;  %v12508_v52 = vadd.f32 %v12183_v31, %v3421_v39  ;;  %4510 = vperm.xlu1 %6832, %v6576_v40   ;;  %v3827_v41 = vmul.f32 %v12136_v0, %v12136_v0  ;;  %v3889_v11 = vsel %vm3479_vm2, %v3826_v15, 0.0  ;;  %4515 = vperm.xlu0 %6831, %v6577_v3   ;;  %v6578_v14 = vld [vmem:[%s14886_s2 + $0x128] sm:$0xff]  ;;  %v16435_v40 = vld [vmem:[#allocation197_spill] sm:$0xff]  ;;  %v6579_v15 = vld [vmem:[%s14886_s2 + $0x130] sm:$0xff] }
 0x3de   : > { %16429 = vst [vmem:[#allocation138_spill] sm:$0xff] %v12503_v43  ;;  %v2754_v20 = vadd.f32 %v16433_v57, %v16432_v37  ;;  %v5051_v33 = vadd.f32 %v5050_v1, %v5049_v7  ;;  %v4981_v39 = vsel %vm3479_vm2, %v12487_v17, 0.0  ;;  %v2953_v2 = vadd.f32 %v16434_v28, %v2753_v12  ;;  %v16437_v37 = vld [vmem:[#allocation148_spill] sm:$0xff]  ;;  %v12531_v0 = vpop.permute.xlu1 %4001  ;;  %v16438_v12 = vld [vmem:[#allocation189_spill] sm:$0xff] }
 0x3df   : > { %16431 = vst [vmem:[#allocation30_spill] sm:$0xff] %v12508_v52  ;;  %v3223_v38 = vadd.f32 %v16435_v40, %v3023_v23  ;;  %v12525_v60 = vadd.f32 %v12183_v31, %v3422_v5  ;;  %v3786_v7 = vadd.f32 %v3785_v55, %v3784_v50  ;;  %v3890_v1 = vadd.f32 %v3889_v11, %v3888_v6  ;;  %v16439_v5 = vld [vmem:[#allocation167_spill] sm:$0xff]  ;;  %v12539_v46 = vpop.permute.xlu0 %4006  ;;  %v16440_v6 = vld [vmem:[#allocation293_spill] sm:$0xff] }
 0x3e0   : > { %v4982_v3 = vadd.f32 %v4981_v39, %v4980_v19  ;;  %v2954_v57 = vadd.f32 %v16437_v37, %v2754_v20  ;;  %v4983_v17 = vsel %vm3479_vm2, %v12503_v43, 0.0  ;;  %v3224_v28 = vadd.f32 %v16438_v12, %v3024_v48  ;;  %v16441_v19 = vld [vmem:[#allocation164_spill] sm:$0xff]  ;;  %v16446_v43 = vld [vmem:[#allocation219_spill] sm:$0xff] }
 0x3e1   : > { %16436 = vst [vmem:[#allocation111_spill] sm:$0xff] %v12525_v60  ;;  %v5052_v23 = vsel %vm3479_vm2, %v12508_v52, 0.0  ;;  %v3423_v40 = vadd.f32 %v16439_v5, %v3223_v38  ;;  %4520 = vperm.xlu1 %6832, %v6578_v14   ;;  %v3787_v50 = vsel %vm3543_vm3, %v12439_v18, 0.0  ;;  %v3891_v55 = vsel %vm3543_vm3, %v3827_v41, 0.0  ;;  %4525 = vperm.xlu0 %6831, %v6579_v15   ;;  %v6580_v48 = vld [vmem:[%s14886_s2 + $0x138] sm:$0xff]  ;;  %v16443_v38 = vld [vmem:[#allocation294_spill] sm:$0xff] }
 0x3e2   : > { %v2556_v11 = vmul.f32 %v16441_v19, %v16440_v6  ;;  %v5053_v20 = vadd.f32 %v5052_v23, %v5051_v33  ;;  %v12550_v39 = vadd.f32 %v11896_v34, %v2953_v2  ;;  %v3025_v14 = vmul.f32 %v12054_v53, %v16443_v38  ;;  %v16444_v37 = vld [vmem:[#allocation208_spill] sm:$0xff]  ;;  %v6581_v33 = vld [vmem:[%s14886_s2 + $0x140] sm:$0xff]  ;;  %v12563_v2 = vpop.permute.xlu1 %4011  ;;  %v16447_v52 = vld [vmem:[#allocation62_spill] sm:$0xff] }
 0x3e3   : > { %v5054_v18 = vsel %vm3479_vm2, %v12525_v60, 0.0  ;;  %v3424_v41 = vadd.f32 %v16444_v37, %v3224_v28  ;;  %v3788_v15 = vadd.f32 %v3787_v50, %v3786_v7  ;;  %v3892_v12 = vadd.f32 %v3891_v55, %v3890_v1  ;;  %v12572_v37 = vpop.permute.xlu0 %4016  ;;  %v16449_v7 = vld [vmem:[#allocation61_spill] sm:$0xff]  ;;  %v16451_v50 = vld [vmem:[#allocation96_spill] sm:$0xff] }
 0x3e4   : > { %16442 = vst [vmem:[#allocation133_spill] sm:$0xff] %v12550_v39  ;;  %v4984_v23 = vadd.f32 %v4983_v17, %v4982_v3  ;;  %v12561_v5 = vadd.f32 %v11896_v34, %v2954_v57  ;;  %v2755_v38 = vadd.f32 %v16447_v52, %v16446_v43  ;;  %v3026_v60 = vmul.f32 %v12054_v53, %v16440_v6  ;;  %v16450_v17 = vld [vmem:[#allocation296_spill] sm:$0xff]  ;;  %v6582_v43 = vld [vmem:[%s14886_s2 + $0x148] sm:$0xff] }
 0x3e5   : > { %v12570_v28 = vadd.f32 %v12183_v31, %v3423_v40  ;;  %4530 = vperm.xlu1 %6832, %v6580_v48   ;;  %v2756_v1 = vadd.f32 %v16449_v7, %v2556_v11  ;;  %v2557_v3 = vmul.f32 %v16441_v19, %v16450_v17  ;;  %v5055_v57 = vadd.f32 %v5054_v18, %v5053_v20  ;;  %v16452_v55 = vld [vmem:[#allocation156_spill] sm:$0xff]  ;;  %v6583_v11 = vld [vmem:[%s14886_s2 + $0x150] sm:$0xff] }
 0x3e6   : > { %16445 = vst [vmem:[#allocation179_spill] sm:$0xff] %v12561_v5  ;;  %4535 = vperm.xlu0 %6831, %v6581_v33   ;;  %v4985_v52 = vsel %vm3479_vm2, %v12550_v39, 0.0  ;;  %v2955_v40 = vadd.f32 %v16451_v50, %v2755_v38  ;;  %v3225_v6 = vadd.f32 %v16452_v55, %v3025_v14  ;;  %v12585_v48 = vadd.f32 %v12183_v31, %v3424_v41  ;;  %v12592_v54 = vpop.permute.xlu1 %4021  ;;  %v16454_v39 = vld [vmem:[#allocation268_spill] sm:$0xff]  ;;  %v16455_v38 = vld [vmem:[#allocation278_spill] sm:$0xff] }
 0x3e7   : > { %16448 = vst [vmem:[#allocation306_spill] sm:$0xff] %v12570_v28  ;;  %v3789_v20 = vrot.slane %v3788_v15, 4  ;;  %v3893_v18 = vrot.slane %v3892_v12, 4  ;;  %v4986_v33 = vadd.f32 %v4985_v52, %v4984_v23  ;;  %v4987_v7 = vsel %vm3479_vm2, %v12561_v5, 0.0  ;;  %v16456_v41 = vld [vmem:[#allocation226_spill] sm:$0xff]  ;;  %v12599_v51 = vpop.permute.xlu0 %4026  ;;  %v6584_v5 = vld [vmem:[%s14886_s2 + $0x158] sm:$0xff] }
 0x3e8   : > { %16453 = vst [vmem:[#allocation178_spill] sm:$0xff] %v12585_v48  ;;  %v2956_v29 = vadd.f32 %v16454_v39, %v2756_v1  ;;  %v3226_v50 = vadd.f32 %v16455_v38, %v3026_v60  ;;  %v5056_v14 = vsel %vm3479_vm2, %v12570_v28, 0.0  ;;  %v3425_v55 = vadd.f32 %v16456_v41, %v3225_v6  ;;  %v16459_v6 = vld [vmem:[#allocation124_spill] sm:$0xff]  ;;  %v16460_v28 = vld [vmem:[#allocation65_spill] sm:$0xff] }
 0x3e9   : > { %4540 = vperm.xlu1 %6832, %v6582_v43   ;;  %v2558_v23 = vmul.f32 %v16441_v19, %v16457_v45  ;;  %v5057_v52 = vadd.f32 %v5056_v14, %v5055_v57  ;;  %v12607_v39 = vadd.f32 %v11896_v34, %v2955_v40  ;;  %v3027_v60 = vmul.f32 %v12054_v53, %v16450_v17  ;;  %v6585_v57 = vld [vmem:[%s14886_s2 + $0x160] sm:$0xff] }
 0x3ea   : > { %4545 = vperm.xlu0 %6831, %v6583_v11   ;;  %v5058_v1 = vsel %vm3479_vm2, %v12585_v48, 0.0  ;;  %v3426_v43 = vadd.f32 %v16459_v6, %v3226_v50  ;;  %v3790_v11 = vadd.f32 %v3789_v20, %v3788_v15  ;;  %v3894_v38 = vadd.f32 %v3893_v18, %v3892_v12  ;;  %v12617_v41 = vpop.permute.xlu1 %4031  ;;  %v16463_v6 = vld [vmem:[#allocation230_spill] sm:$0xff] }
 0x3eb   : > { %16458 = vst [vmem:[#allocation260_spill] sm:$0xff] %v12607_v39  ;;  %v4988_v14 = vadd.f32 %v4987_v7, %v4986_v33  ;;  %v2757_v40 = vadd.f32 %v16460_v28, %v2557_v3  ;;  %v12621_v21 = vadd.f32 %v11896_v34, %v2956_v29  ;;  %v3028_v17 = vmul.f32 %v12054_v53, %v16457_v45  ;;  %v12628_v50 = vpop.permute.xlu0 %4036  ;;  %v16464_v12 = vld [vmem:[#allocation298_spill] sm:$0xff]  ;;  %v16466_v33 = vld [vmem:[#allocation191_spill] sm:$0xff] }
 0x3ec   : > { %v12626_v48 = vadd.f32 %v12183_v31, %v3425_v55  ;;  %v2758_v15 = vadd.f32 %v16463_v6, %v2558_v23  ;;  %v2559_v20 = vmul.f32 %v16441_v19, %v16464_v12  ;;  %v5059_v18 = vadd.f32 %v5058_v1, %v5057_v52  ;;  %v6586_v29 = vld [vmem:[%s14886_s2 + $0x168] sm:$0xff]  ;;  %v6587_v55 = vld [vmem:[%s14886_s2 + $0x170] sm:$0xff] }
 0x3ed   : > { %16461 = vst [vmem:[#allocation305_spill] sm:$0xff] %v12621_v21  ;;  %4550 = vperm.xlu1 %6832, %v6584_v5   ;;  %v4989_v45 = vsel %vm3479_vm2, %v12607_v39, 0.0  ;;  %v16465_v28 = vld [vmem:[#allocation182_spill] sm:$0xff]  ;;  %v3227_v7 = vadd.f32 %v16466_v33, %v3027_v60  ;;  %v12641_v5 = vadd.f32 %v12183_v31, %v3426_v43  ;;  %v3791_v23 = vrot.slane %v3790_v11, 2 }
 0x3ee   : > { %16462 = vst [vmem:[#allocation38_spill] sm:$0xff] %v12626_v48  ;;  %4555 = vperm.xlu0 %6831, %v6585_v57   ;;  %v2957_v3 = vadd.f32 %v16465_v28, %v2757_v40  ;;  %v3895_v52 = vrot.slane %v3894_v38, 2  ;;  %v4990_v1 = vadd.f32 %v4989_v45, %v4988_v14  ;;  %v16468_v57 = vld [vmem:[#allocation269_spill] sm:$0xff]  ;;  %v12647_v56 = vpop.permute.xlu1 %4041  ;;  %v4991_v39 = vsel %vm3479_vm2, %v12621_v21, 0.0  ;;  %v16469_v40 = vld [vmem:[#allocation19_spill] sm:$0xff]  ;;  %v16470_v43 = vld [vmem:[#allocation250_spill] sm:$0xff] }
 0x3ef   : > { %16467 = vst [vmem:[#allocation132_spill] sm:$0xff] %v12641_v5  ;;  %v2958_v6 = vadd.f32 %v16468_v57, %v2758_v15  ;;  %v3228_v28 = vadd.f32 %v16469_v40, %v3028_v17  ;;  %v5060_v60 = vsel %vm3479_vm2, %v12626_v48, 0.0  ;;  %v3427_v33 = vadd.f32 %v16470_v43, %v3227_v7  ;;  %v12655_v4 = vpop.permute.xlu0 %4046  ;;  %v6588_v15 = vld [vmem:[%s14886_s2 + $0x178] sm:$0xff] }
 0x3f0   : > { %v2560_v14 = vmul.f32 %v16441_v19, %v16471_v30  ;;  %v5061_v45 = vadd.f32 %v5060_v60, %v5059_v18  ;;  %v12663_v57 = vadd.f32 %v11896_v34, %v2957_v3  ;;  %v3029_v17 = vmul.f32 %v12054_v53, %v16464_v12  ;;  %v16473_v40 = vld [vmem:[#allocation252_spill] sm:$0xff]  ;;  %v6589_v18 = vld [vmem:[%s14886_s2 + $0x180] sm:$0xff] }
 0x3f1   : > { %4560 = vperm.xlu1 %6832, %v6586_v29   ;;  %v5062_v7 = vsel %vm3479_vm2, %v12641_v5, 0.0  ;;  %v3428_v29 = vadd.f32 %v16473_v40, %v3228_v28  ;;  %v3896_v60 = vadd.f32 %v3895_v52, %v3894_v38  ;;  %v4992_v43 = vadd.f32 %v4991_v39, %v4990_v1  ;;  %v16474_v48 = vld [vmem:[#allocation232_spill] sm:$0xff]  ;;  %v16478_v40 = vld [vmem:[#allocation231_spill] sm:$0xff]  ;;  %v16479_v38 = vld [vmem:[#allocation301_spill] sm:$0xff] }
 0x3f2   : > { %4565 = vperm.xlu0 %6831, %v6587_v55   ;;  %16472 = vst [vmem:[#allocation265_spill] sm:$0xff] %v12663_v57  ;;  %v3792_v55 = vadd.f32 %v3791_v23, %v3790_v11  ;;  %v12673_v21 = vpop.permute.xlu1 %4051  ;;  %v2759_v3 = vadd.f32 %v16474_v48, %v2559_v20  ;;  %v12677_v36 = vadd.f32 %v11896_v34, %v2958_v6  ;;  %v6590_v48 = vld [vmem:[%s14886_s2 + $0x188] sm:$0xff]  ;;  %v16480_v20 = vld [vmem:[#allocation185_spill] sm:$0xff]  ;;  %v16481_v1 = vld [vmem:[#allocation263_spill] sm:$0xff] }
 0x3f3   : > { %v3030_v12 = vmul.f32 %v12054_v53, %v16471_v30  ;;  %v12682_v5 = vadd.f32 %v12183_v31, %v3427_v33  ;;  %v12684_v28 = vpop.permute.xlu0 %4056  ;;  %v2760_v11 = vadd.f32 %v16478_v40, %v2560_v14  ;;  %v2561_v39 = vmul.f32 %v16441_v19, %v16479_v38  ;;  %v6591_v14 = vld [vmem:[%s14886_s2 + $0x190] sm:$0xff] }
 0x3f4   : > { %16475 = vst [vmem:[#allocation40_spill] sm:$0xff] %v12677_v36  ;;  %16477 = vst [vmem:[#allocation81_spill] sm:$0xff] %v12684_v28  ;;  %v5063_v23 = vadd.f32 %v5062_v7, %v5061_v45  ;;  %v4993_v30 = vsel %vm3479_vm2, %v12663_v57, 0.0  ;;  %v2959_v52 = vadd.f32 %v16480_v20, %v2759_v3  ;;  %v3229_v6 = vadd.f32 %v16481_v1, %v3029_v17  ;;  %v16485_v3 = vld [vmem:[#allocation113_spill] sm:$0xff] }
 0x3f5   : > { %16476 = vst [vmem:[#allocation199_spill] sm:$0xff] %v12682_v5  ;;  %4570 = vperm.xlu1 %6832, %v6588_v15   ;;  %v12697_v33 = vadd.f32 %v12183_v31, %v3428_v29  ;;  %v3793_v45 = vrot.slane %v3792_v55, 1  ;;  %v3897_v15 = vrot.slane %v3896_v60, 1  ;;  %v4994_v7 = vadd.f32 %v4993_v30, %v4992_v43  ;;  %v16486_v29 = vld [vmem:[#allocation207_spill] sm:$0xff] }
 0x3f6   : > { %4575 = vperm.xlu0 %6831, %v6589_v18   ;;  %v16483_v18 = vld [vmem:[#allocation97_spill] sm:$0xff]  ;;  %v12703_v22 = vpop.permute.xlu1 %4061  ;;  %v4995_v57 = vsel %vm3479_vm2, %v12677_v36, 0.0  ;;  %v3230_v20 = vadd.f32 %v16485_v3, %v3030_v12  ;;  %v5064_v17 = vsel %vm3479_vm2, %v12682_v5, 0.0  ;;  %v3429_v1 = vadd.f32 %v16486_v29, %v3229_v6  ;;  %v16490_v3 = vld [vmem:[#allocation254_spill] sm:$0xff]  ;;  %v16493_v5 = vld [vmem:[#allocation68_spill] sm:$0xff] }
 0x3f7   : > { %16482 = vst [vmem:[#allocation210_spill] sm:$0xff] %v12697_v33  ;;  %v2960_v40 = vadd.f32 %v16483_v18, %v2760_v11  ;;  %16484 = vst [vmem:[#allocation324_spill] sm:$0xff] %v12703_v22  ;;  %v12711_v24 = vpop.permute.xlu0 %4066  ;;  %v2562_v43 = vmul.f32 %v16441_v19, %v16488_v10  ;;  %v5065_v30 = vadd.f32 %v5064_v17, %v5063_v23  ;;  %v6592_v11 = vld [vmem:[%s14886_s2 + $0x198] sm:$0xff]  ;;  %v5066_v6 = vsel %vm3479_vm2, %v12697_v33, 0.0  ;;  %v6593_v23 = vld [vmem:[%s14886_s2 + $0x1a0] sm:$0xff] }
 0x3f8   : > { %16487 = vst [vmem:[#allocation136_spill] sm:$0xff] %v12711_v24  ;;  %v12719_v18 = vadd.f32 %v11896_v34, %v2959_v52  ;;  %v3031_v12 = vmul.f32 %v12054_v53, %v16479_v38  ;;  %v3898_v17 = vadd.f32 %v3897_v15, %v3896_v60  ;;  %v4996_v29 = vadd.f32 %v4995_v57, %v4994_v7  ;;  %v6594_v57 = vld [vmem:[%s14886_s2 + $0x1a8] sm:$0xff] }
 0x3f9   : > { %4580 = vperm.xlu1 %6832, %v6590_v48   ;;  %v3430_v48 = vadd.f32 %v16490_v3, %v3230_v20  ;;  %v12730_v36 = vadd.f32 %v11896_v34, %v2960_v40  ;;  %v2761_v24 = vadd.f32 %v16493_v5, %v2561_v39  ;;  %v3032_v38 = vmul.f32 %v12054_v53, %v16488_v10  ;;  %v16496_v3 = vld [vmem:[#allocation240_spill] sm:$0xff]  ;;  %v16497_v39 = vld [vmem:[#allocation319_spill] sm:$0xff]  ;;  %v16498_v10 = vld [vmem:[#allocation190_spill] sm:$0xff] }
 0x3fa   : > { %4585 = vperm.xlu0 %6831, %v6591_v14   ;;  %16489 = vst [vmem:[#allocation31_spill] sm:$0xff] %v12719_v18  ;;  %v3794_v14 = vadd.f32 %v3793_v45, %v3792_v55  ;;  %v12732_v52 = vpop.permute.xlu1 %4071  ;;  %v12738_v33 = vadd.f32 %v12183_v31, %v3429_v1  ;;  %v2762_v55 = vadd.f32 %v16496_v3, %v2562_v43  ;;  %v4997_v5 = vsel %vm3479_vm2, %v12719_v18, 0.0  ;;  %v6595_v40 = vld [vmem:[%s14886_s2 + $0x1b0] sm:$0xff]  ;;  %v16500_v43 = vld [vmem:[#allocation304_spill] sm:$0xff]  ;;  %v16562_v22 = vld [vmem:[#allocation198_spill] sm:$0xff] }
 0x3fb   : > { %16491 = vst [vmem:[#allocation195_spill] sm:$0xff] %v12730_v36  ;;  %16492 = vst [vmem:[#allocation181_spill] sm:$0xff] %v12732_v52  ;;  %v12740_v20 = vpop.permute.xlu0 %4076  ;;  %v5067_v60 = vadd.f32 %v5066_v6, %v5065_v30  ;;  %v2961_v45 = vadd.f32 %v16497_v39, %v2761_v24  ;;  %v3231_v15 = vadd.f32 %v16498_v10, %v3031_v12  ;;  %v4999_v6 = vsel %vm3479_vm2, %v12730_v36, 0.0  ;;  %v16502_v24 = vld [vmem:[#allocation12_spill] sm:$0xff]  ;;  %v16503_v12 = vld [vmem:[#allocation158_spill] sm:$0xff] }
 0x3fc   : > { %16494 = vst [vmem:[#allocation310_spill] sm:$0xff] %v12738_v33  ;;  %16495 = vst [vmem:[#allocation7_spill] sm:$0xff] %v12740_v20  ;;  %v12751_v7 = vadd.f32 %v12183_v31, %v3430_v48  ;;  %v3899_v1 = vadd.f32 %v3898_v17, %v3794_v14  ;;  %v2563_v30 = vmul.f32 %v16441_v19, %v16500_v43  ;;  %v5068_v48 = vsel %vm3479_vm2, %v12738_v33, 0.0  ;;  %v16504_v10 = vld [vmem:[#allocation209_spill] sm:$0xff]  ;;  %v16561_v52 = vld [vmem:[#allocation188_spill] sm:$0xff] }
 0x3fd   : > { %4590 = vperm.xlu1 %6832, %v6592_v11   ;;  %v4998_v11 = vadd.f32 %v4997_v5, %v4996_v29  ;;  %v2962_v3 = vadd.f32 %v16502_v24, %v2762_v55  ;;  %v3232_v39 = vadd.f32 %v16503_v12, %v3032_v38  ;;  %v3431_v18 = vadd.f32 %v16504_v10, %v3231_v15  ;;  %v16506_v14 = vld [vmem:[#allocation221_spill] sm:$0xff]  ;;  %v6596_v5 = vld [vmem:[%s14886_s2 + $0x1b8] sm:$0xff] }
 0x3fe   : > { %4595 = vperm.xlu0 %6831, %v6593_v23   ;;  %16499 = vst [vmem:[#allocation264_spill] sm:$0xff] %v12751_v7  ;;  %v12760_v23 = vpop.permute.xlu1 %4081  ;;  %v2564_v17 = vmul.f32 %v16441_v19, %v16506_v14  ;;  %v5069_v29 = vadd.f32 %v5068_v48, %v5067_v60  ;;  %v12775_v55 = vadd.f32 %v11896_v34, %v2961_v45  ;;  %v5070_v15 = vsel %vm3479_vm2, %v12751_v7, 0.0  ;;  %v6597_v60 = vld [vmem:[%s14886_s2 + $0x1c0] sm:$0xff]  ;;  %v16509_v48 = vld [vmem:[#allocation242_spill] sm:$0xff] }
 0x3ff   : > { %16501 = vst [vmem:[#allocation309_spill] sm:$0xff] %v12760_v23  ;;  %v12767_v20 = vpop.permute.xlu0 %4086  ;;  %v3033_v38 = vmul.f32 %v12054_v53, %v16500_v43  ;;  %v5000_v24 = vadd.f32 %v4999_v6, %v4998_v11  ;;  %v2763_v10 = vadd.f32 %v16509_v48, %v2563_v30  ;;  %v12789_v45 = vadd.f32 %v11896_v34, %v2962_v3  ;;  %v6598_v30 = vld [vmem:[%s14886_s2 + $0x1c8] sm:$0xff]  ;;  %v16516_v48 = vld [vmem:[#allocation193_spill] sm:$0xff] }
 0x400   : > { %16505 = vst [vmem:[#allocation134_spill] sm:$0xff] %v12767_v20  ;;  %16507 = vst [vmem:[#allocation6_spill] sm:$0xff] %v12775_v55  ;;  %v3034_v43 = vmul.f32 %v12054_v53, %v16506_v14  ;;  %v12794_v7 = vadd.f32 %v12183_v31, %v3431_v18  ;;  %v5071_v6 = vadd.f32 %v5070_v15, %v5069_v29  ;;  %v5001_v3 = vsel %vm3479_vm2, %v12775_v55, 0.0  ;;  %v16515_v14 = vld [vmem:[#allocation98_spill] sm:$0xff]  ;;  %v16518_v15 = vld [vmem:[#allocation312_spill] sm:$0xff] }
 0x401   : > { %4600 = vperm.xlu1 %6832, %v6594_v57   ;;  %v3432_v57 = vadd.f32 %v12158_v13, %v3232_v39  ;;  %16510 = vst [vmem:[#allocation51_spill] sm:$0xff] %v12789_v45  ;;  %v16513_v39 = vld [vmem:[#allocation239_spill] sm:$0xff]  ;;  %v2963_v18 = vadd.f32 %v16515_v14, %v2763_v10  ;;  %v3233_v33 = vadd.f32 %v16516_v48, %v3033_v38  ;;  %v5003_v10 = vsel %vm3479_vm2, %v12789_v45, 0.0  ;;  %v16521_v38 = vld [vmem:[#allocation266_spill] sm:$0xff]  ;;  %v16543_v23 = vld [vmem:[#allocation325_spill] sm:$0xff] }
 0x402   : > { %4605 = vperm.xlu0 %6831, %v6595_v40   ;;  %v3900_v40 = vmul.f32 0.0019455253, %v3899_v1  ;;  %v12785_v12 = vpop.permute.xlu1 %4091  ;;  %16511 = vst [vmem:[#allocation140_spill] sm:$0xff] %v12794_v7  ;;  %v2764_v36 = vadd.f32 %v16513_v39, %v2564_v17  ;;  %v16514_v1 = vld [vmem:[#allocation308_spill] sm:$0xff]  ;;  %v6599_v17 = vld [vmem:[%s14886_s2 + $0x1d0] sm:$0xff]  ;;  %v5002_v39 = vadd.f32 %v5001_v3, %v5000_v24  ;;  %v3234_v14 = vadd.f32 %v16521_v38, %v3034_v43  ;;  %v16526_v38 = vld [vmem:[#allocation73_spill] sm:$0xff] }
 0x403   : > { %16508 = vst [vmem:[#allocation135_spill] sm:$0xff] %v12785_v12  ;;  %v12796_v13 = vpop.permute.xlu0 %4096  ;;  %v2565_v11 = vmul.f32 %v16441_v19, %v16514_v1  ;;  %v3433_v48 = vadd.f32 %v12147_v49, %v3233_v33  ;;  %v3035_v43 = vmul.f32 %v12054_v53, %v16514_v1 }
 0x404   : > { %16512 = vst [vmem:[#allocation18_spill] sm:$0xff] %v12796_v13  ;;  %v3901_v29 = vadd.f32 1e-05, %v3900_v40  ;;  %v16519_v13 = vld [vmem:[#allocation152_spill] sm:$0xff]  ;;  %v16523_v40 = vld [vmem:[#allocation307_spill] sm:$0xff]  ;;  %v3434_v33 = vadd.f32 %v12214_v58, %v3234_v14  ;;  %v5004_v45 = vadd.f32 %v5003_v10, %v5002_v39 }
 0x405   : > { %4610 = vperm.xlu1 %6832, %v6596_v5   ;;  %v12809_v5 = vadd.f32 %v12183_v31, %v3432_v57  ;;  %v2964_v12 = vadd.f32 %v16519_v13, %v2764_v36  ;;  %v5072_v57 = vsel %vm3479_vm2, %v12794_v7, 0.0  ;;  %v2566_v24 = vmul.f32 %v16441_v19, %v16523_v40  ;;  %v6600_v36 = vld [vmem:[%s14886_s2 + $0x1d8] sm:$0xff] }
 0x406   : > { %4615 = vperm.xlu0 %6831, %v6597_v60   ;;  %v2567_v60 = vmul.f32 %v16441_v19, %v16518_v15  ;;  %v12817_v20 = vpop.permute.xlu1 %4101  ;;  %v5073_v3 = vadd.f32 %v5072_v57, %v5071_v6  ;;  %v12833_v13 = vadd.f32 %v11896_v34, %v2963_v18  ;;  %v6601_v6 = vld [vmem:[%s14886_s2 + $0x1e0] sm:$0xff]  ;;  %6899 = vrsqrt.f32 %v3901_v29  ;;  %v16531_v29 = vld [vmem:[#allocation70_spill] sm:$0xff] }
 0x407   : > { %16517 = vst [vmem:[#allocation314_spill] sm:$0xff] %v12809_v5  ;;  %16520 = vst [vmem:[#allocation9_spill] sm:$0xff] %v12817_v20  ;;  %v12825_v55 = vpop.permute.xlu0 %4106  ;;  %v5074_v49 = vsel %vm3479_vm2, %v12809_v5, 0.0  ;;  %v12848_v7 = vadd.f32 %v11896_v34, %v2964_v12  ;;  %v3036_v1 = vmul.f32 %v12054_v53, %v16523_v40  ;;  %v12853_v58 = vadd.f32 %v12183_v31, %v3433_v48  ;;  %v6602_v12 = vld [vmem:[%s14886_s2 + $0x1e8] sm:$0xff] }
 0x408   : > { %16522 = vst [vmem:[#allocation49_spill] sm:$0xff] %v12825_v55  ;;  %16524 = vst [vmem:[#allocation139_spill] sm:$0xff] %v12833_v13  ;;  %v2767_v57 = vadd.f32 %v16526_v38, %v2567_v60  ;;  %v2766_v5 = vadd.f32 %v16531_v29, %v2566_v24  ;;  %v16533_v60 = vld [vmem:[#allocation271_spill] sm:$0xff]  ;;  %v5075_v10 = vadd.f32 %v5074_v49, %v5073_v3  ;;  %v5005_v48 = vsel %vm3479_vm2, %v12833_v13, 0.0  ;;  %v16537_v49 = vld [vmem:[#allocation316_spill] sm:$0xff] }
 0x409   : > { %4620 = vperm.xlu1 %6832, %v6598_v30   ;;  %v16525_v30 = vld [vmem:[#allocation72_spill] sm:$0xff]  ;;  %16528 = vst [vmem:[#allocation34_spill] sm:$0xff] %v12848_v7  ;;  %16529 = vst [vmem:[#allocation142_spill] sm:$0xff] %v12853_v58  ;;  %v16534_v38 = vld [vmem:[#allocation311_spill] sm:$0xff]  ;;  %v12869_v24 = vadd.f32 %v12183_v31, %v3434_v33  ;;  %v5006_v29 = vadd.f32 %v5005_v48, %v5004_v45  ;;  %v5076_v13 = vsel %vm3479_vm2, %v12853_v58, 0.0 }
 0x40a   : > { %4625 = vperm.xlu0 %6831, %v6599_v17   ;;  %v2765_v17 = vadd.f32 %v16525_v30, %v2565_v11  ;;  %v12845_v18 = vpop.permute.xlu1 %4111  ;;  %v16532_v11 = vld [vmem:[#allocation313_spill] sm:$0xff]  ;;  %v2967_v39 = vadd.f32 %v16533_v60, %v2767_v57  ;;  %v2568_v40 = vmul.f32 %v16441_v19, %v16534_v38  ;;  %v6603_v3 = vld [vmem:[%s14886_s2 + $0x1f0] sm:$0xff]  ;;  %v2572_v45 = vmul.f32 %v16441_v19, %v16543_v23 }
 0x40b   : > { %16527 = vst [vmem:[#allocation214_spill] sm:$0xff] %v12845_v18  ;;  %v12855_v14 = vpop.permute.xlu0 %4116  ;;  %16536 = vst [vmem:[#allocation36_spill] sm:$0xff] %v12869_v24  ;;  %v16541_v33 = vld [vmem:[#allocation101_spill] sm:$0xff] }
 0x40c   : > { %16530 = vst [vmem:[#allocation39_spill] sm:$0xff] %v12855_v14  ;;  %v2965_v30 = vadd.f32 %v16532_v11, %v2765_v17  ;;  %v16535_v14 = vld [vmem:[#allocation102_spill] sm:$0xff]  ;;  %v16538_v17 = vld [vmem:[#allocation317_spill] sm:$0xff]  ;;  %v16539_v11 = vld [vmem:[#allocation15_spill] sm:$0xff]  ;;  %v12895_v48 = vadd.f32 %v11896_v34, %v2967_v39 }
 0x40d   : > { %4630 = vperm.xlu1 %6832, %v6600_v36   ;;  %v3235_v36 = vadd.f32 %v16535_v14, %v3035_v43  ;;  %v2569_v57 = vmul.f32 %v16441_v19, %v16538_v17  ;;  %v2966_v60 = vadd.f32 %v16539_v11, %v2766_v5  ;;  %v5007_v43 = vsel %vm3479_vm2, %v12848_v7, 0.0  ;;  %v16546_v39 = vld [vmem:[#allocation71_spill] sm:$0xff]  ;;  %v16550_v58 = vld [vmem:[#allocation77_spill] sm:$0xff] }
 0x40e   : > { %4635 = vperm.xlu0 %6831, %v6601_v6   ;;  %v2570_v6 = vmul.f32 %v16441_v19, %v16537_v49  ;;  %v12879_v18 = vpop.permute.xlu1 %4121  ;;  %v3236_v14 = vadd.f32 %v16541_v33, %v3036_v1  ;;  %v12892_v5 = vadd.f32 %v11896_v34, %v2965_v30  ;;  %16545 = vst [vmem:[#allocation41_spill] sm:$0xff] %v12895_v48  ;;  %v6604_v1 = vld [vmem:[%s14886_s2 + $0x1f8] sm:$0xff]  ;;  %v6605_v30 = vld [vmem:[%s14886_s2 + $0x200] sm:$0xff] }
 0x40f   : > { %16540 = vst [vmem:[#allocation137_spill] sm:$0xff] %v12879_v18  ;;  %v3435_v55 = vadd.f32 %v12205_v32, %v3235_v36  ;;  %v12887_v20 = vpop.permute.xlu0 %4126  ;;  %v5077_v11 = vadd.f32 %v5076_v13, %v5075_v10  ;;  %v3037_v32 = vmul.f32 %v12054_v53, %v16518_v15  ;;  %v2768_v33 = vadd.f32 %v16546_v39, %v2568_v40  ;;  %v16547_v13 = vld [vmem:[#allocation326_spill] sm:$0xff] }
 0x410   : > { %16542 = vst [vmem:[#allocation131_spill] sm:$0xff] %v12887_v20  ;;  %16544 = vst [vmem:[#allocation42_spill] sm:$0xff] %v12892_v5  ;;  %v3436_v36 = vadd.f32 %v12267_v59, %v3236_v14  ;;  %v12911_v10 = vmul.f32 %v16441_v19, %v16547_v13  ;;  %v12914_v7 = vadd.f32 %v11896_v34, %v2966_v60  ;;  %v16551_v59 = vld [vmem:[#allocation78_spill] sm:$0xff]  ;;  %v12927_v18 = vpop.eup %6899 }
 0x411   : > { %4640 = vperm.xlu1 %6832, %v6602_v12   ;;  %v5078_v12 = vsel %vm3479_vm2, %v12869_v24, 0.0  ;;  %v12919_v24 = vadd.f32 %v16550_v58, %v2570_v6  ;;  %v2769_v14 = vadd.f32 %v16551_v59, %v2569_v57  ;;  %v3038_v20 = vmul.f32 %v12054_v53, %v16534_v38  ;;  %v16554_v38 = vld [vmem:[#allocation151_spill] sm:$0xff] }
 0x412   : > { %4645 = vperm.xlu0 %6831, %v6603_v3   ;;  %v5008_v3 = vadd.f32 %v5007_v43, %v5006_v29  ;;  %16548 = vst [vmem:[#allocation45_spill] sm:$0xff] %v12914_v7  ;;  %v12916_v15 = vpop.permute.xlu1 %4131  ;;  %v12925_v40 = vadd.f32 %v12183_v31, %v3435_v55  ;;  %v16553_v29 = vld [vmem:[#allocation80_spill] sm:$0xff]  ;;  %v5009_v58 = vsel %vm3479_vm2, %v12892_v5, 0.0  ;;  %v12936_v6 = vsel %vm3479_vm2, %v12895_v48, 0.0  ;;  %v6606_v55 = vld [vmem:[%s14886_s2 + $0x208] sm:$0x1] }
 0x413   : > { %16549 = vst [vmem:[#allocation52_spill] sm:$0xff] %v12916_v15  ;;  %v4203_v39 = vpop.permute.xlu0 %4202  ;;  %v12930_v60 = vadd.f32 %v16553_v29, %v2572_v45  ;;  %v5079_v57 = vadd.f32 %v5078_v12, %v5077_v11  ;;  %v12942_v43 = vadd.f32 %v16554_v38, %v2769_v14  ;;  %v16556_v45 = vld [vmem:[#allocation284_spill] sm:$0xff]  ;;  %v12947_v15 = vadd.f32 %v12183_v31, %v3436_v36  ;;  %v6607_v48 = vld [vmem:[%s14887_s3 + $0x108] sm:$0xff] }
 0x414   : > { %16552 = vst [vmem:[#allocation54_spill] sm:$0xff] %v12925_v40  ;;  %v3237_v29 = vadd.f32 %v16556_v45, %v3037_v32  ;;  %v5010_v11 = vadd.f32 %v5009_v58, %v5008_v3  ;;  %v5011_v12 = vsel %vm3479_vm2, %v12914_v7, 0.0  ;;  %v3039_v14 = vmul.f32 %v12054_v53, %v16538_v17  ;;  %v16558_v32 = vld [vmem:[#allocation161_spill] sm:$0xff]  ;;  %v16559_v45 = vld [vmem:[#allocation100_spill] sm:$0xff] }
 0x415   : > { %4650 = vperm.xlu1 %6832, %v6604_v1   ;;  %v16555_v1 = vld [vmem:[#allocation184_spill] sm:$0xff]  ;;  %16557 = vst [vmem:[#allocation141_spill] sm:$0xff] %v12947_v15  ;;  %v3238_v38 = vadd.f32 %v16558_v32, %v3038_v20  ;;  %v5080_v36 = vsel %vm3479_vm2, %v12925_v40, 0.0  ;;  %v3903_v3 = vmul.f32 %v12927_v18, %v16559_v45  ;;  %v3905_v17 = vmul.f32 %v12927_v18, %v16561_v52  ;;  %v16563_v32 = vld [vmem:[#allocation159_spill] sm:$0xff] }
 0x416   : > { %4655 = vperm.xlu0 %6831, %v6605_v30   ;;  %v2968_v59 = vadd.f32 %v16555_v1, %v2768_v33  ;;  %v3040_v30 = vmul.f32 %v12054_v53, %v16537_v49  ;;  %v4208_v33 = vpop.permute.xlu1 %4207  ;;  %v3437_v1 = vadd.f32 %v12254_v9, %v3237_v29  ;;  %v5081_v7 = vadd.f32 %v5080_v36, %v5079_v57  ;;  %v16560_v5 = vld [vmem:[#allocation112_spill] sm:$0xff]  ;;  %v6608_v9 = vld [vmem:[%s14887_s3 + $0x110] sm:$0xff] }
 0x417   : > { %v4213_v58 = vpop.permute.xlu0 %4212  ;;  %v3904_v49 = vmul.f32 %v12927_v18, %v16560_v5  ;;  %v3906_v20 = vmul.f32 %v12927_v18, %v16562_v22  ;;  %v5082_v29 = vsel %vm3479_vm2, %v12947_v15, 0.0  ;;  %v4134_v57 = vmul.f32 %v12446_v26, %v3903_v3  ;;  %v6609_v52 = vld [vmem:[%s14887_s3 + $0x118] sm:$0xff] }
 0x418   : > { %v3907_v5 = vmul.f32 %v12927_v18, %v16563_v32  ;;  %v16564_v36 = vld [vmem:[#allocation280_spill] sm:$0xff]  ;;  %v12995_v26 = vadd.f32 %v12183_v31, %v3437_v1  ;;  %v6610_v1 = vld [vmem:[%s14887_s3 + $0x120] sm:$0xff] }
 0x419   : > { %4660 = vperm.xlu1 %6832, %v6606_v55   ;;  %v3438_v55 = vadd.f32 %v12315_v25, %v3238_v38  ;;  %v4135_v22 = vmul.f32 %v12433_v62, %v3904_v49  ;;  %v3908_v45 = vmul.f32 %v12927_v18, %v16564_v36  ;;  %v16565_v40 = vld [vmem:[#allocation200_spill] sm:$0xff]  ;;  %v4137_v62 = vmul.f32 %v12476_v27, %v3906_v20  ;;  %v16566_v49 = vld [vmem:[#allocation283_spill] sm:$0xff] }
 0x41a   : > { %4732 = vperm.xlu0 %6831, %v6607_v48   ;;  %v4136_v48 = vmul.f32 %v12468_v61, %v3905_v17  ;;  %v3909_v15 = vmul.f32 %v12927_v18, %v16565_v40  ;;  %v4218_v25 = vpop.permute.xlu1 %4217  ;;  %v4138_v61 = vmul.f32 %v12498_v16, %v3907_v5  ;;  %v4365_v38 = vadd.f32 %v4203_v39, %v4134_v57  ;;  %v16567_v20 = vld [vmem:[#allocation116_spill] sm:$0xff] }
 0x41b   : > { %v4223_v3 = vpop.permute.xlu0 %4222  ;;  %v3239_v17 = vadd.f32 %v16566_v49, %v3039_v14  ;;  %v5083_v40 = vadd.f32 %v5082_v29, %v5081_v7  ;;  %v4366_v32 = vadd.f32 %v4208_v33, %v4135_v22  ;;  %v13004_v28 = vadd.f32 %v12183_v31, %v3438_v55  ;;  %v6611_v7 = vld [vmem:[%s14887_s3 + $0x128] sm:$0xff]  ;;  %v16568_v29 = vld [vmem:[#allocation192_spill] sm:$0xff] }
 0x41c   : > { %v4367_v36 = vadd.f32 %v4213_v58, %v4136_v48  ;;  %v4139_v27 = vmul.f32 %v12510_v63, %v3908_v45  ;;  %4398 = vst.msk [vmem:[%s12992_s19] sm:$0xff] %vm3479_vm2, %v4365_v38  ;;  %v4368_v16 = vadd.f32 %v4218_v25, %v4137_v62  ;;  %v4369_v39 = vadd.f32 %v4223_v3, %v4138_v61  ;;  %v6613_v25 = vld [vmem:[%s14887_s3 + $0x138] sm:$0xff] }
 0x41d   : > { %4737 = vperm.xlu1 %6832, %v6608_v9   ;;  %v5012_v14 = vadd.f32 %v5011_v12, %v5010_v11  ;;  %v13013_v33 = vadd.f32 %v11896_v34, %v2968_v59  ;;  %v4140_v58 = vmul.f32 %v12531_v0, %v3909_v15  ;;  %v3910_v9 = vmul.f32 %v12927_v18, %v16567_v20  ;;  %v6615_v20 = vld [vmem:[%s14887_s3 + $0x148] sm:$0xff] }
 0x41e   : > { %4742 = vperm.xlu0 %6831, %v6609_v52   ;;  %4399 = vst.msk [vmem:[%s12992_s19 + $0x8] sm:$0xff] %vm3479_vm2, %v4366_v32  ;;  %4400 = vst.msk [vmem:[%s12992_s19 + $0x10] sm:$0xff] %vm3479_vm2, %v4367_v36  ;;  %v4228_v63 = vpop.permute.xlu1 %4227  ;;  %v3240_v55 = vadd.f32 %v16568_v29, %v3040_v30  ;;  %v5084_v57 = vsel %vm3479_vm2, %v12995_v26, 0.0  ;;  %v3439_v11 = vadd.f32 %v12301_v42, %v3239_v17  ;;  %v16569_v30 = vld [vmem:[#allocation272_spill] sm:$0xff]  ;;  %v6612_v42 = vld [vmem:[%s14887_s3 + $0x130] sm:$0xff]  ;;  %v5086_v48 = vsel %vm3479_vm2, %v13004_v28, 0.0 }
 0x41f   : > { %4401 = vst.msk [vmem:[%s12992_s19 + $0x18] sm:$0xff] %vm3479_vm2, %v4368_v16  ;;  %4402 = vst.msk [vmem:[%s12992_s19 + $0x20] sm:$0xff] %vm3479_vm2, %v4369_v39  ;;  %v4370_v0 = vadd.f32 %v4228_v63, %v4139_v27  ;;  %v4233_v15 = vpop.permute.xlu0 %4232  ;;  %v13032_v59 = vadd.f32 %v11896_v34, %v12942_v43  ;;  %v5085_v12 = vadd.f32 %v5084_v57, %v5083_v40  ;;  %v5015_v61 = vsel %vm3479_vm2, %v13013_v33, 0.0  ;;  %v16571_v17 = vld [vmem:[#allocation22_spill] sm:$0xff] }
 0x420   : > { %v3911_v5 = vmul.f32 %v12927_v18, %v16569_v30  ;;  %v4371_v52 = vadd.f32 %v4233_v15, %v4140_v58  ;;  %v3041_v22 = vmul.f32 %v12054_v53, %v16547_v13  ;;  %v3440_v43 = vadd.f32 %v12362_v44, %v3240_v55  ;;  %v16570_v13 = vld [vmem:[#allocation318_spill] sm:$0xff]  ;;  %v16575_v55 = vld [vmem:[#allocation205_spill] sm:$0xff] }
 0x421   : > { %4747 = vperm.xlu1 %6832, %v6610_v1   ;;  %v4141_v45 = vmul.f32 %v12539_v46, %v3910_v9  ;;  %4403 = vst.msk [vmem:[%s12992_s19 + $0x28] sm:$0xff] %vm3479_vm2, %v4370_v0  ;;  %v5014_v62 = vadd.f32 %v12936_v6, %v5012_v14  ;;  %v2970_v38 = vadd.f32 %v16570_v13, %v12919_v24  ;;  %v16572_v24 = vld [vmem:[#allocation315_spill] sm:$0xff]  ;;  %v5017_v39 = vsel %vm3479_vm2, %v13032_v59, 0.0  ;;  %v16576_v0 = vld [vmem:[#allocation118_spill] sm:$0xff] }
 0x422   : > { %4752 = vperm.xlu0 %6831, %v6611_v7   ;;  %v4142_v3 = vmul.f32 %v12563_v2, %v3911_v5  ;;  %4404 = vst.msk [vmem:[%s12992_s19 + $0x30] sm:$0xff] %vm3479_vm2, %v4371_v52  ;;  %v4238_v44 = vpop.permute.xlu1 %4237  ;;  %v3042_v46 = vmul.f32 %v12054_v53, %v16543_v23  ;;  %v13061_v49 = vadd.f32 %v12183_v31, %v3439_v11  ;;  %v16573_v1 = vld [vmem:[#allocation163_spill] sm:$0xff]  ;;  %v6614_v23 = vld [vmem:[%s14887_s3 + $0x140] sm:$0xff]  ;;  %v16577_v52 = vld [vmem:[#allocation270_spill] sm:$0xff] }
 0x423   : > { %v3912_v6 = vmul.f32 %v12927_v18, %v16571_v17  ;;  %v4372_v40 = vadd.f32 %v4238_v44, %v4141_v45  ;;  %v4243_v32 = vpop.permute.xlu0 %4242  ;;  %v2771_v36 = vadd.f32 %v16572_v24, %v12911_v10  ;;  %v5087_v2 = vadd.f32 %v5086_v48, %v5085_v12  ;;  %v16574_v7 = vld [vmem:[#allocation117_spill] sm:$0xff]  ;;  %v6616_v45 = vld [vmem:[%s14887_s3 + $0x150] sm:$0xff] }
 0x424   : > { %v3913_v27 = vmul.f32 %v12927_v18, %v16573_v1  ;;  %v4373_v16 = vadd.f32 %v4243_v32, %v4142_v3  ;;  %v3241_v14 = vadd.f32 %v16574_v7, %v3041_v22  ;;  %v13076_v58 = vadd.f32 %v12183_v31, %v3440_v43  ;;  %v16578_v22 = vld [vmem:[#allocation217_spill] sm:$0xff] }
 0x425   : > { %4757 = vperm.xlu1 %6832, %v6612_v42   ;;  %v4143_v10 = vmul.f32 %v12572_v37, %v3912_v6  ;;  %4405 = vst.msk [vmem:[%s12992_s19 + $0x38] sm:$0xff] %vm3479_vm2, %v4372_v40  ;;  %v5016_v9 = vadd.f32 %v5015_v61, %v5014_v62  ;;  %v13085_v63 = vadd.f32 %v11896_v34, %v2970_v38  ;;  %v5088_v15 = vsel %vm3479_vm2, %v13061_v49, 0.0  ;;  %v6617_v38 = vld [vmem:[%s14887_s3 + $0x158] sm:$0xff]  ;;  %v16581_v40 = vld [vmem:[#allocation203_spill] sm:$0xff]  ;;  %v6618_v1 = vld [vmem:[%s14887_s3 + $0x160] sm:$0xff] }
 0x426   : > { %4762 = vperm.xlu0 %6831, %v6613_v25   ;;  %v4144_v29 = vmul.f32 %v12592_v54, %v3913_v27  ;;  %v3914_v57 = vmul.f32 %v12927_v18, %v16575_v55  ;;  %4406 = vst.msk [vmem:[%s12992_s19 + $0x40] sm:$0xff] %vm3479_vm2, %v4373_v16  ;;  %v4248_v11 = vpop.permute.xlu1 %4247  ;;  %v3242_v37 = vadd.f32 %v16576_v0, %v3042_v46  ;;  %v16579_v25 = vld [vmem:[#allocation196_spill] sm:$0xff]  ;;  %v16580_v46 = vld [vmem:[#allocation17_spill] sm:$0xff]  ;;  %v16583_v16 = vld [vmem:[#allocation162_spill] sm:$0xff] }
 0x427   : > { %v3441_v12 = vadd.f32 %v12349_v8, %v3241_v14  ;;  %v4374_v30 = vadd.f32 %v4248_v11, %v4143_v10  ;;  %v4253_v5 = vpop.permute.xlu0 %4252  ;;  %v2971_v42 = vadd.f32 %v16577_v52, %v2771_v36  ;;  %v5089_v54 = vadd.f32 %v5088_v15, %v5087_v2  ;;  %v16582_v36 = vld [vmem:[#allocation165_spill] sm:$0xff]  ;;  %v6619_v14 = vld [vmem:[%s14887_s3 + $0x168] sm:$0xff] }
 0x428   : > { %v3915_v48 = vmul.f32 %v12927_v18, %v16578_v22  ;;  %v4375_v43 = vadd.f32 %v4253_v5, %v4144_v29  ;;  %v3043_v62 = vmul.f32 %v12054_v53, %v16579_v25  ;;  %v5090_v8 = vsel %vm3479_vm2, %v13076_v58, 0.0  ;;  %v16585_v10 = vld [vmem:[#allocation21_spill] sm:$0xff] }
 0x429   : > { %4767 = vperm.xlu1 %6832, %v6614_v23   ;;  %v3442_v61 = vadd.f32 %v12409_v47, %v3242_v37  ;;  %v4145_v13 = vmul.f32 %v12599_v51, %v3914_v57  ;;  %4407 = vst.msk [vmem:[%s12992_s19 + $0x48] sm:$0xff] %vm3479_vm2, %v4374_v30  ;;  %v2573_v3 = vmul.f32 %v16441_v19, %v16579_v25  ;;  %v5019_v51 = vsel %vm3479_vm2, %v13085_v63, 0.0  ;;  %v16587_v0 = vld [vmem:[#allocation201_spill] sm:$0xff] }
 0x42a   : > { %4772 = vperm.xlu0 %6831, %v6615_v20   ;;  %v5018_v44 = vadd.f32 %v5017_v39, %v5016_v9  ;;  %v2972_v53 = vadd.f32 %v16580_v46, %v12930_v60  ;;  %v4146_v17 = vmul.f32 %v12617_v41, %v3915_v48  ;;  %4408 = vst.msk [vmem:[%s12992_s19 + $0x50] sm:$0xff] %vm3479_vm2, %v4375_v43  ;;  %v4258_v47 = vpop.permute.xlu1 %4257  ;;  %v16588_v5 = vld [vmem:[#allocation105_spill] sm:$0xff] }
 0x42b   : > { %v13123_v6 = vadd.f32 %v12183_v31, %v3441_v12  ;;  %v3916_v32 = vmul.f32 %v12927_v18, %v16581_v40  ;;  %v4376_v19 = vadd.f32 %v4258_v47, %v4145_v13  ;;  %v4263_v24 = vpop.permute.xlu0 %4262  ;;  %v5091_v60 = vadd.f32 %v5090_v8, %v5089_v54  ;;  %v16589_v54 = vld [vmem:[#allocation187_spill] sm:$0xff]  ;;  %v6622_v47 = vld [vmem:[%s14887_s3 + $0x180] sm:$0xff] }
 0x42c   : > { %v3917_v41 = vmul.f32 %v12927_v18, %v16582_v36  ;;  %v4377_v2 = vadd.f32 %v4263_v24, %v4146_v17  ;;  %v13133_v27 = vadd.f32 %v11896_v34, %v2971_v42  ;;  %v3243_v23 = vadd.f32 %v16583_v16, %v3043_v62  ;;  %v6620_v42 = vld [vmem:[%s14887_s3 + $0x170] sm:$0xff]  ;;  %v16595_v24 = vld [vmem:[#allocation324_spill] sm:$0xff] }
 0x42d   : > { %4777 = vperm.xlu1 %6832, %v6616_v45   ;;  %v13137_v39 = vadd.f32 %v12183_v31, %v3442_v61  ;;  %v4147_v7 = vmul.f32 %v12628_v50, %v3916_v32  ;;  %4409 = vst.msk [vmem:[%s12992_s19 + $0x58] sm:$0xff] %vm3479_vm2, %v4376_v19  ;;  %v2773_v20 = vadd.f32 %v16585_v10, %v2573_v3  ;;  %v5092_v50 = vsel %vm3479_vm2, %v13123_v6, 0.0  ;;  %v6621_v45 = vld [vmem:[%s14887_s3 + $0x178] sm:$0xff]  ;;  %v6623_v32 = vld [vmem:[%s14887_s3 + $0x188] sm:$0xff] }
 0x42e   : > { %4782 = vperm.xlu0 %6831, %v6617_v38   ;;  %v5020_v9 = vadd.f32 %v5019_v51, %v5018_v44  ;;  %v13147_v29 = vadd.f32 %v11896_v34, %v2972_v53  ;;  %v4148_v55 = vmul.f32 %v12647_v56, %v3917_v41  ;;  %4410 = vst.msk [vmem:[%s12992_s19 + $0x60] sm:$0xff] %vm3479_vm2, %v4377_v2  ;;  %v4268_v57 = vpop.permute.xlu1 %4267  ;;  %v16592_v53 = vld [vmem:[#allocation204_spill] sm:$0xff]  ;;  %v16594_v51 = vld [vmem:[#allocation81_spill] sm:$0xff] }
 0x42f   : > { %16584 = vst [vmem:[#allocation153_spill] sm:$0xff] %v13137_v39  ;;  %v3443_v11 = vadd.f32 %v12401_v35, %v3243_v23  ;;  %v3918_v37 = vmul.f32 %v12927_v18, %v16587_v0  ;;  %v4378_v15 = vadd.f32 %v4268_v57, %v4147_v7  ;;  %v5093_v30 = vadd.f32 %v5092_v50, %v5091_v60  ;;  %v16597_v7 = vld [vmem:[#allocation225_spill] sm:$0xff]  ;;  %v6625_v50 = vld [vmem:[%s14887_s3 + $0x198] sm:$0xff] }
 0x430   : > { %16586 = vst [vmem:[#allocation145_spill] sm:$0xff] %v13147_v29  ;;  %v4273_v12 = vpop.permute.xlu0 %4272  ;;  %v3919_v56 = vmul.f32 %v12927_v18, %v16588_v5  ;;  %v5021_v35 = vsel %vm3479_vm2, %v13133_v27, 0.0  ;;  %v2973_v22 = vadd.f32 %v16589_v54, %v2773_v20  ;;  %v5094_v48 = vsel %vm3479_vm2, %v13137_v39, 0.0  ;;  %v6624_v20 = vld [vmem:[%s14887_s3 + $0x190] sm:$0xff]  ;;  %v16599_v0 = vld [vmem:[#allocation181_spill] sm:$0xff] }
 0x431   : > { %4787 = vperm.xlu1 %6832, %v6618_v1   ;;  %v4379_v52 = vadd.f32 %v4273_v12, %v4148_v55  ;;  %v4149_v43 = vmul.f32 %v12655_v4, %v3918_v37  ;;  %4411 = vst.msk [vmem:[%s12992_s19 + $0x68] sm:$0xff] %vm3479_vm2, %v4378_v15  ;;  %v5022_v25 = vadd.f32 %v5021_v35, %v5020_v9  ;;  %v5023_v61 = vsel %vm3479_vm2, %v13147_v29, 0.0  ;;  %v16591_v4 = vld [vmem:[#allocation251_spill] sm:$0xff]  ;;  %v16598_v55 = vld [vmem:[#allocation136_spill] sm:$0xff]  ;;  %v16600_v12 = vld [vmem:[#allocation253_spill] sm:$0xff] }
 0x432   : > { %4792 = vperm.xlu0 %6831, %v6619_v14   ;;  %v4150_v62 = vmul.f32 %v12673_v21, %v3919_v56  ;;  %v4278_v8 = vpop.permute.xlu1 %4277  ;;  %v13179_v13 = vadd.f32 %v12183_v31, %v3443_v11  ;;  %v3920_v38 = vmul.f32 %v12927_v18, %v16591_v4  ;;  %v5095_v46 = vadd.f32 %v5094_v48, %v5093_v30  ;;  %v16602_v48 = vld [vmem:[#allocation7_spill] sm:$0xff]  ;;  %v16604_v4 = vld [vmem:[#allocation212_spill] sm:$0xff]  ;;  %v16693_v29 = vld [vmem:[#allocation277_spill] sm:$0xff] }
 0x433   : > { %4412 = vst.msk [vmem:[%s12992_s19 + $0x70] sm:$0xff] %vm3479_vm2, %v4379_v52  ;;  %v4380_v3 = vadd.f32 %v4278_v8, %v4149_v43  ;;  %v3921_v21 = vmul.f32 %v12927_v18, %v16592_v53  ;;  %v13189_v31 = vadd.f32 %v11896_v34, %v2973_v22  ;;  %v5024_v19 = vadd.f32 %v5023_v61, %v5022_v25  ;;  %v16596_v34 = vld [vmem:[#allocation168_spill] sm:$0xff]  ;;  %v6626_v22 = vld [vmem:[%s14887_s3 + $0x1a0] sm:$0xff]  ;;  %v16605_v53 = vld [vmem:[#allocation27_spill] sm:$0xff] }
 0x434   : > { %16590 = vst [vmem:[#allocation50_spill] sm:$0xff] %v13179_v13  ;;  %v4283_v44 = vpop.permute.xlu0 %4282  ;;  %v4151_v40 = vmul.f32 %v16594_v51, %v3920_v38  ;;  %v5096_v41 = vsel %vm3543_vm3, %v13179_v13, 0.0  ;;  %v3922_v2 = vmul.f32 %v12927_v18, %v16596_v34  ;;  %v3923_v14 = vmul.f32 %v12927_v18, %v16597_v7  ;;  %v16606_v51 = vld [vmem:[#allocation134_spill] sm:$0xff] }
 0x435   : > { %4797 = vperm.xlu1 %6832, %v6620_v42   ;;  %v4381_v17 = vadd.f32 %v4283_v44, %v4150_v62  ;;  %16593 = vst [vmem:[#allocation47_spill] sm:$0xff] %v13189_v31  ;;  %4413 = vst.msk [vmem:[%s12992_s19 + $0x78] sm:$0xff] %vm3479_vm2, %v4380_v3  ;;  %v4152_v60 = vmul.f32 %v16595_v24, %v3921_v21  ;;  %v5097_v23 = vadd.f32 %v5096_v41, %v5095_v46  ;;  %v16601_v42 = vld [vmem:[#allocation237_spill] sm:$0xff]  ;;  %v16607_v24 = vld [vmem:[#allocation135_spill] sm:$0xff] }
 0x436   : > { %4802 = vperm.xlu0 %6831, %v6621_v45   ;;  %v4288_v36 = vpop.permute.xlu1 %4287  ;;  %v5025_v9 = vsel %vm3543_vm3, %v13189_v31, 0.0  ;;  %v4153_v57 = vmul.f32 %v16598_v55, %v3922_v2  ;;  %v4154_v37 = vmul.f32 %v16599_v0, %v3923_v14  ;;  %v3924_v30 = vmul.f32 %v12927_v18, %v16600_v12  ;;  %v6627_v45 = vld [vmem:[%s14887_s3 + $0x1a8] sm:$0xff]  ;;  %v16603_v62 = vld [vmem:[#allocation309_spill] sm:$0xff]  ;;  %v16608_v41 = vld [vmem:[#allocation108_spill] sm:$0xff] }
 0x437   : > { %4414 = vst.msk [vmem:[%s12992_s19 + $0x80] sm:$0xff] %vm3479_vm2, %v4381_v17  ;;  %v4382_v1 = vadd.f32 %v4288_v36, %v4151_v40  ;;  %v5026_v11 = vadd.f32 %v5025_v9, %v5024_v19  ;;  %v5098_v52 = vrot.slane %v5097_v23, 4  ;;  %v3925_v35 = vmul.f32 %v12927_v18, %v16601_v42  ;;  %v6631_v55 = vld [vmem:[%s14887_s3 + $0x1c8] sm:$0xff] }
 0x438   : > { %v4293_v16 = vpop.permute.xlu0 %4292  ;;  %v4155_v43 = vmul.f32 %v16602_v48, %v3924_v30  ;;  %v3926_v38 = vmul.f32 %v12927_v18, %v16604_v4  ;;  %v3927_v21 = vmul.f32 %v12927_v18, %v16605_v53  ;;  %v3928_v34 = vmul.f32 %v12927_v18, %v16608_v41  ;;  %v6633_v48 = vld [vmem:[%s14887_s3 + $0x1d8] sm:$0xff] }
 0x439   : > { %4807 = vperm.xlu1 %6832, %v6622_v47   ;;  %v4383_v10 = vadd.f32 %v4293_v16, %v4152_v60  ;;  %4415 = vst.msk [vmem:[%s12992_s19 + $0x88] sm:$0xff] %vm3479_vm2, %v4382_v1  ;;  %v5027_v25 = vrot.slane %v5026_v11, 4  ;;  %v4156_v8 = vmul.f32 %v16603_v62, %v3925_v35  ;;  %v5099_v46 = vadd.f32 %v5098_v52, %v5097_v23  ;;  %v6628_v47 = vld [vmem:[%s14887_s3 + $0x1b0] sm:$0xff] }
 0x43a   : > { %4812 = vperm.xlu0 %6831, %v6623_v32   ;;  %v4298_v15 = vpop.permute.xlu1 %4297  ;;  %v4157_v40 = vmul.f32 %v16606_v51, %v3926_v38  ;;  %v6629_v32 = vld [vmem:[%s14887_s3 + $0x1b8] sm:$0xff]  ;;  %v4158_v60 = vmul.f32 %v16607_v24, %v3927_v21  ;;  %v16609_v23 = vld [vmem:[#allocation171_spill] sm:$0xff]  ;;  %v6634_v21 = vld [vmem:[%s14887_s3 + $0x1e0] sm:$0xff] }
 0x43b   : > { %4416 = vst.msk [vmem:[%s12992_s19 + $0x90] sm:$0xff] %vm3479_vm2, %v4383_v10  ;;  %v4384_v5 = vadd.f32 %v4298_v15, %v4153_v57  ;;  %v5028_v19 = vadd.f32 %v5027_v25, %v5026_v11  ;;  %v5100_v16 = vrot.slane %v5099_v46, 2  ;;  %v3929_v7 = vmul.f32 %v12927_v18, %v16609_v23  ;;  %v6630_v10 = vld [vmem:[%s14887_s3 + $0x1c0] sm:$0xff]  ;;  %v6632_v35 = vld [vmem:[%s14887_s3 + $0x1d0] sm:$0xff]  ;;  %v6635_v51 = vld [vmem:[%s14887_s3 + $0x1e8] sm:$0xff] }
 0x43c   : > { %v4303_v56 = vpop.permute.xlu0 %4302 }
 0x43d   : > { %4817 = vperm.xlu1 %6832, %v6624_v20   ;;  %v4385_v54 = vadd.f32 %v4303_v56, %v4154_v37  ;;  %4417 = vst.msk [vmem:[%s12992_s19 + $0x98] sm:$0xff] %vm3479_vm2, %v4384_v5  ;;  %v16610_v20 = vld [vmem:[#allocation18_spill] sm:$0xff]  ;;  %v5029_v57 = vrot.slane %v5028_v19, 2  ;;  %v5101_v5 = vadd.f32 %v5100_v16, %v5099_v46 }
 0x43e   : > { %4822 = vperm.xlu0 %6831, %v6625_v50   ;;  %v4159_v9 = vmul.f32 %v16610_v20, %v3928_v34  ;;  %v16611_v50 = vld [vmem:[#allocation9_spill] sm:$0xff]  ;;  %v16612_v37 = vld [vmem:[#allocation126_spill] sm:$0xff]  ;;  %v6637_v20 = vld [vmem:[%s14887_s3 + $0x1f8] sm:$0xff] }
 0x43f   : > { %4418 = vst.msk [vmem:[%s12992_s19 + $0xa0] sm:$0xff] %vm3479_vm2, %v4385_v54  ;;  %v4308_v61 = vpop.permute.xlu1 %4307  ;;  %v4160_v11 = vmul.f32 %v16611_v50, %v3929_v7  ;;  %v3930_v15 = vmul.f32 %v12927_v18, %v16612_v37  ;;  %v16613_v56 = vld [vmem:[#allocation170_spill] sm:$0xff]  ;;  %v16614_v54 = vld [vmem:[#allocation49_spill] sm:$0xff]  ;;  %v6636_v7 = vld [vmem:[%s14887_s3 + $0x1f0] sm:$0xff] }
 0x440   : > { %v4386_v3 = vadd.f32 %v4308_v61, %v4155_v43  ;;  %v4313_v44 = vpop.permute.xlu0 %4312  ;;  %v3931_v52 = vmul.f32 %v12927_v18, %v16613_v56  ;;  %v5030_v43 = vadd.f32 %v5029_v57, %v5028_v19 }
 0x441   : > { %4827 = vperm.xlu1 %6832, %v6626_v22   ;;  %v4387_v17 = vadd.f32 %v4313_v44, %v4156_v8  ;;  %v4161_v22 = vmul.f32 %v16614_v54, %v3930_v15  ;;  %v16616_v8 = vld [vmem:[#allocation236_spill] sm:$0xff]  ;;  %v16617_v44 = vld [vmem:[#allocation257_spill] sm:$0xff] }
 0x442   : > { %4832 = vperm.xlu0 %6831, %v6627_v45   ;;  %4419 = vst.msk [vmem:[%s12992_s19 + $0xa8] sm:$0xff] %vm3479_vm2, %v4386_v3  ;;  %v16615_v45 = vld [vmem:[#allocation214_spill] sm:$0xff]  ;;  %v3932_v61 = vmul.f32 %v12927_v18, %v16616_v8  ;;  %v5102_v3 = vrot.slane %v5101_v5, 1  ;;  %v3933_v46 = vmul.f32 %v12927_v18, %v16617_v44 }
 0x443   : > { %4420 = vst.msk [vmem:[%s12992_s19 + $0xb0] sm:$0xff] %vm3479_vm2, %v4387_v17  ;;  %v4162_v25 = vmul.f32 %v16615_v45, %v3931_v52  ;;  %v16618_v17 = vld [vmem:[#allocation39_spill] sm:$0xff]  ;;  %v16626_v45 = vld [vmem:[#allocation5_spill] sm:$0xff] }
 0x444   : > { %v4318_v36 = vpop.permute.xlu1 %4317  ;;  %v4323_v1 = vpop.permute.xlu0 %4322 }
 0x445   : > { %v4388_v2 = vadd.f32 %v4318_v36, %v4157_v40  ;;  %4837 = vperm.xlu1 %6832, %v6628_v47   ;;  %v4389_v14 = vadd.f32 %v4323_v1, %v4158_v60  ;;  %v4163_v47 = vmul.f32 %v16618_v17, %v3932_v61  ;;  %v5031_v40 = vrot.slane %v5030_v43, 1  ;;  %v16620_v60 = vld [vmem:[#allocation32_spill] sm:$0xff]  ;;  %v16621_v1 = vld [vmem:[#allocation245_spill] sm:$0xff] }
 0x446   : > { %4842 = vperm.xlu0 %6831, %v6629_v32   ;;  %v16619_v32 = vld [vmem:[#allocation137_spill] sm:$0xff]  ;;  %v3934_v36 = vmul.f32 %v12927_v18, %v16620_v60  ;;  %v3935_v16 = vmul.f32 %v12927_v18, %v16621_v1  ;;  %v16630_v61 = vld [vmem:[#allocation128_spill] sm:$0xff] }
 0x447   : > { %4421 = vst.msk [vmem:[%s12992_s19 + $0xb8] sm:$0xff] %vm3479_vm2, %v4388_v2  ;;  %4422 = vst.msk [vmem:[%s12992_s19 + $0xc0] sm:$0xff] %vm3479_vm2, %v4389_v14  ;;  %v4164_v19 = vmul.f32 %v16619_v32, %v3933_v46  ;;  %v5103_v2 = vadd.f32 %v5102_v3, %v5101_v5  ;;  %v16622_v14 = vld [vmem:[#allocation131_spill] sm:$0xff]  ;;  %v5420_v3 = vld [vmem:[%s14888_s4 + $0x18] sm:$0xff] }
 0x448   : > { %v4328_v0 = vpop.permute.xlu1 %4327  ;;  %v4333_v30 = vpop.permute.xlu0 %4332  ;;  %v16632_v32 = vld [vmem:[#allocation299_spill] sm:$0xff] }
 0x449   : > { %v4390_v12 = vadd.f32 %v4328_v0, %v4159_v9  ;;  %4847 = vperm.xlu1 %6832, %v6630_v10   ;;  %v4391_v42 = vadd.f32 %v4333_v30, %v4160_v11  ;;  %v4165_v10 = vmul.f32 %v16622_v14, %v3934_v36  ;;  %v5032_v9 = vadd.f32 %v5031_v40, %v5030_v43  ;;  %v6639_v30 = vld [vmem:[%s14887_s3 + $0x208] sm:$0x1] }
 0x44a   : > { %4852 = vperm.xlu0 %6831, %v6631_v55   ;;  %v16623_v55 = vld [vmem:[#allocation52_spill] sm:$0xff]  ;;  %v5422_v40 = vld [vmem:[%s14888_s4 + $0x28] sm:$0xff] }
 0x44b   : > { %4423 = vst.msk [vmem:[%s12992_s19 + $0xc8] sm:$0xff] %vm3479_vm2, %v4390_v12  ;;  %4424 = vst.msk [vmem:[%s12992_s19 + $0xd0] sm:$0xff] %vm3479_vm2, %v4391_v42  ;;  %v4166_v57 = vmul.f32 %v16623_v55, %v3935_v16  ;;  %v5104_v37 = vadd.f32 %v5103_v2, %v5032_v9  ;;  %v6638_v12 = vld [vmem:[%s14887_s3 + $0x200] sm:$0xff]  ;;  %v16636_v14 = vld [vmem:[#allocation174_spill] sm:$0xff] }
 0x44c   : > { %v4338_v62 = vpop.permute.xlu1 %4337  ;;  %v4343_v38 = vpop.permute.xlu0 %4342  ;;  %v5417_v42 = vld [vmem:[%s14888_s4] sm:$0xff] }
 0x44d   : > { %v4392_v4 = vadd.f32 %v4338_v62, %v4161_v22  ;;  %4857 = vperm.xlu1 %6832, %v6632_v35   ;;  %v4393_v53 = vadd.f32 %v4343_v38, %v4162_v25  ;;  %v13330_v52 = vmul.f32 0.0019455253, %v5104_v37  ;;  %v5418_v35 = vld [vmem:[%s14888_s4 + $0x8] sm:$0xff]  ;;  %v16628_v62 = vld [vmem:[#allocation175_spill] sm:$0xff] }
 0x44e   : > { %4862 = vperm.xlu0 %6831, %v6633_v48   ;;  %v16624_v48 = vld [vmem:[#allocation127_spill] sm:$0xff] }
 0x44f   : > { %4425 = vst.msk [vmem:[%s12992_s19 + $0xd8] sm:$0xff] %vm3479_vm2, %v4392_v4  ;;  %4426 = vst.msk [vmem:[%s12992_s19 + $0xe0] sm:$0xff] %vm3479_vm2, %v4393_v53  ;;  %v13344_v43 = vsub.f32 %v16624_v48, %v13330_v52  ;;  %v13348_v25 = vsub.f32 %v16626_v45, %v13330_v52  ;;  %v13352_v8 = vsub.f32 %v16628_v62, %v13330_v52  ;;  %v5419_v38 = vld [vmem:[%s14888_s4 + $0x10] sm:$0xff]  ;;  %v5426_v48 = vld [vmem:[%s14888_s4 + $0x48] sm:$0xff] }
 0x450   : > { %v4348_v24 = vpop.permute.xlu1 %4347  ;;  %v4353_v34 = vpop.permute.xlu0 %4352  ;;  %v13356_v4 = vsub.f32 %v16630_v61, %v13330_v52 }
 0x451   : > { %v4394_v41 = vadd.f32 %v4348_v24, %v4163_v47  ;;  %4867 = vperm.xlu1 %6832, %v6634_v21   ;;  %v4395_v23 = vadd.f32 %v4353_v34, %v4164_v19  ;;  %16625 = vst [vmem:[#allocation57_spill] sm:$0xff] %v13344_v43  ;;  %16627 = vst [vmem:[#allocation53_spill] sm:$0xff] %v13348_v25  ;;  %v5172_v53 = vmul.f32 %v13344_v43, %v13344_v43  ;;  %v16634_v24 = vld [vmem:[#allocation248_spill] sm:$0xff] }
 0x452   : > { %4872 = vperm.xlu0 %6831, %v6635_v51   ;;  %16629 = vst [vmem:[#allocation58_spill] sm:$0xff] %v13352_v8  ;;  %16631 = vst [vmem:[#allocation55_spill] sm:$0xff] %v13356_v4  ;;  %v5173_v21 = vmul.f32 %v13348_v25, %v13348_v25  ;;  %v5276_v17 = vmul.f32 %v13352_v8, %v13352_v8  ;;  %v5277_v47 = vmul.f32 %v13356_v4, %v13356_v4  ;;  %v5421_v51 = vld [vmem:[%s14888_s4 + $0x20] sm:$0xff]  ;;  %v16662_v8 = vld [vmem:[#allocation218_spill] sm:$0xff] }
 0x453   : > { %4427 = vst.msk [vmem:[%s12992_s19 + $0xe8] sm:$0xff] %vm3479_vm2, %v4394_v41  ;;  %4428 = vst.msk [vmem:[%s12992_s19 + $0xf0] sm:$0xff] %vm3479_vm2, %v4395_v23  ;;  %v13384_v19 = vsub.f32 %v16632_v32, %v13330_v52  ;;  %v13388_v60 = vsub.f32 %v16634_v24, %v13330_v52  ;;  %v5205_v34 = vsel %vm3479_vm2, %v5172_v53, 0.0  ;;  %v5423_v23 = vld [vmem:[%s14888_s4 + $0x30] sm:$0xff]  ;;  %v16646_v32 = vld [vmem:[#allocation262_spill] sm:$0xff] }
 0x454   : > { %v4358_v50 = vpop.permute.xlu1 %4357  ;;  %v4363_v0 = vpop.permute.xlu0 %4362  ;;  %v5206_v2 = vsel %vm3479_vm2, %v5173_v21, 0.0  ;;  %v5309_v1 = vsel %vm3479_vm2, %v5276_v17, 0.0  ;;  %v5310_v16 = vsel %vm3479_vm2, %v5277_v47, 0.0  ;;  %v5427_v47 = vld [vmem:[%s14888_s4 + $0x50] sm:$0xff]  ;;  %v13453_v24 = vsub.f32 %v16646_v32, %v13330_v52  ;;  %v16652_v32 = vld [vmem:[#allocation129_spill] sm:$0xff]  ;;  %v16686_v43 = vld [vmem:[#allocation16_spill] sm:$0xff] }
 0x455   : > { %v4396_v11 = vadd.f32 %v4358_v50, %v4165_v10  ;;  %4877 = vperm.xlu1 %6832, %v6636_v7   ;;  %v4397_v15 = vadd.f32 %v4363_v0, %v4166_v57  ;;  %16633 = vst [vmem:[#allocation64_spill] sm:$0xff] %v13384_v19  ;;  %16635 = vst [vmem:[#allocation227_spill] sm:$0xff] %v13388_v60  ;;  %v5424_v7 = vld [vmem:[%s14888_s4 + $0x38] sm:$0xff]  ;;  %v13406_v10 = vsub.f32 %v16636_v14, %v13330_v52 }
 0x456   : > { %4882 = vperm.xlu0 %6831, %v6637_v20   ;;  %v16638_v20 = vld [vmem:[#allocation258_spill] sm:$0xff]  ;;  %v5174_v55 = vmul.f32 %v13384_v19, %v13384_v19  ;;  %v5278_v57 = vmul.f32 %v13388_v60, %v13388_v60  ;;  %v5311_v0 = vadd.f32 %v5310_v16, %v5309_v1  ;;  %16647 = vst [vmem:[#allocation234_spill] sm:$0xff] %v13453_v24  ;;  %v16660_v60 = vld [vmem:[#allocation255_spill] sm:$0xff]  ;;  %v5445_v19 = vld [vmem:[%s14888_s4 + $0xe0] sm:$0xff] }
 0x457   : > { %4429 = vst.msk [vmem:[%s12992_s19 + $0xf8] sm:$0xff] %vm3479_vm2, %v4396_v11  ;;  %16637 = vst [vmem:[#allocation66_spill] sm:$0xff] %v13406_v10  ;;  %v13410_v9 = vsub.f32 %v16638_v20, %v13330_v52  ;;  %v5207_v11 = vadd.f32 %v5206_v2, %v5205_v34  ;;  %v5175_v45 = vmul.f32 %v13406_v10, %v13406_v10  ;;  %v5428_v34 = vld [vmem:[%s14888_s4 + $0x58] sm:$0xff] }
 0x458   : > { %4430 = vst.msk [vmem:[%s12992_s19 + $0x100] sm:$0x1] %vm3543_vm3, %v4397_v15  ;;  %v13326_v5 = vpop.permute.xlu1 %4500  ;;  %v13328_v56 = vpop.permute.xlu0 %4505  ;;  %v5425_v15 = vld [vmem:[%s14888_s4 + $0x40] sm:$0xff]  ;;  %v5208_v62 = vsel %vm3479_vm2, %v5174_v55, 0.0  ;;  %v4431_v13 = vmul.f32 %v12927_v18, %v16686_v43  ;;  %v5448_v43 = vld [vmem:[%s14888_s4 + $0xf8] sm:$0xff] }
 0x459   : > { %4887 = vperm.xlu1 %6832, %v6638_v12   ;;  %16639 = vst [vmem:[#allocation63_spill] sm:$0xff] %v13410_v9  ;;  %v16640_v12 = vld [vmem:[#allocation35_spill] sm:$0xff]  ;;  %v5279_v61 = vmul.f32 %v13410_v9, %v13410_v9  ;;  %v5209_v53 = vadd.f32 %v5208_v62, %v5207_v11  ;;  %v5210_v1 = vsel %vm3479_vm2, %v5175_v45, 0.0  ;;  %v16648_v11 = vld [vmem:[#allocation130_spill] sm:$0xff]  ;;  %v5281_v62 = vmul.f32 %v13453_v24, %v13453_v24  ;;  %v5437_v24 = vld [vmem:[%s14888_s4 + $0xa0] sm:$0xff] }
 0x45a   : > { %4892 = vperm.xlu0 %6831, %v6639_v30   ;;  %v13425_v30 = vsub.f32 %v16640_v12, %v13330_v52  ;;  %v16664_v9 = vld [vmem:[#allocation261_spill] sm:$0xff] }
 0x45b   : > { %v5211_v14 = vadd.f32 %v5210_v1, %v5209_v53 }
 0x45c   : > { %v13338_v54 = vpop.permute.xlu1 %4510  ;;  %v13340_v22 = vpop.permute.xlu0 %4515  ;;  %16641 = vst [vmem:[#allocation233_spill] sm:$0xff] %v13425_v30  ;;  %v5176_v2 = vmul.f32 %v13425_v30, %v13425_v30  ;;  %v5443_v30 = vld [vmem:[%s14888_s4 + $0xd0] sm:$0xff] }
 0x45d   : > { %5452 = vperm.xlu1 %6832, %v5417_v42   ;;  %v16642_v42 = vld [vmem:[#allocation37_spill] sm:$0xff] }
 0x45e   : > { %5457 = vperm.xlu0 %6831, %v5418_v35   ;;  %v13429_v35 = vsub.f32 %v16642_v42, %v13330_v52  ;;  %v5430_v42 = vld [vmem:[%s14888_s4 + $0x68] sm:$0xff]  ;;  %v5212_v45 = vsel %vm3479_vm2, %v5176_v2, 0.0  ;;  %v16654_v2 = vld [vmem:[#allocation303_spill] sm:$0xff] }
 0x45f   : > { %v5213_v53 = vadd.f32 %v5212_v45, %v5211_v14  ;;  %v13501_v1 = vsub.f32 %v16654_v2, %v13330_v52  ;;  %v16658_v2 = vld [vmem:[#allocation302_spill] sm:$0xff] }
 0x460   : > { %v13364_v44 = vpop.permute.xlu1 %4520  ;;  %v13366_v46 = vpop.permute.xlu0 %4525  ;;  %16643 = vst [vmem:[#allocation229_spill] sm:$0xff] %v13429_v35  ;;  %v5280_v16 = vmul.f32 %v13429_v35, %v13429_v35  ;;  %v5435_v35 = vld [vmem:[%s14888_s4 + $0x90] sm:$0xff] }
 0x461   : > { %5462 = vperm.xlu1 %6832, %v5419_v38   ;;  %v5312_v38 = vsel %vm3479_vm2, %v5278_v57, 0.0  ;;  %v5429_v57 = vld [vmem:[%s14888_s4 + $0x60] sm:$0xff]  ;;  %16655 = vst [vmem:[#allocation241_spill] sm:$0xff] %v13501_v1 }
 0x462   : > { %5467 = vperm.xlu0 %6831, %v5420_v3   ;;  %v5313_v21 = vadd.f32 %v5312_v38, %v5311_v0  ;;  %v13473_v0 = vsub.f32 %v16648_v11, %v13330_v52 }
 0x464   : > { %v13390_v36 = vpop.permute.xlu1 %4530  ;;  %16649 = vst [vmem:[#allocation67_spill] sm:$0xff] %v13473_v0 }
 0x465   : > { %v13392_v41 = vpop.permute.xlu0 %4535  ;;  %5472 = vperm.xlu1 %6832, %v5421_v51   ;;  %v16644_v51 = vld [vmem:[#allocation256_spill] sm:$0xff] }
 0x466   : > { %5477 = vperm.xlu0 %6831, %v5422_v40   ;;  %v13449_v40 = vsub.f32 %v16644_v51, %v13330_v52  ;;  %v5431_v51 = vld [vmem:[%s14888_s4 + $0x70] sm:$0xff] }
 0x468   : > { %v13416_v50 = vpop.permute.xlu1 %4540  ;;  %16645 = vst [vmem:[#allocation238_spill] sm:$0xff] %v13449_v40 }
 0x469   : > { %v13418_v37 = vpop.permute.xlu0 %4545  ;;  %5482 = vperm.xlu1 %6832, %v5423_v23   ;;  %v5314_v23 = vsel %vm3479_vm2, %v5279_v61, 0.0  ;;  %v5316_v61 = vsel %vm3479_vm2, %v5280_v16, 0.0  ;;  %v5432_v16 = vld [vmem:[%s14888_s4 + $0x78] sm:$0xff] }
 0x46a   : > { %5487 = vperm.xlu0 %6831, %v5424_v7   ;;  %v5315_v20 = vadd.f32 %v5314_v23, %v5313_v21  ;;  %v5178_v23 = vmul.f32 %v13473_v0, %v13473_v0  ;;  %v5441_v0 = vld [vmem:[%s14888_s4 + $0xc0] sm:$0xff] }
 0x46c   : > { %v13440_v3 = vpop.permute.xlu1 %4550  ;;  %v5317_v21 = vadd.f32 %v5316_v61, %v5315_v20  ;;  %v5433_v61 = vld [vmem:[%s14888_s4 + $0x80] sm:$0xff] }
 0x46d   : > { %v13442_v17 = vpop.permute.xlu0 %4555  ;;  %5492 = vperm.xlu1 %6832, %v5425_v15   ;;  %v16650_v15 = vld [vmem:[#allocation177_spill] sm:$0xff] }
 0x46e   : > { %5497 = vperm.xlu0 %6831, %v5426_v48   ;;  %v13477_v12 = vsub.f32 %v16650_v15, %v13330_v52  ;;  %v5177_v48 = vmul.f32 %v13449_v40, %v13449_v40 }
 0x470   : > { %v13464_v7 = vpop.permute.xlu1 %4560  ;;  %16651 = vst [vmem:[#allocation235_spill] sm:$0xff] %v13477_v12  ;;  %v5214_v14 = vsel %vm3479_vm2, %v5177_v48, 0.0  ;;  %v5282_v20 = vmul.f32 %v13477_v12, %v13477_v12  ;;  %v13525_v12 = vsub.f32 %v16658_v2, %v13330_v52 }
 0x471   : > { %v13466_v55 = vpop.permute.xlu0 %4565  ;;  %5502 = vperm.xlu1 %6832, %v5427_v47   ;;  %v5215_v15 = vadd.f32 %v5214_v14, %v5213_v53 }
 0x472   : > { %5507 = vperm.xlu0 %6831, %v5428_v34   ;;  %v13497_v34 = vsub.f32 %v16652_v32, %v13330_v52  ;;  %v16656_v32 = vld [vmem:[#allocation176_spill] sm:$0xff]  ;;  %16659 = vst [vmem:[#allocation243_spill] sm:$0xff] %v13525_v12 }
 0x473   : > { %v13521_v48 = vsub.f32 %v16656_v32, %v13330_v52 }
 0x474   : > { %v13488_v38 = vpop.permute.xlu1 %4570  ;;  %16653 = vst [vmem:[#allocation69_spill] sm:$0xff] %v13497_v34  ;;  %v5179_v53 = vmul.f32 %v13497_v34, %v13497_v34 }
 0x475   : > { %v13490_v47 = vpop.permute.xlu0 %4575  ;;  %5512 = vperm.xlu1 %6832, %v5429_v57   ;;  %v5318_v57 = vsel %vm3479_vm2, %v5281_v62, 0.0  ;;  %16657 = vst [vmem:[#allocation76_spill] sm:$0xff] %v13521_v48  ;;  %v5434_v62 = vld [vmem:[%s14888_s4 + $0x88] sm:$0xff] }
 0x476   : > { %5517 = vperm.xlu0 %6831, %v5430_v42   ;;  %v5319_v42 = vadd.f32 %v5318_v57, %v5317_v21  ;;  %v5216_v21 = vsel %vm3479_vm2, %v5178_v23, 0.0  ;;  %v13545_v23 = vsub.f32 %v16660_v60, %v13330_v52 }
 0x477   : > { %v5217_v57 = vadd.f32 %v5216_v21, %v5215_v15  ;;  %v5180_v15 = vmul.f32 %v13521_v48, %v13521_v48  ;;  %v5439_v48 = vld [vmem:[%s14888_s4 + $0xb0] sm:$0xff] }
 0x478   : > { %v13512_v11 = vpop.permute.xlu1 %4580  ;;  %16661 = vst [vmem:[#allocation75_spill] sm:$0xff] %v13545_v23 }
 0x479   : > { %v13514_v45 = vpop.permute.xlu0 %4585  ;;  %5522 = vperm.xlu1 %6832, %v5431_v51   ;;  %v5283_v51 = vmul.f32 %v13501_v1, %v13501_v1  ;;  %v13549_v1 = vsub.f32 %v16662_v8, %v13330_v52 }
 0x47a   : > { %5527 = vperm.xlu0 %6831, %v5432_v16   ;;  %v5320_v16 = vsel %vm3479_vm2, %v5282_v20, 0.0  ;;  %v5436_v20 = vld [vmem:[%s14888_s4 + $0x98] sm:$0xff] }
 0x47b   : > { %v5321_v32 = vadd.f32 %v5320_v16, %v5319_v42  ;;  %16663 = vst [vmem:[#allocation146_spill] sm:$0xff] %v13549_v1  ;;  %v5218_v42 = vsel %vm3479_vm2, %v5179_v53, 0.0  ;;  %v13569_v53 = vsub.f32 %v16664_v9, %v13330_v52 }
 0x47c   : > { %v13536_v14 = vpop.permute.xlu1 %4590  ;;  %v5219_v21 = vadd.f32 %v5218_v42, %v5217_v57  ;;  %v5220_v57 = vsel %vm3479_vm2, %v5180_v15, 0.0 }
 0x47d   : > { %v13538_v2 = vpop.permute.xlu0 %4595  ;;  %5532 = vperm.xlu1 %6832, %v5433_v61   ;;  %v5284_v61 = vmul.f32 %v13525_v12, %v13525_v12  ;;  %16665 = vst [vmem:[#allocation43_spill] sm:$0xff] %v13569_v53  ;;  %v16666_v12 = vld [vmem:[#allocation30_spill] sm:$0xff] }
 0x47e   : > { %5537 = vperm.xlu0 %6831, %v5434_v62   ;;  %v5322_v62 = vsel %vm3479_vm2, %v5283_v51, 0.0  ;;  %v13573_v4 = vsub.f32 %v16666_v12, %v13330_v52  ;;  %v5438_v51 = vld [vmem:[%s14888_s4 + $0xa8] sm:$0xff]  ;;  %v5221_v42 = vadd.f32 %v5220_v57, %v5219_v21 }
 0x47f   : > { %v5323_v16 = vadd.f32 %v5322_v62, %v5321_v32  ;;  %v5285_v32 = vmul.f32 %v13549_v1, %v13549_v1  ;;  %v16670_v1 = vld [vmem:[#allocation111_spill] sm:$0xff] }
 0x480   : > { %v13560_v60 = vpop.permute.xlu1 %4600  ;;  %16667 = vst [vmem:[#allocation44_spill] sm:$0xff] %v13573_v4  ;;  %v13597_v34 = vsub.f32 %v16670_v1, %v13330_v52 }
 0x481   : > { %v13562_v8 = vpop.permute.xlu0 %4605  ;;  %5542 = vperm.xlu1 %6832, %v5435_v35   ;;  %v5181_v35 = vmul.f32 %v13545_v23, %v13545_v23  ;;  %v16668_v23 = vld [vmem:[#allocation138_spill] sm:$0xff] }
 0x482   : > { %5547 = vperm.xlu0 %6831, %v5436_v20   ;;  %v5324_v20 = vsel %vm3479_vm2, %v5284_v61, 0.0  ;;  %v13593_v15 = vsub.f32 %v16668_v23, %v13330_v52  ;;  %16671 = vst [vmem:[#allocation46_spill] sm:$0xff] %v13597_v34  ;;  %v5440_v61 = vld [vmem:[%s14888_s4 + $0xb8] sm:$0xff] }
 0x483   : > { %v5325_v62 = vadd.f32 %v5324_v20, %v5323_v16  ;;  %v5222_v21 = vsel %vm3479_vm2, %v5181_v35, 0.0  ;;  %v5286_v16 = vmul.f32 %v13573_v4, %v13573_v4  ;;  %v16674_v4 = vld [vmem:[#allocation306_spill] sm:$0xff] }
 0x484   : > { %v13584_v9 = vpop.permute.xlu1 %4610  ;;  %16669 = vst [vmem:[#allocation150_spill] sm:$0xff] %v13593_v15  ;;  %v5223_v57 = vadd.f32 %v5222_v21, %v5221_v42  ;;  %v13621_v40 = vsub.f32 %v16674_v4, %v13330_v52 }
 0x485   : > { %v13586_v12 = vpop.permute.xlu0 %4615  ;;  %5552 = vperm.xlu1 %6832, %v5437_v24   ;;  %v5182_v24 = vmul.f32 %v13569_v53, %v13569_v53  ;;  %v16672_v53 = vld [vmem:[#allocation133_spill] sm:$0xff] }
 0x486   : > { %5557 = vperm.xlu0 %6831, %v5438_v51   ;;  %v5326_v51 = vsel %vm3479_vm2, %v5285_v32, 0.0  ;;  %v13617_v35 = vsub.f32 %v16672_v53, %v13330_v52  ;;  %16675 = vst [vmem:[#allocation149_spill] sm:$0xff] %v13621_v40  ;;  %v5442_v32 = vld [vmem:[%s14888_s4 + $0xc8] sm:$0xff] }
 0x487   : > { %v5327_v20 = vadd.f32 %v5326_v51, %v5325_v62  ;;  %v5224_v42 = vsel %vm3479_vm2, %v5182_v24, 0.0  ;;  %v5287_v62 = vmul.f32 %v13597_v34, %v13597_v34  ;;  %v16678_v34 = vld [vmem:[#allocation178_spill] sm:$0xff] }
 0x488   : > { %v13608_v23 = vpop.permute.xlu1 %4620  ;;  %16673 = vst [vmem:[#allocation222_spill] sm:$0xff] %v13617_v35  ;;  %v5225_v21 = vadd.f32 %v5224_v42, %v5223_v57  ;;  %v13645_v10 = vsub.f32 %v16678_v34, %v13330_v52 }
 0x489   : > { %v13610_v1 = vpop.permute.xlu0 %4625  ;;  %5562 = vperm.xlu1 %6832, %v5439_v48   ;;  %v5183_v48 = vmul.f32 %v13593_v15, %v13593_v15  ;;  %v16676_v15 = vld [vmem:[#allocation179_spill] sm:$0xff] }
 0x48a   : > { %5567 = vperm.xlu0 %6831, %v5440_v61   ;;  %v5328_v61 = vsel %vm3479_vm2, %v5286_v16, 0.0  ;;  %v13641_v24 = vsub.f32 %v16676_v15, %v13330_v52  ;;  %16679 = vst [vmem:[#allocation321_spill] sm:$0xff] %v13645_v10  ;;  %v5444_v16 = vld [vmem:[%s14888_s4 + $0xd8] sm:$0xff] }
 0x48b   : > { %v5329_v51 = vadd.f32 %v5328_v61, %v5327_v20  ;;  %v5226_v57 = vsel %vm3479_vm2, %v5183_v48, 0.0  ;;  %v5288_v20 = vmul.f32 %v13621_v40, %v13621_v40  ;;  %v16682_v40 = vld [vmem:[#allocation38_spill] sm:$0xff] }
 0x48c   : > { %v13632_v53 = vpop.permute.xlu1 %4630  ;;  %16677 = vst [vmem:[#allocation74_spill] sm:$0xff] %v13641_v24  ;;  %v5227_v42 = vadd.f32 %v5226_v57, %v5225_v21  ;;  %v13669_v25 = vsub.f32 %v16682_v40, %v13330_v52 }
 0x48d   : > { %v13634_v4 = vpop.permute.xlu0 %4635  ;;  %5572 = vperm.xlu1 %6832, %v5441_v0   ;;  %v5184_v0 = vmul.f32 %v13617_v35, %v13617_v35  ;;  %v16680_v35 = vld [vmem:[#allocation260_spill] sm:$0xff] }
 0x48e   : > { %5577 = vperm.xlu0 %6831, %v5442_v32   ;;  %v5330_v32 = vsel %vm3479_vm2, %v5287_v62, 0.0  ;;  %v13665_v48 = vsub.f32 %v16680_v35, %v13330_v52  ;;  %16683 = vst [vmem:[#allocation223_spill] sm:$0xff] %v13669_v25  ;;  %v5446_v62 = vld [vmem:[%s14888_s4 + $0xe8] sm:$0xff] }
 0x48f   : > { %v5331_v61 = vadd.f32 %v5330_v32, %v5329_v51  ;;  %v5228_v21 = vsel %vm3479_vm2, %v5184_v0, 0.0  ;;  %v5289_v51 = vmul.f32 %v13645_v10, %v13645_v10  ;;  %v5447_v0 = vld [vmem:[%s14888_s4 + $0xf0] sm:$0xff] }
 0x490   : > { %v13656_v15 = vpop.permute.xlu1 %4640  ;;  %16681 = vst [vmem:[#allocation48_spill] sm:$0xff] %v13665_v48  ;;  %v5229_v57 = vadd.f32 %v5228_v21, %v5227_v42  ;;  %v5186_v42 = vmul.f32 %v13665_v48, %v13665_v48 }
 0x491   : > { %v13658_v34 = vpop.permute.xlu0 %4645  ;;  %5582 = vperm.xlu1 %6832, %v5443_v30   ;;  %v5185_v30 = vmul.f32 %v13641_v24, %v13641_v24  ;;  %v16687_v24 = vld [vmem:[#allocation305_spill] sm:$0xff] }
 0x492   : > { %5587 = vperm.xlu0 %6831, %v5444_v16   ;;  %v5332_v16 = vsel %vm3479_vm2, %v5288_v20, 0.0  ;;  %v13691_v10 = vsub.f32 %v16687_v24, %v13330_v52  ;;  %v16689_v20 = vld [vmem:[#allocation132_spill] sm:$0xff]  ;;  %v4663_v24 = vmul.f32 %v13326_v5, %v4431_v13  ;;  %v16694_v13 = vld [vmem:[#allocation265_spill] sm:$0xff] }
 0x493   : > { %v5333_v32 = vadd.f32 %v5332_v16, %v5331_v61  ;;  %v13695_v31 = vsub.f32 %v16689_v20, %v13330_v52  ;;  %v5290_v61 = vmul.f32 %v13669_v25, %v13669_v25  ;;  %v13718_v5 = vsub.f32 %v16694_v13, %v13330_v52 }
 0x494   : > { %v13680_v35 = vpop.permute.xlu1 %4650  ;;  %16688 = vst [vmem:[#allocation246_spill] sm:$0xff] %v13691_v10 }
 0x495   : > { %16684 = vst [vmem:[#allocation224_spill] sm:$0xff] %v13680_v35  ;;  %v13682_v40 = vpop.permute.xlu0 %4655  ;;  %5592 = vperm.xlu1 %6832, %v5445_v19   ;;  %16690 = vst [vmem:[#allocation320_spill] sm:$0xff] %v13695_v31  ;;  %v5230_v19 = vsel %vm3479_vm2, %v5185_v30, 0.0  ;;  %v4433_v30 = vmul.f32 %v12927_v18, %v16693_v29  ;;  %v5232_v29 = vsel %vm3479_vm2, %v5186_v42, 0.0  ;;  %v16698_v42 = vld [vmem:[#allocation281_spill] sm:$0xff] }
 0x496   : > { %16685 = vst [vmem:[#allocation228_spill] sm:$0xff] %v13682_v40  ;;  %5597 = vperm.xlu0 %6831, %v5446_v62   ;;  %v5334_v62 = vsel %vm3479_vm2, %v5289_v51, 0.0  ;;  %v5231_v16 = vadd.f32 %v5230_v19, %v5229_v57  ;;  %v16692_v40 = vld [vmem:[#allocation157_spill] sm:$0xff]  ;;  %v16695_v57 = vld [vmem:[#allocation199_spill] sm:$0xff]  ;;  %v5336_v19 = vsel %vm3479_vm2, %v5290_v61, 0.0 }
 0x497   : > { %v5335_v20 = vadd.f32 %v5334_v62, %v5333_v32  ;;  %v4432_v48 = vmul.f32 %v12927_v18, %v16692_v40  ;;  %v5449_v51 = vld [vmem:[%s14888_s4 + $0x100] sm:$0x1]  ;;  %v13722_v32 = vsub.f32 %v16695_v57, %v13330_v52  ;;  %v5187_v40 = vmul.f32 %v13691_v10, %v13691_v10 }
 0x498   : > { %v13707_v21 = vpop.permute.xlu1 %4660  ;;  %v4665_v62 = vmul.f32 %v13338_v54, %v4433_v30  ;;  %v5233_v13 = vadd.f32 %v5232_v29, %v5231_v16  ;;  %v5649_v54 = vld [vmem:[%s14889_s5 + $0x8] sm:$0xff]  ;;  %v5188_v30 = vmul.f32 %v13718_v5, %v13718_v5 }
 0x499   : > { %16691 = vst [vmem:[#allocation82_spill] sm:$0xff] %v13707_v21  ;;  %v4733_v39 = vpop.permute.xlu0 %4732  ;;  %5602 = vperm.xlu1 %6832, %v5447_v0   ;;  %16696 = vst [vmem:[#allocation56_spill] sm:$0xff] %v13722_v32  ;;  %v4664_v0 = vmul.f32 %v13328_v56, %v4432_v48  ;;  %v5337_v57 = vadd.f32 %v5336_v19, %v5335_v20  ;;  %v16697_v56 = vld [vmem:[#allocation114_spill] sm:$0xff] }
 0x49a   : > { %v4895_v35 = vadd.f32 %v4733_v39, %v4663_v24  ;;  %5607 = vperm.xlu0 %6831, %v5448_v43   ;;  %v5648_v39 = vld [vmem:[%s14889_s5] sm:$0xff]  ;;  %v5291_v43 = vmul.f32 %v13695_v31, %v13695_v31  ;;  %v4434_v48 = vmul.f32 %v12927_v18, %v16697_v56  ;;  %v4435_v31 = vmul.f32 %v12927_v18, %v16698_v42  ;;  %v16700_v16 = vld [vmem:[#allocation210_spill] sm:$0xff] }
 0x49b   : > { %v13750_v20 = vsub.f32 %v16700_v16, %v13330_v52 }
 0x49c   : > { %6640 = vst.msk [vmem:[%s12992_s19 + $0x108] sm:$0xff] %vm3479_vm2, %v4895_v35  ;;  %v4738_v24 = vpop.permute.xlu1 %4737  ;;  %v16699_v35 = vld [vmem:[#allocation40_spill] sm:$0xff]  ;;  %v5338_v29 = vsel %vm3479_vm2, %v5291_v43, 0.0  ;;  %v4667_v19 = vmul.f32 %v13364_v44, %v4435_v31  ;;  %v16704_v44 = vld [vmem:[#allocation31_spill] sm:$0xff]  ;;  %v16705_v43 = vld [vmem:[#allocation310_spill] sm:$0xff] }
 0x49d   : > { %v4896_v25 = vadd.f32 %v4738_v24, %v4664_v0  ;;  %v4743_v10 = vpop.permute.xlu0 %4742  ;;  %5612 = vperm.xlu1 %6832, %v5449_v51   ;;  %v13746_v61 = vsub.f32 %v16699_v35, %v13330_v52  ;;  %16701 = vst [vmem:[#allocation89_spill] sm:$0xff] %v13750_v20  ;;  %v4666_v51 = vmul.f32 %v13340_v22, %v4434_v48  ;;  %v5234_v0 = vsel %vm3479_vm2, %v5187_v40, 0.0  ;;  %v16703_v40 = vld [vmem:[#allocation267_spill] sm:$0xff]  ;;  %v5651_v31 = vld [vmem:[%s14889_s5 + $0x18] sm:$0xff] }
 0x49e   : > { %v4897_v21 = vadd.f32 %v4743_v10, %v4665_v62  ;;  %5683 = vperm.xlu0 %6831, %v5648_v39   ;;  %v5650_v10 = vld [vmem:[%s14889_s5 + $0x10] sm:$0xff]  ;;  %v5292_v39 = vmul.f32 %v13722_v32, %v13722_v32  ;;  %v5235_v22 = vadd.f32 %v5234_v0, %v5233_v13  ;;  %v5339_v24 = vadd.f32 %v5338_v29, %v5337_v57 }
 0x49f   : > { %6641 = vst.msk [vmem:[%s12992_s19 + $0x110] sm:$0xff] %vm3479_vm2, %v4896_v25  ;;  %v16702_v25 = vld [vmem:[#allocation20_spill] sm:$0xff]  ;;  %v4437_v35 = vmul.f32 %v12927_v18, %v16703_v40  ;;  %v13780_v13 = vsub.f32 %v16705_v43, %v13330_v52  ;;  %v5189_v57 = vmul.f32 %v13746_v61, %v13746_v61  ;;  %v5293_v0 = vmul.f32 %v13750_v20, %v13750_v20 }
 0x4a0   : > { %6642 = vst.msk [vmem:[%s12992_s19 + $0x118] sm:$0xff] %vm3479_vm2, %v4897_v21  ;;  %v4748_v62 = vpop.permute.xlu1 %4747  ;;  %v4436_v56 = vmul.f32 %v12927_v18, %v16702_v25  ;;  %v13776_v21 = vsub.f32 %v16704_v44, %v13330_v52  ;;  %v5340_v29 = vsel %vm3479_vm2, %v5292_v39, 0.0  ;;  %v16709_v39 = vld [vmem:[#allocation195_spill] sm:$0xff] }
 0x4a1   : > { %v4898_v48 = vadd.f32 %v4748_v62, %v4666_v51  ;;  %v4753_v42 = vpop.permute.xlu0 %4752  ;;  %5688 = vperm.xlu1 %6832, %v5649_v54   ;;  %16706 = vst [vmem:[#allocation91_spill] sm:$0xff] %v13780_v13  ;;  %v5652_v51 = vld [vmem:[%s14889_s5 + $0x20] sm:$0xff]  ;;  %v5341_v25 = vadd.f32 %v5340_v29, %v5339_v24  ;;  %v16710_v24 = vld [vmem:[#allocation264_spill] sm:$0xff]  ;;  %v5342_v29 = vsel %vm3479_vm2, %v5293_v0, 0.0  ;;  %v16714_v0 = vld [vmem:[#allocation6_spill] sm:$0xff] }
 0x4a2   : > { %v4899_v16 = vadd.f32 %v4753_v42, %v4667_v19  ;;  %5693 = vperm.xlu0 %6831, %v5650_v10   ;;  %v4668_v54 = vmul.f32 %v13366_v46, %v4436_v56  ;;  %v5236_v10 = vsel %vm3479_vm2, %v5188_v30, 0.0  ;;  %v4669_v19 = vmul.f32 %v13390_v36, %v4437_v35  ;;  %v16707_v56 = vld [vmem:[#allocation115_spill] sm:$0xff]  ;;  %v16708_v30 = vld [vmem:[#allocation160_spill] sm:$0xff]  ;;  %v5653_v36 = vld [vmem:[%s14889_s5 + $0x28] sm:$0xff] }
 0x4a3   : > { %6643 = vst.msk [vmem:[%s12992_s19 + $0x120] sm:$0xff] %vm3479_vm2, %v4898_v48  ;;  %v5237_v46 = vadd.f32 %v5236_v10, %v5235_v22  ;;  %v4438_v48 = vmul.f32 %v12927_v18, %v16707_v56  ;;  %v4439_v44 = vmul.f32 %v12927_v18, %v16708_v30  ;;  %v13806_v22 = vsub.f32 %v16709_v39, %v13330_v52 }
 0x4a4   : > { %6644 = vst.msk [vmem:[%s12992_s19 + $0x128] sm:$0xff] %vm3479_vm2, %v4899_v16  ;;  %v4758_v62 = vpop.permute.xlu1 %4757  ;;  %v13810_v35 = vsub.f32 %v16710_v24, %v13330_v52  ;;  %v5190_v16 = vmul.f32 %v13776_v21, %v13776_v21  ;;  %v5294_v10 = vmul.f32 %v13780_v13, %v13780_v13  ;;  %v5343_v56 = vadd.f32 %v5342_v29, %v5341_v25  ;;  %v16715_v25 = vld [vmem:[#allocation140_spill] sm:$0xff]  ;;  %v16769_v13 = vld [vmem:[#allocation57_spill] sm:$0xff] }
 0x4a5   : > { %v4900_v42 = vadd.f32 %v4758_v62, %v4668_v54  ;;  %v4763_v40 = vpop.permute.xlu0 %4762  ;;  %5698 = vperm.xlu1 %6832, %v5651_v31   ;;  %v4670_v31 = vmul.f32 %v13392_v41, %v4438_v48  ;;  %v5654_v54 = vld [vmem:[%s14889_s5 + $0x30] sm:$0xff]  ;;  %v16712_v48 = vld [vmem:[#allocation206_spill] sm:$0xff] }
 0x4a6   : > { %v4901_v43 = vadd.f32 %v4763_v40, %v4669_v19  ;;  %5703 = vperm.xlu0 %6831, %v5652_v51   ;;  %16711 = vst [vmem:[#allocation322_spill] sm:$0xff] %v13810_v35  ;;  %v5238_v51 = vsel %vm3479_vm2, %v5189_v57, 0.0  ;;  %v4671_v19 = vmul.f32 %v13416_v50, %v4439_v44  ;;  %v16713_v57 = vld [vmem:[#allocation286_spill] sm:$0xff]  ;;  %v5655_v50 = vld [vmem:[%s14889_s5 + $0x38] sm:$0xff]  ;;  %v13840_v44 = vsub.f32 %v16715_v25, %v13330_v52 }
 0x4a7   : > { %6645 = vst.msk [vmem:[%s12992_s19 + $0x130] sm:$0xff] %vm3479_vm2, %v4900_v42  ;;  %v5239_v41 = vadd.f32 %v5238_v51, %v5237_v46  ;;  %v4440_v42 = vmul.f32 %v12927_v18, %v16712_v48  ;;  %v4441_v39 = vmul.f32 %v12927_v18, %v16713_v57  ;;  %v13836_v46 = vsub.f32 %v16714_v0, %v13330_v52 }
 0x4a8   : > { %6646 = vst.msk [vmem:[%s12992_s19 + $0x138] sm:$0xff] %vm3479_vm2, %v4901_v43  ;;  %v4768_v62 = vpop.permute.xlu1 %4767  ;;  %16716 = vst [vmem:[#allocation94_spill] sm:$0xff] %v13840_v44  ;;  %v5191_v43 = vmul.f32 %v13806_v22, %v13806_v22  ;;  %v5295_v51 = vmul.f32 %v13810_v35, %v13810_v35  ;;  %v5344_v29 = vsel %vm3479_vm2, %v5294_v10, 0.0  ;;  %v16719_v10 = vld [vmem:[#allocation51_spill] sm:$0xff] }
 0x4a9   : > { %v4902_v40 = vadd.f32 %v4768_v62, %v4670_v31  ;;  %v4773_v30 = vpop.permute.xlu0 %4772  ;;  %5708 = vperm.xlu1 %6832, %v5653_v36   ;;  %v4672_v36 = vmul.f32 %v13418_v37, %v4440_v42  ;;  %v5656_v31 = vld [vmem:[%s14889_s5 + $0x40] sm:$0xff]  ;;  %v5345_v48 = vadd.f32 %v5344_v29, %v5343_v56  ;;  %v16720_v56 = vld [vmem:[#allocation314_spill] sm:$0xff] }
 0x4aa   : > { %v4903_v24 = vadd.f32 %v4773_v30, %v4671_v19  ;;  %5713 = vperm.xlu0 %6831, %v5654_v54   ;;  %v5240_v54 = vsel %vm3479_vm2, %v5190_v16, 0.0  ;;  %v4673_v19 = vmul.f32 %v13440_v3, %v4441_v39  ;;  %v16717_v42 = vld [vmem:[#allocation285_spill] sm:$0xff]  ;;  %v5657_v3 = vld [vmem:[%s14889_s5 + $0x48] sm:$0xff]  ;;  %v13870_v39 = vsub.f32 %v16720_v56, %v13330_v52 }
 0x4ab   : > { %6647 = vst.msk [vmem:[%s12992_s19 + $0x140] sm:$0xff] %vm3479_vm2, %v4902_v40  ;;  %v5241_v37 = vadd.f32 %v5240_v54, %v5239_v41  ;;  %v4442_v40 = vmul.f32 %v12927_v18, %v16717_v42  ;;  %v16718_v16 = vld [vmem:[#allocation25_spill] sm:$0xff]  ;;  %v13866_v41 = vsub.f32 %v16719_v10, %v13330_v52  ;;  %v5296_v54 = vmul.f32 %v13840_v44, %v13840_v44 }
 0x4ac   : > { %6648 = vst.msk [vmem:[%s12992_s19 + $0x148] sm:$0xff] %vm3479_vm2, %v4903_v24  ;;  %v4778_v62 = vpop.permute.xlu1 %4777  ;;  %v4443_v0 = vmul.f32 %v12927_v18, %v16718_v16  ;;  %16721 = vst [vmem:[#allocation180_spill] sm:$0xff] %v13870_v39  ;;  %v5192_v24 = vmul.f32 %v13836_v46, %v13836_v46  ;;  %v5346_v29 = vsel %vm3479_vm2, %v5295_v51, 0.0  ;;  %v16724_v51 = vld [vmem:[#allocation139_spill] sm:$0xff] }
 0x4ad   : > { %v4904_v30 = vadd.f32 %v4778_v62, %v4672_v36  ;;  %v4783_v57 = vpop.permute.xlu0 %4782  ;;  %5718 = vperm.xlu1 %6832, %v5655_v50   ;;  %v4674_v50 = vmul.f32 %v13442_v17, %v4442_v40  ;;  %v5658_v36 = vld [vmem:[%s14889_s5 + $0x50] sm:$0xff]  ;;  %v5347_v42 = vadd.f32 %v5346_v29, %v5345_v48  ;;  %v16722_v40 = vld [vmem:[#allocation104_spill] sm:$0xff]  ;;  %v16725_v48 = vld [vmem:[#allocation142_spill] sm:$0xff]  ;;  %v5348_v29 = vsel %vm3479_vm2, %v5296_v54, 0.0 }
 0x4ae   : > { %v4905_v25 = vadd.f32 %v4783_v57, %v4673_v19  ;;  %5723 = vperm.xlu0 %6831, %v5656_v31   ;;  %v5242_v31 = vsel %vm3479_vm2, %v5191_v43, 0.0  ;;  %v4675_v19 = vmul.f32 %v13464_v7, %v4443_v0  ;;  %v16723_v43 = vld [vmem:[#allocation292_spill] sm:$0xff]  ;;  %v13900_v0 = vsub.f32 %v16725_v48, %v13330_v52  ;;  %v16729_v54 = vld [vmem:[#allocation34_spill] sm:$0xff] }
 0x4af   : > { %6649 = vst.msk [vmem:[%s12992_s19 + $0x150] sm:$0xff] %vm3479_vm2, %v4904_v30  ;;  %v5243_v17 = vadd.f32 %v5242_v31, %v5241_v37  ;;  %v4444_v30 = vmul.f32 %v12927_v18, %v16722_v40  ;;  %v4445_v10 = vmul.f32 %v12927_v18, %v16723_v43  ;;  %v5659_v7 = vld [vmem:[%s14889_s5 + $0x58] sm:$0xff]  ;;  %v13896_v37 = vsub.f32 %v16724_v51, %v13330_v52 }
 0x4b0   : > { %6650 = vst.msk [vmem:[%s12992_s19 + $0x158] sm:$0xff] %vm3479_vm2, %v4905_v25  ;;  %v4788_v62 = vpop.permute.xlu1 %4787  ;;  %16726 = vst [vmem:[#allocation323_spill] sm:$0xff] %v13900_v0  ;;  %v5193_v25 = vmul.f32 %v13866_v41, %v13866_v41  ;;  %v5297_v31 = vmul.f32 %v13870_v39, %v13870_v39  ;;  %v5349_v40 = vadd.f32 %v5348_v29, %v5347_v42  ;;  %v16730_v42 = vld [vmem:[#allocation36_spill] sm:$0xff]  ;;  %v6738_v39 = vld [vmem:[%s14888_s4 + $0x208] sm:$0x1] }
 0x4b1   : > { %v4906_v57 = vadd.f32 %v4788_v62, %v4674_v50  ;;  %v4793_v16 = vpop.permute.xlu0 %4792  ;;  %5728 = vperm.xlu1 %6832, %v5657_v3   ;;  %v4676_v3 = vmul.f32 %v13466_v55, %v4444_v30  ;;  %v5660_v50 = vld [vmem:[%s14889_s5 + $0x60] sm:$0xff]  ;;  %v16727_v30 = vld [vmem:[#allocation220_spill] sm:$0xff] }
 0x4b2   : > { %v4907_v56 = vadd.f32 %v4793_v16, %v4675_v19  ;;  %5733 = vperm.xlu0 %6831, %v5658_v36   ;;  %v5244_v36 = vsel %vm3479_vm2, %v5192_v24, 0.0  ;;  %v4677_v19 = vmul.f32 %v13488_v38, %v4445_v10  ;;  %v16728_v24 = vld [vmem:[#allocation122_spill] sm:$0xff]  ;;  %v13930_v10 = vsub.f32 %v16730_v42, %v13330_v52 }
 0x4b3   : > { %6651 = vst.msk [vmem:[%s12992_s19 + $0x160] sm:$0xff] %vm3479_vm2, %v4906_v57  ;;  %v5245_v55 = vadd.f32 %v5244_v36, %v5243_v17  ;;  %v4446_v57 = vmul.f32 %v12927_v18, %v16727_v30  ;;  %v4447_v51 = vmul.f32 %v12927_v18, %v16728_v24  ;;  %v5661_v38 = vld [vmem:[%s14889_s5 + $0x68] sm:$0xff]  ;;  %v13926_v17 = vsub.f32 %v16729_v54, %v13330_v52 }
 0x4b4   : > { %6652 = vst.msk [vmem:[%s12992_s19 + $0x168] sm:$0xff] %vm3479_vm2, %v4907_v56  ;;  %v4798_v62 = vpop.permute.xlu1 %4797  ;;  %16731 = vst [vmem:[#allocation85_spill] sm:$0xff] %v13930_v10  ;;  %v5194_v56 = vmul.f32 %v13896_v37, %v13896_v37  ;;  %v5298_v36 = vmul.f32 %v13900_v0, %v13900_v0  ;;  %v5350_v29 = vsel %vm3479_vm2, %v5297_v31, 0.0  ;;  %v16734_v31 = vld [vmem:[#allocation42_spill] sm:$0xff] }
 0x4b5   : > { %v4908_v16 = vadd.f32 %v4798_v62, %v4676_v3  ;;  %v4803_v43 = vpop.permute.xlu0 %4802  ;;  %5738 = vperm.xlu1 %6832, %v5659_v7   ;;  %v4678_v7 = vmul.f32 %v13490_v47, %v4446_v57  ;;  %v5662_v3 = vld [vmem:[%s14889_s5 + $0x70] sm:$0xff]  ;;  %v5351_v30 = vadd.f32 %v5350_v29, %v5349_v40  ;;  %v16732_v57 = vld [vmem:[#allocation24_spill] sm:$0xff]  ;;  %v16735_v40 = vld [vmem:[#allocation54_spill] sm:$0xff] }
 0x4b6   : > { %v4909_v48 = vadd.f32 %v4803_v43, %v4677_v19  ;;  %5743 = vperm.xlu0 %6831, %v5660_v50   ;;  %v5246_v50 = vsel %vm3479_vm2, %v5193_v25, 0.0  ;;  %v4679_v19 = vmul.f32 %v13512_v11, %v4447_v51  ;;  %v16733_v25 = vld [vmem:[#allocation106_spill] sm:$0xff]  ;;  %v5663_v11 = vld [vmem:[%s14889_s5 + $0x78] sm:$0xff]  ;;  %v13960_v51 = vsub.f32 %v16735_v40, %v13330_v52 }
 0x4b7   : > { %6653 = vst.msk [vmem:[%s12992_s19 + $0x170] sm:$0xff] %vm3479_vm2, %v4908_v16  ;;  %v5247_v47 = vadd.f32 %v5246_v50, %v5245_v55  ;;  %v4448_v16 = vmul.f32 %v12927_v18, %v16732_v57  ;;  %v4449_v54 = vmul.f32 %v12927_v18, %v16733_v25  ;;  %v13956_v55 = vsub.f32 %v16734_v31, %v13330_v52 }
 0x4b8   : > { %6654 = vst.msk [vmem:[%s12992_s19 + $0x178] sm:$0xff] %vm3479_vm2, %v4909_v48  ;;  %v4808_v62 = vpop.permute.xlu1 %4807  ;;  %16736 = vst [vmem:[#allocation90_spill] sm:$0xff] %v13960_v51  ;;  %v5195_v48 = vmul.f32 %v13926_v17, %v13926_v17  ;;  %v5299_v50 = vmul.f32 %v13930_v10, %v13930_v10  ;;  %v5352_v29 = vsel %vm3479_vm2, %v5298_v36, 0.0  ;;  %v16739_v36 = vld [vmem:[#allocation45_spill] sm:$0xff] }
 0x4b9   : > { %v4910_v43 = vadd.f32 %v4808_v62, %v4678_v7  ;;  %v4813_v24 = vpop.permute.xlu0 %4812  ;;  %5748 = vperm.xlu1 %6832, %v5661_v38   ;;  %v4680_v38 = vmul.f32 %v13514_v45, %v4448_v16  ;;  %v5664_v7 = vld [vmem:[%s14889_s5 + $0x80] sm:$0xff]  ;;  %v5353_v57 = vadd.f32 %v5352_v29, %v5351_v30  ;;  %v16737_v16 = vld [vmem:[#allocation107_spill] sm:$0xff] }
 0x4ba   : > { %v4911_v42 = vadd.f32 %v4813_v24, %v4679_v19  ;;  %5753 = vperm.xlu0 %6831, %v5662_v3   ;;  %v5248_v3 = vsel %vm3479_vm2, %v5194_v56, 0.0  ;;  %v4681_v19 = vmul.f32 %v13536_v14, %v4449_v54  ;;  %v16738_v56 = vld [vmem:[#allocation213_spill] sm:$0xff]  ;;  %v5665_v14 = vld [vmem:[%s14889_s5 + $0x88] sm:$0xff]  ;;  %v5354_v29 = vsel %vm3479_vm2, %v5299_v50, 0.0 }
 0x4bb   : > { %6655 = vst.msk [vmem:[%s12992_s19 + $0x180] sm:$0xff] %vm3479_vm2, %v4910_v43  ;;  %v5249_v45 = vadd.f32 %v5248_v3, %v5247_v47  ;;  %v4450_v43 = vmul.f32 %v12927_v18, %v16737_v16  ;;  %v4451_v31 = vmul.f32 %v12927_v18, %v16738_v56  ;;  %v13986_v47 = vsub.f32 %v16739_v36, %v13330_v52  ;;  %v16740_v30 = vld [vmem:[#allocation141_spill] sm:$0xff] }
 0x4bc   : > { %6656 = vst.msk [vmem:[%s12992_s19 + $0x188] sm:$0xff] %vm3479_vm2, %v4911_v42  ;;  %v4818_v62 = vpop.permute.xlu1 %4817  ;;  %v13990_v54 = vsub.f32 %v16740_v30, %v13330_v52  ;;  %v5196_v42 = vmul.f32 %v13956_v55, %v13956_v55  ;;  %v5300_v3 = vmul.f32 %v13960_v51, %v13960_v51  ;;  %v5355_v16 = vadd.f32 %v5354_v29, %v5353_v57  ;;  %v16744_v50 = vld [vmem:[#allocation41_spill] sm:$0xff]  ;;  %v6734_v51 = vld [vmem:[%s14888_s4 + $0x1e8] sm:$0xff] }
 0x4bd   : > { %v4912_v24 = vadd.f32 %v4818_v62, %v4680_v38  ;;  %v4823_v25 = vpop.permute.xlu0 %4822  ;;  %5758 = vperm.xlu1 %6832, %v5663_v11   ;;  %v4682_v11 = vmul.f32 %v13538_v2, %v4450_v43  ;;  %v5666_v38 = vld [vmem:[%s14889_s5 + $0x90] sm:$0xff]  ;;  %v16742_v43 = vld [vmem:[#allocation29_spill] sm:$0xff]  ;;  %v14020_v57 = vsub.f32 %v12995_v26, %v13330_v52 }
 0x4be   : > { %v4913_v40 = vadd.f32 %v4823_v25, %v4681_v19  ;;  %5763 = vperm.xlu0 %6831, %v5664_v7   ;;  %16741 = vst [vmem:[#allocation11_spill] sm:$0xff] %v13990_v54  ;;  %v5250_v7 = vsel %vm3479_vm2, %v5195_v48, 0.0  ;;  %v4683_v19 = vmul.f32 %v13560_v60, %v4451_v31  ;;  %v16743_v48 = vld [vmem:[#allocation109_spill] sm:$0xff]  ;;  %v5667_v60 = vld [vmem:[%s14889_s5 + $0x98] sm:$0xff]  ;;  %v5197_v31 = vmul.f32 %v13986_v47, %v13986_v47 }
 0x4bf   : > { %6657 = vst.msk [vmem:[%s12992_s19 + $0x190] sm:$0xff] %vm3479_vm2, %v4912_v24  ;;  %v5251_v2 = vadd.f32 %v5250_v7, %v5249_v45  ;;  %v4452_v24 = vmul.f32 %v12927_v18, %v16742_v43  ;;  %v4453_v36 = vmul.f32 %v12927_v18, %v16743_v48  ;;  %v14016_v45 = vsub.f32 %v16744_v50, %v13330_v52 }
 0x4c0   : > { %6658 = vst.msk [vmem:[%s12992_s19 + $0x198] sm:$0xff] %vm3479_vm2, %v4913_v40  ;;  %v4828_v62 = vpop.permute.xlu1 %4827  ;;  %16745 = vst [vmem:[#allocation144_spill] sm:$0xff] %v14020_v57  ;;  %v5356_v7 = vsel %vm3479_vm2, %v5300_v3, 0.0  ;;  %v14046_v3 = vsub.f32 %v13013_v33, %v13330_v52  ;;  %v5302_v33 = vmul.f32 %v14020_v57, %v14020_v57 }
 0x4c1   : > { %v4914_v25 = vadd.f32 %v4828_v62, %v4682_v11  ;;  %v4833_v56 = vpop.permute.xlu0 %4832  ;;  %5768 = vperm.xlu1 %6832, %v5665_v14   ;;  %v4684_v40 = vmul.f32 %v13562_v8, %v4452_v24  ;;  %v5668_v14 = vld [vmem:[%s14889_s5 + $0xa0] sm:$0xff]  ;;  %v5252_v11 = vsel %vm3479_vm2, %v5196_v42, 0.0  ;;  %v4685_v26 = vmul.f32 %v13584_v9, %v4453_v36  ;;  %v16746_v62 = vld [vmem:[#allocation110_spill] sm:$0xff] }
 0x4c2   : > { %v4915_v30 = vadd.f32 %v4833_v56, %v4683_v19  ;;  %5773 = vperm.xlu0 %6831, %v5666_v38   ;;  %v5301_v38 = vmul.f32 %v13990_v54, %v13990_v54  ;;  %v5253_v8 = vadd.f32 %v5252_v11, %v5251_v2  ;;  %v5357_v19 = vadd.f32 %v5356_v7, %v5355_v16  ;;  %v16747_v42 = vld [vmem:[#allocation125_spill] sm:$0xff]  ;;  %v5669_v9 = vld [vmem:[%s14889_s5 + $0xa8] sm:$0xff] }
 0x4c3   : > { %6659 = vst.msk [vmem:[%s12992_s19 + $0x1a0] sm:$0xff] %vm3479_vm2, %v4914_v25  ;;  %v4454_v43 = vmul.f32 %v12927_v18, %v16746_v62  ;;  %v4455_v56 = vmul.f32 %v12927_v18, %v16747_v42  ;;  %v14050_v2 = vsub.f32 %v13004_v28, %v13330_v52  ;;  %v5198_v16 = vmul.f32 %v14016_v45, %v14016_v45  ;;  %v16749_v11 = vld [vmem:[#allocation173_spill] sm:$0xff] }
 0x4c4   : > { %6660 = vst.msk [vmem:[%s12992_s19 + $0x1a8] sm:$0xff] %vm3479_vm2, %v4915_v30  ;;  %v4838_v29 = vpop.permute.xlu1 %4837  ;;  %v5670_v30 = vld [vmem:[%s14889_s5 + $0xb0] sm:$0xff]  ;;  %v5358_v50 = vsel %vm3479_vm2, %v5301_v38, 0.0  ;;  %v4456_v7 = vmul.f32 %v12927_v18, %v16749_v11  ;;  %v14076_v38 = vsub.f32 %v13032_v59, %v13330_v52 }
 0x4c5   : > { %v4916_v24 = vadd.f32 %v4838_v29, %v4684_v40  ;;  %v4843_v25 = vpop.permute.xlu0 %4842  ;;  %5778 = vperm.xlu1 %6832, %v5667_v60   ;;  %16748 = vst [vmem:[#allocation183_spill] sm:$0xff] %v14050_v2  ;;  %v4686_v36 = vmul.f32 %v13586_v12, %v4454_v43  ;;  %v5254_v60 = vsel %vm3479_vm2, %v5197_v31, 0.0  ;;  %v4687_v28 = vmul.f32 %v13608_v23, %v4455_v56  ;;  %v16750_v31 = vld [vmem:[#allocation172_spill] sm:$0xff] }
 0x4c6   : > { %v4917_v48 = vadd.f32 %v4843_v25, %v4685_v26  ;;  %5783 = vperm.xlu0 %6831, %v5668_v14   ;;  %v5255_v12 = vadd.f32 %v5254_v60, %v5253_v8  ;;  %v5359_v14 = vadd.f32 %v5358_v50, %v5357_v19  ;;  %v4457_v62 = vmul.f32 %v12927_v18, %v16750_v31  ;;  %v5671_v23 = vld [vmem:[%s14889_s5 + $0xb8] sm:$0xff]  ;;  %v5672_v25 = vld [vmem:[%s14889_s5 + $0xc0] sm:$0xff] }
 0x4c7   : > { %6661 = vst.msk [vmem:[%s12992_s19 + $0x1b0] sm:$0xff] %vm3479_vm2, %v4916_v24  ;;  %v14080_v8 = vsub.f32 %v13061_v49, %v13330_v52  ;;  %v5199_v19 = vmul.f32 %v14046_v3, %v14046_v3  ;;  %v4688_v24 = vmul.f32 %v13610_v1, %v4456_v7  ;;  %v5256_v42 = vsel %vm3479_vm2, %v5198_v16, 0.0  ;;  %v16753_v16 = vld [vmem:[#allocation259_spill] sm:$0xff] }
 0x4c8   : > { %6662 = vst.msk [vmem:[%s12992_s19 + $0x1b8] sm:$0xff] %vm3479_vm2, %v4917_v48  ;;  %v4848_v40 = vpop.permute.xlu1 %4847  ;;  %v5303_v59 = vmul.f32 %v14050_v2, %v14050_v2  ;;  %v5360_v56 = vsel %vm3479_vm2, %v5302_v33, 0.0  ;;  %v4689_v49 = vmul.f32 %v13632_v53, %v4457_v62  ;;  %v5257_v1 = vadd.f32 %v5256_v42, %v5255_v12  ;;  %v5673_v53 = vld [vmem:[%s14889_s5 + $0xc8] sm:$0xff]  ;;  %v5674_v7 = vld [vmem:[%s14889_s5 + $0xd0] sm:$0xff]  ;;  %v16770_v2 = vld [vmem:[#allocation53_spill] sm:$0xff] }
 0x4c9   : > { %v4918_v26 = vadd.f32 %v4848_v40, %v4686_v36  ;;  %v4853_v29 = vpop.permute.xlu0 %4852  ;;  %5788 = vperm.xlu1 %6832, %v5669_v9   ;;  %16751 = vst [vmem:[#allocation13_spill] sm:$0xff] %v14080_v8  ;;  %v5361_v9 = vadd.f32 %v5360_v56, %v5359_v14  ;;  %v16752_v36 = vld [vmem:[#allocation244_spill] sm:$0xff]  ;;  %v14106_v33 = vsub.f32 %v13085_v63, %v13330_v52 }
 0x4ca   : > { %v4919_v43 = vadd.f32 %v4853_v29, %v4687_v28  ;;  %5793 = vperm.xlu0 %6831, %v5670_v30   ;;  %v4458_v30 = vmul.f32 %v12927_v18, %v16752_v36  ;;  %v4459_v28 = vmul.f32 %v12927_v18, %v16753_v16  ;;  %v14110_v12 = vsub.f32 %v13076_v58, %v13330_v52 }
 0x4cb   : > { %6663 = vst.msk [vmem:[%s12992_s19 + $0x1c0] sm:$0xff] %vm3479_vm2, %v4918_v26  ;;  %v5200_v14 = vmul.f32 %v14076_v38, %v14076_v38  ;;  %v5258_v26 = vsel %vm3479_vm2, %v5199_v19, 0.0  ;;  %v5304_v63 = vmul.f32 %v14080_v8, %v14080_v8  ;;  %v5362_v29 = vsel %vm3479_vm2, %v5303_v59, 0.0  ;;  %v16756_v19 = vld [vmem:[#allocation249_spill] sm:$0xff] }
 0x4cc   : > { %6664 = vst.msk [vmem:[%s12992_s19 + $0x1c8] sm:$0xff] %vm3479_vm2, %v4919_v43  ;;  %v4858_v48 = vpop.permute.xlu1 %4857  ;;  %16754 = vst [vmem:[#allocation147_spill] sm:$0xff] %v14110_v12  ;;  %v4690_v11 = vmul.f32 %v13634_v4, %v4458_v30  ;;  %v4691_v58 = vmul.f32 %v13656_v15, %v4459_v28  ;;  %v5259_v4 = vadd.f32 %v5258_v26, %v5257_v1  ;;  %v16755_v43 = vld [vmem:[#allocation33_spill] sm:$0xff]  ;;  %v5675_v15 = vld [vmem:[%s14889_s5 + $0xd8] sm:$0xff] }
 0x4cd   : > { %v4920_v60 = vadd.f32 %v4858_v48, %v4688_v24  ;;  %v4863_v50 = vpop.permute.xlu0 %4862  ;;  %5798 = vperm.xlu1 %6832, %v5671_v23   ;;  %v5363_v62 = vadd.f32 %v5362_v29, %v5361_v9  ;;  %v4460_v23 = vmul.f32 %v12927_v18, %v16755_v43  ;;  %v4461_v42 = vmul.f32 %v12927_v18, %v16756_v19  ;;  %v5676_v9 = vld [vmem:[%s14889_s5 + $0xe0] sm:$0xff]  ;;  %v16759_v28 = vld [vmem:[#allocation215_spill] sm:$0xff]  ;;  %v16764_v43 = vld [vmem:[#allocation228_spill] sm:$0xff] }
 0x4ce   : > { %v4921_v40 = vadd.f32 %v4863_v50, %v4689_v49  ;;  %5803 = vperm.xlu0 %6831, %v5672_v25   ;;  %v14136_v59 = vsub.f32 %v13133_v27, %v13330_v52  ;;  %v14140_v49 = vsub.f32 %v13123_v6, %v13330_v52  ;;  %v5201_v48 = vmul.f32 %v14106_v33, %v14106_v33  ;;  %v16758_v6 = vld [vmem:[#allocation224_spill] sm:$0xff]  ;;  %v16761_v29 = vld [vmem:[#allocation145_spill] sm:$0xff] }
 0x4cf   : > { %6665 = vst.msk [vmem:[%s12992_s19 + $0x1d0] sm:$0xff] %vm3479_vm2, %v4920_v60  ;;  %v4692_v1 = vmul.f32 %v13658_v34, %v4460_v23  ;;  %v5260_v36 = vsel %vm3479_vm2, %v5200_v14, 0.0  ;;  %v5305_v27 = vmul.f32 %v14110_v12, %v14110_v12  ;;  %v5364_v30 = vsel %vm3479_vm2, %v5304_v63, 0.0  ;;  %v16760_v14 = vld [vmem:[#allocation211_spill] sm:$0xff]  ;;  %v5677_v63 = vld [vmem:[%s14889_s5 + $0xe8] sm:$0xff] }
 0x4d0   : > { %6666 = vst.msk [vmem:[%s12992_s19 + $0x1d8] sm:$0xff] %vm3479_vm2, %v4921_v40  ;;  %v4868_v31 = vpop.permute.xlu1 %4867  ;;  %16757 = vst [vmem:[#allocation84_spill] sm:$0xff] %v14140_v49  ;;  %v4693_v60 = vmul.f32 %v16758_v6, %v4461_v42  ;;  %v5261_v34 = vadd.f32 %v5260_v36, %v5259_v4  ;;  %v5365_v16 = vadd.f32 %v5364_v30, %v5363_v62  ;;  %v16765_v42 = vld [vmem:[#allocation82_spill] sm:$0xff] }
 0x4d1   : > { %v4922_v24 = vadd.f32 %v4868_v31, %v4690_v11  ;;  %v4873_v25 = vpop.permute.xlu0 %4872  ;;  %5808 = vperm.xlu1 %6832, %v5673_v53   ;;  %v4462_v40 = vmul.f32 %v12927_v18, %v16759_v28  ;;  %v16762_v31 = vld [vmem:[#allocation153_spill] sm:$0xff]  ;;  %v5202_v62 = vmul.f32 %v14136_v59, %v14136_v59  ;;  %v5366_v19 = vsel %vm3479_vm2, %v5305_v27, 0.0 }
 0x4d2   : > { %v4923_v56 = vadd.f32 %v4873_v25, %v4691_v58  ;;  %5813 = vperm.xlu0 %6831, %v5674_v7   ;;  %v4463_v7 = vmul.f32 %v12927_v18, %v16760_v14  ;;  %v14166_v58 = vsub.f32 %v16761_v29, %v13330_v52  ;;  %v14170_v4 = vsub.f32 %v16762_v31, %v13330_v52  ;;  %v5678_v18 = vld [vmem:[%s14889_s5 + $0xf0] sm:$0xff] }
 0x4d3   : > { %6667 = vst.msk [vmem:[%s12992_s19 + $0x1e0] sm:$0xff] %vm3479_vm2, %v4922_v24  ;;  %v4694_v23 = vmul.f32 %v16764_v43, %v4462_v40  ;;  %v5262_v24 = vsel %vm3479_vm2, %v5201_v48, 0.0  ;;  %v5306_v25 = vmul.f32 %v14140_v49, %v14140_v49  ;;  %v5679_v48 = vld [vmem:[%s14889_s5 + $0xf8] sm:$0xff]  ;;  %v5264_v40 = vsel %vm3479_vm2, %v5202_v62, 0.0  ;;  %v6707_v29 = vld [vmem:[%s14888_s4 + $0x110] sm:$0xff] }
 0x4d4   : > { %6668 = vst.msk [vmem:[%s12992_s19 + $0x1e8] sm:$0xff] %vm3479_vm2, %v4923_v56  ;;  %v4878_v50 = vpop.permute.xlu1 %4877  ;;  %16763 = vst [vmem:[#allocation79_spill] sm:$0xff] %v14170_v4  ;;  %v4695_v56 = vmul.f32 %v16765_v42, %v4463_v7  ;;  %v6708_v42 = vld [vmem:[%s14888_s4 + $0x118] sm:$0xff] }
 0x4d5   : > { %v4924_v53 = vadd.f32 %v4878_v50, %v4692_v1  ;;  %v4883_v11 = vpop.permute.xlu0 %4882  ;;  %5818 = vperm.xlu1 %6832, %v5675_v15   ;;  %v5263_v1 = vadd.f32 %v5262_v24, %v5261_v34  ;;  %v16767_v50 = vld [vmem:[#allocation50_spill] sm:$0xff]  ;;  %v5680_v34 = vld [vmem:[%s14889_s5 + $0x100] sm:$0x1] }
 0x4d6   : > { %v4925_v26 = vadd.f32 %v4883_v11, %v4693_v60  ;;  %5823 = vperm.xlu0 %6831, %v5676_v9   ;;  %v5367_v9 = vadd.f32 %v5366_v19, %v5365_v16  ;;  %v16766_v60 = vld [vmem:[#allocation47_spill] sm:$0xff]  ;;  %v14196_v28 = vsub.f32 %v16767_v50, %v13330_v52  ;;  %v5203_v16 = vmul.f32 %v14166_v58, %v14166_v58 }
 0x4d7   : > { %6669 = vst.msk [vmem:[%s12992_s19 + $0x1f0] sm:$0xff] %vm3479_vm2, %v4924_v53  ;;  %v14192_v27 = vsub.f32 %v16766_v60, %v13330_v52  ;;  %v5307_v53 = vmul.f32 %v14170_v4, %v14170_v4  ;;  %v5368_v11 = vsel %vm3479_vm2, %v5306_v25, 0.0  ;;  %v5265_v14 = vadd.f32 %v5264_v40, %v5263_v1  ;;  %v6711_v60 = vld [vmem:[%s14888_s4 + $0x130] sm:$0xff] }
 0x4d8   : > { %6670 = vst.msk [vmem:[%s12992_s19 + $0x1f8] sm:$0xff] %vm3479_vm2, %v4925_v26  ;;  %v4888_v15 = vpop.permute.xlu1 %4887  ;;  %16768 = vst [vmem:[#allocation83_spill] sm:$0xff] %v14196_v28  ;;  %v5369_v7 = vadd.f32 %v5368_v11, %v5367_v9  ;;  %v5266_v62 = vsel %vm3479_vm2, %v5203_v16, 0.0  ;;  %v5308_v43 = vmul.f32 %v14196_v28, %v14196_v28  ;;  %v6713_v11 = vld [vmem:[%s14888_s4 + $0x140] sm:$0xff] }
 0x4d9   : > { %v4926_v36 = vadd.f32 %v4888_v15, %v4694_v23  ;;  %v4893_v30 = vpop.permute.xlu0 %4892  ;;  %5828 = vperm.xlu1 %6832, %v5677_v63   ;;  %v6706_v63 = vld [vmem:[%s14888_s4 + $0x108] sm:$0xff]  ;;  %v5204_v31 = vmul.f32 %v14192_v27, %v14192_v27  ;;  %v5370_v23 = vsel %vm3479_vm2, %v5307_v53, 0.0  ;;  %v5267_v24 = vadd.f32 %v5266_v62, %v5265_v14  ;;  %v6712_v53 = vld [vmem:[%s14888_s4 + $0x138] sm:$0xff]  ;;  %v6715_v62 = vld [vmem:[%s14888_s4 + $0x150] sm:$0xff] }
 0x4da   : > { %v4927_v6 = vadd.f32 %v4893_v30, %v4695_v56  ;;  %5833 = vperm.xlu0 %6831, %v5678_v18   ;;  %v5371_v25 = vadd.f32 %v5370_v23, %v5369_v7  ;;  %v6709_v56 = vld [vmem:[%s14888_s4 + $0x120] sm:$0xff]  ;;  %v5372_v1 = vsel %vm3543_vm3, %v5308_v43, 0.0 }
 0x4db   : > { %6671 = vst.msk [vmem:[%s12992_s19 + $0x200] sm:$0xff] %vm3479_vm2, %v4926_v36  ;;  %v5268_v15 = vsel %vm3543_vm3, %v5204_v31, 0.0  ;;  %v6714_v31 = vld [vmem:[%s14888_s4 + $0x148] sm:$0xff] }
 0x4dc   : > { %6672 = vst.msk [vmem:[%s12992_s19 + $0x208] sm:$0x1] %vm3543_vm3, %v4927_v6  ;;  %v14211_v52 = vpop.permute.xlu1 %5452  ;;  %v5269_v36 = vadd.f32 %v5268_v15, %v5267_v24  ;;  %v5373_v30 = vadd.f32 %v5372_v1, %v5371_v25 }
 0x4dd   : > { %v14213_v26 = vpop.permute.xlu0 %5457  ;;  %5838 = vperm.xlu1 %6832, %v5679_v48   ;;  %v6710_v48 = vld [vmem:[%s14888_s4 + $0x128] sm:$0xff] }
 0x4de   : > { %5843 = vperm.xlu0 %6831, %v5680_v34   ;;  %v5270_v34 = vrot.slane %v5269_v36, 4  ;;  %v5374_v16 = vrot.slane %v5373_v30, 4 }
 0x4e0   : > { %v14227_v18 = vpop.permute.xlu1 %5462  ;;  %v5271_v7 = vadd.f32 %v5270_v34, %v5269_v36 }
 0x4e1   : > { %v14229_v19 = vpop.permute.xlu0 %5467  ;;  %5982 = vperm.xlu1 %6832, %v6706_v63   ;;  %v5375_v63 = vadd.f32 %v5374_v16, %v5373_v30 }
 0x4e2   : > { %5987 = vperm.xlu0 %6831, %v6707_v29   ;;  %v5272_v23 = vrot.slane %v5271_v7, 2 }
 0x4e3   : > { %v5376_v24 = vrot.slane %v5375_v63, 2 }
 0x4e4   : > { %v14239_v9 = vpop.permute.xlu1 %5472  ;;  %v5273_v1 = vadd.f32 %v5272_v23, %v5271_v7  ;;  %v6720_v7 = vld [vmem:[%s14888_s4 + $0x178] sm:$0xff] }
 0x4e5   : > { %v14241_v6 = vpop.permute.xlu0 %5477  ;;  %5992 = vperm.xlu1 %6832, %v6708_v42   ;;  %v6716_v42 = vld [vmem:[%s14888_s4 + $0x158] sm:$0xff]  ;;  %v5377_v36 = vadd.f32 %v5376_v24, %v5375_v63  ;;  %v6721_v63 = vld [vmem:[%s14888_s4 + $0x180] sm:$0xff] }
 0x4e6   : > { %5997 = vperm.xlu0 %6831, %v6709_v56   ;;  %v6717_v56 = vld [vmem:[%s14888_s4 + $0x160] sm:$0xff]  ;;  %v5274_v16 = vrot.slane %v5273_v1, 1 }
 0x4e8   : > { %v14249_v50 = vpop.permute.xlu1 %5482 }
 0x4e9   : > { %v14251_v40 = vpop.permute.xlu0 %5487  ;;  %6002 = vperm.xlu1 %6832, %v6710_v48   ;;  %v6718_v48 = vld [vmem:[%s14888_s4 + $0x168] sm:$0xff] }
 0x4ea   : > { %6007 = vperm.xlu0 %6831, %v6711_v60   ;;  %v6719_v60 = vld [vmem:[%s14888_s4 + $0x170] sm:$0xff] }
 0x4ec   : > { %v14259_v14 = vpop.permute.xlu1 %5492 }
 0x4ed   : > { %v14261_v29 = vpop.permute.xlu0 %5497  ;;  %6012 = vperm.xlu1 %6832, %v6712_v53   ;;  %v5378_v53 = vrot.slane %v5377_v36, 1 }
 0x4ee   : > { %6017 = vperm.xlu0 %6831, %v6713_v11  }
 0x4ef   : > { %v5379_v23 = vadd.f32 %v5378_v53, %v5377_v36  ;;  %v6725_v36 = vld [vmem:[%s14888_s4 + $0x1a0] sm:$0xff] }
 0x4f0   : > { %v14269_v43 = vpop.permute.xlu1 %5502 }
 0x4f1   : > { %v14271_v25 = vpop.permute.xlu0 %5507  ;;  %6022 = vperm.xlu1 %6832, %v6714_v31  }
 0x4f2   : > { %6027 = vperm.xlu0 %6831, %v6715_v62   ;;  %v5275_v62 = vadd.f32 %v5274_v16, %v5273_v1  ;;  %v6724_v1 = vld [vmem:[%s14888_s4 + $0x198] sm:$0xff] }
 0x4f4   : > { %v14279_v15 = vpop.permute.xlu1 %5512 }
 0x4f5   : > { %v14281_v30 = vpop.permute.xlu0 %5517  ;;  %6032 = vperm.xlu1 %6832, %v6716_v42   ;;  %v6722_v42 = vld [vmem:[%s14888_s4 + $0x188] sm:$0xff] }
 0x4f6   : > { %6037 = vperm.xlu0 %6831, %v6717_v56   ;;  %v6723_v56 = vld [vmem:[%s14888_s4 + $0x190] sm:$0xff] }
 0x4f8   : > { %v14289_v34 = vpop.permute.xlu1 %5522 }
 0x4f9   : > { %v14291_v11 = vpop.permute.xlu0 %5527  ;;  %6042 = vperm.xlu1 %6832, %v6718_v48  }
 0x4fa   : > { %6047 = vperm.xlu0 %6831, %v6719_v60   ;;  %v5380_v60 = vadd.f32 %v5379_v23, %v5275_v62  ;;  %v6727_v62 = vld [vmem:[%s14888_s4 + $0x1b0] sm:$0xff] }
 0x4fc   : > { %v14299_v31 = vpop.permute.xlu1 %5532  ;;  %v5381_v53 = vmul.f32 0.0019455253, %v5380_v60  ;;  %v6728_v60 = vld [vmem:[%s14888_s4 + $0x1b8] sm:$0xff] }
 0x4fd   : > { %v14301_v24 = vpop.permute.xlu0 %5537  ;;  %6052 = vperm.xlu1 %6832, %v6720_v7  }
 0x4fe   : > { %6057 = vperm.xlu0 %6831, %v6721_v63   ;;  %v6726_v63 = vld [vmem:[%s14888_s4 + $0x1a8] sm:$0xff] }
 0x500   : > { %v14309_v48 = vpop.permute.xlu1 %5542 }
 0x501   : > { %v14311_v28 = vpop.permute.xlu0 %5547  ;;  %6062 = vperm.xlu1 %6832, %v6722_v42   ;;  %v5382_v42 = vadd.f32 1e-05, %v5381_v53  ;;  %v6730_v53 = vld [vmem:[%s14888_s4 + $0x1c8] sm:$0xff] }
 0x502   : > { %6067 = vperm.xlu0 %6831, %v6723_v56  }
 0x503   : > { %6901 = vrsqrt.f32 %v5382_v42  ;;  %v6732_v42 = vld [vmem:[%s14888_s4 + $0x1d8] sm:$0xff] }
 0x504   : > { %v14319_v16 = vpop.permute.xlu1 %5552 }
 0x505   : > { %v14321_v7 = vpop.permute.xlu0 %5557  ;;  %6072 = vperm.xlu1 %6832, %v6724_v1   ;;  %v6729_v1 = vld [vmem:[%s14888_s4 + $0x1c0] sm:$0xff] }
 0x506   : > { %6077 = vperm.xlu0 %6831, %v6725_v36  }
 0x508   : > { %v14329_v23 = vpop.permute.xlu1 %5562 }
 0x509   : > { %v14331_v56 = vpop.permute.xlu0 %5567  ;;  %6082 = vperm.xlu1 %6832, %v6726_v63   ;;  %v6731_v63 = vld [vmem:[%s14888_s4 + $0x1d0] sm:$0xff] }
 0x50a   : > { %6087 = vperm.xlu0 %6831, %v6727_v62  }
 0x50c   : > { %v14339_v36 = vpop.permute.xlu1 %5572 }
 0x50d   : > { %v14341_v49 = vpop.permute.xlu0 %5577  ;;  %6092 = vperm.xlu1 %6832, %v6728_v60   ;;  %v6733_v60 = vld [vmem:[%s14888_s4 + $0x1e0] sm:$0xff] }
 0x50e   : > { %6097 = vperm.xlu0 %6831, %v6729_v1  }
 0x510   : > { %v14349_v62 = vpop.permute.xlu1 %5582 }
 0x511   : > { %v14351_v8 = vpop.permute.xlu0 %5587  ;;  %6102 = vperm.xlu1 %6832, %v6730_v53   ;;  %v14366_v53 = vpop.eup %6901 }
 0x512   : > { %6107 = vperm.xlu0 %6831, %v6731_v63   ;;  %v6735_v63 = vld [vmem:[%s14888_s4 + $0x1f0] sm:$0xff]  ;;  %v5384_v32 = vmul.f32 %v14366_v53, %v16769_v13  ;;  %v16771_v13 = vld [vmem:[#allocation64_spill] sm:$0xff] }
 0x514   : > { %v14359_v1 = vpop.permute.xlu1 %5592  ;;  %v5615_v4 = vmul.f32 %v14211_v52, %v5384_v32  ;;  %v6739_v32 = vld [vmem:[%s14889_s5 + $0x108] sm:$0xff] }
 0x515   : > { %v14361_v57 = vpop.permute.xlu0 %5597  ;;  %6112 = vperm.xlu1 %6832, %v6732_v42   ;;  %v6736_v42 = vld [vmem:[%s14888_s4 + $0x1f8] sm:$0xff] }
 0x516   : > { %6117 = vperm.xlu0 %6831, %v6733_v60   ;;  %v6737_v60 = vld [vmem:[%s14888_s4 + $0x200] sm:$0xff] }
 0x518   : > { %v14371_v0 = vpop.permute.xlu1 %5602 }
 0x519   : > { %v14373_v44 = vpop.permute.xlu0 %5607  ;;  %6122 = vperm.xlu1 %6832, %v6734_v51   ;;  %v5385_v51 = vmul.f32 %v14366_v53, %v16770_v2 }
 0x51a   : > { %6127 = vperm.xlu0 %6831, %v6735_v63   ;;  %v5386_v63 = vmul.f32 %v14366_v53, %v16771_v13  ;;  %v16773_v13 = vld [vmem:[#allocation233_spill] sm:$0xff] }
 0x51b   : > { %v5616_v35 = vmul.f32 %v14213_v26, %v5385_v51  ;;  %v5388_v20 = vmul.f32 %v14366_v53, %v16773_v13  ;;  %v6740_v51 = vld [vmem:[%s14889_s5 + $0x110] sm:$0xff] }
 0x51c   : > { %v14384_v12 = vpop.permute.xlu1 %5612  ;;  %v5617_v2 = vmul.f32 %v14227_v18, %v5386_v63  ;;  %v16774_v63 = vld [vmem:[#allocation238_spill] sm:$0xff] }
 0x51d   : > { %v5684_v54 = vpop.permute.xlu0 %5683  ;;  %6132 = vperm.xlu1 %6832, %v6736_v42   ;;  %v16772_v42 = vld [vmem:[#allocation66_spill] sm:$0xff] }
 0x51e   : > { %v5846_v10 = vadd.f32 %v5684_v54, %v5615_v4  ;;  %6137 = vperm.xlu0 %6831, %v6737_v60   ;;  %v5387_v54 = vmul.f32 %v14366_v53, %v16772_v42  ;;  %v16775_v42 = vld [vmem:[#allocation67_spill] sm:$0xff] }
 0x520   : > { %6673 = vst.msk [vmem:[%s12992_s19 + $0x210] sm:$0xff] %vm3479_vm2, %v5846_v10  ;;  %v5689_v52 = vpop.permute.xlu1 %5688  ;;  %v5618_v18 = vmul.f32 %v14229_v19, %v5387_v54  ;;  %v5390_v19 = vmul.f32 %v14366_v53, %v16775_v42  ;;  %v16778_v42 = vld [vmem:[#allocation75_spill] sm:$0xff] }
 0x521   : > { %v5847_v4 = vadd.f32 %v5689_v52, %v5616_v35  ;;  %v5694_v60 = vpop.permute.xlu0 %5693  ;;  %6142 = vperm.xlu1 %6832, %v6738_v39   ;;  %v6741_v35 = vld [vmem:[%s14889_s5 + $0x118] sm:$0xff]  ;;  %v5619_v39 = vmul.f32 %v14239_v9, %v5388_v20  ;;  %v6743_v9 = vld [vmem:[%s14889_s5 + $0x128] sm:$0xff] }
 0x522   : > { %v5848_v26 = vadd.f32 %v5694_v60, %v5617_v2  ;;  %6214 = vperm.xlu0 %6831, %v6739_v32   ;;  %v5389_v32 = vmul.f32 %v14366_v53, %v16774_v63  ;;  %v5621_v60 = vmul.f32 %v14249_v50, %v5390_v19  ;;  %v6744_v63 = vld [vmem:[%s14889_s5 + $0x130] sm:$0xff]  ;;  %v5393_v19 = vmul.f32 %v14366_v53, %v16778_v42  ;;  %v16782_v42 = vld [vmem:[#allocation74_spill] sm:$0xff] }
 0x523   : > { %6674 = vst.msk [vmem:[%s12992_s19 + $0x218] sm:$0xff] %vm3479_vm2, %v5847_v4  ;;  %v6742_v4 = vld [vmem:[%s14889_s5 + $0x120] sm:$0xff] }
 0x524   : > { %6675 = vst.msk [vmem:[%s12992_s19 + $0x220] sm:$0xff] %vm3479_vm2, %v5848_v26  ;;  %v5699_v10 = vpop.permute.xlu1 %5698  ;;  %v5620_v20 = vmul.f32 %v14241_v6, %v5389_v32  ;;  %v16776_v26 = vld [vmem:[#allocation69_spill] sm:$0xff]  ;;  %v6745_v32 = vld [vmem:[%s14889_s5 + $0x138] sm:$0xff] }
 0x525   : > { %v5849_v2 = vadd.f32 %v5699_v10, %v5618_v18  ;;  %v5704_v52 = vpop.permute.xlu0 %5703  ;;  %6219 = vperm.xlu1 %6832, %v6740_v51   ;;  %v5391_v51 = vmul.f32 %v14366_v53, %v16776_v26 }
 0x526   : > { %v5850_v54 = vadd.f32 %v5704_v52, %v5619_v39  ;;  %6224 = vperm.xlu0 %6831, %v6741_v35   ;;  %v16777_v39 = vld [vmem:[#allocation76_spill] sm:$0xff] }
 0x527   : > { %6676 = vst.msk [vmem:[%s12992_s19 + $0x228] sm:$0xff] %vm3479_vm2, %v5849_v2  ;;  %v5392_v6 = vmul.f32 %v14366_v53, %v16777_v39  ;;  %v5622_v50 = vmul.f32 %v14251_v40, %v5391_v51 }
 0x528   : > { %6677 = vst.msk [vmem:[%s12992_s19 + $0x230] sm:$0xff] %vm3479_vm2, %v5850_v54  ;;  %v5709_v13 = vpop.permute.xlu1 %5708 }
 0x529   : > { %v5851_v18 = vadd.f32 %v5709_v13, %v5620_v20  ;;  %v5714_v35 = vpop.permute.xlu0 %5713  ;;  %6229 = vperm.xlu1 %6832, %v6742_v4   ;;  %v5623_v2 = vmul.f32 %v14259_v14, %v5392_v6  ;;  %v16779_v20 = vld [vmem:[#allocation43_spill] sm:$0xff]  ;;  %v5624_v14 = vmul.f32 %v14261_v29, %v5393_v19  ;;  %v6747_v13 = vld [vmem:[%s14889_s5 + $0x148] sm:$0xff]  ;;  %v5397_v19 = vmul.f32 %v14366_v53, %v16782_v42 }
 0x52a   : > { %v5852_v10 = vadd.f32 %v5714_v35, %v5621_v60  ;;  %6234 = vperm.xlu0 %6831, %v6743_v9   ;;  %v5394_v40 = vmul.f32 %v14366_v53, %v16779_v20  ;;  %v6746_v60 = vld [vmem:[%s14889_s5 + $0x140] sm:$0xff]  ;;  %v16783_v20 = vld [vmem:[#allocation48_spill] sm:$0xff]  ;;  %v5403_v42 = vmul.f32 %v14366_v53, %v13806_v22 }
 0x52b   : > { %6678 = vst.msk [vmem:[%s12992_s19 + $0x238] sm:$0xff] %vm3479_vm2, %v5851_v18  ;;  %v16780_v18 = vld [vmem:[#allocation150_spill] sm:$0xff]  ;;  %v6757_v22 = vld [vmem:[%s14889_s5 + $0x198] sm:$0xff] }
 0x52c   : > { %6679 = vst.msk [vmem:[%s12992_s19 + $0x240] sm:$0xff] %vm3479_vm2, %v5852_v10  ;;  %v5719_v52 = vpop.permute.xlu1 %5718  ;;  %v5625_v26 = vmul.f32 %v14269_v43, %v5394_v40  ;;  %v5395_v35 = vmul.f32 %v14366_v53, %v16780_v18  ;;  %v16781_v10 = vld [vmem:[#allocation222_spill] sm:$0xff] }
 0x52d   : > { %v5853_v54 = vadd.f32 %v5719_v52, %v5622_v50  ;;  %v5724_v4 = vpop.permute.xlu0 %5723  ;;  %6239 = vperm.xlu1 %6832, %v6744_v63   ;;  %v5396_v29 = vmul.f32 %v14366_v53, %v16781_v10  ;;  %v6748_v50 = vld [vmem:[%s14889_s5 + $0x150] sm:$0xff]  ;;  %v6753_v10 = vld [vmem:[%s14889_s5 + $0x178] sm:$0xff] }
 0x52e   : > { %v5854_v9 = vadd.f32 %v5724_v4, %v5623_v2  ;;  %6244 = vperm.xlu0 %6831, %v6745_v32   ;;  %v5626_v43 = vmul.f32 %v14271_v25, %v5395_v35  ;;  %v6749_v32 = vld [vmem:[%s14889_s5 + $0x158] sm:$0xff]  ;;  %v5398_v25 = vmul.f32 %v14366_v53, %v16783_v20  ;;  %v6756_v20 = vld [vmem:[%s14889_s5 + $0x190] sm:$0xff] }
 0x52f   : > { %6680 = vst.msk [vmem:[%s12992_s19 + $0x248] sm:$0xff] %vm3479_vm2, %v5853_v54  ;;  %v5627_v2 = vmul.f32 %v14279_v15, %v5396_v29  ;;  %v5628_v15 = vmul.f32 %v14281_v30, %v5397_v19  ;;  %v5400_v30 = vmul.f32 %v14366_v53, %v13718_v5 }
 0x530   : > { %6681 = vst.msk [vmem:[%s12992_s19 + $0x250] sm:$0xff] %vm3479_vm2, %v5854_v9  ;;  %v5729_v51 = vpop.permute.xlu1 %5728  ;;  %v6750_v9 = vld [vmem:[%s14889_s5 + $0x160] sm:$0xff] }
 0x531   : > { %v5855_v39 = vadd.f32 %v5729_v51, %v5624_v14  ;;  %v5734_v6 = vpop.permute.xlu0 %5733  ;;  %6249 = vperm.xlu1 %6832, %v6746_v60   ;;  %v6751_v60 = vld [vmem:[%s14889_s5 + $0x168] sm:$0xff]  ;;  %v5629_v14 = vmul.f32 %v14289_v34, %v5398_v25  ;;  %v5631_v29 = vmul.f32 %v14299_v31, %v5400_v30  ;;  %v6760_v30 = vld [vmem:[%s14889_s5 + $0x1b0] sm:$0xff] }
 0x532   : > { %v5856_v63 = vadd.f32 %v5734_v6, %v5625_v26  ;;  %6254 = vperm.xlu0 %6831, %v6747_v13   ;;  %v16784_v26 = vld [vmem:[#allocation246_spill] sm:$0xff]  ;;  %v6752_v6 = vld [vmem:[%s14889_s5 + $0x170] sm:$0xff] }
 0x533   : > { %6682 = vst.msk [vmem:[%s12992_s19 + $0x258] sm:$0xff] %vm3479_vm2, %v5855_v39  ;;  %v5399_v51 = vmul.f32 %v14366_v53, %v16784_v26  ;;  %v5407_v26 = vmul.f32 %v14366_v53, %v13926_v17  ;;  %v6761_v17 = vld [vmem:[%s14889_s5 + $0x1b8] sm:$0xff] }
 0x534   : > { %6683 = vst.msk [vmem:[%s12992_s19 + $0x260] sm:$0xff] %vm3479_vm2, %v5856_v63  ;;  %v5739_v52 = vpop.permute.xlu1 %5738  ;;  %v5401_v63 = vmul.f32 %v14366_v53, %v13746_v61  ;;  %v6755_v61 = vld [vmem:[%s14889_s5 + $0x188] sm:$0xff] }
 0x535   : > { %v5857_v54 = vadd.f32 %v5739_v52, %v5626_v43  ;;  %v5744_v4 = vpop.permute.xlu0 %5743  ;;  %6259 = vperm.xlu1 %6832, %v6748_v50   ;;  %v5630_v34 = vmul.f32 %v14291_v11, %v5399_v51  ;;  %v5402_v11 = vmul.f32 %v14366_v53, %v13776_v21 }
 0x536   : > { %v5858_v40 = vadd.f32 %v5744_v4, %v5627_v2  ;;  %6264 = vperm.xlu0 %6831, %v6749_v32   ;;  %v6754_v2 = vld [vmem:[%s14889_s5 + $0x180] sm:$0xff]  ;;  %v5632_v31 = vmul.f32 %v14301_v24, %v5401_v63  ;;  %v5404_v24 = vmul.f32 %v14366_v53, %v13836_v46 }
 0x537   : > { %6684 = vst.msk [vmem:[%s12992_s19 + $0x268] sm:$0xff] %vm3479_vm2, %v5857_v54  ;;  %v5633_v52 = vmul.f32 %v14309_v48, %v5402_v11  ;;  %v5634_v48 = vmul.f32 %v14311_v28, %v5403_v42  ;;  %v5406_v28 = vmul.f32 %v14366_v53, %v13896_v37 }
 0x538   : > { %6685 = vst.msk [vmem:[%s12992_s19 + $0x270] sm:$0xff] %vm3479_vm2, %v5858_v40  ;;  %v5749_v13 = vpop.permute.xlu1 %5748  ;;  %v5635_v25 = vmul.f32 %v14319_v16, %v5404_v24  ;;  %v5405_v40 = vmul.f32 %v14366_v53, %v13866_v41  ;;  %v6759_v41 = vld [vmem:[%s14889_s5 + $0x1a8] sm:$0xff]  ;;  %v5415_v24 = vmul.f32 %v14366_v53, %v14166_v58  ;;  %v6769_v58 = vld [vmem:[%s14889_s5 + $0x1f8] sm:$0xff] }
 0x539   : > { %v5859_v18 = vadd.f32 %v5749_v13, %v5628_v15  ;;  %v5754_v35 = vpop.permute.xlu0 %5753  ;;  %6269 = vperm.xlu1 %6832, %v6750_v9   ;;  %v5637_v13 = vmul.f32 %v14329_v23, %v5406_v28  ;;  %v5638_v23 = vmul.f32 %v14331_v56, %v5407_v26  ;;  %v5410_v56 = vmul.f32 %v14366_v53, %v14016_v45  ;;  %v16785_v28 = vld [vmem:[#allocation55_spill] sm:$0xff] }
 0x53a   : > { %v5860_v39 = vadd.f32 %v5754_v35, %v5629_v14  ;;  %6274 = vperm.xlu0 %6831, %v6751_v60   ;;  %v6758_v14 = vld [vmem:[%s14889_s5 + $0x1a0] sm:$0xff]  ;;  %v5636_v16 = vmul.f32 %v14321_v7, %v5405_v40  ;;  %v5408_v7 = vmul.f32 %v14366_v53, %v13956_v55 }
 0x53b   : > { %6686 = vst.msk [vmem:[%s12992_s19 + $0x278] sm:$0xff] %vm3479_vm2, %v5859_v18  ;;  %v5641_v63 = vmul.f32 %v14349_v62, %v5410_v56  ;;  %v16789_v56 = vld [vmem:[#allocation146_spill] sm:$0xff] }
 0x53c   : > { %6687 = vst.msk [vmem:[%s12992_s19 + $0x280] sm:$0xff] %vm3479_vm2, %v5860_v39  ;;  %v5759_v5 = vpop.permute.xlu1 %5758  ;;  %v5639_v39 = vmul.f32 %v14339_v36, %v5408_v7  ;;  %v16787_v7 = vld [vmem:[#allocation234_spill] sm:$0xff] }
 0x53d   : > { %v5861_v50 = vadd.f32 %v5759_v5, %v5630_v34  ;;  %v5764_v43 = vpop.permute.xlu0 %5763  ;;  %6279 = vperm.xlu1 %6832, %v6752_v6   ;;  %v5409_v6 = vmul.f32 %v14366_v53, %v13986_v47  ;;  %v6762_v5 = vld [vmem:[%s14889_s5 + $0x1c0] sm:$0xff]  ;;  %v6763_v47 = vld [vmem:[%s14889_s5 + $0x1c8] sm:$0xff] }
 0x53e   : > { %v5862_v32 = vadd.f32 %v5764_v43, %v5631_v29  ;;  %6284 = vperm.xlu0 %6831, %v6753_v10  }
 0x53f   : > { %6688 = vst.msk [vmem:[%s12992_s19 + $0x288] sm:$0xff] %vm3479_vm2, %v5861_v50  ;;  %v5640_v36 = vmul.f32 %v14341_v49, %v5409_v6  ;;  %v5411_v50 = vmul.f32 %v14366_v53, %v14046_v3  ;;  %v5412_v49 = vmul.f32 %v14366_v53, %v14076_v38  ;;  %v6765_v3 = vld [vmem:[%s14889_s5 + $0x1d8] sm:$0xff] }
 0x540   : > { %6689 = vst.msk [vmem:[%s12992_s19 + $0x290] sm:$0xff] %vm3479_vm2, %v5862_v32  ;;  %v5769_v21 = vpop.permute.xlu1 %5768 }
 0x541   : > { %v5863_v19 = vadd.f32 %v5769_v21, %v5632_v31  ;;  %v5774_v54 = vpop.permute.xlu0 %5773  ;;  %6289 = vperm.xlu1 %6832, %v6754_v2   ;;  %v6764_v2 = vld [vmem:[%s14889_s5 + $0x1d0] sm:$0xff]  ;;  %v5642_v62 = vmul.f32 %v14351_v8, %v5411_v50  ;;  %v5643_v31 = vmul.f32 %v14359_v1, %v5412_v49  ;;  %v5414_v8 = vmul.f32 %v14366_v53, %v14136_v59  ;;  %v16791_v49 = vld [vmem:[#allocation321_spill] sm:$0xff] }
 0x542   : > { %v5864_v4 = vadd.f32 %v5774_v54, %v5633_v52  ;;  %6294 = vperm.xlu0 %6831, %v6755_v61   ;;  %v5413_v61 = vmul.f32 %v14366_v53, %v14106_v33  ;;  %v6767_v33 = vld [vmem:[%s14889_s5 + $0x1e8] sm:$0xff] }
 0x543   : > { %6690 = vst.msk [vmem:[%s12992_s19 + $0x298] sm:$0xff] %vm3479_vm2, %v5863_v19  ;;  %v6766_v19 = vld [vmem:[%s14889_s5 + $0x1e0] sm:$0xff]  ;;  %v5645_v54 = vmul.f32 %v14371_v0, %v5414_v8  ;;  %v6768_v0 = vld [vmem:[%s14889_s5 + $0x1f0] sm:$0xff] }
 0x544   : > { %6691 = vst.msk [vmem:[%s12992_s19 + $0x2a0] sm:$0xff] %vm3479_vm2, %v5864_v4  ;;  %v5779_v46 = vpop.permute.xlu1 %5778  ;;  %v5644_v1 = vmul.f32 %v14361_v57, %v5413_v61  ;;  %v5416_v57 = vmul.f32 %v14366_v53, %v14192_v27  ;;  %v16793_v8 = vld [vmem:[#allocation89_spill] sm:$0xff] }
 0x545   : > { %v5865_v9 = vadd.f32 %v5779_v46, %v5634_v48  ;;  %v5784_v15 = vpop.permute.xlu0 %5783  ;;  %6299 = vperm.xlu1 %6832, %v6756_v20  }
 0x546   : > { %v5866_v60 = vadd.f32 %v5784_v15, %v5635_v25  ;;  %6304 = vperm.xlu0 %6831, %v6757_v22   ;;  %v5646_v22 = vmul.f32 %v14373_v44, %v5415_v24  ;;  %v5647_v25 = vmul.f32 %v14384_v12, %v5416_v57  ;;  %v6770_v44 = vld [vmem:[%s14889_s5 + $0x200] sm:$0xff]  ;;  %v6771_v15 = vld [vmem:[%s14889_s5 + $0x208] sm:$0x1]  ;;  %v16795_v57 = vld [vmem:[#allocation180_spill] sm:$0xff] }
 0x547   : > { %6692 = vst.msk [vmem:[%s12992_s19 + $0x2a8] sm:$0xff] %vm3479_vm2, %v5865_v9 }
 0x548   : > { %6693 = vst.msk [vmem:[%s12992_s19 + $0x2b0] sm:$0xff] %vm3479_vm2, %v5866_v60  ;;  %v5789_v37 = vpop.permute.xlu1 %5788  ;;  %v5914_v60 = vmul.f32 %v14366_v53, %v16785_v28 }
 0x549   : > { %v5867_v51 = vadd.f32 %v5789_v37, %v5636_v16  ;;  %v5794_v18 = vpop.permute.xlu0 %5793  ;;  %6309 = vperm.xlu1 %6832, %v6758_v14  }
 0x54a   : > { %v5868_v35 = vadd.f32 %v5794_v18, %v5637_v13  ;;  %6314 = vperm.xlu0 %6831, %v6759_v41   ;;  %v16786_v13 = vld [vmem:[#allocation63_spill] sm:$0xff] }
 0x54b   : > { %6694 = vst.msk [vmem:[%s12992_s19 + $0x2b8] sm:$0xff] %vm3479_vm2, %v5867_v51  ;;  %v5916_v37 = vmul.f32 %v14366_v53, %v16786_v13  ;;  %v16798_v13 = vld [vmem:[#allocation183_spill] sm:$0xff] }
 0x54c   : > { %6695 = vst.msk [vmem:[%s12992_s19 + $0x2c0] sm:$0xff] %vm3479_vm2, %v5868_v35  ;;  %v5799_v55 = vpop.permute.xlu1 %5798  ;;  %v5918_v35 = vmul.f32 %v14366_v53, %v16787_v7 }
 0x54d   : > { %v5869_v34 = vadd.f32 %v5799_v55, %v5638_v23  ;;  %v5804_v10 = vpop.permute.xlu0 %5803  ;;  %6319 = vperm.xlu1 %6832, %v6760_v30  }
 0x54e   : > { %v5870_v29 = vadd.f32 %v5804_v10, %v5639_v39  ;;  %6324 = vperm.xlu0 %6831, %v6761_v17   ;;  %v16788_v39 = vld [vmem:[#allocation241_spill] sm:$0xff] }
 0x54f   : > { %6696 = vst.msk [vmem:[%s12992_s19 + $0x2c8] sm:$0xff] %vm3479_vm2, %v5869_v34  ;;  %v5920_v55 = vmul.f32 %v14366_v53, %v16788_v39 }
 0x550   : > { %6697 = vst.msk [vmem:[%s12992_s19 + $0x2d0] sm:$0xff] %vm3479_vm2, %v5870_v29  ;;  %v5809_v45 = vpop.permute.xlu1 %5808  ;;  %v5922_v29 = vmul.f32 %v14366_v53, %v16789_v56 }
 0x551   : > { %v5871_v43 = vadd.f32 %v5809_v45, %v5640_v36  ;;  %v5814_v11 = vpop.permute.xlu0 %5813  ;;  %6329 = vperm.xlu1 %6832, %v6762_v5  }
 0x552   : > { %v5872_v32 = vadd.f32 %v5814_v11, %v5641_v63  ;;  %6334 = vperm.xlu0 %6831, %v6763_v47   ;;  %v16790_v63 = vld [vmem:[#allocation46_spill] sm:$0xff] }
 0x553   : > { %6698 = vst.msk [vmem:[%s12992_s19 + $0x2d8] sm:$0xff] %vm3479_vm2, %v5871_v43  ;;  %v5924_v45 = vmul.f32 %v14366_v53, %v16790_v63 }
 0x554   : > { %6699 = vst.msk [vmem:[%s12992_s19 + $0x2e0] sm:$0xff] %vm3479_vm2, %v5872_v32  ;;  %v5819_v38 = vpop.permute.xlu1 %5818  ;;  %v5926_v32 = vmul.f32 %v14366_v53, %v16791_v49 }
 0x555   : > { %v5873_v52 = vadd.f32 %v5819_v38, %v5642_v62  ;;  %v5824_v21 = vpop.permute.xlu0 %5823  ;;  %6339 = vperm.xlu1 %6832, %v6764_v2  }
 0x556   : > { %v5874_v42 = vadd.f32 %v5824_v21, %v5643_v31  ;;  %6344 = vperm.xlu0 %6831, %v6765_v3   ;;  %v16792_v31 = vld [vmem:[#allocation320_spill] sm:$0xff] }
 0x557   : > { %6700 = vst.msk [vmem:[%s12992_s19 + $0x2e8] sm:$0xff] %vm3479_vm2, %v5873_v52  ;;  %v5928_v38 = vmul.f32 %v14366_v53, %v16792_v31 }
 0x558   : > { %6701 = vst.msk [vmem:[%s12992_s19 + $0x2f0] sm:$0xff] %vm3479_vm2, %v5874_v42  ;;  %v5829_v59 = vpop.permute.xlu1 %5828  ;;  %v5930_v42 = vmul.f32 %v14366_v53, %v16793_v8 }
 0x559   : > { %v5875_v4 = vadd.f32 %v5829_v59, %v5644_v1  ;;  %v5834_v20 = vpop.permute.xlu0 %5833  ;;  %6349 = vperm.xlu1 %6832, %v6766_v19  }
 0x55a   : > { %v5876_v48 = vadd.f32 %v5834_v20, %v5645_v54  ;;  %6354 = vperm.xlu0 %6831, %v6767_v33   ;;  %v16794_v54 = vld [vmem:[#allocation322_spill] sm:$0xff] }
 0x55b   : > { %6702 = vst.msk [vmem:[%s12992_s19 + $0x2f8] sm:$0xff] %vm3479_vm2, %v5875_v4  ;;  %v5932_v59 = vmul.f32 %v14366_v53, %v16794_v54 }
 0x55c   : > { %6703 = vst.msk [vmem:[%s12992_s19 + $0x300] sm:$0xff] %vm3479_vm2, %v5876_v48  ;;  %v5839_v27 = vpop.permute.xlu1 %5838  ;;  %v5934_v48 = vmul.f32 %v14366_v53, %v16795_v57 }
 0x55d   : > { %v5877_v46 = vadd.f32 %v5839_v27, %v5646_v22  ;;  %v5844_v40 = vpop.permute.xlu0 %5843  ;;  %6359 = vperm.xlu1 %6832, %v6768_v0  }
 0x55e   : > { %v5878_v9 = vadd.f32 %v5844_v40, %v5647_v25  ;;  %6364 = vperm.xlu0 %6831, %v6769_v58   ;;  %v16796_v25 = vld [vmem:[#allocation85_spill] sm:$0xff] }
 0x55f   : > { %6704 = vst.msk [vmem:[%s12992_s19 + $0x308] sm:$0xff] %vm3479_vm2, %v5877_v46  ;;  %v5936_v27 = vmul.f32 %v14366_v53, %v16796_v25 }
 0x560   : > { %6705 = vst.msk [vmem:[%s12992_s19 + $0x310] sm:$0x1] %vm3543_vm3, %v5878_v9  ;;  %v14650_v12 = vpop.permute.xlu1 %5982 }
 0x561   : > { %v5988_v14 = vpop.permute.xlu0 %5987  ;;  %6369 = vperm.xlu1 %6832, %v6770_v44   ;;  %v16797_v44 = vld [vmem:[#allocation11_spill] sm:$0xff] }
 0x562   : > { %v14654_v16 = vmul.f32 %v5988_v14, %v5914_v60  ;;  %6374 = vperm.xlu0 %6831, %v6771_v15   ;;  %v5938_v15 = vmul.f32 %v14366_v53, %v16797_v44 }
 0x564   : > { %v14656_v41 = vpop.permute.xlu1 %5992 }
 0x565   : > { %v5998_v26 = vpop.permute.xlu0 %5997 }
 0x566   : > { %v14660_v51 = vmul.f32 %v5998_v26, %v5916_v37  ;;  %v5940_v37 = vmul.f32 %v14366_v53, %v16798_v13  ;;  %v16805_v13 = vld [vmem:[#allocation243_spill] sm:$0xff] }
 0x568   : > { %v14662_v18 = vpop.permute.xlu1 %6002 }
 0x569   : > { %v6008_v30 = vpop.permute.xlu0 %6007 }
 0x56a   : > { %v14666_v23 = vmul.f32 %v6008_v30, %v5918_v35  ;;  %v16799_v30 = vld [vmem:[#allocation147_spill] sm:$0xff] }
 0x56b   : > { %v5942_v39 = vmul.f32 %v14366_v53, %v16799_v30 }
 0x56c   : > { %v14668_v17 = vpop.permute.xlu1 %6012 }
 0x56d   : > { %v6018_v6 = vpop.permute.xlu0 %6017 }
 0x56e   : > { %v14672_v34 = vmul.f32 %v6018_v6, %v5920_v55 }
 0x570   : > { %v14674_v10 = vpop.permute.xlu1 %6022 }
 0x571   : > { %v6028_v5 = vpop.permute.xlu0 %6027 }
 0x572   : > { %v14678_v36 = vmul.f32 %v6028_v5, %v5922_v29  ;;  %v16800_v29 = vld [vmem:[#allocation79_spill] sm:$0xff] }
 0x573   : > { %v5944_v5 = vmul.f32 %v14366_v53, %v16800_v29 }
 0x574   : > { %v14680_v47 = vpop.permute.xlu1 %6032 }
 0x575   : > { %v6038_v50 = vpop.permute.xlu0 %6037 }
 0x576   : > { %v14684_v43 = vmul.f32 %v6038_v50, %v5924_v45  ;;  %v16801_v45 = vld [vmem:[#allocation58_spill] sm:$0xff] }
 0x577   : > { %v5913_v50 = vmul.f32 %v14366_v53, %v16801_v45 }
 0x578   : > { %v14686_v11 = vpop.permute.xlu1 %6042 }
 0x579   : > { %v6048_v2 = vpop.permute.xlu0 %6047 }
 0x57a   : > { %v14690_v62 = vmul.f32 %v6048_v2, %v5926_v32  ;;  %v6145_v32 = vmul.f32 %v14650_v12, %v5913_v50  ;;  %v16807_v50 = vld [vmem:[#allocation149_spill] sm:$0xff] }
 0x57c   : > { %v14692_v3 = vpop.permute.xlu1 %6052 }
 0x57d   : > { %v6058_v61 = vpop.permute.xlu0 %6057 }
 0x57e   : > { %v14696_v52 = vmul.f32 %v6058_v61, %v5928_v38  ;;  %v16802_v38 = vld [vmem:[#allocation227_spill] sm:$0xff] }
 0x57f   : > { %v5915_v61 = vmul.f32 %v14366_v53, %v16802_v38 }
 0x580   : > { %v14698_v21 = vpop.permute.xlu1 %6062 }
 0x581   : > { %v6068_v19 = vpop.permute.xlu0 %6067 }
 0x582   : > { %v14702_v1 = vmul.f32 %v6068_v19, %v5930_v42  ;;  %v6147_v42 = vmul.f32 %v14656_v41, %v5915_v61 }
 0x584   : > { %v14704_v33 = vpop.permute.xlu1 %6072 }
 0x585   : > { %v6078_v24 = vpop.permute.xlu0 %6077 }
 0x586   : > { %v14708_v4 = vmul.f32 %v6078_v24, %v5932_v59  ;;  %v16803_v24 = vld [vmem:[#allocation229_spill] sm:$0xff] }
 0x587   : > { %v5917_v12 = vmul.f32 %v14366_v53, %v16803_v24  ;;  %v16809_v24 = vld [vmem:[#allocation56_spill] sm:$0xff] }
 0x588   : > { %v14710_v20 = vpop.permute.xlu1 %6082 }
 0x589   : > { %v6088_v0 = vpop.permute.xlu0 %6087 }
 0x58a   : > { %v14714_v22 = vmul.f32 %v6088_v0, %v5934_v48  ;;  %v6149_v48 = vmul.f32 %v14662_v18, %v5917_v12 }
 0x58c   : > { %v14716_v58 = vpop.permute.xlu1 %6092 }
 0x58d   : > { %v6098_v46 = vpop.permute.xlu0 %6097 }
 0x58e   : > { %v14720_v40 = vmul.f32 %v6098_v46, %v5936_v27  ;;  %v16804_v27 = vld [vmem:[#allocation235_spill] sm:$0xff] }
 0x590   : > { %v14722_v9 = vpop.permute.xlu1 %6102 }
 0x591   : > { %v6108_v28 = vpop.permute.xlu0 %6107 }
 0x592   : > { %v14726_v60 = vmul.f32 %v6108_v28, %v5938_v15 }
 0x594   : > { %v14728_v14 = vpop.permute.xlu1 %6112 }
 0x595   : > { %v6118_v26 = vpop.permute.xlu0 %6117 }
 0x596   : > { %v14732_v7 = vmul.f32 %v6118_v26, %v5940_v37 }
 0x598   : > { %v14734_v35 = vpop.permute.xlu1 %6122 }
 0x599   : > { %v6128_v55 = vpop.permute.xlu0 %6127 }
 0x59a   : > { %v14738_v6 = vmul.f32 %v6128_v55, %v5942_v39  ;;  %v16806_v55 = vld [vmem:[#allocation44_spill] sm:$0xff] }
 0x59c   : > { %v14740_v56 = vpop.permute.xlu1 %6132 }
 0x59d   : > { %v6138_v63 = vpop.permute.xlu0 %6137 }
 0x59e   : > { %v14746_v49 = vmul.f32 %v6138_v63, %v5944_v5 }
 0x5a0   : > { %v14749_v2 = vpop.permute.xlu1 %6142 }
 0x5a1   : > { %v6215_v31 = vpop.permute.xlu0 %6214 }
 0x5a2   : > { %v6377_v8 = vadd.f32 %v6215_v31, %v6145_v32 }
 0x5a4   : > { %6772 = vst.msk [vmem:[%s12992_s19 + $0x318] sm:$0xff] %vm3479_vm2, %v6377_v8  ;;  %v6220_v19 = vpop.permute.xlu1 %6219  ;;  %v16808_v8 = vld [vmem:[#allocation223_spill] sm:$0xff] }
 0x5a5   : > { %v6378_v54 = vadd.f32 %v6220_v19, %v14654_v16  ;;  %v6225_v59 = vpop.permute.xlu0 %6224  ;;  %v5919_v16 = vmul.f32 %v14366_v53, %v16804_v27 }
 0x5a6   : > { %v6379_v57 = vadd.f32 %v6225_v59, %v6147_v42 }
 0x5a7   : > { %6773 = vst.msk [vmem:[%s12992_s19 + $0x320] sm:$0xff] %vm3479_vm2, %v6378_v54  ;;  %v6151_v44 = vmul.f32 %v14668_v17, %v5919_v16 }
 0x5a8   : > { %6774 = vst.msk [vmem:[%s12992_s19 + $0x328] sm:$0xff] %vm3479_vm2, %v6379_v57  ;;  %v6230_v41 = vpop.permute.xlu1 %6229 }
 0x5a9   : > { %v6380_v0 = vadd.f32 %v6230_v41, %v14660_v51  ;;  %v6235_v25 = vpop.permute.xlu0 %6234  ;;  %v5921_v51 = vmul.f32 %v14366_v53, %v16805_v13 }
 0x5aa   : > { %v6381_v46 = vadd.f32 %v6235_v25, %v6149_v48 }
 0x5ab   : > { %6775 = vst.msk [vmem:[%s12992_s19 + $0x330] sm:$0xff] %vm3479_vm2, %v6380_v0  ;;  %v6153_v26 = vmul.f32 %v14674_v10, %v5921_v51  ;;  %v16810_v0 = vld [vmem:[#allocation91_spill] sm:$0xff] }
 0x5ac   : > { %6776 = vst.msk [vmem:[%s12992_s19 + $0x338] sm:$0xff] %vm3479_vm2, %v6381_v46  ;;  %v6240_v18 = vpop.permute.xlu1 %6239  ;;  %v16812_v51 = vld [vmem:[#allocation323_spill] sm:$0xff] }
 0x5ad   : > { %v6382_v15 = vadd.f32 %v6240_v18, %v14666_v23  ;;  %v6245_v28 = vpop.permute.xlu0 %6244  ;;  %v5923_v23 = vmul.f32 %v14366_v53, %v16806_v55 }
 0x5ae   : > { %v6383_v37 = vadd.f32 %v6245_v28, %v6151_v44  ;;  %v16811_v44 = vld [vmem:[#allocation94_spill] sm:$0xff] }
 0x5af   : > { %6777 = vst.msk [vmem:[%s12992_s19 + $0x340] sm:$0xff] %vm3479_vm2, %v6382_v15  ;;  %v6155_v5 = vmul.f32 %v14680_v47, %v5923_v23 }
 0x5b0   : > { %6778 = vst.msk [vmem:[%s12992_s19 + $0x348] sm:$0xff] %vm3479_vm2, %v6383_v37  ;;  %v6250_v17 = vpop.permute.xlu1 %6249 }
 0x5b1   : > { %v6384_v30 = vadd.f32 %v6250_v17, %v14672_v34  ;;  %v6255_v39 = vpop.permute.xlu0 %6254  ;;  %v5925_v34 = vmul.f32 %v14366_v53, %v16807_v50 }
 0x5b2   : > { %v6385_v29 = vadd.f32 %v6255_v39, %v6153_v26  ;;  %v16813_v39 = vld [vmem:[#allocation90_spill] sm:$0xff] }
 0x5b3   : > { %6779 = vst.msk [vmem:[%s12992_s19 + $0x350] sm:$0xff] %vm3479_vm2, %v6384_v30  ;;  %v6157_v31 = vmul.f32 %v14686_v11, %v5925_v34 }
 0x5b4   : > { %6780 = vst.msk [vmem:[%s12992_s19 + $0x358] sm:$0xff] %vm3479_vm2, %v6385_v29  ;;  %v6260_v10 = vpop.permute.xlu1 %6259 }
 0x5b5   : > { %v6386_v63 = vadd.f32 %v6260_v10, %v14678_v36  ;;  %v6265_v45 = vpop.permute.xlu0 %6264  ;;  %v5927_v36 = vmul.f32 %v14366_v53, %v16808_v8  ;;  %v16814_v10 = vld [vmem:[#allocation144_spill] sm:$0xff] }
 0x5b6   : > { %v6387_v32 = vadd.f32 %v6265_v45, %v6155_v5  ;;  %v16816_v8 = vld [vmem:[#allocation84_spill] sm:$0xff] }
 0x5b7   : > { %6781 = vst.msk [vmem:[%s12992_s19 + $0x360] sm:$0xff] %vm3479_vm2, %v6386_v63  ;;  %v6159_v19 = vmul.f32 %v14692_v3, %v5927_v36 }
 0x5b8   : > { %6782 = vst.msk [vmem:[%s12992_s19 + $0x368] sm:$0xff] %vm3479_vm2, %v6387_v32  ;;  %v6270_v47 = vpop.permute.xlu1 %6269  ;;  %v16815_v32 = vld [vmem:[#allocation13_spill] sm:$0xff] }
 0x5b9   : > { %v6388_v38 = vadd.f32 %v6270_v47, %v14684_v43  ;;  %v6275_v61 = vpop.permute.xlu0 %6274  ;;  %v5929_v43 = vmul.f32 %v14366_v53, %v16809_v24 }
 0x5ba   : > { %v6389_v42 = vadd.f32 %v6275_v61, %v6157_v31 }
 0x5bb   : > { %6783 = vst.msk [vmem:[%s12992_s19 + $0x370] sm:$0xff] %vm3479_vm2, %v6388_v38  ;;  %v6161_v57 = vmul.f32 %v14698_v21, %v5929_v43 }
 0x5bc   : > { %6784 = vst.msk [vmem:[%s12992_s19 + $0x378] sm:$0xff] %vm3479_vm2, %v6389_v42  ;;  %v6280_v11 = vpop.permute.xlu1 %6279 }
 0x5bd   : > { %v6390_v54 = vadd.f32 %v6280_v11, %v14690_v62  ;;  %v6285_v59 = vpop.permute.xlu0 %6284  ;;  %v5931_v62 = vmul.f32 %v14366_v53, %v16810_v0 }
 0x5be   : > { %v6391_v12 = vadd.f32 %v6285_v59, %v6159_v19 }
 0x5bf   : > { %6785 = vst.msk [vmem:[%s12992_s19 + $0x380] sm:$0xff] %vm3479_vm2, %v6390_v54  ;;  %v6163_v27 = vmul.f32 %v14704_v33, %v5931_v62  ;;  %v16817_v54 = vld [vmem:[#allocation83_spill] sm:$0xff] }
 0x5c0   : > { %6786 = vst.msk [vmem:[%s12992_s19 + $0x388] sm:$0xff] %vm3479_vm2, %v6391_v12  ;;  %v6290_v3 = vpop.permute.xlu1 %6289 }
 0x5c1   : > { %v6392_v48 = vadd.f32 %v6290_v3, %v14696_v52  ;;  %v6295_v41 = vpop.permute.xlu0 %6294  ;;  %v5933_v52 = vmul.f32 %v14366_v53, %v16811_v44 }
 0x5c2   : > { %v6393_v25 = vadd.f32 %v6295_v41, %v6161_v57 }
 0x5c3   : > { %6787 = vst.msk [vmem:[%s12992_s19 + $0x390] sm:$0xff] %vm3479_vm2, %v6392_v48  ;;  %v6165_v15 = vmul.f32 %v14710_v20, %v5933_v52 }
 0x5c4   : > { %6788 = vst.msk [vmem:[%s12992_s19 + $0x398] sm:$0xff] %vm3479_vm2, %v6393_v25  ;;  %v6300_v21 = vpop.permute.xlu1 %6299 }
 0x5c5   : > { %v6394_v16 = vadd.f32 %v6300_v21, %v14702_v1  ;;  %v6305_v46 = vpop.permute.xlu0 %6304  ;;  %v5935_v1 = vmul.f32 %v14366_v53, %v16812_v51 }
 0x5c6   : > { %v6395_v18 = vadd.f32 %v6305_v46, %v6163_v27 }
 0x5c7   : > { %6789 = vst.msk [vmem:[%s12992_s19 + $0x3a0] sm:$0xff] %vm3479_vm2, %v6394_v16  ;;  %v6167_v26 = vmul.f32 %v14716_v58, %v5935_v1 }
 0x5c8   : > { %6790 = vst.msk [vmem:[%s12992_s19 + $0x3a8] sm:$0xff] %vm3479_vm2, %v6395_v18  ;;  %v6310_v33 = vpop.permute.xlu1 %6309 }
 0x5c9   : > { %v6396_v28 = vadd.f32 %v6310_v33, %v14708_v4  ;;  %v6315_v13 = vpop.permute.xlu0 %6314  ;;  %v5937_v4 = vmul.f32 %v14366_v53, %v16813_v39 }
 0x5ca   : > { %v6397_v37 = vadd.f32 %v6315_v13, %v6165_v15 }
 0x5cb   : > { %6791 = vst.msk [vmem:[%s12992_s19 + $0x3b0] sm:$0xff] %vm3479_vm2, %v6396_v28  ;;  %v6169_v23 = vmul.f32 %v14722_v9, %v5937_v4 }
 0x5cc   : > { %6792 = vst.msk [vmem:[%s12992_s19 + $0x3b8] sm:$0xff] %vm3479_vm2, %v6397_v37  ;;  %v6320_v20 = vpop.permute.xlu1 %6319 }
 0x5cd   : > { %v6398_v17 = vadd.f32 %v6320_v20, %v14714_v22  ;;  %v6325_v30 = vpop.permute.xlu0 %6324  ;;  %v5939_v22 = vmul.f32 %v14366_v53, %v16814_v10 }
 0x5ce   : > { %v6399_v55 = vadd.f32 %v6325_v30, %v6167_v26 }
 0x5cf   : > { %6793 = vst.msk [vmem:[%s12992_s19 + $0x3c0] sm:$0xff] %vm3479_vm2, %v6398_v17  ;;  %v6171_v45 = vmul.f32 %v14728_v14, %v5939_v22 }
 0x5d0   : > { %6794 = vst.msk [vmem:[%s12992_s19 + $0x3c8] sm:$0xff] %vm3479_vm2, %v6399_v55  ;;  %v6330_v58 = vpop.permute.xlu1 %6329 }
 0x5d1   : > { %v6400_v29 = vadd.f32 %v6330_v58, %v14720_v40  ;;  %v6335_v5 = vpop.permute.xlu0 %6334  ;;  %v5941_v40 = vmul.f32 %v14366_v53, %v16815_v32 }
 0x5d2   : > { %v6401_v63 = vadd.f32 %v6335_v5, %v6169_v23 }
 0x5d3   : > { %6795 = vst.msk [vmem:[%s12992_s19 + $0x3d0] sm:$0xff] %vm3479_vm2, %v6400_v29  ;;  %v6173_v47 = vmul.f32 %v14734_v35, %v5941_v40 }
 0x5d4   : > { %6796 = vst.msk [vmem:[%s12992_s19 + $0x3d8] sm:$0xff] %vm3479_vm2, %v6401_v63  ;;  %v6340_v9 = vpop.permute.xlu1 %6339 }
 0x5d5   : > { %v6402_v50 = vadd.f32 %v6340_v9, %v14726_v60  ;;  %v6345_v34 = vpop.permute.xlu0 %6344  ;;  %v5943_v60 = vmul.f32 %v14366_v53, %v16816_v8 }
 0x5d6   : > { %v6403_v31 = vadd.f32 %v6345_v34, %v6171_v45 }
 0x5d7   : > { %6797 = vst.msk [vmem:[%s12992_s19 + $0x3e0] sm:$0xff] %vm3479_vm2, %v6402_v50  ;;  %v6175_v42 = vmul.f32 %v14740_v56, %v5943_v60 }
 0x5d8   : > { %6798 = vst.msk [vmem:[%s12992_s19 + $0x3e8] sm:$0xff] %vm3479_vm2, %v6403_v31  ;;  %v6350_v14 = vpop.permute.xlu1 %6349 }
 0x5d9   : > { %v6404_v38 = vadd.f32 %v6350_v14, %v14732_v7  ;;  %v6355_v61 = vpop.permute.xlu0 %6354  ;;  %v5945_v7 = vmul.f32 %v14366_v53, %v16817_v54 }
 0x5da   : > { %v6405_v36 = vadd.f32 %v6355_v61, %v6173_v47 }
 0x5db   : > { %6799 = vst.msk [vmem:[%s12992_s19 + $0x3f0] sm:$0xff] %vm3479_vm2, %v6404_v38  ;;  %v6177_v24 = vmul.f32 %v14749_v2, %v5945_v7 }
 0x5dc   : > { %6800 = vst.msk [vmem:[%s12992_s19 + $0x3f8] sm:$0xff] %vm3479_vm2, %v6405_v36  ;;  %v6360_v35 = vpop.permute.xlu1 %6359 }
 0x5dd   : > { %v6406_v19 = vadd.f32 %v6360_v35, %v14738_v6  ;;  %v6365_v11 = vpop.permute.xlu0 %6364 }
 0x5de   : > { %v6407_v59 = vadd.f32 %v6365_v11, %v6175_v42 }
 0x5df   : > { %6801 = vst.msk [vmem:[%s12992_s19 + $0x400] sm:$0xff] %vm3479_vm2, %v6406_v19 }
 0x5e0   : > { %6802 = vst.msk [vmem:[%s12992_s19 + $0x408] sm:$0xff] %vm3479_vm2, %v6407_v59  ;;  %v6370_v43 = vpop.permute.xlu1 %6369 }
 0x5e1   : > { %v6408_v12 = vadd.f32 %v6370_v43, %v14746_v49  ;;  %v6375_v56 = vpop.permute.xlu0 %6374 }
 0x5e2   : > { %v6409_v57 = vadd.f32 %v6375_v56, %v6177_v24 }
 0x5e3   : > { %6803 = vst.msk [vmem:[%s12992_s19 + $0x410] sm:$0xff] %vm3479_vm2, %v6408_v12 }
 0x5e4   : > { %6804 = vst.msk [vmem:[%s12992_s19 + $0x418] sm:$0x1] %vm3543_vm3, %v6409_v57 }
 0x5e5 PF: > { %s17_s21 = sadd.s32 1, %s7070_s21  }
 0x5e6   : > { %p14_p1 = scmp.ge.s32.totalorder %s17_s21, 4  }
 0x5e8   :  { %16 = sbr.rel (!%p14_p1) target bundleno = 1 (0x1), region = 87 }
 0x5ef   :  { %6465 = vsyncpa [#allocation3], 1 }
 0x5f0   :  { %6467 = vsyncpa [#allocation3 + $0x1], 1 }

</bundles_post_ra>
